<compile_context>
chip_gen: v6e
topology: v6e:2x2x1
jax: 0.10.0
libtpu: 0.0.40
codegen_flags: <defaults>
</compile_context>

<pallas_src>
import functools

import numpy as np
import jax
import jax.numpy as jnp
from jax import lax
from jax.experimental import pallas as pl
from jax.experimental.pallas import tpu as pltpu


# ----------------------------- in-kernel helpers ----------------------------

def _gn_lrelu(y, s_scaled, eps, slope):
    """GroupNorm(affine=False) + LeakyReLU for ONE sample.

    y:        (HWo, C) f32 conv output (+bias) of a single sample.
    s_scaled: (C, C) f32, s_scaled[c, c'] = 1/(HWo*Cg) when c, c' share a
              group else 0 -> one tiny matmul does the group reduction AND the
              broadcast back to channels.  Two-pass variance for precision.
    """
    colsum = jnp.sum(y, axis=0, keepdims=True)                            # (1, C)
    mean_c = jnp.dot(colsum, s_scaled, preferred_element_type=jnp.float32)
    d = y - mean_c
    colsq = jnp.sum(d * d, axis=0, keepdims=True)                         # (1, C)
    var_c = jnp.dot(colsq, s_scaled, preferred_element_type=jnp.float32)
    a = d * lax.rsqrt(var_c + eps)
    return jnp.where(a >= 0, a, slope * a)                                # LeakyReLU


def _im2col_into(a, scr, hout, wout):
    """In-kernel im2col for Conv2d(k=4, s=2, p=1) on ONE sample's activation.

    a:   (Hin, Win, C) f32 value (previous layer's output, never leaves VMEM).
    scr: (hout, wout, 16*C) f32 VMEM scratch, filled with plain static stores.
    Only leading-dim reshapes / unit-stride slices are used (lowering-safe).
    Returns the (hout*wout, 16*C) patch matrix, feature order (kh, kw, c).
    """
    hin, win, c = a.shape
    # Padded even / odd row maps via a leading-dim reshape + leading concat.
    a_r = a.reshape(hin // 2, 2, win, c)
    zrow = jnp.zeros((1, win, c), a.dtype)
    pad_even = jnp.concatenate([zrow, a_r[:, 1]], axis=0)   # padded rows 0,2,..,hin
    pad_odd = jnp.concatenate([a_r[:, 0], zrow], axis=0)    # padded rows 1,3,..,hin+1

    scr[...] = jnp.zeros(scr.shape, scr.dtype)               # zero-padding taps
    for kh in range(4):
        rows = pad_even if kh % 2 == 0 else pad_odd
        rows = rows[kh // 2: kh // 2 + hout]                  # (hout, win, c)
        for kw in range(4):
            f0 = (kh * 4 + kw) * c
            for j in range(wout):
                pc = 2 * j + kw                               # padded column index
                if 1 <= pc <= win:                            # else: stays zero (pad)
                    scr[:, j, f0:f0 + c] = rows[:, pc - 1, :]
    return scr[...].reshape(hout * wout, 16 * c)


# ------------------------------ Pallas kernels -------------------------------

def _conv1_kernel(p_ref, w_ref, b_ref, s_ref, o_ref, *, eps, slope):
    """Layer 1: conv (im2col matmul) + bias + GroupNorm + LeakyReLU; 1 sample."""
    y = jnp.dot(p_ref[...], w_ref[...],
                preferred_element_type=jnp.float32) + b_ref[...]
    a = _gn_lrelu(y, s_ref[...], eps, slope)
    o_ref[...] = a.astype(o_ref.dtype)                        # bf16 back to HBM


def _deep_fused_kernel(p2_ref, w2_ref, b2_ref, s2_ref,
                       w3_ref, b3_ref, s3_ref,
                       w4_ref, b4_ref, s4_ref,
                       wcl_ref, bcl_ref, o_ref, p3_scr, p4_scr,
                       *, h2, eps, slope):
    """Layers 2-4 + classifier for ONE sample, entirely inside VMEM."""
    h3, h4 = h2 // 2, h2 // 4

    # ----- layer 2: conv + GN + LeakyReLU -----
    y2 = jnp.dot(p2_ref[...], w2_ref[...],
                 preferred_element_type=jnp.float32) + b2_ref[...]
    a2 = _gn_lrelu(y2, s2_ref[...], eps, slope)                # (h2*h2, C2)

    # ----- layer 3: in-kernel im2col + conv + GN + LeakyReLU -----
    p3 = _im2col_into(a2.reshape(h2, h2, a2.shape[-1]), p3_scr, h3, h3)
    y3 = jnp.dot(p3.astype(jnp.bfloat16), w3_ref[...],
                 preferred_element_type=jnp.float32) + b3_ref[...]
    a3 = _gn_lrelu(y3, s3_ref[...], eps, slope)                # (h3*h3, C3)

    # ----- layer 4 -----
    p4 = _im2col_into(a3.reshape(h3, h3, a3.shape[-1]), p4_scr, h4, h4)
    y4 = jnp.dot(p4.astype(jnp.bfloat16), w4_ref[...],
                 preferred_element_type=jnp.float32) + b4_ref[...]
    a4 = _gn_lrelu(y4, s4_ref[...], eps, slope)                # (4, C4)

    # ----- classifier: k=4,s=2,p=1 on a 2x2 map -> only taps [1:3,1:3] hit data
    z = jnp.sum(a4 * wcl_ref[...], axis=-1, keepdims=True)     # (4, 1)
    logit = jnp.sum(z, axis=0, keepdims=True) + bcl_ref[...]   # (1, 1)
    # Lane-padded scalar output block (keeps the out block (8,128)-aligned).
    o_ref[...] = jnp.zeros(o_ref.shape, jnp.float32) + logit


# --------------------------------- JAX glue ----------------------------------

def _im2col_nhwc(x, k=4, s=2, p=1):
    """(N, H, W, C) -> (N*Ho*Wo, k*k*C) patches, feature order (kh, kw, c).

    Gather-free: 16 static strided slices + concat (contiguous copies).  Runs
    on the (bf16) activation BEFORE any widening, per the perf review.
    """
    n, h, w, c = x.shape
    ho = (h + 2 * p - k) // s + 1
    wo = (w + 2 * p - k) // s + 1
    xp = jnp.pad(x, ((0, 0), (p, p), (p, p), (0, 0)))
    cols = []
    for kh in range(k):
        for kw in range(k):
            cols.append(lax.slice(
                xp, (0, kh, kw, 0),
                (n, kh + (ho - 1) * s + 1, kw + (wo - 1) * s + 1, c),
                (1, s, s, 1)))                                 # (N, Ho, Wo, C)
    patches = jnp.concatenate(cols, axis=-1)                   # (N, Ho, Wo, k*k*C)
    return patches.reshape(n * ho * wo, k * k * c), ho, wo


def _weight_matrix(w):
    """PyTorch OIHW (Cout, Cin, 4, 4) -> (16*Cin, Cout), order (kh, kw, cin)."""
    cout = w.shape[0]
    return jnp.transpose(w, (2, 3, 1, 0)).reshape(-1, cout)


def _group_scale_matrix(c, num_groups, hwo):
    """(C, C) f32: 1/(HWo*Cg) where the channels share a group, else 0."""
    cg = c // num_groups
    gid = np.arange(c) // cg
    s = (gid[:, None] == gid[None, :]).astype(np.float32) / float(hwo * cg)
    return jnp.asarray(s)


def conv1(x_nhwc, w, b, num_groups=32, eps=1e-5, slope=0.2):
    """Layer 1: Conv(k=4,s=2,p=1) + GroupNorm(32) + LeakyReLU; one sample/step.

    x_nhwc: (N, H, W, Cin) bf16.  Returns (N, Ho, Wo, Cout) bf16.
    TODO(synk): layer-1's im2col is still host-side (XLA pad/slice/concat);
    moving it in-kernel would drop the last HBM patch round trip.
    """
    n = x_nhwc.shape[0]
    cout = w.shape[0]
    patches, ho, wo = _im2col_nhwc(x_nhwc)                     # bf16 patches
    hwo = ho * wo
    m, k = patches.shape
    wm = _weight_matrix(w).astype(jnp.bfloat16)
    bm = b.reshape(1, cout).astype(jnp.float32)
    sm = _group_scale_matrix(cout, num_groups, hwo)

    kernel = functools.partial(_conv1_kernel, eps=eps, slope=slope)
    out = pl.pallas_call(
        kernel,
        out_shape=jax.ShapeDtypeStruct((m, cout), jnp.bfloat16),
        grid=(n,),
        in_specs=[pl.BlockSpec((hwo, k), lambda i: (i, 0)),
                  pl.BlockSpec((k, cout), lambda i: (0, 0)),
                  pl.BlockSpec((1, cout), lambda i: (0, 0)),
                  pl.BlockSpec((cout, cout), lambda i: (0, 0))],
        out_specs=pl.BlockSpec((hwo, cout), lambda i: (i, 0)),
        compiler_params=pltpu.CompilerParams(dimension_semantics=("parallel",)),
    )(patches, wm, bm, sm)
    return out.reshape(n, ho, wo, cout)


def deep_fused(a1, params, num_groups=32, eps=1e-5, slope=0.2):
    """Layers 2-4 + classifier fused into one pallas_call (one sample/step).

    a1: (N, 16, 16, C1) bf16 layer-1 activation (32x32 network input: the
    fused classifier path needs the layer-4 output to be exactly 2x2).
    Returns (N, 1, 1, 1) f32.
    """
    n, h1, w1, c1 = a1.shape
    assert h1 == w1 and h1 == 16, "fused deep path expects a 16x16 layer-1 map"
    patches2, h2, _ = _im2col_nhwc(a1)                         # (N*64, 16*C1) bf16
    hw2 = h2 * h2
    _, k2 = patches2.shape
    h3, h4 = h2 // 2, h2 // 4

    w2m = _weight_matrix(params["w2"]).astype(jnp.bfloat16)
    w3m = _weight_matrix(params["w3"]).astype(jnp.bfloat16)
    w4m = _weight_matrix(params["w4"]).astype(jnp.bfloat16)
    c2, c3, c4 = w2m.shape[1], w3m.shape[1], w4m.shape[1]
    k3, k4 = 16 * c2, 16 * c3
    b2m = params["b2"].reshape(1, c2).astype(jnp.float32)
    b3m = params["b3"].reshape(1, c3).astype(jnp.float32)
    b4m = params["b4"].reshape(1, c4).astype(jnp.float32)
    s2 = _group_scale_matrix(c2, num_groups, hw2)
    s3 = _group_scale_matrix(c3, num_groups, h3 * h3)
    s4 = _group_scale_matrix(c4, num_groups, h4 * h4)
    # Classifier conv on a 2x2 map: only kernel taps [1:3, 1:3] touch real data.
    wcl = jnp.transpose(params["wc"][0, :, 1:3, 1:3], (1, 2, 0)).reshape(4, c4)
    wcl = wcl.astype(jnp.float32)
    bcl = params["bc"].reshape(1, 1).astype(jnp.float32)

    kernel = functools.partial(_deep_fused_kernel, h2=h2, eps=eps, slope=slope)
    rep = lambda i: (0, 0)                    # grid-invariant operands
    out = pl.pallas_call(
        kernel,
        out_shape=jax.ShapeDtypeStruct((n, 8, 128), jnp.float32),
        grid=(n,),
        in_specs=[pl.BlockSpec((hw2, k2), lambda i: (i, 0)),
                  pl.BlockSpec((k2, c2), rep), pl.BlockSpec((1, c2), rep),
                  pl.BlockSpec((c2, c2), rep),
                  pl.BlockSpec((k3, c3), rep), pl.BlockSpec((1, c3), rep),
                  pl.BlockSpec((c3, c3), rep),
                  pl.BlockSpec((k4, c4), rep), pl.BlockSpec((1, c4), rep),
                  pl.BlockSpec((c4, c4), rep),
                  pl.BlockSpec((4, c4), rep), pl.BlockSpec((1, 1), rep)],
        out_specs=pl.BlockSpec((1, 8, 128), lambda i: (i, 0, 0)),
        scratch_shapes=[pltpu.VMEM((h3, h3, k3), jnp.float32),
                        pltpu.VMEM((h4, h4, k4), jnp.float32)],
        compiler_params=pltpu.CompilerParams(dimension_semantics=("parallel",)),
    )(patches2, w2m, b2m, s2, w3m, b3m, s3, w4m, b4m, s4, wcl, bcl)
    return out[:, 0, 0].reshape(n, 1, 1, 1)


@jax.jit
def label_discriminator_forward(x_nchw, params):
    # NCHW -> NHWC once at entry; cast to bf16 BEFORE im2col (half the bytes).
    x = jnp.transpose(x_nchw, (0, 2, 3, 1)).astype(jnp.bfloat16)
    a1 = conv1(x, params["w1"], params["b1"])          # (N, 16, 16, ndf) bf16
    return deep_fused(a1, params)                       # (N, 1, 1, 1) f32


# ------------------------- reference (pure JAX, f32) -------------------------

def ref_forward(x, params, num_groups=32, eps=1e-5, slope=0.2):
    def conv(x, w, b):
        y = lax.conv_general_dilated(
            x, w, (2, 2), ((1, 1), (1, 1)),
            dimension_numbers=("NCHW", "OIHW", "NCHW"))
        return y + b[None, :, None, None]

    def gn(x):
        n, c, h, w = x.shape
        xg = x.reshape(n, num_groups, -1)
        m = xg.mean(axis=-1, keepdims=True)
        v = xg.var(axis=-1, keepdims=True)
        return ((xg - m) * lax.rsqrt(v + eps)).reshape(n, c, h, w)

    def lrelu(x):
        return jnp.where(x >= 0, x, slope * x)

    h = x
    for i in ("1", "2", "3", "4"):
        h = lrelu(gn(conv(h, params[f"w{i}"], params[f"b{i}"])))
    return conv(h, params["wc"], params["bc"])


# ------------------------------- init & main ---------------------------------

def init_params(key, num_classes, ndf):
    # Deterministic init mimicking PyTorch Conv2d default (uniform +-1/sqrt(fan_in)).
    dims = [(num_classes, ndf), (ndf, ndf * 2), (ndf * 2, ndf * 4),
            (ndf * 4, ndf * 8), (ndf * 8, 1)]
    names = ["1", "2", "3", "4", "c"]
    params = {}
    for (cin, cout), name in zip(dims, names):
        key, kw, kb = jax.random.split(key, 3)
        bound = 1.0 / np.sqrt(cin * 16)
        params[f"w{name}"] = jax.random.uniform(
            kw, (cout, cin, 4, 4), jnp.float32, -bound, bound)
        params[f"b{name}"] = jax.random.uniform(
            kb, (cout,), jnp.float32, -bound, bound)
    return params


if __name__ == "__main__":
    # GroupNorm(32 groups) requires conv-output channels divisible by 32 -> ndf=32
    # keeps things small while preserving semantics; 32x32 spatial is the minimum
    # that survives the five stride-2 convs (32 -> 16 -> 8 -> 4 -> 2 -> 1).
    num_classes, ndf = 4, 32
    N, H, W = 2, 32, 32

    key = jax.random.PRNGKey(0)
    kx, kp = jax.random.split(key)
    x = jax.random.normal(kx, (N, num_classes, H, W), jnp.float32)
    params = init_params(kp, num_classes, ndf)

    out = jax.block_until_ready(label_discriminator_forward(x, params))
    ref = jax.block_until_ready(jax.jit(ref_forward)(x, params))

    assert out.shape == (N, 1, 1, 1), out.shape
    # Tolerance documents the bf16 MXU conv path (f32 accumulation, two-pass GN).
    assert bool(jnp.allclose(out, ref, rtol=5e-2, atol=5e-2)), (out, ref)
    print("KERNEL_OK")
</pallas_src>

<mosaic_0001>
module attributes {stable_mosaic.version = 11 : i64} {
  func.func @_conv1_kernel(%arg0: i32, %arg1: memref<256x64xbf16, #tpu.memory_space<vmem>>, %arg2: memref<64x32xbf16, #tpu.memory_space<vmem>>, %arg3: memref<1x32xf32, #tpu.memory_space<vmem>>, %arg4: memref<32x32xf32, #tpu.memory_space<vmem>>, %arg5: memref<256x32xbf16, #tpu.memory_space<vmem>>) attributes {dimension_semantics = [#tpu.dimension_semantics<parallel>], iteration_bounds = array<i64: 2>, scalar_prefetch = 0 : i64, scratch_operands = 0 : i64, tpu.core_type = #tpu.core_type<tc>, window_params = [{transform_indices = @transform_0, window_bounds = array<i64: 256, 64>}, {pipeline_mode = #tpu.pipeline_mode<synchronous>, transform_indices = @transform_1, window_bounds = array<i64: 64, 32>}, {pipeline_mode = #tpu.pipeline_mode<synchronous>, transform_indices = @transform_2, window_bounds = array<i64: 1, 32>}, {pipeline_mode = #tpu.pipeline_mode<synchronous>, transform_indices = @transform_3, window_bounds = array<i64: 32, 32>}, {transform_indices = @transform_4, window_bounds = array<i64: 256, 32>}]} {
    %c0 = arith.constant 0 : index
    %c0_0 = arith.constant 0 : index
    %0 = vector.load %arg1[%c0, %c0_0] : memref<256x64xbf16, #tpu.memory_space<vmem>>, vector<256x64xbf16>
    %c0_1 = arith.constant 0 : index
    %c0_2 = arith.constant 0 : index
    %1 = vector.load %arg2[%c0_1, %c0_2] : memref<64x32xbf16, #tpu.memory_space<vmem>>, vector<64x32xbf16>
    %cst = arith.constant dense<0.000000e+00> : vector<256x32xf32>
    %2 = tpu.matmul %0, %1, %cst {dimension_numbers = #tpu.dot_dimension_numbers<[1], [0], [0], [1], [0, 0, 1, 1], [], []>} : vector<256x64xbf16>, vector<64x32xbf16>, vector<256x32xf32> -> vector<256x32xf32>
    %c0_3 = arith.constant 0 : index
    %c0_4 = arith.constant 0 : index
    %3 = vector.load %arg3[%c0_3, %c0_4] : memref<1x32xf32, #tpu.memory_space<vmem>>, vector<1x32xf32>
    %4 = vector.broadcast %3 : vector<1x32xf32> to vector<256x32xf32>
    %5 = arith.addf %2, %4 : vector<256x32xf32>
    %c0_5 = arith.constant 0 : index
    %c0_6 = arith.constant 0 : index
    %6 = vector.load %arg4[%c0_5, %c0_6] : memref<32x32xf32, #tpu.memory_space<vmem>>, vector<32x32xf32>
    %cst_7 = arith.constant dense<0.000000e+00> : vector<32xf32>
    %7 = vector.multi_reduction <add>, %5, %cst_7 [0] : vector<256x32xf32> to vector<32xf32>
    %8 = vector.shape_cast %7 : vector<32xf32> to vector<1x32xf32>
    %cst_8 = arith.constant dense<0.000000e+00> : vector<1x32xf32>
    %9 = tpu.matmul %8, %6, %cst_8 {dimension_numbers = #tpu.dot_dimension_numbers<[1], [0], [0], [1], [0, 0, 1, 1], [], []>} : vector<1x32xf32>, vector<32x32xf32>, vector<1x32xf32> -> vector<1x32xf32>
    %10 = vector.broadcast %9 : vector<1x32xf32> to vector<256x32xf32>
    %11 = arith.subf %5, %10 : vector<256x32xf32>
    %12 = arith.mulf %11, %11 : vector<256x32xf32>
    %cst_9 = arith.constant dense<0.000000e+00> : vector<32xf32>
    %13 = vector.multi_reduction <add>, %12, %cst_9 [0] : vector<256x32xf32> to vector<32xf32>
    %14 = vector.shape_cast %13 : vector<32xf32> to vector<1x32xf32>
    %cst_10 = arith.constant dense<0.000000e+00> : vector<1x32xf32>
    %15 = tpu.matmul %14, %6, %cst_10 {dimension_numbers = #tpu.dot_dimension_numbers<[1], [0], [0], [1], [0, 0, 1, 1], [], []>} : vector<1x32xf32>, vector<32x32xf32>, vector<1x32xf32> -> vector<1x32xf32>
    %cst_11 = arith.constant 9.99999974E-6 : f32
    %16 = vector.broadcast %cst_11 : f32 to vector<1x32xf32>
    %17 = arith.addf %15, %16 : vector<1x32xf32>
    %18 = math.rsqrt %17 : vector<1x32xf32>
    %19 = vector.broadcast %18 : vector<1x32xf32> to vector<256x32xf32>
    %20 = arith.mulf %11, %19 : vector<256x32xf32>
    %cst_12 = arith.constant 0.000000e+00 : f32
    %21 = vector.broadcast %cst_12 : f32 to vector<256x32xf32>
    %22 = arith.cmpf oge, %20, %21 : vector<256x32xf32>
    %cst_13 = arith.constant 2.000000e-01 : f32
    %23 = vector.broadcast %cst_13 : f32 to vector<256x32xf32>
    %24 = arith.mulf %23, %20 : vector<256x32xf32>
    %25 = arith.select %22, %20, %24 : vector<256x32xi1>, vector<256x32xf32>
    %26 = arith.truncf %25 : vector<256x32xf32> to vector<256x32xbf16>
    %c0_14 = arith.constant 0 : index
    %c0_15 = arith.constant 0 : index
    %27 = vector.load %arg5[%c0_14, %c0_15] : memref<256x32xbf16, #tpu.memory_space<vmem>>, vector<256x32xbf16>
    tpu.vector_store %arg5[%c0_14, %c0_15], %26 {strides = array<i32>} : memref<256x32xbf16, #tpu.memory_space<vmem>>, vector<256x32xbf16>,
    return
  }
  func.func @transform_0(%arg0: i32) -> (i32, i32) {
    %c0_i32 = arith.constant 0 : i32
    %c0_i32_0 = arith.constant 0 : i32
    return %arg0, %c0_i32 : i32, i32
  }
  func.func @transform_1(%arg0: i32) -> (i32, i32) {
    %c0_i32 = arith.constant 0 : i32
    %c0_i32_0 = arith.constant 0 : i32
    %c0_i32_1 = arith.constant 0 : i32
    return %c0_i32, %c0_i32_0 : i32, i32
  }
  func.func @transform_2(%arg0: i32) -> (i32, i32) {
    %c0_i32 = arith.constant 0 : i32
    %c0_i32_0 = arith.constant 0 : i32
    %c0_i32_1 = arith.constant 0 : i32
    return %c0_i32, %c0_i32_0 : i32, i32
  }
  func.func @transform_3(%arg0: i32) -> (i32, i32) {
    %c0_i32 = arith.constant 0 : i32
    %c0_i32_0 = arith.constant 0 : i32
    %c0_i32_1 = arith.constant 0 : i32
    return %c0_i32, %c0_i32_0 : i32, i32
  }
  func.func @transform_4(%arg0: i32) -> (i32, i32) {
    %c0_i32 = arith.constant 0 : i32
    %c0_i32_0 = arith.constant 0 : i32
    return %arg0, %c0_i32 : i32, i32
  }
}

module attributes {stable_mosaic.version = 11 : i64} {
  func.func @_deep_fused_kernel(%arg0: i32, %arg1: memref<64x512xbf16, #tpu.memory_space<vmem>>, %arg2: memref<512x64xbf16, #tpu.memory_space<vmem>>, %arg3: memref<1x64xf32, #tpu.memory_space<vmem>>, %arg4: memref<64x64xf32, #tpu.memory_space<vmem>>, %arg5: memref<1024x128xbf16, #tpu.memory_space<vmem>>, %arg6: memref<1x128xf32, #tpu.memory_space<vmem>>, %arg7: memref<128x128xf32, #tpu.memory_space<vmem>>, %arg8: memref<2048x256xbf16, #tpu.memory_space<vmem>>, %arg9: memref<1x256xf32, #tpu.memory_space<vmem>>, %arg10: memref<256x256xf32, #tpu.memory_space<vmem>>, %arg11: memref<4x256xf32, #tpu.memory_space<vmem>>, %arg12: memref<1x1xf32, #tpu.memory_space<vmem>>, %arg13: memref<1x8x128xf32, #tpu.memory_space<vmem>>, %arg14: memref<4x4x1024xf32, #tpu.memory_space<vmem>>, %arg15: memref<2x2x2048xf32, #tpu.memory_space<vmem>>) attributes {dimension_semantics = [#tpu.dimension_semantics<parallel>], iteration_bounds = array<i64: 2>, scalar_prefetch = 0 : i64, scratch_operands = 2 : i64, tpu.core_type = #tpu.core_type<tc>, window_params = [{transform_indices = @transform_0, window_bounds = array<i64: 64, 512>}, {pipeline_mode = #tpu.pipeline_mode<synchronous>, transform_indices = @transform_1, window_bounds = array<i64: 512, 64>}, {pipeline_mode = #tpu.pipeline_mode<synchronous>, transform_indices = @transform_2, window_bounds = array<i64: 1, 64>}, {pipeline_mode = #tpu.pipeline_mode<synchronous>, transform_indices = @transform_3, window_bounds = array<i64: 64, 64>}, {pipeline_mode = #tpu.pipeline_mode<synchronous>, transform_indices = @transform_4, window_bounds = array<i64: 1024, 128>}, {pipeline_mode = #tpu.pipeline_mode<synchronous>, transform_indices = @transform_5, window_bounds = array<i64: 1, 128>}, {pipeline_mode = #tpu.pipeline_mode<synchronous>, transform_indices = @transform_6, window_bounds = array<i64: 128, 128>}, {pipeline_mode = #tpu.pipeline_mode<synchronous>, transform_indices = @transform_7, window_bounds = array<i64: 2048, 256>}, {pipeline_mode = #tpu.pipeline_mode<synchronous>, transform_indices = @transform_8, window_bounds = array<i64: 1, 256>}, {pipeline_mode = #tpu.pipeline_mode<synchronous>, transform_indices = @transform_9, window_bounds = array<i64: 256, 256>}, {pipeline_mode = #tpu.pipeline_mode<synchronous>, transform_indices = @transform_10, window_bounds = array<i64: 4, 256>}, {pipeline_mode = #tpu.pipeline_mode<synchronous>, transform_indices = @transform_11, window_bounds = array<i64: 1, 1>}, {transform_indices = @transform_12, window_bounds = array<i64: 1, 8, 128>}]} {
    %c0 = arith.constant 0 : index
    %c0_0 = arith.constant 0 : index
    %0 = vector.load %arg1[%c0, %c0_0] : memref<64x512xbf16, #tpu.memory_space<vmem>>, vector<64x512xbf16>
    %c0_1 = arith.constant 0 : index
    %c0_2 = arith.constant 0 : index
    %1 = vector.load %arg2[%c0_1, %c0_2] : memref<512x64xbf16, #tpu.memory_space<vmem>>, vector<512x64xbf16>
    %cst = arith.constant dense<0.000000e+00> : vector<64x64xf32>
    %2 = tpu.matmul %0, %1, %cst {dimension_numbers = #tpu.dot_dimension_numbers<[1], [0], [0], [1], [0, 0, 1, 1], [], []>} : vector<64x512xbf16>, vector<512x64xbf16>, vector<64x64xf32> -> vector<64x64xf32>
    %c0_3 = arith.constant 0 : index
    %c0_4 = arith.constant 0 : index
    %3 = vector.load %arg3[%c0_3, %c0_4] : memref<1x64xf32, #tpu.memory_space<vmem>>, vector<1x64xf32>
    %4 = vector.broadcast %3 : vector<1x64xf32> to vector<64x64xf32>
    %5 = arith.addf %2, %4 : vector<64x64xf32>
    %c0_5 = arith.constant 0 : index
    %c0_6 = arith.constant 0 : index
    %6 = vector.load %arg4[%c0_5, %c0_6] : memref<64x64xf32, #tpu.memory_space<vmem>>, vector<64x64xf32>
    %cst_7 = arith.constant dense<0.000000e+00> : vector<64xf32>
    %7 = vector.multi_reduction <add>, %5, %cst_7 [0] : vector<64x64xf32> to vector<64xf32>
    %8 = vector.shape_cast %7 : vector<64xf32> to vector<1x64xf32>
    %cst_8 = arith.constant dense<0.000000e+00> : vector<1x64xf32>
    %9 = tpu.matmul %8, %6, %cst_8 {dimension_numbers = #tpu.dot_dimension_numbers<[1], [0], [0], [1], [0, 0, 1, 1], [], []>} : vector<1x64xf32>, vector<64x64xf32>, vector<1x64xf32> -> vector<1x64xf32>
    %10 = vector.broadcast %9 : vector<1x64xf32> to vector<64x64xf32>
    %11 = arith.subf %5, %10 : vector<64x64xf32>
    %12 = arith.mulf %11, %11 : vector<64x64xf32>
    %cst_9 = arith.constant dense<0.000000e+00> : vector<64xf32>
    %13 = vector.multi_reduction <add>, %12, %cst_9 [0] : vector<64x64xf32> to vector<64xf32>
    %14 = vector.shape_cast %13 : vector<64xf32> to vector<1x64xf32>
    %cst_10 = arith.constant dense<0.000000e+00> : vector<1x64xf32>
    %15 = tpu.matmul %14, %6, %cst_10 {dimension_numbers = #tpu.dot_dimension_numbers<[1], [0], [0], [1], [0, 0, 1, 1], [], []>} : vector<1x64xf32>, vector<64x64xf32>, vector<1x64xf32> -> vector<1x64xf32>
    %cst_11 = arith.constant 9.99999974E-6 : f32
    %16 = vector.broadcast %cst_11 : f32 to vector<1x64xf32>
    %17 = arith.addf %15, %16 : vector<1x64xf32>
    %18 = math.rsqrt %17 : vector<1x64xf32>
    %19 = vector.broadcast %18 : vector<1x64xf32> to vector<64x64xf32>
    %20 = arith.mulf %11, %19 : vector<64x64xf32>
    %cst_12 = arith.constant 0.000000e+00 : f32
    %21 = vector.broadcast %cst_12 : f32 to vector<64x64xf32>
    %22 = arith.cmpf oge, %20, %21 : vector<64x64xf32>
    %cst_13 = arith.constant 2.000000e-01 : f32
    %23 = vector.broadcast %cst_13 : f32 to vector<64x64xf32>
    %24 = arith.mulf %23, %20 : vector<64x64xf32>
    %25 = arith.select %22, %20, %24 : vector<64x64xi1>, vector<64x64xf32>
    %26 = vector.shape_cast %25 : vector<64x64xf32> to vector<8x8x64xf32>
    %27 = vector.shape_cast %26 : vector<8x8x64xf32> to vector<4x2x8x64xf32>
    %cst_14 = arith.constant 0.000000e+00 : f32
    %28 = vector.broadcast %cst_14 : f32 to vector<1x8x64xf32>
    %29 = vector.extract_strided_slice %27 {offsets = [0, 1, 0, 0], sizes = [4, 1, 8, 64], strides = [1, 1, 1, 1]} : vector<4x2x8x64xf32> to vector<4x1x8x64xf32>
    %30 = vector.shape_cast %29 : vector<4x1x8x64xf32> to vector<4x8x64xf32>
    %31 = tpu.concatenate %28, %30 in 0 : vector<1x8x64xf32>, vector<4x8x64xf32> -> vector<5x8x64xf32>
    %32 = vector.extract_strided_slice %27 {offsets = [0, 0, 0, 0], sizes = [4, 1, 8, 64], strides = [1, 1, 1, 1]} : vector<4x2x8x64xf32> to vector<4x1x8x64xf32>
    %33 = vector.shape_cast %32 : vector<4x1x8x64xf32> to vector<4x8x64xf32>
    %34 = tpu.concatenate %33, %28 in 0 : vector<4x8x64xf32>, vector<1x8x64xf32> -> vector<5x8x64xf32>
    %cst_15 = arith.constant 0.000000e+00 : f32
    %35 = vector.broadcast %cst_15 : f32 to vector<4x4x1024xf32>
    %c0_16 = arith.constant 0 : index
    %c0_17 = arith.constant 0 : index
    %c0_18 = arith.constant 0 : index
    %36 = vector.load %arg14[%c0_16, %c0_17, %c0_18] : memref<4x4x1024xf32, #tpu.memory_space<vmem>>, vector<4x4x1024xf32>
    tpu.vector_store %arg14[%c0_16, %c0_17, %c0_18], %35 {strides = array<i32>} : memref<4x4x1024xf32, #tpu.memory_space<vmem>>, vector<4x4x1024xf32>,
    %37 = vector.extract_strided_slice %31 {offsets = [0, 0, 0], sizes = [4, 8, 64], strides = [1, 1, 1]} : vector<5x8x64xf32> to vector<4x8x64xf32>
    %38 = vector.extract_strided_slice %37 {offsets = [0, 1, 0], sizes = [4, 1, 64], strides = [1, 1, 1]} : vector<4x8x64xf32> to vector<4x1x64xf32>
    %39 = vector.shape_cast %38 : vector<4x1x64xf32> to vector<4x64xf32>
    %c0_19 = arith.constant 0 : index
    %c1 = arith.constant 1 : index
    %c0_20 = arith.constant 0 : index
    %40 = vector.load %arg14[%c0_19, %c1, %c0_20] : memref<4x4x1024xf32, #tpu.memory_space<vmem>>, vector<4x1x64xf32>
    %41 = vector.shape_cast %40 : vector<4x1x64xf32> to vector<4x64xf32>
    %42 = vector.shape_cast %39 : vector<4x64xf32> to vector<4x1x64xf32>
    tpu.vector_store %arg14[%c0_19, %c1, %c0_20], %42 {strides = array<i32>} : memref<4x4x1024xf32, #tpu.memory_space<vmem>>, vector<4x1x64xf32>,
    %43 = vector.extract_strided_slice %37 {offsets = [0, 3, 0], sizes = [4, 1, 64], strides = [1, 1, 1]} : vector<4x8x64xf32> to vector<4x1x64xf32>
    %44 = vector.shape_cast %43 : vector<4x1x64xf32> to vector<4x64xf32>
    %c0_21 = arith.constant 0 : index
    %c2 = arith.constant 2 : index
    %c0_22 = arith.constant 0 : index
    %45 = vector.load %arg14[%c0_21, %c2, %c0_22] : memref<4x4x1024xf32, #tpu.memory_space<vmem>>, vector<4x1x64xf32>
    %46 = vector.shape_cast %45 : vector<4x1x64xf32> to vector<4x64xf32>
    %47 = vector.shape_cast %44 : vector<4x64xf32> to vector<4x1x64xf32>
    tpu.vector_store %arg14[%c0_21, %c2, %c0_22], %47 {strides = array<i32>} : memref<4x4x1024xf32, #tpu.memory_space<vmem>>, vector<4x1x64xf32>,
    %48 = vector.extract_strided_slice %37 {offsets = [0, 5, 0], sizes = [4, 1, 64], strides = [1, 1, 1]} : vector<4x8x64xf32> to vector<4x1x64xf32>
    %49 = vector.shape_cast %48 : vector<4x1x64xf32> to vector<4x64xf32>
    %c0_23 = arith.constant 0 : index
    %c3 = arith.constant 3 : index
    %c0_24 = arith.constant 0 : index
    %50 = vector.load %arg14[%c0_23, %c3, %c0_24] : memref<4x4x1024xf32, #tpu.memory_space<vmem>>, vector<4x1x64xf32>
    %51 = vector.shape_cast %50 : vector<4x1x64xf32> to vector<4x64xf32>
    %52 = vector.shape_cast %49 : vector<4x64xf32> to vector<4x1x64xf32>
    tpu.vector_store %arg14[%c0_23, %c3, %c0_24], %52 {strides = array<i32>} : memref<4x4x1024xf32, #tpu.memory_space<vmem>>, vector<4x1x64xf32>,
    %53 = vector.extract_strided_slice %37 {offsets = [0, 0, 0], sizes = [4, 1, 64], strides = [1, 1, 1]} : vector<4x8x64xf32> to vector<4x1x64xf32>
    %54 = vector.shape_cast %53 : vector<4x1x64xf32> to vector<4x64xf32>
    %c0_25 = arith.constant 0 : index
    %c0_26 = arith.constant 0 : index
    %c64 = arith.constant 64 : index
    %55 = vector.load %arg14[%c0_25, %c0_26, %c64] : memref<4x4x1024xf32, #tpu.memory_space<vmem>>, vector<4x1x64xf32>
    %56 = vector.shape_cast %55 : vector<4x1x64xf32> to vector<4x64xf32>
    %57 = vector.shape_cast %54 : vector<4x64xf32> to vector<4x1x64xf32>
    tpu.vector_store %arg14[%c0_25, %c0_26, %c64], %57 {strides = array<i32>} : memref<4x4x1024xf32, #tpu.memory_space<vmem>>, vector<4x1x64xf32>,
    %58 = vector.extract_strided_slice %37 {offsets = [0, 2, 0], sizes = [4, 1, 64], strides = [1, 1, 1]} : vector<4x8x64xf32> to vector<4x1x64xf32>
    %59 = vector.shape_cast %58 : vector<4x1x64xf32> to vector<4x64xf32>
    %c0_27 = arith.constant 0 : index
    %c1_28 = arith.constant 1 : index
    %c64_29 = arith.constant 64 : index
    %60 = vector.load %arg14[%c0_27, %c1_28, %c64_29] : memref<4x4x1024xf32, #tpu.memory_space<vmem>>, vector<4x1x64xf32>
    %61 = vector.shape_cast %60 : vector<4x1x64xf32> to vector<4x64xf32>
    %62 = vector.shape_cast %59 : vector<4x64xf32> to vector<4x1x64xf32>
    tpu.vector_store %arg14[%c0_27, %c1_28, %c64_29], %62 {strides = array<i32>} : memref<4x4x1024xf32, #tpu.memory_space<vmem>>, vector<4x1x64xf32>,
    %63 = vector.extract_strided_slice %37 {offsets = [0, 4, 0], sizes = [4, 1, 64], strides = [1, 1, 1]} : vector<4x8x64xf32> to vector<4x1x64xf32>
    %64 = vector.shape_cast %63 : vector<4x1x64xf32> to vector<4x64xf32>
    %c0_30 = arith.constant 0 : index
    %c2_31 = arith.constant 2 : index
    %c64_32 = arith.constant 64 : index
    %65 = vector.load %arg14[%c0_30, %c2_31, %c64_32] : memref<4x4x1024xf32, #tpu.memory_space<vmem>>, vector<4x1x64xf32>
    %66 = vector.shape_cast %65 : vector<4x1x64xf32> to vector<4x64xf32>
    %67 = vector.shape_cast %64 : vector<4x64xf32> to vector<4x1x64xf32>
    tpu.vector_store %arg14[%c0_30, %c2_31, %c64_32], %67 {strides = array<i32>} : memref<4x4x1024xf32, #tpu.memory_space<vmem>>, vector<4x1x64xf32>,
    %68 = vector.extract_strided_slice %37 {offsets = [0, 6, 0], sizes = [4, 1, 64], strides = [1, 1, 1]} : vector<4x8x64xf32> to vector<4x1x64xf32>
    %69 = vector.shape_cast %68 : vector<4x1x64xf32> to vector<4x64xf32>
    %c0_33 = arith.constant 0 : index
    %c3_34 = arith.constant 3 : index
    %c64_35 = arith.constant 64 : index
    %70 = vector.load %arg14[%c0_33, %c3_34, %c64_35] : memref<4x4x1024xf32, #tpu.memory_space<vmem>>, vector<4x1x64xf32>
    %71 = vector.shape_cast %70 : vector<4x1x64xf32> to vector<4x64xf32>
    %72 = vector.shape_cast %69 : vector<4x64xf32> to vector<4x1x64xf32>
    tpu.vector_store %arg14[%c0_33, %c3_34, %c64_35], %72 {strides = array<i32>} : memref<4x4x1024xf32, #tpu.memory_space<vmem>>, vector<4x1x64xf32>,
    %73 = vector.extract_strided_slice %37 {offsets = [0, 1, 0], sizes = [4, 1, 64], strides = [1, 1, 1]} : vector<4x8x64xf32> to vector<4x1x64xf32>
    %74 = vector.shape_cast %73 : vector<4x1x64xf32> to vector<4x64xf32>
    %c0_36 = arith.constant 0 : index
    %c0_37 = arith.constant 0 : index
    %c128 = arith.constant 128 : index
    %75 = vector.load %arg14[%c0_36, %c0_37, %c128] : memref<4x4x1024xf32, #tpu.memory_space<vmem>>, vector<4x1x64xf32>
    %76 = vector.shape_cast %75 : vector<4x1x64xf32> to vector<4x64xf32>
    %77 = vector.shape_cast %74 : vector<4x64xf32> to vector<4x1x64xf32>
    tpu.vector_store %arg14[%c0_36, %c0_37, %c128], %77 {strides = array<i32>} : memref<4x4x1024xf32, #tpu.memory_space<vmem>>, vector<4x1x64xf32>,
    %78 = vector.extract_strided_slice %37 {offsets = [0, 3, 0], sizes = [4, 1, 64], strides = [1, 1, 1]} : vector<4x8x64xf32> to vector<4x1x64xf32>
    %79 = vector.shape_cast %78 : vector<4x1x64xf32> to vector<4x64xf32>
    %c0_38 = arith.constant 0 : index
    %c1_39 = arith.constant 1 : index
    %c128_40 = arith.constant 128 : index
    %80 = vector.load %arg14[%c0_38, %c1_39, %c128_40] : memref<4x4x1024xf32, #tpu.memory_space<vmem>>, vector<4x1x64xf32>
    %81 = vector.shape_cast %80 : vector<4x1x64xf32> to vector<4x64xf32>
    %82 = vector.shape_cast %79 : vector<4x64xf32> to vector<4x1x64xf32>
    tpu.vector_store %arg14[%c0_38, %c1_39, %c128_40], %82 {strides = array<i32>} : memref<4x4x1024xf32, #tpu.memory_space<vmem>>, vector<4x1x64xf32>,
    %83 = vector.extract_strided_slice %37 {offsets = [0, 5, 0], sizes = [4, 1, 64], strides = [1, 1, 1]} : vector<4x8x64xf32> to vector<4x1x64xf32>
    %84 = vector.shape_cast %83 : vector<4x1x64xf32> to vector<4x64xf32>
    %c0_41 = arith.constant 0 : index
    %c2_42 = arith.constant 2 : index
    %c128_43 = arith.constant 128 : index
    %85 = vector.load %arg14[%c0_41, %c2_42, %c128_43] : memref<4x4x1024xf32, #tpu.memory_space<vmem>>, vector<4x1x64xf32>
    %86 = vector.shape_cast %85 : vector<4x1x64xf32> to vector<4x64xf32>
    %87 = vector.shape_cast %84 : vector<4x64xf32> to vector<4x1x64xf32>
    tpu.vector_store %arg14[%c0_41, %c2_42, %c128_43], %87 {strides = array<i32>} : memref<4x4x1024xf32, #tpu.memory_space<vmem>>, vector<4x1x64xf32>,
    %88 = vector.extract_strided_slice %37 {offsets = [0, 7, 0], sizes = [4, 1, 64], strides = [1, 1, 1]} : vector<4x8x64xf32> to vector<4x1x64xf32>
    %89 = vector.shape_cast %88 : vector<4x1x64xf32> to vector<4x64xf32>
    %c0_44 = arith.constant 0 : index
    %c3_45 = arith.constant 3 : index
    %c128_46 = arith.constant 128 : index
    %90 = vector.load %arg14[%c0_44, %c3_45, %c128_46] : memref<4x4x1024xf32, #tpu.memory_space<vmem>>, vector<4x1x64xf32>
    %91 = vector.shape_cast %90 : vector<4x1x64xf32> to vector<4x64xf32>
    %92 = vector.shape_cast %89 : vector<4x64xf32> to vector<4x1x64xf32>
    tpu.vector_store %arg14[%c0_44, %c3_45, %c128_46], %92 {strides = array<i32>} : memref<4x4x1024xf32, #tpu.memory_space<vmem>>, vector<4x1x64xf32>,
    %93 = vector.extract_strided_slice %37 {offsets = [0, 2, 0], sizes = [4, 1, 64], strides = [1, 1, 1]} : vector<4x8x64xf32> to vector<4x1x64xf32>
    %94 = vector.shape_cast %93 : vector<4x1x64xf32> to vector<4x64xf32>
    %c0_47 = arith.constant 0 : index
    %c0_48 = arith.constant 0 : index
    %c192 = arith.constant 192 : index
    %95 = vector.load %arg14[%c0_47, %c0_48, %c192] : memref<4x4x1024xf32, #tpu.memory_space<vmem>>, vector<4x1x64xf32>
    %96 = vector.shape_cast %95 : vector<4x1x64xf32> to vector<4x64xf32>
    %97 = vector.shape_cast %94 : vector<4x64xf32> to vector<4x1x64xf32>
    tpu.vector_store %arg14[%c0_47, %c0_48, %c192], %97 {strides = array<i32>} : memref<4x4x1024xf32, #tpu.memory_space<vmem>>, vector<4x1x64xf32>,
    %98 = vector.extract_strided_slice %37 {offsets = [0, 4, 0], sizes = [4, 1, 64], strides = [1, 1, 1]} : vector<4x8x64xf32> to vector<4x1x64xf32>
    %99 = vector.shape_cast %98 : vector<4x1x64xf32> to vector<4x64xf32>
    %c0_49 = arith.constant 0 : index
    %c1_50 = arith.constant 1 : index
    %c192_51 = arith.constant 192 : index
    %100 = vector.load %arg14[%c0_49, %c1_50, %c192_51] : memref<4x4x1024xf32, #tpu.memory_space<vmem>>, vector<4x1x64xf32>
    %101 = vector.shape_cast %100 : vector<4x1x64xf32> to vector<4x64xf32>
    %102 = vector.shape_cast %99 : vector<4x64xf32> to vector<4x1x64xf32>
    tpu.vector_store %arg14[%c0_49, %c1_50, %c192_51], %102 {strides = array<i32>} : memref<4x4x1024xf32, #tpu.memory_space<vmem>>, vector<4x1x64xf32>,
    %103 = vector.extract_strided_slice %37 {offsets = [0, 6, 0], sizes = [4, 1, 64], strides = [1, 1, 1]} : vector<4x8x64xf32> to vector<4x1x64xf32>
    %104 = vector.shape_cast %103 : vector<4x1x64xf32> to vector<4x64xf32>
    %c0_52 = arith.constant 0 : index
    %c2_53 = arith.constant 2 : index
    %c192_54 = arith.constant 192 : index
    %105 = vector.load %arg14[%c0_52, %c2_53, %c192_54] : memref<4x4x1024xf32, #tpu.memory_space<vmem>>, vector<4x1x64xf32>
    %106 = vector.shape_cast %105 : vector<4x1x64xf32> to vector<4x64xf32>
    %107 = vector.shape_cast %104 : vector<4x64xf32> to vector<4x1x64xf32>
    tpu.vector_store %arg14[%c0_52, %c2_53, %c192_54], %107 {strides = array<i32>} : memref<4x4x1024xf32, #tpu.memory_space<vmem>>, vector<4x1x64xf32>,
    %108 = vector.extract_strided_slice %34 {offsets = [0, 0, 0], sizes = [4, 8, 64], strides = [1, 1, 1]} : vector<5x8x64xf32> to vector<4x8x64xf32>
    %109 = vector.extract_strided_slice %108 {offsets = [0, 1, 0], sizes = [4, 1, 64], strides = [1, 1, 1]} : vector<4x8x64xf32> to vector<4x1x64xf32>
    %110 = vector.shape_cast %109 : vector<4x1x64xf32> to vector<4x64xf32>
    %c0_55 = arith.constant 0 : index
    %c1_56 = arith.constant 1 : index
    %c256 = arith.constant 256 : index
    %111 = vector.load %arg14[%c0_55, %c1_56, %c256] : memref<4x4x1024xf32, #tpu.memory_space<vmem>>, vector<4x1x64xf32>
    %112 = vector.shape_cast %111 : vector<4x1x64xf32> to vector<4x64xf32>
    %113 = vector.shape_cast %110 : vector<4x64xf32> to vector<4x1x64xf32>
    tpu.vector_store %arg14[%c0_55, %c1_56, %c256], %113 {strides = array<i32>} : memref<4x4x1024xf32, #tpu.memory_space<vmem>>, vector<4x1x64xf32>,
    %114 = vector.extract_strided_slice %108 {offsets = [0, 3, 0], sizes = [4, 1, 64], strides = [1, 1, 1]} : vector<4x8x64xf32> to vector<4x1x64xf32>
    %115 = vector.shape_cast %114 : vector<4x1x64xf32> to vector<4x64xf32>
    %c0_57 = arith.constant 0 : index
    %c2_58 = arith.constant 2 : index
    %c256_59 = arith.constant 256 : index
    %116 = vector.load %arg14[%c0_57, %c2_58, %c256_59] : memref<4x4x1024xf32, #tpu.memory_space<vmem>>, vector<4x1x64xf32>
    %117 = vector.shape_cast %116 : vector<4x1x64xf32> to vector<4x64xf32>
    %118 = vector.shape_cast %115 : vector<4x64xf32> to vector<4x1x64xf32>
    tpu.vector_store %arg14[%c0_57, %c2_58, %c256_59], %118 {strides = array<i32>} : memref<4x4x1024xf32, #tpu.memory_space<vmem>>, vector<4x1x64xf32>,
    %119 = vector.extract_strided_slice %108 {offsets = [0, 5, 0], sizes = [4, 1, 64], strides = [1, 1, 1]} : vector<4x8x64xf32> to vector<4x1x64xf32>
    %120 = vector.shape_cast %119 : vector<4x1x64xf32> to vector<4x64xf32>
    %c0_60 = arith.constant 0 : index
    %c3_61 = arith.constant 3 : index
    %c256_62 = arith.constant 256 : index
    %121 = vector.load %arg14[%c0_60, %c3_61, %c256_62] : memref<4x4x1024xf32, #tpu.memory_space<vmem>>, vector<4x1x64xf32>
    %122 = vector.shape_cast %121 : vector<4x1x64xf32> to vector<4x64xf32>
    %123 = vector.shape_cast %120 : vector<4x64xf32> to vector<4x1x64xf32>
    tpu.vector_store %arg14[%c0_60, %c3_61, %c256_62], %123 {strides = array<i32>} : memref<4x4x1024xf32, #tpu.memory_space<vmem>>, vector<4x1x64xf32>,
    %124 = vector.extract_strided_slice %108 {offsets = [0, 0, 0], sizes = [4, 1, 64], strides = [1, 1, 1]} : vector<4x8x64xf32> to vector<4x1x64xf32>
    %125 = vector.shape_cast %124 : vector<4x1x64xf32> to vector<4x64xf32>
    %c0_63 = arith.constant 0 : index
    %c0_64 = arith.constant 0 : index
    %c320 = arith.constant 320 : index
    %126 = vector.load %arg14[%c0_63, %c0_64, %c320] : memref<4x4x1024xf32, #tpu.memory_space<vmem>>, vector<4x1x64xf32>
    %127 = vector.shape_cast %126 : vector<4x1x64xf32> to vector<4x64xf32>
    %128 = vector.shape_cast %125 : vector<4x64xf32> to vector<4x1x64xf32>
    tpu.vector_store %arg14[%c0_63, %c0_64, %c320], %128 {strides = array<i32>} : memref<4x4x1024xf32, #tpu.memory_space<vmem>>, vector<4x1x64xf32>,
    %129 = vector.extract_strided_slice %108 {offsets = [0, 2, 0], sizes = [4, 1, 64], strides = [1, 1, 1]} : vector<4x8x64xf32> to vector<4x1x64xf32>
    %130 = vector.shape_cast %129 : vector<4x1x64xf32> to vector<4x64xf32>
    %c0_65 = arith.constant 0 : index
    %c1_66 = arith.constant 1 : index
    %c320_67 = arith.constant 320 : index
    %131 = vector.load %arg14[%c0_65, %c1_66, %c320_67] : memref<4x4x1024xf32, #tpu.memory_space<vmem>>, vector<4x1x64xf32>
    %132 = vector.shape_cast %131 : vector<4x1x64xf32> to vector<4x64xf32>
    %133 = vector.shape_cast %130 : vector<4x64xf32> to vector<4x1x64xf32>
    tpu.vector_store %arg14[%c0_65, %c1_66, %c320_67], %133 {strides = array<i32>} : memref<4x4x1024xf32, #tpu.memory_space<vmem>>, vector<4x1x64xf32>,
    %134 = vector.extract_strided_slice %108 {offsets = [0, 4, 0], sizes = [4, 1, 64], strides = [1, 1, 1]} : vector<4x8x64xf32> to vector<4x1x64xf32>
    %135 = vector.shape_cast %134 : vector<4x1x64xf32> to vector<4x64xf32>
    %c0_68 = arith.constant 0 : index
    %c2_69 = arith.constant 2 : index
    %c320_70 = arith.constant 320 : index
    %136 = vector.load %arg14[%c0_68, %c2_69, %c320_70] : memref<4x4x1024xf32, #tpu.memory_space<vmem>>, vector<4x1x64xf32>
    %137 = vector.shape_cast %136 : vector<4x1x64xf32> to vector<4x64xf32>
    %138 = vector.shape_cast %135 : vector<4x64xf32> to vector<4x1x64xf32>
    tpu.vector_store %arg14[%c0_68, %c2_69, %c320_70], %138 {strides = array<i32>} : memref<4x4x1024xf32, #tpu.memory_space<vmem>>, vector<4x1x64xf32>,
    %139 = vector.extract_strided_slice %108 {offsets = [0, 6, 0], sizes = [4, 1, 64], strides = [1, 1, 1]} : vector<4x8x64xf32> to vector<4x1x64xf32>
    %140 = vector.shape_cast %139 : vector<4x1x64xf32> to vector<4x64xf32>
    %c0_71 = arith.constant 0 : index
    %c3_72 = arith.constant 3 : index
    %c320_73 = arith.constant 320 : index
    %141 = vector.load %arg14[%c0_71, %c3_72, %c320_73] : memref<4x4x1024xf32, #tpu.memory_space<vmem>>, vector<4x1x64xf32>
    %142 = vector.shape_cast %141 : vector<4x1x64xf32> to vector<4x64xf32>
    %143 = vector.shape_cast %140 : vector<4x64xf32> to vector<4x1x64xf32>
    tpu.vector_store %arg14[%c0_71, %c3_72, %c320_73], %143 {strides = array<i32>} : memref<4x4x1024xf32, #tpu.memory_space<vmem>>, vector<4x1x64xf32>,
    %144 = vector.extract_strided_slice %108 {offsets = [0, 1, 0], sizes = [4, 1, 64], strides = [1, 1, 1]} : vector<4x8x64xf32> to vector<4x1x64xf32>
    %145 = vector.shape_cast %144 : vector<4x1x64xf32> to vector<4x64xf32>
    %c0_74 = arith.constant 0 : index
    %c0_75 = arith.constant 0 : index
    %c384 = arith.constant 384 : index
    %146 = vector.load %arg14[%c0_74, %c0_75, %c384] : memref<4x4x1024xf32, #tpu.memory_space<vmem>>, vector<4x1x64xf32>
    %147 = vector.shape_cast %146 : vector<4x1x64xf32> to vector<4x64xf32>
    %148 = vector.shape_cast %145 : vector<4x64xf32> to vector<4x1x64xf32>
    tpu.vector_store %arg14[%c0_74, %c0_75, %c384], %148 {strides = array<i32>} : memref<4x4x1024xf32, #tpu.memory_space<vmem>>, vector<4x1x64xf32>,
    %149 = vector.extract_strided_slice %108 {offsets = [0, 3, 0], sizes = [4, 1, 64], strides = [1, 1, 1]} : vector<4x8x64xf32> to vector<4x1x64xf32>
    %150 = vector.shape_cast %149 : vector<4x1x64xf32> to vector<4x64xf32>
    %c0_76 = arith.constant 0 : index
    %c1_77 = arith.constant 1 : index
    %c384_78 = arith.constant 384 : index
    %151 = vector.load %arg14[%c0_76, %c1_77, %c384_78] : memref<4x4x1024xf32, #tpu.memory_space<vmem>>, vector<4x1x64xf32>
    %152 = vector.shape_cast %151 : vector<4x1x64xf32> to vector<4x64xf32>
    %153 = vector.shape_cast %150 : vector<4x64xf32> to vector<4x1x64xf32>
    tpu.vector_store %arg14[%c0_76, %c1_77, %c384_78], %153 {strides = array<i32>} : memref<4x4x1024xf32, #tpu.memory_space<vmem>>, vector<4x1x64xf32>,
    %154 = vector.extract_strided_slice %108 {offsets = [0, 5, 0], sizes = [4, 1, 64], strides = [1, 1, 1]} : vector<4x8x64xf32> to vector<4x1x64xf32>
    %155 = vector.shape_cast %154 : vector<4x1x64xf32> to vector<4x64xf32>
    %c0_79 = arith.constant 0 : index
    %c2_80 = arith.constant 2 : index
    %c384_81 = arith.constant 384 : index
    %156 = vector.load %arg14[%c0_79, %c2_80, %c384_81] : memref<4x4x1024xf32, #tpu.memory_space<vmem>>, vector<4x1x64xf32>
    %157 = vector.shape_cast %156 : vector<4x1x64xf32> to vector<4x64xf32>
    %158 = vector.shape_cast %155 : vector<4x64xf32> to vector<4x1x64xf32>
    tpu.vector_store %arg14[%c0_79, %c2_80, %c384_81], %158 {strides = array<i32>} : memref<4x4x1024xf32, #tpu.memory_space<vmem>>, vector<4x1x64xf32>,
    %159 = vector.extract_strided_slice %108 {offsets = [0, 7, 0], sizes = [4, 1, 64], strides = [1, 1, 1]} : vector<4x8x64xf32> to vector<4x1x64xf32>
    %160 = vector.shape_cast %159 : vector<4x1x64xf32> to vector<4x64xf32>
    %c0_82 = arith.constant 0 : index
    %c3_83 = arith.constant 3 : index
    %c384_84 = arith.constant 384 : index
    %161 = vector.load %arg14[%c0_82, %c3_83, %c384_84] : memref<4x4x1024xf32, #tpu.memory_space<vmem>>, vector<4x1x64xf32>
    %162 = vector.shape_cast %161 : vector<4x1x64xf32> to vector<4x64xf32>
    %163 = vector.shape_cast %160 : vector<4x64xf32> to vector<4x1x64xf32>
    tpu.vector_store %arg14[%c0_82, %c3_83, %c384_84], %163 {strides = array<i32>} : memref<4x4x1024xf32, #tpu.memory_space<vmem>>, vector<4x1x64xf32>,
    %164 = vector.extract_strided_slice %108 {offsets = [0, 2, 0], sizes = [4, 1, 64], strides = [1, 1, 1]} : vector<4x8x64xf32> to vector<4x1x64xf32>
    %165 = vector.shape_cast %164 : vector<4x1x64xf32> to vector<4x64xf32>
    %c0_85 = arith.constant 0 : index
    %c0_86 = arith.constant 0 : index
    %c448 = arith.constant 448 : index
    %166 = vector.load %arg14[%c0_85, %c0_86, %c448] : memref<4x4x1024xf32, #tpu.memory_space<vmem>>, vector<4x1x64xf32>
    %167 = vector.shape_cast %166 : vector<4x1x64xf32> to vector<4x64xf32>
    %168 = vector.shape_cast %165 : vector<4x64xf32> to vector<4x1x64xf32>
    tpu.vector_store %arg14[%c0_85, %c0_86, %c448], %168 {strides = array<i32>} : memref<4x4x1024xf32, #tpu.memory_space<vmem>>, vector<4x1x64xf32>,
    %169 = vector.extract_strided_slice %108 {offsets = [0, 4, 0], sizes = [4, 1, 64], strides = [1, 1, 1]} : vector<4x8x64xf32> to vector<4x1x64xf32>
    %170 = vector.shape_cast %169 : vector<4x1x64xf32> to vector<4x64xf32>
    %c0_87 = arith.constant 0 : index
    %c1_88 = arith.constant 1 : index
    %c448_89 = arith.constant 448 : index
    %171 = vector.load %arg14[%c0_87, %c1_88, %c448_89] : memref<4x4x1024xf32, #tpu.memory_space<vmem>>, vector<4x1x64xf32>
    %172 = vector.shape_cast %171 : vector<4x1x64xf32> to vector<4x64xf32>
    %173 = vector.shape_cast %170 : vector<4x64xf32> to vector<4x1x64xf32>
    tpu.vector_store %arg14[%c0_87, %c1_88, %c448_89], %173 {strides = array<i32>} : memref<4x4x1024xf32, #tpu.memory_space<vmem>>, vector<4x1x64xf32>,
    %174 = vector.extract_strided_slice %108 {offsets = [0, 6, 0], sizes = [4, 1, 64], strides = [1, 1, 1]} : vector<4x8x64xf32> to vector<4x1x64xf32>
    %175 = vector.shape_cast %174 : vector<4x1x64xf32> to vector<4x64xf32>
    %c0_90 = arith.constant 0 : index
    %c2_91 = arith.constant 2 : index
    %c448_92 = arith.constant 448 : index
    %176 = vector.load %arg14[%c0_90, %c2_91, %c448_92] : memref<4x4x1024xf32, #tpu.memory_space<vmem>>, vector<4x1x64xf32>
    %177 = vector.shape_cast %176 : vector<4x1x64xf32> to vector<4x64xf32>
    %178 = vector.shape_cast %175 : vector<4x64xf32> to vector<4x1x64xf32>
    tpu.vector_store %arg14[%c0_90, %c2_91, %c448_92], %178 {strides = array<i32>} : memref<4x4x1024xf32, #tpu.memory_space<vmem>>, vector<4x1x64xf32>,
    %179 = vector.extract_strided_slice %31 {offsets = [1, 0, 0], sizes = [4, 8, 64], strides = [1, 1, 1]} : vector<5x8x64xf32> to vector<4x8x64xf32>
    %180 = vector.extract_strided_slice %179 {offsets = [0, 1, 0], sizes = [4, 1, 64], strides = [1, 1, 1]} : vector<4x8x64xf32> to vector<4x1x64xf32>
    %181 = vector.shape_cast %180 : vector<4x1x64xf32> to vector<4x64xf32>
    %c0_93 = arith.constant 0 : index
    %c1_94 = arith.constant 1 : index
    %c512 = arith.constant 512 : index
    %182 = vector.load %arg14[%c0_93, %c1_94, %c512] : memref<4x4x1024xf32, #tpu.memory_space<vmem>>, vector<4x1x64xf32>
    %183 = vector.shape_cast %182 : vector<4x1x64xf32> to vector<4x64xf32>
    %184 = vector.shape_cast %181 : vector<4x64xf32> to vector<4x1x64xf32>
    tpu.vector_store %arg14[%c0_93, %c1_94, %c512], %184 {strides = array<i32>} : memref<4x4x1024xf32, #tpu.memory_space<vmem>>, vector<4x1x64xf32>,
    %185 = vector.extract_strided_slice %179 {offsets = [0, 3, 0], sizes = [4, 1, 64], strides = [1, 1, 1]} : vector<4x8x64xf32> to vector<4x1x64xf32>
    %186 = vector.shape_cast %185 : vector<4x1x64xf32> to vector<4x64xf32>
    %c0_95 = arith.constant 0 : index
    %c2_96 = arith.constant 2 : index
    %c512_97 = arith.constant 512 : index
    %187 = vector.load %arg14[%c0_95, %c2_96, %c512_97] : memref<4x4x1024xf32, #tpu.memory_space<vmem>>, vector<4x1x64xf32>
    %188 = vector.shape_cast %187 : vector<4x1x64xf32> to vector<4x64xf32>
    %189 = vector.shape_cast %186 : vector<4x64xf32> to vector<4x1x64xf32>
    tpu.vector_store %arg14[%c0_95, %c2_96, %c512_97], %189 {strides = array<i32>} : memref<4x4x1024xf32, #tpu.memory_space<vmem>>, vector<4x1x64xf32>,
    %190 = vector.extract_strided_slice %179 {offsets = [0, 5, 0], sizes = [4, 1, 64], strides = [1, 1, 1]} : vector<4x8x64xf32> to vector<4x1x64xf32>
    %191 = vector.shape_cast %190 : vector<4x1x64xf32> to vector<4x64xf32>
    %c0_98 = arith.constant 0 : index
    %c3_99 = arith.constant 3 : index
    %c512_100 = arith.constant 512 : index
    %192 = vector.load %arg14[%c0_98, %c3_99, %c512_100] : memref<4x4x1024xf32, #tpu.memory_space<vmem>>, vector<4x1x64xf32>
    %193 = vector.shape_cast %192 : vector<4x1x64xf32> to vector<4x64xf32>
    %194 = vector.shape_cast %191 : vector<4x64xf32> to vector<4x1x64xf32>
    tpu.vector_store %arg14[%c0_98, %c3_99, %c512_100], %194 {strides = array<i32>} : memref<4x4x1024xf32, #tpu.memory_space<vmem>>, vector<4x1x64xf32>,
    %195 = vector.extract_strided_slice %179 {offsets = [0, 0, 0], sizes = [4, 1, 64], strides = [1, 1, 1]} : vector<4x8x64xf32> to vector<4x1x64xf32>
    %196 = vector.shape_cast %195 : vector<4x1x64xf32> to vector<4x64xf32>
    %c0_101 = arith.constant 0 : index
    %c0_102 = arith.constant 0 : index
    %c576 = arith.constant 576 : index
    %197 = vector.load %arg14[%c0_101, %c0_102, %c576] : memref<4x4x1024xf32, #tpu.memory_space<vmem>>, vector<4x1x64xf32>
    %198 = vector.shape_cast %197 : vector<4x1x64xf32> to vector<4x64xf32>
    %199 = vector.shape_cast %196 : vector<4x64xf32> to vector<4x1x64xf32>
    tpu.vector_store %arg14[%c0_101, %c0_102, %c576], %199 {strides = array<i32>} : memref<4x4x1024xf32, #tpu.memory_space<vmem>>, vector<4x1x64xf32>,
    %200 = vector.extract_strided_slice %179 {offsets = [0, 2, 0], sizes = [4, 1, 64], strides = [1, 1, 1]} : vector<4x8x64xf32> to vector<4x1x64xf32>
    %201 = vector.shape_cast %200 : vector<4x1x64xf32> to vector<4x64xf32>
    %c0_103 = arith.constant 0 : index
    %c1_104 = arith.constant 1 : index
    %c576_105 = arith.constant 576 : index
    %202 = vector.load %arg14[%c0_103, %c1_104, %c576_105] : memref<4x4x1024xf32, #tpu.memory_space<vmem>>, vector<4x1x64xf32>
    %203 = vector.shape_cast %202 : vector<4x1x64xf32> to vector<4x64xf32>
    %204 = vector.shape_cast %201 : vector<4x64xf32> to vector<4x1x64xf32>
    tpu.vector_store %arg14[%c0_103, %c1_104, %c576_105], %204 {strides = array<i32>} : memref<4x4x1024xf32, #tpu.memory_space<vmem>>, vector<4x1x64xf32>,
    %205 = vector.extract_strided_slice %179 {offsets = [0, 4, 0], sizes = [4, 1, 64], strides = [1, 1, 1]} : vector<4x8x64xf32> to vector<4x1x64xf32>
    %206 = vector.shape_cast %205 : vector<4x1x64xf32> to vector<4x64xf32>
    %c0_106 = arith.constant 0 : index
    %c2_107 = arith.constant 2 : index
    %c576_108 = arith.constant 576 : index
    %207 = vector.load %arg14[%c0_106, %c2_107, %c576_108] : memref<4x4x1024xf32, #tpu.memory_space<vmem>>, vector<4x1x64xf32>
    %208 = vector.shape_cast %207 : vector<4x1x64xf32> to vector<4x64xf32>
    %209 = vector.shape_cast %206 : vector<4x64xf32> to vector<4x1x64xf32>
    tpu.vector_store %arg14[%c0_106, %c2_107, %c576_108], %209 {strides = array<i32>} : memref<4x4x1024xf32, #tpu.memory_space<vmem>>, vector<4x1x64xf32>,
    %210 = vector.extract_strided_slice %179 {offsets = [0, 6, 0], sizes = [4, 1, 64], strides = [1, 1, 1]} : vector<4x8x64xf32> to vector<4x1x64xf32>
    %211 = vector.shape_cast %210 : vector<4x1x64xf32> to vector<4x64xf32>
    %c0_109 = arith.constant 0 : index
    %c3_110 = arith.constant 3 : index
    %c576_111 = arith.constant 576 : index
    %212 = vector.load %arg14[%c0_109, %c3_110, %c576_111] : memref<4x4x1024xf32, #tpu.memory_space<vmem>>, vector<4x1x64xf32>
    %213 = vector.shape_cast %212 : vector<4x1x64xf32> to vector<4x64xf32>
    %214 = vector.shape_cast %211 : vector<4x64xf32> to vector<4x1x64xf32>
    tpu.vector_store %arg14[%c0_109, %c3_110, %c576_111], %214 {strides = array<i32>} : memref<4x4x1024xf32, #tpu.memory_space<vmem>>, vector<4x1x64xf32>,
    %215 = vector.extract_strided_slice %179 {offsets = [0, 1, 0], sizes = [4, 1, 64], strides = [1, 1, 1]} : vector<4x8x64xf32> to vector<4x1x64xf32>
    %216 = vector.shape_cast %215 : vector<4x1x64xf32> to vector<4x64xf32>
    %c0_112 = arith.constant 0 : index
    %c0_113 = arith.constant 0 : index
    %c640 = arith.constant 640 : index
    %217 = vector.load %arg14[%c0_112, %c0_113, %c640] : memref<4x4x1024xf32, #tpu.memory_space<vmem>>, vector<4x1x64xf32>
    %218 = vector.shape_cast %217 : vector<4x1x64xf32> to vector<4x64xf32>
    %219 = vector.shape_cast %216 : vector<4x64xf32> to vector<4x1x64xf32>
    tpu.vector_store %arg14[%c0_112, %c0_113, %c640], %219 {strides = array<i32>} : memref<4x4x1024xf32, #tpu.memory_space<vmem>>, vector<4x1x64xf32>,
    %220 = vector.extract_strided_slice %179 {offsets = [0, 3, 0], sizes = [4, 1, 64], strides = [1, 1, 1]} : vector<4x8x64xf32> to vector<4x1x64xf32>
    %221 = vector.shape_cast %220 : vector<4x1x64xf32> to vector<4x64xf32>
    %c0_114 = arith.constant 0 : index
    %c1_115 = arith.constant 1 : index
    %c640_116 = arith.constant 640 : index
    %222 = vector.load %arg14[%c0_114, %c1_115, %c640_116] : memref<4x4x1024xf32, #tpu.memory_space<vmem>>, vector<4x1x64xf32>
    %223 = vector.shape_cast %222 : vector<4x1x64xf32> to vector<4x64xf32>
    %224 = vector.shape_cast %221 : vector<4x64xf32> to vector<4x1x64xf32>
    tpu.vector_store %arg14[%c0_114, %c1_115, %c640_116], %224 {strides = array<i32>} : memref<4x4x1024xf32, #tpu.memory_space<vmem>>, vector<4x1x64xf32>,
    %225 = vector.extract_strided_slice %179 {offsets = [0, 5, 0], sizes = [4, 1, 64], strides = [1, 1, 1]} : vector<4x8x64xf32> to vector<4x1x64xf32>
    %226 = vector.shape_cast %225 : vector<4x1x64xf32> to vector<4x64xf32>
    %c0_117 = arith.constant 0 : index
    %c2_118 = arith.constant 2 : index
    %c640_119 = arith.constant 640 : index
    %227 = vector.load %arg14[%c0_117, %c2_118, %c640_119] : memref<4x4x1024xf32, #tpu.memory_space<vmem>>, vector<4x1x64xf32>
    %228 = vector.shape_cast %227 : vector<4x1x64xf32> to vector<4x64xf32>
    %229 = vector.shape_cast %226 : vector<4x64xf32> to vector<4x1x64xf32>
    tpu.vector_store %arg14[%c0_117, %c2_118, %c640_119], %229 {strides = array<i32>} : memref<4x4x1024xf32, #tpu.memory_space<vmem>>, vector<4x1x64xf32>,
    %230 = vector.extract_strided_slice %179 {offsets = [0, 7, 0], sizes = [4, 1, 64], strides = [1, 1, 1]} : vector<4x8x64xf32> to vector<4x1x64xf32>
    %231 = vector.shape_cast %230 : vector<4x1x64xf32> to vector<4x64xf32>
    %c0_120 = arith.constant 0 : index
    %c3_121 = arith.constant 3 : index
    %c640_122 = arith.constant 640 : index
    %232 = vector.load %arg14[%c0_120, %c3_121, %c640_122] : memref<4x4x1024xf32, #tpu.memory_space<vmem>>, vector<4x1x64xf32>
    %233 = vector.shape_cast %232 : vector<4x1x64xf32> to vector<4x64xf32>
    %234 = vector.shape_cast %231 : vector<4x64xf32> to vector<4x1x64xf32>
    tpu.vector_store %arg14[%c0_120, %c3_121, %c640_122], %234 {strides = array<i32>} : memref<4x4x1024xf32, #tpu.memory_space<vmem>>, vector<4x1x64xf32>,
    %235 = vector.extract_strided_slice %179 {offsets = [0, 2, 0], sizes = [4, 1, 64], strides = [1, 1, 1]} : vector<4x8x64xf32> to vector<4x1x64xf32>
    %236 = vector.shape_cast %235 : vector<4x1x64xf32> to vector<4x64xf32>
    %c0_123 = arith.constant 0 : index
    %c0_124 = arith.constant 0 : index
    %c704 = arith.constant 704 : index
    %237 = vector.load %arg14[%c0_123, %c0_124, %c704] : memref<4x4x1024xf32, #tpu.memory_space<vmem>>, vector<4x1x64xf32>
    %238 = vector.shape_cast %237 : vector<4x1x64xf32> to vector<4x64xf32>
    %239 = vector.shape_cast %236 : vector<4x64xf32> to vector<4x1x64xf32>
    tpu.vector_store %arg14[%c0_123, %c0_124, %c704], %239 {strides = array<i32>} : memref<4x4x1024xf32, #tpu.memory_space<vmem>>, vector<4x1x64xf32>,
    %240 = vector.extract_strided_slice %179 {offsets = [0, 4, 0], sizes = [4, 1, 64], strides = [1, 1, 1]} : vector<4x8x64xf32> to vector<4x1x64xf32>
    %241 = vector.shape_cast %240 : vector<4x1x64xf32> to vector<4x64xf32>
    %c0_125 = arith.constant 0 : index
    %c1_126 = arith.constant 1 : index
    %c704_127 = arith.constant 704 : index
    %242 = vector.load %arg14[%c0_125, %c1_126, %c704_127] : memref<4x4x1024xf32, #tpu.memory_space<vmem>>, vector<4x1x64xf32>
    %243 = vector.shape_cast %242 : vector<4x1x64xf32> to vector<4x64xf32>
    %244 = vector.shape_cast %241 : vector<4x64xf32> to vector<4x1x64xf32>
    tpu.vector_store %arg14[%c0_125, %c1_126, %c704_127], %244 {strides = array<i32>} : memref<4x4x1024xf32, #tpu.memory_space<vmem>>, vector<4x1x64xf32>,
    %245 = vector.extract_strided_slice %179 {offsets = [0, 6, 0], sizes = [4, 1, 64], strides = [1, 1, 1]} : vector<4x8x64xf32> to vector<4x1x64xf32>
    %246 = vector.shape_cast %245 : vector<4x1x64xf32> to vector<4x64xf32>
    %c0_128 = arith.constant 0 : index
    %c2_129 = arith.constant 2 : index
    %c704_130 = arith.constant 704 : index
    %247 = vector.load %arg14[%c0_128, %c2_129, %c704_130] : memref<4x4x1024xf32, #tpu.memory_space<vmem>>, vector<4x1x64xf32>
    %248 = vector.shape_cast %247 : vector<4x1x64xf32> to vector<4x64xf32>
    %249 = vector.shape_cast %246 : vector<4x64xf32> to vector<4x1x64xf32>
    tpu.vector_store %arg14[%c0_128, %c2_129, %c704_130], %249 {strides = array<i32>} : memref<4x4x1024xf32, #tpu.memory_space<vmem>>, vector<4x1x64xf32>,
    %250 = vector.extract_strided_slice %34 {offsets = [1, 0, 0], sizes = [4, 8, 64], strides = [1, 1, 1]} : vector<5x8x64xf32> to vector<4x8x64xf32>
    %251 = vector.extract_strided_slice %250 {offsets = [0, 1, 0], sizes = [4, 1, 64], strides = [1, 1, 1]} : vector<4x8x64xf32> to vector<4x1x64xf32>
    %252 = vector.shape_cast %251 : vector<4x1x64xf32> to vector<4x64xf32>
    %c0_131 = arith.constant 0 : index
    %c1_132 = arith.constant 1 : index
    %c768 = arith.constant 768 : index
    %253 = vector.load %arg14[%c0_131, %c1_132, %c768] : memref<4x4x1024xf32, #tpu.memory_space<vmem>>, vector<4x1x64xf32>
    %254 = vector.shape_cast %253 : vector<4x1x64xf32> to vector<4x64xf32>
    %255 = vector.shape_cast %252 : vector<4x64xf32> to vector<4x1x64xf32>
    tpu.vector_store %arg14[%c0_131, %c1_132, %c768], %255 {strides = array<i32>} : memref<4x4x1024xf32, #tpu.memory_space<vmem>>, vector<4x1x64xf32>,
    %256 = vector.extract_strided_slice %250 {offsets = [0, 3, 0], sizes = [4, 1, 64], strides = [1, 1, 1]} : vector<4x8x64xf32> to vector<4x1x64xf32>
    %257 = vector.shape_cast %256 : vector<4x1x64xf32> to vector<4x64xf32>
    %c0_133 = arith.constant 0 : index
    %c2_134 = arith.constant 2 : index
    %c768_135 = arith.constant 768 : index
    %258 = vector.load %arg14[%c0_133, %c2_134, %c768_135] : memref<4x4x1024xf32, #tpu.memory_space<vmem>>, vector<4x1x64xf32>
    %259 = vector.shape_cast %258 : vector<4x1x64xf32> to vector<4x64xf32>
    %260 = vector.shape_cast %257 : vector<4x64xf32> to vector<4x1x64xf32>
    tpu.vector_store %arg14[%c0_133, %c2_134, %c768_135], %260 {strides = array<i32>} : memref<4x4x1024xf32, #tpu.memory_space<vmem>>, vector<4x1x64xf32>,
    %261 = vector.extract_strided_slice %250 {offsets = [0, 5, 0], sizes = [4, 1, 64], strides = [1, 1, 1]} : vector<4x8x64xf32> to vector<4x1x64xf32>
    %262 = vector.shape_cast %261 : vector<4x1x64xf32> to vector<4x64xf32>
    %c0_136 = arith.constant 0 : index
    %c3_137 = arith.constant 3 : index
    %c768_138 = arith.constant 768 : index
    %263 = vector.load %arg14[%c0_136, %c3_137, %c768_138] : memref<4x4x1024xf32, #tpu.memory_space<vmem>>, vector<4x1x64xf32>
    %264 = vector.shape_cast %263 : vector<4x1x64xf32> to vector<4x64xf32>
    %265 = vector.shape_cast %262 : vector<4x64xf32> to vector<4x1x64xf32>
    tpu.vector_store %arg14[%c0_136, %c3_137, %c768_138], %265 {strides = array<i32>} : memref<4x4x1024xf32, #tpu.memory_space<vmem>>, vector<4x1x64xf32>,
    %266 = vector.extract_strided_slice %250 {offsets = [0, 0, 0], sizes = [4, 1, 64], strides = [1, 1, 1]} : vector<4x8x64xf32> to vector<4x1x64xf32>
    %267 = vector.shape_cast %266 : vector<4x1x64xf32> to vector<4x64xf32>
    %c0_139 = arith.constant 0 : index
    %c0_140 = arith.constant 0 : index
    %c832 = arith.constant 832 : index
    %268 = vector.load %arg14[%c0_139, %c0_140, %c832] : memref<4x4x1024xf32, #tpu.memory_space<vmem>>, vector<4x1x64xf32>
    %269 = vector.shape_cast %268 : vector<4x1x64xf32> to vector<4x64xf32>
    %270 = vector.shape_cast %267 : vector<4x64xf32> to vector<4x1x64xf32>
    tpu.vector_store %arg14[%c0_139, %c0_140, %c832], %270 {strides = array<i32>} : memref<4x4x1024xf32, #tpu.memory_space<vmem>>, vector<4x1x64xf32>,
    %271 = vector.extract_strided_slice %250 {offsets = [0, 2, 0], sizes = [4, 1, 64], strides = [1, 1, 1]} : vector<4x8x64xf32> to vector<4x1x64xf32>
    %272 = vector.shape_cast %271 : vector<4x1x64xf32> to vector<4x64xf32>
    %c0_141 = arith.constant 0 : index
    %c1_142 = arith.constant 1 : index
    %c832_143 = arith.constant 832 : index
    %273 = vector.load %arg14[%c0_141, %c1_142, %c832_143] : memref<4x4x1024xf32, #tpu.memory_space<vmem>>, vector<4x1x64xf32>
    %274 = vector.shape_cast %273 : vector<4x1x64xf32> to vector<4x64xf32>
    %275 = vector.shape_cast %272 : vector<4x64xf32> to vector<4x1x64xf32>
    tpu.vector_store %arg14[%c0_141, %c1_142, %c832_143], %275 {strides = array<i32>} : memref<4x4x1024xf32, #tpu.memory_space<vmem>>, vector<4x1x64xf32>,
    %276 = vector.extract_strided_slice %250 {offsets = [0, 4, 0], sizes = [4, 1, 64], strides = [1, 1, 1]} : vector<4x8x64xf32> to vector<4x1x64xf32>
    %277 = vector.shape_cast %276 : vector<4x1x64xf32> to vector<4x64xf32>
    %c0_144 = arith.constant 0 : index
    %c2_145 = arith.constant 2 : index
    %c832_146 = arith.constant 832 : index
    %278 = vector.load %arg14[%c0_144, %c2_145, %c832_146] : memref<4x4x1024xf32, #tpu.memory_space<vmem>>, vector<4x1x64xf32>
    %279 = vector.shape_cast %278 : vector<4x1x64xf32> to vector<4x64xf32>
    %280 = vector.shape_cast %277 : vector<4x64xf32> to vector<4x1x64xf32>
    tpu.vector_store %arg14[%c0_144, %c2_145, %c832_146], %280 {strides = array<i32>} : memref<4x4x1024xf32, #tpu.memory_space<vmem>>, vector<4x1x64xf32>,
    %281 = vector.extract_strided_slice %250 {offsets = [0, 6, 0], sizes = [4, 1, 64], strides = [1, 1, 1]} : vector<4x8x64xf32> to vector<4x1x64xf32>
    %282 = vector.shape_cast %281 : vector<4x1x64xf32> to vector<4x64xf32>
    %c0_147 = arith.constant 0 : index
    %c3_148 = arith.constant 3 : index
    %c832_149 = arith.constant 832 : index
    %283 = vector.load %arg14[%c0_147, %c3_148, %c832_149] : memref<4x4x1024xf32, #tpu.memory_space<vmem>>, vector<4x1x64xf32>
    %284 = vector.shape_cast %283 : vector<4x1x64xf32> to vector<4x64xf32>
    %285 = vector.shape_cast %282 : vector<4x64xf32> to vector<4x1x64xf32>
    tpu.vector_store %arg14[%c0_147, %c3_148, %c832_149], %285 {strides = array<i32>} : memref<4x4x1024xf32, #tpu.memory_space<vmem>>, vector<4x1x64xf32>,
    %286 = vector.extract_strided_slice %250 {offsets = [0, 1, 0], sizes = [4, 1, 64], strides = [1, 1, 1]} : vector<4x8x64xf32> to vector<4x1x64xf32>
    %287 = vector.shape_cast %286 : vector<4x1x64xf32> to vector<4x64xf32>
    %c0_150 = arith.constant 0 : index
    %c0_151 = arith.constant 0 : index
    %c896 = arith.constant 896 : index
    %288 = vector.load %arg14[%c0_150, %c0_151, %c896] : memref<4x4x1024xf32, #tpu.memory_space<vmem>>, vector<4x1x64xf32>
    %289 = vector.shape_cast %288 : vector<4x1x64xf32> to vector<4x64xf32>
    %290 = vector.shape_cast %287 : vector<4x64xf32> to vector<4x1x64xf32>
    tpu.vector_store %arg14[%c0_150, %c0_151, %c896], %290 {strides = array<i32>} : memref<4x4x1024xf32, #tpu.memory_space<vmem>>, vector<4x1x64xf32>,
    %291 = vector.extract_strided_slice %250 {offsets = [0, 3, 0], sizes = [4, 1, 64], strides = [1, 1, 1]} : vector<4x8x64xf32> to vector<4x1x64xf32>
    %292 = vector.shape_cast %291 : vector<4x1x64xf32> to vector<4x64xf32>
    %c0_152 = arith.constant 0 : index
    %c1_153 = arith.constant 1 : index
    %c896_154 = arith.constant 896 : index
    %293 = vector.load %arg14[%c0_152, %c1_153, %c896_154] : memref<4x4x1024xf32, #tpu.memory_space<vmem>>, vector<4x1x64xf32>
    %294 = vector.shape_cast %293 : vector<4x1x64xf32> to vector<4x64xf32>
    %295 = vector.shape_cast %292 : vector<4x64xf32> to vector<4x1x64xf32>
    tpu.vector_store %arg14[%c0_152, %c1_153, %c896_154], %295 {strides = array<i32>} : memref<4x4x1024xf32, #tpu.memory_space<vmem>>, vector<4x1x64xf32>,
    %296 = vector.extract_strided_slice %250 {offsets = [0, 5, 0], sizes = [4, 1, 64], strides = [1, 1, 1]} : vector<4x8x64xf32> to vector<4x1x64xf32>
    %297 = vector.shape_cast %296 : vector<4x1x64xf32> to vector<4x64xf32>
    %c0_155 = arith.constant 0 : index
    %c2_156 = arith.constant 2 : index
    %c896_157 = arith.constant 896 : index
    %298 = vector.load %arg14[%c0_155, %c2_156, %c896_157] : memref<4x4x1024xf32, #tpu.memory_space<vmem>>, vector<4x1x64xf32>
    %299 = vector.shape_cast %298 : vector<4x1x64xf32> to vector<4x64xf32>
    %300 = vector.shape_cast %297 : vector<4x64xf32> to vector<4x1x64xf32>
    tpu.vector_store %arg14[%c0_155, %c2_156, %c896_157], %300 {strides = array<i32>} : memref<4x4x1024xf32, #tpu.memory_space<vmem>>, vector<4x1x64xf32>,
    %301 = vector.extract_strided_slice %250 {offsets = [0, 7, 0], sizes = [4, 1, 64], strides = [1, 1, 1]} : vector<4x8x64xf32> to vector<4x1x64xf32>
    %302 = vector.shape_cast %301 : vector<4x1x64xf32> to vector<4x64xf32>
    %c0_158 = arith.constant 0 : index
    %c3_159 = arith.constant 3 : index
    %c896_160 = arith.constant 896 : index
    %303 = vector.load %arg14[%c0_158, %c3_159, %c896_160] : memref<4x4x1024xf32, #tpu.memory_space<vmem>>, vector<4x1x64xf32>
    %304 = vector.shape_cast %303 : vector<4x1x64xf32> to vector<4x64xf32>
    %305 = vector.shape_cast %302 : vector<4x64xf32> to vector<4x1x64xf32>
    tpu.vector_store %arg14[%c0_158, %c3_159, %c896_160], %305 {strides = array<i32>} : memref<4x4x1024xf32, #tpu.memory_space<vmem>>, vector<4x1x64xf32>,
    %306 = vector.extract_strided_slice %250 {offsets = [0, 2, 0], sizes = [4, 1, 64], strides = [1, 1, 1]} : vector<4x8x64xf32> to vector<4x1x64xf32>
    %307 = vector.shape_cast %306 : vector<4x1x64xf32> to vector<4x64xf32>
    %c0_161 = arith.constant 0 : index
    %c0_162 = arith.constant 0 : index
    %c960 = arith.constant 960 : index
    %308 = vector.load %arg14[%c0_161, %c0_162, %c960] : memref<4x4x1024xf32, #tpu.memory_space<vmem>>, vector<4x1x64xf32>
    %309 = vector.shape_cast %308 : vector<4x1x64xf32> to vector<4x64xf32>
    %310 = vector.shape_cast %307 : vector<4x64xf32> to vector<4x1x64xf32>
    tpu.vector_store %arg14[%c0_161, %c0_162, %c960], %310 {strides = array<i32>} : memref<4x4x1024xf32, #tpu.memory_space<vmem>>, vector<4x1x64xf32>,
    %311 = vector.extract_strided_slice %250 {offsets = [0, 4, 0], sizes = [4, 1, 64], strides = [1, 1, 1]} : vector<4x8x64xf32> to vector<4x1x64xf32>
    %312 = vector.shape_cast %311 : vector<4x1x64xf32> to vector<4x64xf32>
    %c0_163 = arith.constant 0 : index
    %c1_164 = arith.constant 1 : index
    %c960_165 = arith.constant 960 : index
    %313 = vector.load %arg14[%c0_163, %c1_164, %c960_165] : memref<4x4x1024xf32, #tpu.memory_space<vmem>>, vector<4x1x64xf32>
    %314 = vector.shape_cast %313 : vector<4x1x64xf32> to vector<4x64xf32>
    %315 = vector.shape_cast %312 : vector<4x64xf32> to vector<4x1x64xf32>
    tpu.vector_store %arg14[%c0_163, %c1_164, %c960_165], %315 {strides = array<i32>} : memref<4x4x1024xf32, #tpu.memory_space<vmem>>, vector<4x1x64xf32>,
    %316 = vector.extract_strided_slice %250 {offsets = [0, 6, 0], sizes = [4, 1, 64], strides = [1, 1, 1]} : vector<4x8x64xf32> to vector<4x1x64xf32>
    %317 = vector.shape_cast %316 : vector<4x1x64xf32> to vector<4x64xf32>
    %c0_166 = arith.constant 0 : index
    %c2_167 = arith.constant 2 : index
    %c960_168 = arith.constant 960 : index
    %318 = vector.load %arg14[%c0_166, %c2_167, %c960_168] : memref<4x4x1024xf32, #tpu.memory_space<vmem>>, vector<4x1x64xf32>
    %319 = vector.shape_cast %318 : vector<4x1x64xf32> to vector<4x64xf32>
    %320 = vector.shape_cast %317 : vector<4x64xf32> to vector<4x1x64xf32>
    tpu.vector_store %arg14[%c0_166, %c2_167, %c960_168], %320 {strides = array<i32>} : memref<4x4x1024xf32, #tpu.memory_space<vmem>>, vector<4x1x64xf32>,
    %c0_169 = arith.constant 0 : index
    %c0_170 = arith.constant 0 : index
    %c0_171 = arith.constant 0 : index
    %321 = vector.load %arg14[%c0_169, %c0_170, %c0_171] : memref<4x4x1024xf32, #tpu.memory_space<vmem>>, vector<4x4x1024xf32>
    %322 = vector.shape_cast %321 : vector<4x4x1024xf32> to vector<16x1024xf32>
    %323 = arith.truncf %322 : vector<16x1024xf32> to vector<16x1024xbf16>
    %c0_172 = arith.constant 0 : index
    %c0_173 = arith.constant 0 : index
    %324 = vector.load %arg5[%c0_172, %c0_173] : memref<1024x128xbf16, #tpu.memory_space<vmem>>, vector<1024x128xbf16>
    %cst_174 = arith.constant dense<0.000000e+00> : vector<16x128xf32>
    %325 = tpu.matmul %323, %324, %cst_174 {dimension_numbers = #tpu.dot_dimension_numbers<[1], [0], [0], [1], [0, 0, 1, 1], [], []>} : vector<16x1024xbf16>, vector<1024x128xbf16>, vector<16x128xf32> -> vector<16x128xf32>
    %c0_175 = arith.constant 0 : index
    %c0_176 = arith.constant 0 : index
    %326 = vector.load %arg6[%c0_175, %c0_176] : memref<1x128xf32, #tpu.memory_space<vmem>>, vector<1x128xf32>
    %327 = vector.broadcast %326 : vector<1x128xf32> to vector<16x128xf32>
    %328 = arith.addf %325, %327 : vector<16x128xf32>
    %c0_177 = arith.constant 0 : index
    %c0_178 = arith.constant 0 : index
    %329 = vector.load %arg7[%c0_177, %c0_178] : memref<128x128xf32, #tpu.memory_space<vmem>>, vector<128x128xf32>
    %cst_179 = arith.constant dense<0.000000e+00> : vector<128xf32>
    %330 = vector.multi_reduction <add>, %328, %cst_179 [0] : vector<16x128xf32> to vector<128xf32>
    %331 = vector.shape_cast %330 : vector<128xf32> to vector<1x128xf32>
    %cst_180 = arith.constant dense<0.000000e+00> : vector<1x128xf32>
    %332 = tpu.matmul %331, %329, %cst_180 {dimension_numbers = #tpu.dot_dimension_numbers<[1], [0], [0], [1], [0, 0, 1, 1], [], []>} : vector<1x128xf32>, vector<128x128xf32>, vector<1x128xf32> -> vector<1x128xf32>
    %333 = vector.broadcast %332 : vector<1x128xf32> to vector<16x128xf32>
    %334 = arith.subf %328, %333 : vector<16x128xf32>
    %335 = arith.mulf %334, %334 : vector<16x128xf32>
    %cst_181 = arith.constant dense<0.000000e+00> : vector<128xf32>
    %336 = vector.multi_reduction <add>, %335, %cst_181 [0] : vector<16x128xf32> to vector<128xf32>
    %337 = vector.shape_cast %336 : vector<128xf32> to vector<1x128xf32>
    %cst_182 = arith.constant dense<0.000000e+00> : vector<1x128xf32>
    %338 = tpu.matmul %337, %329, %cst_182 {dimension_numbers = #tpu.dot_dimension_numbers<[1], [0], [0], [1], [0, 0, 1, 1], [], []>} : vector<1x128xf32>, vector<128x128xf32>, vector<1x128xf32> -> vector<1x128xf32>
    %cst_183 = arith.constant 9.99999974E-6 : f32
    %339 = vector.broadcast %cst_183 : f32 to vector<1x128xf32>
    %340 = arith.addf %338, %339 : vector<1x128xf32>
    %341 = math.rsqrt %340 : vector<1x128xf32>
    %342 = vector.broadcast %341 : vector<1x128xf32> to vector<16x128xf32>
    %343 = arith.mulf %334, %342 : vector<16x128xf32>
    %cst_184 = arith.constant 0.000000e+00 : f32
    %344 = vector.broadcast %cst_184 : f32 to vector<16x128xf32>
    %345 = arith.cmpf oge, %343, %344 : vector<16x128xf32>
    %cst_185 = arith.constant 2.000000e-01 : f32
    %346 = vector.broadcast %cst_185 : f32 to vector<16x128xf32>
    %347 = arith.mulf %346, %343 : vector<16x128xf32>
    %348 = arith.select %345, %343, %347 : vector<16x128xi1>, vector<16x128xf32>
    %349 = vector.shape_cast %348 : vector<16x128xf32> to vector<4x4x128xf32>
    %350 = vector.shape_cast %349 : vector<4x4x128xf32> to vector<2x2x4x128xf32>
    %cst_186 = arith.constant 0.000000e+00 : f32
    %351 = vector.broadcast %cst_186 : f32 to vector<1x4x128xf32>
    %352 = vector.extract_strided_slice %350 {offsets = [0, 1, 0, 0], sizes = [2, 1, 4, 128], strides = [1, 1, 1, 1]} : vector<2x2x4x128xf32> to vector<2x1x4x128xf32>
    %353 = vector.shape_cast %352 : vector<2x1x4x128xf32> to vector<2x4x128xf32>
    %354 = tpu.concatenate %351, %353 in 0 : vector<1x4x128xf32>, vector<2x4x128xf32> -> vector<3x4x128xf32>
    %355 = vector.extract_strided_slice %350 {offsets = [0, 0, 0, 0], sizes = [2, 1, 4, 128], strides = [1, 1, 1, 1]} : vector<2x2x4x128xf32> to vector<2x1x4x128xf32>
    %356 = vector.shape_cast %355 : vector<2x1x4x128xf32> to vector<2x4x128xf32>
    %357 = tpu.concatenate %356, %351 in 0 : vector<2x4x128xf32>, vector<1x4x128xf32> -> vector<3x4x128xf32>
    %cst_187 = arith.constant 0.000000e+00 : f32
    %358 = vector.broadcast %cst_187 : f32 to vector<2x2x2048xf32>
    %c0_188 = arith.constant 0 : index
    %c0_189 = arith.constant 0 : index
    %c0_190 = arith.constant 0 : index
    %359 = vector.load %arg15[%c0_188, %c0_189, %c0_190] : memref<2x2x2048xf32, #tpu.memory_space<vmem>>, vector<2x2x2048xf32>
    tpu.vector_store %arg15[%c0_188, %c0_189, %c0_190], %358 {strides = array<i32>} : memref<2x2x2048xf32, #tpu.memory_space<vmem>>, vector<2x2x2048xf32>,
    %360 = vector.extract_strided_slice %354 {offsets = [0, 0, 0], sizes = [2, 4, 128], strides = [1, 1, 1]} : vector<3x4x128xf32> to vector<2x4x128xf32>
    %361 = vector.extract_strided_slice %360 {offsets = [0, 1, 0], sizes = [2, 1, 128], strides = [1, 1, 1]} : vector<2x4x128xf32> to vector<2x1x128xf32>
    %362 = vector.shape_cast %361 : vector<2x1x128xf32> to vector<2x128xf32>
    %c0_191 = arith.constant 0 : index
    %c1_192 = arith.constant 1 : index
    %c0_193 = arith.constant 0 : index
    %363 = vector.load %arg15[%c0_191, %c1_192, %c0_193] : memref<2x2x2048xf32, #tpu.memory_space<vmem>>, vector<2x1x128xf32>
    %364 = vector.shape_cast %363 : vector<2x1x128xf32> to vector<2x128xf32>
    %365 = vector.shape_cast %362 : vector<2x128xf32> to vector<2x1x128xf32>
    tpu.vector_store %arg15[%c0_191, %c1_192, %c0_193], %365 {strides = array<i32>} : memref<2x2x2048xf32, #tpu.memory_space<vmem>>, vector<2x1x128xf32>,
    %366 = vector.extract_strided_slice %360 {offsets = [0, 0, 0], sizes = [2, 1, 128], strides = [1, 1, 1]} : vector<2x4x128xf32> to vector<2x1x128xf32>
    %367 = vector.shape_cast %366 : vector<2x1x128xf32> to vector<2x128xf32>
    %c0_194 = arith.constant 0 : index
    %c0_195 = arith.constant 0 : index
    %c128_196 = arith.constant 128 : index
    %368 = vector.load %arg15[%c0_194, %c0_195, %c128_196] : memref<2x2x2048xf32, #tpu.memory_space<vmem>>, vector<2x1x128xf32>
    %369 = vector.shape_cast %368 : vector<2x1x128xf32> to vector<2x128xf32>
    %370 = vector.shape_cast %367 : vector<2x128xf32> to vector<2x1x128xf32>
    tpu.vector_store %arg15[%c0_194, %c0_195, %c128_196], %370 {strides = array<i32>} : memref<2x2x2048xf32, #tpu.memory_space<vmem>>, vector<2x1x128xf32>,
    %371 = vector.extract_strided_slice %360 {offsets = [0, 2, 0], sizes = [2, 1, 128], strides = [1, 1, 1]} : vector<2x4x128xf32> to vector<2x1x128xf32>
    %372 = vector.shape_cast %371 : vector<2x1x128xf32> to vector<2x128xf32>
    %c0_197 = arith.constant 0 : index
    %c1_198 = arith.constant 1 : index
    %c128_199 = arith.constant 128 : index
    %373 = vector.load %arg15[%c0_197, %c1_198, %c128_199] : memref<2x2x2048xf32, #tpu.memory_space<vmem>>, vector<2x1x128xf32>
    %374 = vector.shape_cast %373 : vector<2x1x128xf32> to vector<2x128xf32>
    %375 = vector.shape_cast %372 : vector<2x128xf32> to vector<2x1x128xf32>
    tpu.vector_store %arg15[%c0_197, %c1_198, %c128_199], %375 {strides = array<i32>} : memref<2x2x2048xf32, #tpu.memory_space<vmem>>, vector<2x1x128xf32>,
    %376 = vector.extract_strided_slice %360 {offsets = [0, 1, 0], sizes = [2, 1, 128], strides = [1, 1, 1]} : vector<2x4x128xf32> to vector<2x1x128xf32>
    %377 = vector.shape_cast %376 : vector<2x1x128xf32> to vector<2x128xf32>
    %c0_200 = arith.constant 0 : index
    %c0_201 = arith.constant 0 : index
    %c256_202 = arith.constant 256 : index
    %378 = vector.load %arg15[%c0_200, %c0_201, %c256_202] : memref<2x2x2048xf32, #tpu.memory_space<vmem>>, vector<2x1x128xf32>
    %379 = vector.shape_cast %378 : vector<2x1x128xf32> to vector<2x128xf32>
    %380 = vector.shape_cast %377 : vector<2x128xf32> to vector<2x1x128xf32>
    tpu.vector_store %arg15[%c0_200, %c0_201, %c256_202], %380 {strides = array<i32>} : memref<2x2x2048xf32, #tpu.memory_space<vmem>>, vector<2x1x128xf32>,
    %381 = vector.extract_strided_slice %360 {offsets = [0, 3, 0], sizes = [2, 1, 128], strides = [1, 1, 1]} : vector<2x4x128xf32> to vector<2x1x128xf32>
    %382 = vector.shape_cast %381 : vector<2x1x128xf32> to vector<2x128xf32>
    %c0_203 = arith.constant 0 : index
    %c1_204 = arith.constant 1 : index
    %c256_205 = arith.constant 256 : index
    %383 = vector.load %arg15[%c0_203, %c1_204, %c256_205] : memref<2x2x2048xf32, #tpu.memory_space<vmem>>, vector<2x1x128xf32>
    %384 = vector.shape_cast %383 : vector<2x1x128xf32> to vector<2x128xf32>
    %385 = vector.shape_cast %382 : vector<2x128xf32> to vector<2x1x128xf32>
    tpu.vector_store %arg15[%c0_203, %c1_204, %c256_205], %385 {strides = array<i32>} : memref<2x2x2048xf32, #tpu.memory_space<vmem>>, vector<2x1x128xf32>,
    %386 = vector.extract_strided_slice %360 {offsets = [0, 2, 0], sizes = [2, 1, 128], strides = [1, 1, 1]} : vector<2x4x128xf32> to vector<2x1x128xf32>
    %387 = vector.shape_cast %386 : vector<2x1x128xf32> to vector<2x128xf32>
    %c0_206 = arith.constant 0 : index
    %c0_207 = arith.constant 0 : index
    %c384_208 = arith.constant 384 : index
    %388 = vector.load %arg15[%c0_206, %c0_207, %c384_208] : memref<2x2x2048xf32, #tpu.memory_space<vmem>>, vector<2x1x128xf32>
    %389 = vector.shape_cast %388 : vector<2x1x128xf32> to vector<2x128xf32>
    %390 = vector.shape_cast %387 : vector<2x128xf32> to vector<2x1x128xf32>
    tpu.vector_store %arg15[%c0_206, %c0_207, %c384_208], %390 {strides = array<i32>} : memref<2x2x2048xf32, #tpu.memory_space<vmem>>, vector<2x1x128xf32>,
    %391 = vector.extract_strided_slice %357 {offsets = [0, 0, 0], sizes = [2, 4, 128], strides = [1, 1, 1]} : vector<3x4x128xf32> to vector<2x4x128xf32>
    %392 = vector.extract_strided_slice %391 {offsets = [0, 1, 0], sizes = [2, 1, 128], strides = [1, 1, 1]} : vector<2x4x128xf32> to vector<2x1x128xf32>
    %393 = vector.shape_cast %392 : vector<2x1x128xf32> to vector<2x128xf32>
    %c0_209 = arith.constant 0 : index
    %c1_210 = arith.constant 1 : index
    %c512_211 = arith.constant 512 : index
    %394 = vector.load %arg15[%c0_209, %c1_210, %c512_211] : memref<2x2x2048xf32, #tpu.memory_space<vmem>>, vector<2x1x128xf32>
    %395 = vector.shape_cast %394 : vector<2x1x128xf32> to vector<2x128xf32>
    %396 = vector.shape_cast %393 : vector<2x128xf32> to vector<2x1x128xf32>
    tpu.vector_store %arg15[%c0_209, %c1_210, %c512_211], %396 {strides = array<i32>} : memref<2x2x2048xf32, #tpu.memory_space<vmem>>, vector<2x1x128xf32>,
    %397 = vector.extract_strided_slice %391 {offsets = [0, 0, 0], sizes = [2, 1, 128], strides = [1, 1, 1]} : vector<2x4x128xf32> to vector<2x1x128xf32>
    %398 = vector.shape_cast %397 : vector<2x1x128xf32> to vector<2x128xf32>
    %c0_212 = arith.constant 0 : index
    %c0_213 = arith.constant 0 : index
    %c640_214 = arith.constant 640 : index
    %399 = vector.load %arg15[%c0_212, %c0_213, %c640_214] : memref<2x2x2048xf32, #tpu.memory_space<vmem>>, vector<2x1x128xf32>
    %400 = vector.shape_cast %399 : vector<2x1x128xf32> to vector<2x128xf32>
    %401 = vector.shape_cast %398 : vector<2x128xf32> to vector<2x1x128xf32>
    tpu.vector_store %arg15[%c0_212, %c0_213, %c640_214], %401 {strides = array<i32>} : memref<2x2x2048xf32, #tpu.memory_space<vmem>>, vector<2x1x128xf32>,
    %402 = vector.extract_strided_slice %391 {offsets = [0, 2, 0], sizes = [2, 1, 128], strides = [1, 1, 1]} : vector<2x4x128xf32> to vector<2x1x128xf32>
    %403 = vector.shape_cast %402 : vector<2x1x128xf32> to vector<2x128xf32>
    %c0_215 = arith.constant 0 : index
    %c1_216 = arith.constant 1 : index
    %c640_217 = arith.constant 640 : index
    %404 = vector.load %arg15[%c0_215, %c1_216, %c640_217] : memref<2x2x2048xf32, #tpu.memory_space<vmem>>, vector<2x1x128xf32>
    %405 = vector.shape_cast %404 : vector<2x1x128xf32> to vector<2x128xf32>
    %406 = vector.shape_cast %403 : vector<2x128xf32> to vector<2x1x128xf32>
    tpu.vector_store %arg15[%c0_215, %c1_216, %c640_217], %406 {strides = array<i32>} : memref<2x2x2048xf32, #tpu.memory_space<vmem>>, vector<2x1x128xf32>,
    %407 = vector.extract_strided_slice %391 {offsets = [0, 1, 0], sizes = [2, 1, 128], strides = [1, 1, 1]} : vector<2x4x128xf32> to vector<2x1x128xf32>
    %408 = vector.shape_cast %407 : vector<2x1x128xf32> to vector<2x128xf32>
    %c0_218 = arith.constant 0 : index
    %c0_219 = arith.constant 0 : index
    %c768_220 = arith.constant 768 : index
    %409 = vector.load %arg15[%c0_218, %c0_219, %c768_220] : memref<2x2x2048xf32, #tpu.memory_space<vmem>>, vector<2x1x128xf32>
    %410 = vector.shape_cast %409 : vector<2x1x128xf32> to vector<2x128xf32>
    %411 = vector.shape_cast %408 : vector<2x128xf32> to vector<2x1x128xf32>
    tpu.vector_store %arg15[%c0_218, %c0_219, %c768_220], %411 {strides = array<i32>} : memref<2x2x2048xf32, #tpu.memory_space<vmem>>, vector<2x1x128xf32>,
    %412 = vector.extract_strided_slice %391 {offsets = [0, 3, 0], sizes = [2, 1, 128], strides = [1, 1, 1]} : vector<2x4x128xf32> to vector<2x1x128xf32>
    %413 = vector.shape_cast %412 : vector<2x1x128xf32> to vector<2x128xf32>
    %c0_221 = arith.constant 0 : index
    %c1_222 = arith.constant 1 : index
    %c768_223 = arith.constant 768 : index
    %414 = vector.load %arg15[%c0_221, %c1_222, %c768_223] : memref<2x2x2048xf32, #tpu.memory_space<vmem>>, vector<2x1x128xf32>
    %415 = vector.shape_cast %414 : vector<2x1x128xf32> to vector<2x128xf32>
    %416 = vector.shape_cast %413 : vector<2x128xf32> to vector<2x1x128xf32>
    tpu.vector_store %arg15[%c0_221, %c1_222, %c768_223], %416 {strides = array<i32>} : memref<2x2x2048xf32, #tpu.memory_space<vmem>>, vector<2x1x128xf32>,
    %417 = vector.extract_strided_slice %391 {offsets = [0, 2, 0], sizes = [2, 1, 128], strides = [1, 1, 1]} : vector<2x4x128xf32> to vector<2x1x128xf32>
    %418 = vector.shape_cast %417 : vector<2x1x128xf32> to vector<2x128xf32>
    %c0_224 = arith.constant 0 : index
    %c0_225 = arith.constant 0 : index
    %c896_226 = arith.constant 896 : index
    %419 = vector.load %arg15[%c0_224, %c0_225, %c896_226] : memref<2x2x2048xf32, #tpu.memory_space<vmem>>, vector<2x1x128xf32>
    %420 = vector.shape_cast %419 : vector<2x1x128xf32> to vector<2x128xf32>
    %421 = vector.shape_cast %418 : vector<2x128xf32> to vector<2x1x128xf32>
    tpu.vector_store %arg15[%c0_224, %c0_225, %c896_226], %421 {strides = array<i32>} : memref<2x2x2048xf32, #tpu.memory_space<vmem>>, vector<2x1x128xf32>,
    %422 = vector.extract_strided_slice %354 {offsets = [1, 0, 0], sizes = [2, 4, 128], strides = [1, 1, 1]} : vector<3x4x128xf32> to vector<2x4x128xf32>
    %423 = vector.extract_strided_slice %422 {offsets = [0, 1, 0], sizes = [2, 1, 128], strides = [1, 1, 1]} : vector<2x4x128xf32> to vector<2x1x128xf32>
    %424 = vector.shape_cast %423 : vector<2x1x128xf32> to vector<2x128xf32>
    %c0_227 = arith.constant 0 : index
    %c1_228 = arith.constant 1 : index
    %c1024 = arith.constant 1024 : index
    %425 = vector.load %arg15[%c0_227, %c1_228, %c1024] : memref<2x2x2048xf32, #tpu.memory_space<vmem>>, vector<2x1x128xf32>
    %426 = vector.shape_cast %425 : vector<2x1x128xf32> to vector<2x128xf32>
    %427 = vector.shape_cast %424 : vector<2x128xf32> to vector<2x1x128xf32>
    tpu.vector_store %arg15[%c0_227, %c1_228, %c1024], %427 {strides = array<i32>} : memref<2x2x2048xf32, #tpu.memory_space<vmem>>, vector<2x1x128xf32>,
    %428 = vector.extract_strided_slice %422 {offsets = [0, 0, 0], sizes = [2, 1, 128], strides = [1, 1, 1]} : vector<2x4x128xf32> to vector<2x1x128xf32>
    %429 = vector.shape_cast %428 : vector<2x1x128xf32> to vector<2x128xf32>
    %c0_229 = arith.constant 0 : index
    %c0_230 = arith.constant 0 : index
    %c1152 = arith.constant 1152 : index
    %430 = vector.load %arg15[%c0_229, %c0_230, %c1152] : memref<2x2x2048xf32, #tpu.memory_space<vmem>>, vector<2x1x128xf32>
    %431 = vector.shape_cast %430 : vector<2x1x128xf32> to vector<2x128xf32>
    %432 = vector.shape_cast %429 : vector<2x128xf32> to vector<2x1x128xf32>
    tpu.vector_store %arg15[%c0_229, %c0_230, %c1152], %432 {strides = array<i32>} : memref<2x2x2048xf32, #tpu.memory_space<vmem>>, vector<2x1x128xf32>,
    %433 = vector.extract_strided_slice %422 {offsets = [0, 2, 0], sizes = [2, 1, 128], strides = [1, 1, 1]} : vector<2x4x128xf32> to vector<2x1x128xf32>
    %434 = vector.shape_cast %433 : vector<2x1x128xf32> to vector<2x128xf32>
    %c0_231 = arith.constant 0 : index
    %c1_232 = arith.constant 1 : index
    %c1152_233 = arith.constant 1152 : index
    %435 = vector.load %arg15[%c0_231, %c1_232, %c1152_233] : memref<2x2x2048xf32, #tpu.memory_space<vmem>>, vector<2x1x128xf32>
    %436 = vector.shape_cast %435 : vector<2x1x128xf32> to vector<2x128xf32>
    %437 = vector.shape_cast %434 : vector<2x128xf32> to vector<2x1x128xf32>
    tpu.vector_store %arg15[%c0_231, %c1_232, %c1152_233], %437 {strides = array<i32>} : memref<2x2x2048xf32, #tpu.memory_space<vmem>>, vector<2x1x128xf32>,
    %438 = vector.extract_strided_slice %422 {offsets = [0, 1, 0], sizes = [2, 1, 128], strides = [1, 1, 1]} : vector<2x4x128xf32> to vector<2x1x128xf32>
    %439 = vector.shape_cast %438 : vector<2x1x128xf32> to vector<2x128xf32>
    %c0_234 = arith.constant 0 : index
    %c0_235 = arith.constant 0 : index
    %c1280 = arith.constant 1280 : index
    %440 = vector.load %arg15[%c0_234, %c0_235, %c1280] : memref<2x2x2048xf32, #tpu.memory_space<vmem>>, vector<2x1x128xf32>
    %441 = vector.shape_cast %440 : vector<2x1x128xf32> to vector<2x128xf32>
    %442 = vector.shape_cast %439 : vector<2x128xf32> to vector<2x1x128xf32>
    tpu.vector_store %arg15[%c0_234, %c0_235, %c1280], %442 {strides = array<i32>} : memref<2x2x2048xf32, #tpu.memory_space<vmem>>, vector<2x1x128xf32>,
    %443 = vector.extract_strided_slice %422 {offsets = [0, 3, 0], sizes = [2, 1, 128], strides = [1, 1, 1]} : vector<2x4x128xf32> to vector<2x1x128xf32>
    %444 = vector.shape_cast %443 : vector<2x1x128xf32> to vector<2x128xf32>
    %c0_236 = arith.constant 0 : index
    %c1_237 = arith.constant 1 : index
    %c1280_238 = arith.constant 1280 : index
    %445 = vector.load %arg15[%c0_236, %c1_237, %c1280_238] : memref<2x2x2048xf32, #tpu.memory_space<vmem>>, vector<2x1x128xf32>
    %446 = vector.shape_cast %445 : vector<2x1x128xf32> to vector<2x128xf32>
    %447 = vector.shape_cast %444 : vector<2x128xf32> to vector<2x1x128xf32>
    tpu.vector_store %arg15[%c0_236, %c1_237, %c1280_238], %447 {strides = array<i32>} : memref<2x2x2048xf32, #tpu.memory_space<vmem>>, vector<2x1x128xf32>,
    %448 = vector.extract_strided_slice %422 {offsets = [0, 2, 0], sizes = [2, 1, 128], strides = [1, 1, 1]} : vector<2x4x128xf32> to vector<2x1x128xf32>
    %449 = vector.shape_cast %448 : vector<2x1x128xf32> to vector<2x128xf32>
    %c0_239 = arith.constant 0 : index
    %c0_240 = arith.constant 0 : index
    %c1408 = arith.constant 1408 : index
    %450 = vector.load %arg15[%c0_239, %c0_240, %c1408] : memref<2x2x2048xf32, #tpu.memory_space<vmem>>, vector<2x1x128xf32>
    %451 = vector.shape_cast %450 : vector<2x1x128xf32> to vector<2x128xf32>
    %452 = vector.shape_cast %449 : vector<2x128xf32> to vector<2x1x128xf32>
    tpu.vector_store %arg15[%c0_239, %c0_240, %c1408], %452 {strides = array<i32>} : memref<2x2x2048xf32, #tpu.memory_space<vmem>>, vector<2x1x128xf32>,
    %453 = vector.extract_strided_slice %357 {offsets = [1, 0, 0], sizes = [2, 4, 128], strides = [1, 1, 1]} : vector<3x4x128xf32> to vector<2x4x128xf32>
    %454 = vector.extract_strided_slice %453 {offsets = [0, 1, 0], sizes = [2, 1, 128], strides = [1, 1, 1]} : vector<2x4x128xf32> to vector<2x1x128xf32>
    %455 = vector.shape_cast %454 : vector<2x1x128xf32> to vector<2x128xf32>
    %c0_241 = arith.constant 0 : index
    %c1_242 = arith.constant 1 : index
    %c1536 = arith.constant 1536 : index
    %456 = vector.load %arg15[%c0_241, %c1_242, %c1536] : memref<2x2x2048xf32, #tpu.memory_space<vmem>>, vector<2x1x128xf32>
    %457 = vector.shape_cast %456 : vector<2x1x128xf32> to vector<2x128xf32>
    %458 = vector.shape_cast %455 : vector<2x128xf32> to vector<2x1x128xf32>
    tpu.vector_store %arg15[%c0_241, %c1_242, %c1536], %458 {strides = array<i32>} : memref<2x2x2048xf32, #tpu.memory_space<vmem>>, vector<2x1x128xf32>,
    %459 = vector.extract_strided_slice %453 {offsets = [0, 0, 0], sizes = [2, 1, 128], strides = [1, 1, 1]} : vector<2x4x128xf32> to vector<2x1x128xf32>
    %460 = vector.shape_cast %459 : vector<2x1x128xf32> to vector<2x128xf32>
    %c0_243 = arith.constant 0 : index
    %c0_244 = arith.constant 0 : index
    %c1664 = arith.constant 1664 : index
    %461 = vector.load %arg15[%c0_243, %c0_244, %c1664] : memref<2x2x2048xf32, #tpu.memory_space<vmem>>, vector<2x1x128xf32>
    %462 = vector.shape_cast %461 : vector<2x1x128xf32> to vector<2x128xf32>
    %463 = vector.shape_cast %460 : vector<2x128xf32> to vector<2x1x128xf32>
    tpu.vector_store %arg15[%c0_243, %c0_244, %c1664], %463 {strides = array<i32>} : memref<2x2x2048xf32, #tpu.memory_space<vmem>>, vector<2x1x128xf32>,
    %464 = vector.extract_strided_slice %453 {offsets = [0, 2, 0], sizes = [2, 1, 128], strides = [1, 1, 1]} : vector<2x4x128xf32> to vector<2x1x128xf32>
    %465 = vector.shape_cast %464 : vector<2x1x128xf32> to vector<2x128xf32>
    %c0_245 = arith.constant 0 : index
    %c1_246 = arith.constant 1 : index
    %c1664_247 = arith.constant 1664 : index
    %466 = vector.load %arg15[%c0_245, %c1_246, %c1664_247] : memref<2x2x2048xf32, #tpu.memory_space<vmem>>, vector<2x1x128xf32>
    %467 = vector.shape_cast %466 : vector<2x1x128xf32> to vector<2x128xf32>
    %468 = vector.shape_cast %465 : vector<2x128xf32> to vector<2x1x128xf32>
    tpu.vector_store %arg15[%c0_245, %c1_246, %c1664_247], %468 {strides = array<i32>} : memref<2x2x2048xf32, #tpu.memory_space<vmem>>, vector<2x1x128xf32>,
    %469 = vector.extract_strided_slice %453 {offsets = [0, 1, 0], sizes = [2, 1, 128], strides = [1, 1, 1]} : vector<2x4x128xf32> to vector<2x1x128xf32>
    %470 = vector.shape_cast %469 : vector<2x1x128xf32> to vector<2x128xf32>
    %c0_248 = arith.constant 0 : index
    %c0_249 = arith.constant 0 : index
    %c1792 = arith.constant 1792 : index
    %471 = vector.load %arg15[%c0_248, %c0_249, %c1792] : memref<2x2x2048xf32, #tpu.memory_space<vmem>>, vector<2x1x128xf32>
    %472 = vector.shape_cast %471 : vector<2x1x128xf32> to vector<2x128xf32>
    %473 = vector.shape_cast %470 : vector<2x128xf32> to vector<2x1x128xf32>
    tpu.vector_store %arg15[%c0_248, %c0_249, %c1792], %473 {strides = array<i32>} : memref<2x2x2048xf32, #tpu.memory_space<vmem>>, vector<2x1x128xf32>,
    %474 = vector.extract_strided_slice %453 {offsets = [0, 3, 0], sizes = [2, 1, 128], strides = [1, 1, 1]} : vector<2x4x128xf32> to vector<2x1x128xf32>
    %475 = vector.shape_cast %474 : vector<2x1x128xf32> to vector<2x128xf32>
    %c0_250 = arith.constant 0 : index
    %c1_251 = arith.constant 1 : index
    %c1792_252 = arith.constant 1792 : index
    %476 = vector.load %arg15[%c0_250, %c1_251, %c1792_252] : memref<2x2x2048xf32, #tpu.memory_space<vmem>>, vector<2x1x128xf32>
    %477 = vector.shape_cast %476 : vector<2x1x128xf32> to vector<2x128xf32>
    %478 = vector.shape_cast %475 : vector<2x128xf32> to vector<2x1x128xf32>
    tpu.vector_store %arg15[%c0_250, %c1_251, %c1792_252], %478 {strides = array<i32>} : memref<2x2x2048xf32, #tpu.memory_space<vmem>>, vector<2x1x128xf32>,
    %479 = vector.extract_strided_slice %453 {offsets = [0, 2, 0], sizes = [2, 1, 128], strides = [1, 1, 1]} : vector<2x4x128xf32> to vector<2x1x128xf32>
    %480 = vector.shape_cast %479 : vector<2x1x128xf32> to vector<2x128xf32>
    %c0_253 = arith.constant 0 : index
    %c0_254 = arith.constant 0 : index
    %c1920 = arith.constant 1920 : index
    %481 = vector.load %arg15[%c0_253, %c0_254, %c1920] : memref<2x2x2048xf32, #tpu.memory_space<vmem>>, vector<2x1x128xf32>
    %482 = vector.shape_cast %481 : vector<2x1x128xf32> to vector<2x128xf32>
    %483 = vector.shape_cast %480 : vector<2x128xf32> to vector<2x1x128xf32>
    tpu.vector_store %arg15[%c0_253, %c0_254, %c1920], %483 {strides = array<i32>} : memref<2x2x2048xf32, #tpu.memory_space<vmem>>, vector<2x1x128xf32>,
    %c0_255 = arith.constant 0 : index
    %c0_256 = arith.constant 0 : index
    %c0_257 = arith.constant 0 : index
    %484 = vector.load %arg15[%c0_255, %c0_256, %c0_257] : memref<2x2x2048xf32, #tpu.memory_space<vmem>>, vector<2x2x2048xf32>
    %485 = vector.shape_cast %484 : vector<2x2x2048xf32> to vector<4x2048xf32>
    %486 = arith.truncf %485 : vector<4x2048xf32> to vector<4x2048xbf16>
    %c0_258 = arith.constant 0 : index
    %c0_259 = arith.constant 0 : index
    %487 = vector.load %arg8[%c0_258, %c0_259] : memref<2048x256xbf16, #tpu.memory_space<vmem>>, vector<2048x256xbf16>
    %cst_260 = arith.constant dense<0.000000e+00> : vector<4x256xf32>
    %488 = tpu.matmul %486, %487, %cst_260 {dimension_numbers = #tpu.dot_dimension_numbers<[1], [0], [0], [1], [0, 0, 1, 1], [], []>} : vector<4x2048xbf16>, vector<2048x256xbf16>, vector<4x256xf32> -> vector<4x256xf32>
    %c0_261 = arith.constant 0 : index
    %c0_262 = arith.constant 0 : index
    %489 = vector.load %arg9[%c0_261, %c0_262] : memref<1x256xf32, #tpu.memory_space<vmem>>, vector<1x256xf32>
    %490 = vector.broadcast %489 : vector<1x256xf32> to vector<4x256xf32>
    %491 = arith.addf %488, %490 : vector<4x256xf32>
    %c0_263 = arith.constant 0 : index
    %c0_264 = arith.constant 0 : index
    %492 = vector.load %arg10[%c0_263, %c0_264] : memref<256x256xf32, #tpu.memory_space<vmem>>, vector<256x256xf32>
    %cst_265 = arith.constant dense<0.000000e+00> : vector<256xf32>
    %493 = vector.multi_reduction <add>, %491, %cst_265 [0] : vector<4x256xf32> to vector<256xf32>
    %494 = vector.shape_cast %493 : vector<256xf32> to vector<1x256xf32>
    %cst_266 = arith.constant dense<0.000000e+00> : vector<1x256xf32>
    %495 = tpu.matmul %494, %492, %cst_266 {dimension_numbers = #tpu.dot_dimension_numbers<[1], [0], [0], [1], [0, 0, 1, 1], [], []>} : vector<1x256xf32>, vector<256x256xf32>, vector<1x256xf32> -> vector<1x256xf32>
    %496 = vector.broadcast %495 : vector<1x256xf32> to vector<4x256xf32>
    %497 = arith.subf %491, %496 : vector<4x256xf32>
    %498 = arith.mulf %497, %497 : vector<4x256xf32>
    %cst_267 = arith.constant dense<0.000000e+00> : vector<256xf32>
    %499 = vector.multi_reduction <add>, %498, %cst_267 [0] : vector<4x256xf32> to vector<256xf32>
    %500 = vector.shape_cast %499 : vector<256xf32> to vector<1x256xf32>
    %cst_268 = arith.constant dense<0.000000e+00> : vector<1x256xf32>
    %501 = tpu.matmul %500, %492, %cst_268 {dimension_numbers = #tpu.dot_dimension_numbers<[1], [0], [0], [1], [0, 0, 1, 1], [], []>} : vector<1x256xf32>, vector<256x256xf32>, vector<1x256xf32> -> vector<1x256xf32>
    %cst_269 = arith.constant 9.99999974E-6 : f32
    %502 = vector.broadcast %cst_269 : f32 to vector<1x256xf32>
    %503 = arith.addf %501, %502 : vector<1x256xf32>
    %504 = math.rsqrt %503 : vector<1x256xf32>
    %505 = vector.broadcast %504 : vector<1x256xf32> to vector<4x256xf32>
    %506 = arith.mulf %497, %505 : vector<4x256xf32>
    %cst_270 = arith.constant 0.000000e+00 : f32
    %507 = vector.broadcast %cst_270 : f32 to vector<4x256xf32>
    %508 = arith.cmpf oge, %506, %507 : vector<4x256xf32>
    %cst_271 = arith.constant 2.000000e-01 : f32
    %509 = vector.broadcast %cst_271 : f32 to vector<4x256xf32>
    %510 = arith.mulf %509, %506 : vector<4x256xf32>
    %511 = arith.select %508, %506, %510 : vector<4x256xi1>, vector<4x256xf32>
    %c0_272 = arith.constant 0 : index
    %c0_273 = arith.constant 0 : index
    %512 = vector.load %arg11[%c0_272, %c0_273] : memref<4x256xf32, #tpu.memory_space<vmem>>, vector<4x256xf32>
    %513 = arith.mulf %511, %512 : vector<4x256xf32>
    %cst_274 = arith.constant dense<0.000000e+00> : vector<4xf32>
    %514 = vector.multi_reduction <add>, %513, %cst_274 [1] : vector<4x256xf32> to vector<4xf32>
    %515 = vector.shape_cast %514 : vector<4xf32> to vector<4x1xf32>
    %cst_275 = arith.constant dense<0.000000e+00> : vector<1xf32>
    %516 = vector.multi_reduction <add>, %515, %cst_275 [0] : vector<4x1xf32> to vector<1xf32>
    %517 = vector.shape_cast %516 : vector<1xf32> to vector<1x1xf32>
    %c0_276 = arith.constant 0 : index
    %c0_277 = arith.constant 0 : index
    %518 = vector.load %arg12[%c0_276, %c0_277] : memref<1x1xf32, #tpu.memory_space<vmem>>, vector<1x1xf32>
    %519 = arith.addf %517, %518 : vector<1x1xf32>
    %cst_278 = arith.constant 0.000000e+00 : f32
    %520 = vector.broadcast %cst_278 : f32 to vector<1x8x128xf32>
    %521 = vector.shape_cast %519 : vector<1x1xf32> to vector<1x1x1xf32>
    %522 = vector.broadcast %521 : vector<1x1x1xf32> to vector<1x8x128xf32>
    %523 = arith.addf %520, %522 : vector<1x8x128xf32>
    %c0_279 = arith.constant 0 : index
    %c0_280 = arith.constant 0 : index
    %c0_281 = arith.constant 0 : index
    %524 = vector.load %arg13[%c0_279, %c0_280, %c0_281] : memref<1x8x128xf32, #tpu.memory_space<vmem>>, vector<1x8x128xf32>
    tpu.vector_store %arg13[%c0_279, %c0_280, %c0_281], %523 {strides = array<i32>} : memref<1x8x128xf32, #tpu.memory_space<vmem>>, vector<1x8x128xf32>,
    return
  }
  func.func @transform_0(%arg0: i32) -> (i32, i32) {
    %c0_i32 = arith.constant 0 : i32
    %c0_i32_0 = arith.constant 0 : i32
    return %arg0, %c0_i32 : i32, i32
  }
  func.func @transform_1(%arg0: i32) -> (i32, i32) {
    %c0_i32 = arith.constant 0 : i32
    %c0_i32_0 = arith.constant 0 : i32
    %c0_i32_1 = arith.constant 0 : i32
    return %c0_i32, %c0_i32_0 : i32, i32
  }
  func.func @transform_2(%arg0: i32) -> (i32, i32) {
    %c0_i32 = arith.constant 0 : i32
    %c0_i32_0 = arith.constant 0 : i32
    %c0_i32_1 = arith.constant 0 : i32
    return %c0_i32, %c0_i32_0 : i32, i32
  }
  func.func @transform_3(%arg0: i32) -> (i32, i32) {
    %c0_i32 = arith.constant 0 : i32
    %c0_i32_0 = arith.constant 0 : i32
    %c0_i32_1 = arith.constant 0 : i32
    return %c0_i32, %c0_i32_0 : i32, i32
  }
  func.func @transform_4(%arg0: i32) -> (i32, i32) {
    %c0_i32 = arith.constant 0 : i32
    %c0_i32_0 = arith.constant 0 : i32
    %c0_i32_1 = arith.constant 0 : i32
    return %c0_i32, %c0_i32_0 : i32, i32
  }
  func.func @transform_5(%arg0: i32) -> (i32, i32) {
    %c0_i32 = arith.constant 0 : i32
    %c0_i32_0 = arith.constant 0 : i32
    %c0_i32_1 = arith.constant 0 : i32
    return %c0_i32, %c0_i32_0 : i32, i32
  }
  func.func @transform_6(%arg0: i32) -> (i32, i32) {
    %c0_i32 = arith.constant 0 : i32
    %c0_i32_0 = arith.constant 0 : i32
    %c0_i32_1 = arith.constant 0 : i32
    return %c0_i32, %c0_i32_0 : i32, i32
  }
  func.func @transform_7(%arg0: i32) -> (i32, i32) {
    %c0_i32 = arith.constant 0 : i32
    %c0_i32_0 = arith.constant 0 : i32
    %c0_i32_1 = arith.constant 0 : i32
    return %c0_i32, %c0_i32_0 : i32, i32
  }
  func.func @transform_8(%arg0: i32) -> (i32, i32) {
    %c0_i32 = arith.constant 0 : i32
    %c0_i32_0 = arith.constant 0 : i32
    %c0_i32_1 = arith.constant 0 : i32
    return %c0_i32, %c0_i32_0 : i32, i32
  }
  func.func @transform_9(%arg0: i32) -> (i32, i32) {
    %c0_i32 = arith.constant 0 : i32
    %c0_i32_0 = arith.constant 0 : i32
    %c0_i32_1 = arith.constant 0 : i32
    return %c0_i32, %c0_i32_0 : i32, i32
  }
  func.func @transform_10(%arg0: i32) -> (i32, i32) {
    %c0_i32 = arith.constant 0 : i32
    %c0_i32_0 = arith.constant 0 : i32
    %c0_i32_1 = arith.constant 0 : i32
    return %c0_i32, %c0_i32_0 : i32, i32
  }
  func.func @transform_11(%arg0: i32) -> (i32, i32) {
    %c0_i32 = arith.constant 0 : i32
    %c0_i32_0 = arith.constant 0 : i32
    %c0_i32_1 = arith.constant 0 : i32
    return %c0_i32, %c0_i32_0 : i32, i32
  }
  func.func @transform_12(%arg0: i32) -> (i32, i32, i32) {
    %c0_i32 = arith.constant 0 : i32
    %c0_i32_0 = arith.constant 0 : i32
    %c0_i32_1 = arith.constant 0 : i32
    return %arg0, %c0_i32, %c0_i32_0 : i32, i32, i32
  }
}

</mosaic_0001>

<bundles_post_ra>
// kernel: label_discriminator_forward.2
= control target key start
LH: loop header
LB: loop body
LE: loop exit
PB: predicated region body
PF: predicated region fallthrough
CT: control target
= control target key end

     0   :  { %s1551_s15 = smov 0   ;;  %s2458_s0 = inlined_call_operand.vmem [shape: bf16[512,64], index: 0, kind: input, shape index: {}]   ;;  %s2459_s1 = inlined_call_operand.vmem [shape: bf16[64,32], index: 1, kind: input, shape index: {}]   ;;  %s2460_s2 = inlined_call_operand.vmem [shape: f32[1,32], index: 2, kind: input, shape index: {}]   ;;  %s2461_s3 = inlined_call_operand.vmem [shape: f32[32,32], index: 3, kind: input, shape index: {}]   ;;  %s2462_s4 = inlined_call_operand.vmem [shape: bf16[512,32], index: 4, kind: output, shape index: {}]  }
   0x1 LB: > { %s1270_s16 = sadd.s32 4294967295, %s1522_s15   ;;  %p1274_p0 = scmp.ge.s32.totalorder %s1522_s15, 1  ;;  %s1522_s15 = sphi %s1551_s15, %s14_s15  }
   0x2   : > { %p163_p1 = scmp.lt.s32.totalorder %s1522_s15, 3 }
   0x4   : > { %p164_p2 = pnand %p1274_p0, %p163_p1 }
   0x5   : > { %s1275_s19 = sshll.u32 (!%p164_p2), %s1270_s16, 5 }
   0x6   : > { %167 = sbr.rel (%p164_p2) target bundleno = 840 (0x348), region = 36  ;;  %p190_p3 = scmp.lt.s32.totalorder (!%p164_p2), %s1275_s19, 63 }
   0xb   : > { %v1494_v0 = vld [vmem:[%s2459_s1 + $0x18] sm:$0xff]   ;;  %v1495_v1 = vld [vmem:[%s2459_s1 + $0x10] sm:$0xff]   ;;  %s2478_s19 = smov (!%p190_p3, %s1275_s19), 63  ;;  %v1496_v2 = vld [vmem:[%s2459_s1 + $0x8] sm:$0xff]   ;;  %vm353_vm0 = vcmask 523264   ;;  %v1524_v20 = vmov 0.0  }
   0xc   : > { %1414 = vmatprep.subr.bf16.mxu0 %v1494_v0  ;;  %1476 = vmatprep.subr.bf16.mxu1 %v1494_v0  ;;  %s1276_s24 = sshll.u32 %s2478_s19, 2  ;;  %v1497_v4 = vld [vmem:[%s2459_s1] sm:$0xff]   ;;  %v1617_v21 = vld [vmem:[%s2461_s3 + $0x18] sm:$0xff]  ;;  %v1624_v22 = vld [vmem:[%s2461_s3 + $0x10] sm:$0xff]  ;;  %vm1525_vm1 = vmmov 0   ;;  %vm567_vm2 = vcmask 261120  }
   0xd   : > { %1415 = vmatpush3.bf16.msra.mxu0 %v1494_v0  ;;  %1480 = vmatpush3.bf16.msra.mxu1 %v1494_v0  ;;  %s1576_s27 = scalar_lea.vmem %s2458_s0, %s1276_s24  ;;  %v1631_v23 = vld [vmem:[%s2461_s3 + $0x8] sm:$0xff]  ;;  %v1638_v24 = vld [vmem:[%s2461_s3] sm:$0xff]  ;;  %s2323_s17 = scalar_lea.vmem %s2462_s4, %s1276_s24 }
   0xe   : > { %1416 = vmatprep.subr.bf16.mxu0 %v1495_v1  ;;  %1477 = vmatprep.subr.bf16.mxu1 %v1495_v1  ;;  %v1498_v3 = vld [vmem:[%s1576_s27] sm:$0xff]   ;;  %v1499_v5 = vld [vmem:[%s1576_s27 + $0x8] sm:$0xff]   ;;  %v1500_v6 = vld [vmem:[%s1576_s27 + $0x10] sm:$0xff]  }
   0xf   : > { %1422 = vmatprep.mubr.msk.bf16.mxu0 %vm353_vm0, %v1498_v3  ;;  %v1508_v7 = vld [vmem:[%s1576_s27 + $0x50] sm:$0xff]   ;;  %v1509_v8 = vld [vmem:[%s1576_s27 + $0x58] sm:$0xff]   ;;  %v1510_v9 = vld [vmem:[%s1576_s27 + $0x60] sm:$0xff]  }
  0x10   : > { %1442 = vmatprep.mubr.msk.bf16.mxu1 %vm353_vm0, %v1508_v7  ;;  %v1501_v10 = vld [vmem:[%s1576_s27 + $0x18] sm:$0xff]   ;;  %v1502_v11 = vld [vmem:[%s1576_s27 + $0x20] sm:$0xff]   ;;  %v1511_v12 = vld [vmem:[%s1576_s27 + $0x68] sm:$0xff]  }
  0x11   : > { %1417 = vmatpush3.bf16.msra.mxu0 %v1495_v1  ;;  %1481 = vmatpush3.bf16.msra.mxu1 %v1495_v1  ;;  %v1512_v13 = vld [vmem:[%s1576_s27 + $0x70] sm:$0xff]   ;;  %v1503_v14 = vld [vmem:[%s1576_s27 + $0x28] sm:$0xff]   ;;  %v1513_v16 = vld [vmem:[%s1576_s27 + $0x78] sm:$0xff]  }
  0x12   : > { %1418 = vmatprep.subr.bf16.mxu0 %v1496_v2  ;;  %1478 = vmatprep.subr.bf16.mxu1 %v1496_v2  ;;  %v1504_v15 = vld [vmem:[%s1576_s27 + $0x30] sm:$0xff]   ;;  %v1505_v17 = vld [vmem:[%s1576_s27 + $0x38] sm:$0xff]   ;;  %v1506_v18 = vld [vmem:[%s1576_s27 + $0x40] sm:$0xff]  }
  0x13   : > { %v1507_v19 = vld [vmem:[%s1576_s27 + $0x48] sm:$0xff]   ;;  %v1647_v27 = vld [vmem:[%s2460_s2] ss:$0 sm:$0xff] }
  0x15   : > { %1419 = vmatpush3.bf16.msra.mxu0 %v1496_v2  ;;  %1482 = vmatpush3.bf16.msra.mxu1 %v1496_v2 }
  0x16   : > { %1420 = vmatprep.subr.bf16.mxu0 %v1497_v4  ;;  %1479 = vmatprep.subr.bf16.mxu1 %v1497_v4 }
  0x19   : > { %1421 = vmatpush3.bf16.msra.mxu0 %v1497_v4  ;;  %1483 = vmatpush3.bf16.msra.mxu1 %v1497_v4 }
  0x1a   : > { %1454 = vmatprep.subr.mxu1 %v1524_v20 }
  0x1c   : > { %1423 = vmatmul.mubr.msk.bf16.vlgmr.msra.gmra.mxu0 %vm353_vm0, %v1499_v5  ;;  %1443 = vmatmul.mubr.msk.bf16.vlgmr.msra.gmra.mxu1 %vm353_vm0, %v1509_v8 }
  0x1d   : > { %1426 = vmatprep.mubr.msk.bf16.mxu0 %vm353_vm0, %v1500_v6  ;;  %1446 = vmatprep.mubr.msk.bf16.mxu1 %vm353_vm0, %v1510_v9 }
  0x1e   : > { %1455 = vmatpush3.msra.mxu1 %v1617_v21 }
  0x1f   : > { %1456 = vmatprep.subr.mxu1 %v1524_v20 }
  0x20   : > { %1457 = vmatpush3.msra.mxu1 %v1624_v22 }
  0x21   : > { %1458 = vmatprep.subr.mxu1 %v1524_v20 }
  0x22   : > { %1459 = vmatpush3.msra.mxu1 %v1631_v23 }
  0x23   : > { %1460 = vmatprep.subr.mxu1 %v1524_v20 }
  0x24   : > { %1427 = vmatmul.mubr.msk.bf16.gmra.mxu0 %vm353_vm0, %v1501_v10  ;;  %1447 = vmatmul.mubr.msk.bf16.gmra.mxu1 %vm353_vm0, %v1511_v12 }
  0x25   : > { %1430 = vmatprep.mubr.msk.bf16.mxu0 %vm353_vm0, %v1502_v11  ;;  %1450 = vmatprep.mubr.msk.bf16.mxu1 %vm353_vm0, %v1512_v13 }
  0x26   : > { %1461 = vmatpush3.msra.mxu1 %v1638_v24 }
  0x27   : > { %1465 = vmatprep.subr.mxu1 %v1524_v20 }
  0x2c   : > { %1431 = vmatmul.mubr.msk.bf16.gmra.mxu0 %vm353_vm0, %v1503_v14  ;;  %1451 = vmatmul.mubr.msk.bf16.gmra.mxu1 %vm353_vm0, %v1513_v16 }
  0x2d   : > { %1434 = vmatprep.mubr.msk.bf16.mxu0 %vm353_vm0, %v1504_v15  ;;  %1462 = vmatprep.mubr.msk.f32.mxu1 %vm1525_vm1, %v1524_v20 }
  0x34   : > { %1435 = vmatmul.mubr.msk.bf16.gmra.mxu0 %vm353_vm0, %v1505_v17 }
  0x35   : > { %1438 = vmatprep.mubr.msk.bf16.mxu0 %vm353_vm0, %v1506_v18 }
  0x3c   : > { %1439 = vmatmul.mubr.msk.bf16.gmra.mxu0 %vm353_vm0, %v1507_v19 }
  0xdc   : > { %v1424_v25 = vpop.f32.mrf.mxu0  ;;  %v1672_v46 = vpop.f32.mrf.mxu1 }
  0xdd   : > { %v1653_v31 = vadd.f32 %v1424_v25, %v1647_v27 }
  0xde   : > { %v436_v26 = vpop.f32.mrf.mxu0  ;;  %v516_v56 = vpop.f32.mrf.mxu1 }
  0xdf   : > { %v1650_v29 = vadd.f32 %v1647_v27, %v436_v26  ;;  %v571_v39 = vsel %vm567_vm2, %v1653_v31, 0.0 }
  0xe0   : > { %v1425_v28 = vpop.f32.mrf.mxu0  ;;  %v1445_v0 = vpop.f32.mrf.mxu1 }
  0xe1   : > { %v568_v34 = vsel %vm567_vm2, %v1650_v29, 0.0  ;;  %v1661_v35 = vadd.f32 %v1425_v28, %v1647_v27 }
  0xe2   : > { %v439_v30 = vpop.f32.mrf.mxu0  ;;  %v519_v10 = vpop.f32.mrf.mxu1 }
  0xe3   : > { %v1656_v32 = vadd.f32 %v1647_v27, %v439_v30  ;;  %v573_v43 = vsel %vm567_vm2, %v1661_v35, 0.0 }
  0xe4   : > { %v1428_v33 = vpop.f32.mrf.mxu0  ;;  %v1448_v18 = vpop.f32.mrf.mxu1 }
  0xe5   : > { %v569_v36 = vsel %vm567_vm2, %v1656_v32, 0.0  ;;  %v1675_v47 = vadd.f32 %v1428_v33, %v1647_v27 }
  0xe6   : > { %v570_v37 = vadd.f32 %v569_v36, %v568_v34  ;;  %v452_v38 = vpop.f32.mrf.mxu0 }
  0xe7   : > { %v1668_v40 = vadd.f32 %v1647_v27, %v452_v38  ;;  %v579_v57 = vsel %vm567_vm2, %v1675_v47, 0.0  ;;  %v532_v38 = vpop.f32.mrf.mxu1 }
  0xe8   : > { %v572_v41 = vadd.f32 %v571_v39, %v570_v37  ;;  %v1429_v42 = vpop.f32.mrf.mxu0 }
  0xe9   : > { %v575_v48 = vsel %vm567_vm2, %v1668_v40, 0.0  ;;  %v1683_v52 = vadd.f32 %v1429_v42, %v1647_v27 }
  0xea   : > { %v574_v44 = vadd.f32 %v573_v43, %v572_v41  ;;  %v455_v45 = vpop.f32.mrf.mxu0 }
  0xeb   : > { %v1680_v49 = vadd.f32 %v1647_v27, %v455_v45  ;;  %v581_v61 = vsel %vm567_vm2, %v1683_v52, 0.0 }
  0xec   : > { %v576_v50 = vadd.f32 %v575_v48, %v574_v44  ;;  %v1432_v51 = vpop.f32.mrf.mxu0 }
  0xed   : > { %v577_v53 = vsel %vm567_vm2, %v1680_v49, 0.0  ;;  %v1695_v1 = vadd.f32 %v1432_v51, %v1647_v27 }
  0xee   : > { %v578_v54 = vadd.f32 %v577_v53, %v576_v50  ;;  %v468_v55 = vpop.f32.mrf.mxu0  ;;  %v1449_v50 = vpop.f32.mrf.mxu1 }
  0xef   : > { %v1690_v58 = vadd.f32 %v1647_v27, %v468_v55  ;;  %v587_v11 = vsel %vm567_vm2, %v1695_v1, 0.0 }
  0xf0   : > { %v580_v59 = vadd.f32 %v579_v57, %v578_v54  ;;  %v1433_v60 = vpop.f32.mrf.mxu0 }
  0xf1   : > { %v583_v2 = vsel %vm567_vm2, %v1690_v58, 0.0  ;;  %v1703_v6 = vadd.f32 %v1433_v60, %v1647_v27 }
  0xf2   : > { %v582_v62 = vadd.f32 %v581_v61, %v580_v59  ;;  %v471_v63 = vpop.f32.mrf.mxu0  ;;  %v535_v61 = vpop.f32.mrf.mxu1 }
  0xf3   : > { %v1700_v3 = vadd.f32 %v1647_v27, %v471_v63  ;;  %v589_v15 = vsel %vm567_vm2, %v1703_v6, 0.0  ;;  %v1750_v63 = vadd.f32 %v1647_v27, %v516_v56  ;;  %v1764_v56 = vadd.f32 %v1445_v0, %v1647_v27 }
  0xf4   : > { %v584_v4 = vadd.f32 %v583_v2, %v582_v62  ;;  %v1436_v5 = vpop.f32.mrf.mxu0 }
  0xf5   : > { %v585_v7 = vsel %vm567_vm2, %v1700_v3, 0.0  ;;  %v1715_v19 = vadd.f32 %v1436_v5, %v1647_v27  ;;  %v1755_v5 = vadd.f32 %v1647_v27, %v519_v10 }
  0xf6   : > { %v586_v8 = vadd.f32 %v585_v7, %v584_v4  ;;  %v484_v9 = vpop.f32.mrf.mxu0 }
  0xf7   : > { %v1710_v12 = vadd.f32 %v1647_v27, %v484_v9  ;;  %v595_v39 = vsel %vm567_vm2, %v1715_v19, 0.0  ;;  %v1759_v9 = vadd.f32 %v1672_v46, %v1647_v27 }
  0xf8   : > { %v588_v13 = vadd.f32 %v587_v11, %v586_v8  ;;  %v1437_v14 = vpop.f32.mrf.mxu0  ;;  %v1452_v8 = vpop.f32.mrf.mxu1  ;;  %v607_v11 = vsel %vm567_vm2, %v1750_v63, 0.0 }
  0xf9   : > { %v591_v25 = vsel %vm567_vm2, %v1710_v12, 0.0  ;;  %v1723_v33 = vadd.f32 %v1437_v14, %v1647_v27  ;;  %v609_v14 = vsel %vm567_vm2, %v1755_v5, 0.0  ;;  %v611_v10 = vsel %vm567_vm2, %v1759_v9, 0.0 }
  0xfa   : > { %v590_v16 = vadd.f32 %v589_v15, %v588_v13  ;;  %v487_v17 = vpop.f32.mrf.mxu0 }
  0xfb   : > { %v1720_v26 = vadd.f32 %v1647_v27, %v487_v17  ;;  %v597_v44 = vsel %vm567_vm2, %v1723_v33, 0.0  ;;  %v1771_v17 = vadd.f32 %v1647_v27, %v532_v38 }
  0xfc   : > { %v592_v28 = vadd.f32 %v591_v25, %v590_v16  ;;  %v1440_v30 = vpop.f32.mrf.mxu0  ;;  %v548_v16 = vpop.f32.mrf.mxu1  ;;  %v613_v25 = vsel %vm567_vm2, %v1764_v56, 0.0 }
  0xfd   : > { %v593_v34 = vsel %vm567_vm2, %v1720_v26, 0.0  ;;  %v1735_v51 = vadd.f32 %v1440_v30, %v1647_v27 }
  0xfe   : > { %v594_v36 = vadd.f32 %v593_v34, %v592_v28  ;;  %v500_v37 = vpop.f32.mrf.mxu0  ;;  %v1776_v28 = vadd.f32 %v1647_v27, %v535_v61  ;;  %v1453_v30 = vpop.f32.mrf.mxu1  ;;  %v1779_v34 = vadd.f32 %v1448_v18, %v1647_v27 }
  0xff   : > { %v1730_v41 = vadd.f32 %v1647_v27, %v500_v37  ;;  %v603_v62 = vsel %vm567_vm2, %v1735_v51, 0.0  ;;  %v1804_v61 = vadd.f32 %v1453_v30, %v1647_v27 }
 0x100   : > { %v596_v42 = vadd.f32 %v595_v39, %v594_v36  ;;  %v1441_v43 = vpop.f32.mrf.mxu0  ;;  %v615_v36 = vsel %vm567_vm2, %v1771_v17, 0.0  ;;  %v1784_v39 = vadd.f32 %v1449_v50, %v1647_v27  ;;  %v617_v38 = vsel %vm567_vm2, %v1776_v28, 0.0 }
 0x101   : > { %v599_v53 = vsel %vm567_vm2, %v1730_v41, 0.0  ;;  %v1743_v57 = vadd.f32 %v1441_v43, %v1647_v27  ;;  %v551_v43 = vpop.f32.mrf.mxu1 }
 0x102   : > { %v598_v45 = vadd.f32 %v597_v44, %v596_v42  ;;  %v503_v48 = vpop.f32.mrf.mxu0  ;;  %v619_v44 = vsel %vm567_vm2, %v1779_v34, 0.0 }
 0x103   : > { %v1740_v54 = vadd.f32 %v1647_v27, %v503_v48  ;;  %v605_v4 = vsel %vm567_vm2, %v1743_v57, 0.0  ;;  %v621_v48 = vsel %vm567_vm2, %v1784_v39, 0.0 }
 0x104   : > { %v600_v55 = vadd.f32 %v599_v53, %v598_v45  ;;  %v1791_v45 = vadd.f32 %v1647_v27, %v548_v16  ;;  %v1796_v53 = vadd.f32 %v1647_v27, %v551_v43 }
 0x105   : > { %v601_v59 = vsel %vm567_vm2, %v1740_v54, 0.0 }
 0x106   : > { %v602_v60 = vadd.f32 %v601_v59, %v600_v55  ;;  %v1799_v55 = vadd.f32 %v1452_v8, %v1647_v27  ;;  %v623_v59 = vsel %vm567_vm2, %v1791_v45, 0.0  ;;  %v710_v27 = vlaneseq }
 0x108   : > { %v604_v2 = vadd.f32 %v603_v62, %v602_v60  ;;  %v625_v62 = vsel %vm567_vm2, %v1796_v53, 0.0 }
 0x10a   : > { %v606_v7 = vadd.f32 %v605_v4, %v604_v2  ;;  %v627_v4 = vsel %vm567_vm2, %v1799_v55, 0.0 }
 0x10c   : > { %v608_v13 = vadd.f32 %v607_v11, %v606_v7  ;;  %v629_v11 = vsel %vm567_vm2, %v1804_v61, 0.0 }
 0x10e   : > { %v610_v15 = vadd.f32 %v609_v14, %v608_v13 }
 0x110   : > { %v612_v46 = vadd.f32 %v611_v10, %v610_v15 }
 0x112   : > { %v614_v0 = vadd.f32 %v613_v25, %v612_v46  ;;  %v1822_v25 = vshrl.u32 %v710_v27, 7 }
 0x114   : > { %v616_v37 = vadd.f32 %v615_v36, %v614_v0  ;;  %v712_v30 = vsub.s32 0, %v1822_v25 }
 0x116   : > { %v618_v42 = vadd.f32 %v617_v38, %v616_v37 }
 0x118   : > { %v620_v18 = vadd.f32 %v619_v44, %v618_v42 }
 0x11a   : > { %v622_v50 = vadd.f32 %v621_v48, %v620_v18 }
 0x11c   : > { %v624_v60 = vadd.f32 %v623_v59, %v622_v50 }
 0x11e   : > { %v626_v2 = vadd.f32 %v625_v62, %v624_v60 }
 0x120   : > { %v628_v7 = vadd.f32 %v627_v4, %v626_v2 }
 0x122   : > { %v630_v8 = vadd.f32 %v629_v11, %v628_v7 }
 0x124   : > { %v631_v13 = vrot.slane %v630_v8, 4 }
 0x126   : > { %v632_v14 = vadd.f32 %v631_v13, %v630_v8 }
 0x128   : > { %v633_v15 = vrot.slane %v632_v14, 2 }
 0x12a   : > { %v634_v16 = vadd.f32 %v633_v15, %v632_v14 }
 0x12c   : > { %v635_v10 = vrot.slane %v634_v16, 1 }
 0x12e   : > { %v636_v46 = vadd.f32 %v635_v10, %v634_v16 }
 0x130   : > { %1463 = vmatmul.mubr.msk.f32.vlgmr.msra.gmra.mxu1 %vm567_vm2, %v636_v46 }
 0x131   : > { %1466 = vmatpush3.msra.mxu1 %v1617_v21  ;;  %1473 = vmatprep.mubr.msk.f32.mxu1 %vm1525_vm1, %v1524_v20 }
 0x132   : > { %1467 = vmatprep.subr.mxu1 %v1524_v20 }
 0x133   : > { %1468 = vmatpush3.msra.mxu1 %v1624_v22 }
 0x134   : > { %1469 = vmatprep.subr.mxu1 %v1524_v20 }
 0x135   : > { %1470 = vmatpush3.msra.mxu1 %v1631_v23 }
 0x136   : > { %1471 = vmatprep.subr.mxu1 %v1524_v20 }
 0x137   : > { %1472 = vmatpush3.msra.mxu1 %v1638_v24 }
 0x1f0   : > { %v706_v0 = vpop.f32.mrf.mxu1 }
 0x1f1   : > { %v1827_v36 = vrot.slane %v706_v0, %v712_v30 }
 0x1f2   : > { %v1464_v21 = vpop.f32.mrf.mxu1 }
 0x1f3   : > { %v1831_v22 = vsub.f32 %v1650_v29, %v1827_v36  ;;  %v1835_v20 = vsub.f32 %v1656_v32, %v1827_v36  ;;  %v1839_v23 = vsub.f32 %v1653_v31, %v1827_v36  ;;  %v1843_v24 = vsub.f32 %v1661_v35, %v1827_v36 }
 0x1f4   : > { %v1851_v29 = vsub.f32 %v1668_v40, %v1827_v36  ;;  %v1857_v31 = vsub.f32 %v1680_v49, %v1827_v36  ;;  %v1865_v18 = vsub.f32 %v1675_v47, %v1827_v36  ;;  %v1872_v49 = vsub.f32 %v1683_v52, %v1827_v36 }
 0x1f5   : > { %v746_v37 = vmul.f32 %v1831_v22, %v1831_v22  ;;  %v747_v38 = vmul.f32 %v1835_v20, %v1835_v20  ;;  %v748_v32 = vmul.f32 %v1839_v23, %v1839_v23  ;;  %v749_v35 = vmul.f32 %v1843_v24, %v1843_v24 }
 0x1f6   : > { %v750_v40 = vmul.f32 %v1851_v29, %v1851_v29  ;;  %v751_v59 = vmul.f32 %v1857_v31, %v1857_v31  ;;  %v1879_v47 = vsub.f32 %v1690_v58, %v1827_v36  ;;  %v752_v2 = vmul.f32 %v1865_v18, %v1865_v18 }
 0x1f7   : > { %v778_v42 = vsel %vm567_vm2, %v746_v37, 0.0  ;;  %v779_v43 = vsel %vm567_vm2, %v747_v38, 0.0  ;;  %v781_v48 = vsel %vm567_vm2, %v748_v32, 0.0  ;;  %v783_v60 = vsel %vm567_vm2, %v749_v35, 0.0 }
 0x1f8   : > { %v780_v44 = vadd.f32 %v779_v43, %v778_v42  ;;  %v785_v4 = vsel %vm567_vm2, %v750_v40, 0.0  ;;  %v1886_v52 = vsub.f32 %v1700_v3, %v1827_v36  ;;  %v753_v11 = vmul.f32 %v1872_v49, %v1872_v49 }
 0x1f9   : > { %v787_v8 = vsel %vm567_vm2, %v751_v59, 0.0  ;;  %v1893_v58 = vsub.f32 %v1695_v1, %v1827_v36  ;;  %v754_v14 = vmul.f32 %v1879_v47, %v1879_v47  ;;  %v789_v15 = vsel %vm567_vm2, %v752_v2, 0.0 }
 0x1fa   : > { %v782_v50 = vadd.f32 %v781_v48, %v780_v44  ;;  %v1900_v3 = vsub.f32 %v1703_v6, %v1827_v36  ;;  %v755_v10 = vmul.f32 %v1886_v52, %v1886_v52  ;;  %v791_v46 = vsel %vm567_vm2, %v753_v11, 0.0 }
 0x1fb   : > { %v1907_v1 = vsub.f32 %v1710_v12, %v1827_v36  ;;  %v756_v0 = vmul.f32 %v1893_v58, %v1893_v58  ;;  %v793_v21 = vsel %vm567_vm2, %v754_v14, 0.0  ;;  %v1914_v6 = vsub.f32 %v1720_v26, %v1827_v36 }
 0x1fc   : > { %v784_v62 = vadd.f32 %v783_v60, %v782_v50  ;;  %v757_v38 = vmul.f32 %v1900_v3, %v1900_v3  ;;  %v795_v32 = vsel %vm567_vm2, %v755_v10, 0.0  ;;  %v1921_v12 = vsub.f32 %v1715_v19, %v1827_v36 }
 0x1fd   : > { %v758_v42 = vmul.f32 %v1907_v1, %v1907_v1  ;;  %v797_v43 = vsel %vm567_vm2, %v756_v0, 0.0  ;;  %v1928_v26 = vsub.f32 %v1723_v33, %v1827_v36  ;;  %v759_v40 = vmul.f32 %v1914_v6, %v1914_v6 }
 0x1fe   : > { %v786_v7 = vadd.f32 %v785_v4, %v784_v62  ;;  %v799_v48 = vsel %vm567_vm2, %v757_v38, 0.0  ;;  %v1935_v19 = vsub.f32 %v1730_v41, %v1827_v36  ;;  %v760_v59 = vmul.f32 %v1921_v12, %v1921_v12 }
 0x1ff   : > { %v801_v60 = vsel %vm567_vm2, %v758_v42, 0.0  ;;  %v1942_v33 = vsub.f32 %v1740_v54, %v1827_v36  ;;  %v761_v2 = vmul.f32 %v1928_v26, %v1928_v26  ;;  %v803_v4 = vsel %vm567_vm2, %v759_v40, 0.0 }
 0x200   : > { %v788_v13 = vadd.f32 %v787_v8, %v786_v7  ;;  %v1949_v41 = vsub.f32 %v1735_v51, %v1827_v36  ;;  %v762_v11 = vmul.f32 %v1935_v19, %v1935_v19  ;;  %v805_v8 = vsel %vm567_vm2, %v760_v59, 0.0 }
 0x201   : > { %v1956_v54 = vsub.f32 %v1743_v57, %v1827_v36  ;;  %v763_v14 = vmul.f32 %v1942_v33, %v1942_v33  ;;  %v1963_v51 = vsub.f32 %v1750_v63, %v1827_v36  ;;  %v1970_v57 = vsub.f32 %v1755_v5, %v1827_v36 }
 0x202   : > { %v790_v16 = vadd.f32 %v789_v15, %v788_v13  ;;  %v807_v15 = vsel %vm567_vm2, %v761_v2, 0.0  ;;  %v764_v10 = vmul.f32 %v1949_v41, %v1949_v41  ;;  %v1977_v63 = vsub.f32 %v1759_v9, %v1827_v36 }
 0x203   : > { %v765_v0 = vmul.f32 %v1956_v54, %v1956_v54  ;;  %v766_v38 = vmul.f32 %v1963_v51, %v1963_v51  ;;  %v1984_v5 = vsub.f32 %v1764_v56, %v1827_v36  ;;  %v767_v42 = vmul.f32 %v1970_v57, %v1970_v57 }
 0x204   : > { %v792_v27 = vadd.f32 %v791_v46, %v790_v16  ;;  %v809_v46 = vsel %vm567_vm2, %v762_v11, 0.0  ;;  %v1991_v9 = vsub.f32 %v1771_v17, %v1827_v36  ;;  %v768_v40 = vmul.f32 %v1977_v63, %v1977_v63 }
 0x205   : > { %v1998_v56 = vsub.f32 %v1776_v28, %v1827_v36  ;;  %v769_v59 = vmul.f32 %v1984_v5, %v1984_v5  ;;  %v2005_v17 = vsub.f32 %v1779_v34, %v1827_v36  ;;  %v2012_v28 = vsub.f32 %v1784_v39, %v1827_v36 }
 0x206   : > { %v794_v37 = vadd.f32 %v793_v21, %v792_v27  ;;  %v811_v21 = vsel %vm567_vm2, %v763_v14, 0.0  ;;  %v770_v2 = vmul.f32 %v1991_v9, %v1991_v9  ;;  %v2019_v34 = vsub.f32 %v1791_v45, %v1827_v36 }
 0x207   : > { %v771_v11 = vmul.f32 %v1998_v56, %v1998_v56  ;;  %v772_v14 = vmul.f32 %v2005_v17, %v2005_v17  ;;  %v2026_v39 = vsub.f32 %v1796_v53, %v1827_v36  ;;  %v2033_v45 = vsub.f32 %v1799_v55, %v1827_v36 }
 0x208   : > { %v796_v35 = vadd.f32 %v795_v32, %v794_v37  ;;  %v813_v32 = vsel %vm567_vm2, %v764_v10, 0.0  ;;  %v773_v10 = vmul.f32 %v2012_v28, %v2012_v28  ;;  %v2040_v53 = vsub.f32 %v1804_v61, %v1827_v36 }
 0x209   : > { %v776_v55 = vmul.f32 %v2033_v45, %v2033_v45 }
 0x20a   : > { %v798_v44 = vadd.f32 %v797_v43, %v796_v35  ;;  %v815_v43 = vsel %vm567_vm2, %v765_v0, 0.0  ;;  %v774_v0 = vmul.f32 %v2019_v34, %v2019_v34 }
 0x20b   : > { %v837_v61 = vsel %vm567_vm2, %v776_v55, 0.0 }
 0x20c   : > { %v800_v50 = vadd.f32 %v799_v48, %v798_v44  ;;  %v817_v48 = vsel %vm567_vm2, %v766_v38, 0.0  ;;  %v775_v38 = vmul.f32 %v2026_v39, %v2026_v39 }
 0x20e   : > { %v802_v62 = vadd.f32 %v801_v60, %v800_v50  ;;  %v819_v60 = vsel %vm567_vm2, %v767_v42, 0.0  ;;  %v833_v42 = vsel %vm567_vm2, %v774_v0, 0.0 }
 0x210   : > { %v804_v7 = vadd.f32 %v803_v4, %v802_v62  ;;  %v821_v4 = vsel %vm567_vm2, %v768_v40, 0.0  ;;  %v835_v40 = vsel %vm567_vm2, %v775_v38, 0.0 }
 0x212   : > { %v806_v13 = vadd.f32 %v805_v8, %v804_v7  ;;  %v823_v8 = vsel %vm567_vm2, %v769_v59, 0.0 }
 0x214   : > { %v808_v16 = vadd.f32 %v807_v15, %v806_v13  ;;  %v825_v15 = vsel %vm567_vm2, %v770_v2, 0.0 }
 0x216   : > { %v810_v27 = vadd.f32 %v809_v46, %v808_v16  ;;  %v827_v46 = vsel %vm567_vm2, %v771_v11, 0.0 }
 0x218   : > { %v812_v37 = vadd.f32 %v811_v21, %v810_v27  ;;  %v829_v21 = vsel %vm567_vm2, %v772_v14, 0.0 }
 0x21a   : > { %v814_v35 = vadd.f32 %v813_v32, %v812_v37  ;;  %v831_v32 = vsel %vm567_vm2, %v773_v10, 0.0 }
 0x21c   : > { %v816_v44 = vadd.f32 %v815_v43, %v814_v35 }
 0x21e   : > { %v818_v50 = vadd.f32 %v817_v48, %v816_v44  ;;  %v777_v44 = vmul.f32 %v2040_v53, %v2040_v53 }
 0x220   : > { %v820_v62 = vadd.f32 %v819_v60, %v818_v50  ;;  %v839_v50 = vsel %vm567_vm2, %v777_v44, 0.0 }
 0x222   : > { %v822_v7 = vadd.f32 %v821_v4, %v820_v62 }
 0x224   : > { %v824_v13 = vadd.f32 %v823_v8, %v822_v7 }
 0x226   : > { %v826_v16 = vadd.f32 %v825_v15, %v824_v13 }
 0x228   : > { %v828_v27 = vadd.f32 %v827_v46, %v826_v16 }
 0x22a   : > { %v830_v37 = vadd.f32 %v829_v21, %v828_v27 }
 0x22c   : > { %v832_v35 = vadd.f32 %v831_v32, %v830_v37 }
 0x22e   : > { %v834_v43 = vadd.f32 %v833_v42, %v832_v35 }
 0x230   : > { %v836_v48 = vadd.f32 %v835_v40, %v834_v43 }
 0x232   : > { %v838_v36 = vadd.f32 %v837_v61, %v836_v48 }
 0x234   : > { %v840_v59 = vadd.f32 %v839_v50, %v838_v36 }
 0x236   : > { %v841_v60 = vrot.slane %v840_v59, 4 }
 0x238   : > { %v842_v62 = vadd.f32 %v841_v60, %v840_v59 }
 0x23a   : > { %v843_v2 = vrot.slane %v842_v62, 2 }
 0x23c   : > { %v844_v4 = vadd.f32 %v843_v2, %v842_v62 }
 0x23e   : > { %v845_v7 = vrot.slane %v844_v4, 1 }
 0x240   : > { %v846_v11 = vadd.f32 %v845_v7, %v844_v4 }
 0x242   : > { %1474 = vmatmul.mubr.msk.f32.vlgmr.msra.gmra.mxu1 %vm567_vm2, %v846_v11 }
 0x302   : > { %v916_v8 = vpop.f32.mrf.mxu1 }
 0x303   : > { %v917_v13 = vadd.f32 1e-05, %v916_v8 }
 0x304   : > { %v1475_v14 = vpop.f32.mrf.mxu1 }
 0x305   : > { %1514 = vrsqrt.f32 %v917_v13 }
 0x312   : > { %v1515_v15 = vpop.eup %1514 }
 0x313   : > { %v924_v16 = vrot.slane %v1515_v15, %v712_v30 }
 0x315   : > { %v2057_v10 = vmul.f32 %v924_v16, %v1831_v22  ;;  %v2060_v46 = vmul.f32 %v924_v16, %v1835_v20  ;;  %v2063_v27 = vmul.f32 %v924_v16, %v1839_v23  ;;  %v2066_v0 = vmul.f32 %v924_v16, %v1843_v24 }
 0x316   : > { %v2069_v21 = vmul.f32 %v924_v16, %v1851_v29  ;;  %v2072_v37 = vmul.f32 %v924_v16, %v1857_v31  ;;  %v2075_v25 = vmul.f32 %v924_v16, %v1865_v18  ;;  %v2078_v30 = vmul.f32 %v924_v16, %v1872_v49 }
 0x317   : > { %v2081_v22 = vmul.f32 %v924_v16, %v1879_v47  ;;  %v2084_v20 = vmul.f32 %v924_v16, %v1886_v52  ;;  %v2087_v23 = vmul.f32 %v924_v16, %v1893_v58  ;;  %v2090_v24 = vmul.f32 %v924_v16, %v1900_v3 }
 0x318   : > { %v2093_v29 = vmul.f32 %v924_v16, %v1907_v1  ;;  %v2096_v31 = vmul.f32 %v924_v16, %v1914_v6  ;;  %v2099_v18 = vmul.f32 %v924_v16, %v1921_v12  ;;  %v2102_v49 = vmul.f32 %v924_v16, %v1928_v26 }
 0x319   : > { %v2105_v47 = vmul.f32 %v924_v16, %v1935_v19  ;;  %v2108_v52 = vmul.f32 %v924_v16, %v1942_v33  ;;  %v2111_v58 = vmul.f32 %v924_v16, %v1949_v41  ;;  %v2114_v3 = vmul.f32 %v924_v16, %v1956_v54 }
 0x31a   : > { %v2117_v1 = vmul.f32 %v924_v16, %v1963_v51  ;;  %v2120_v6 = vmul.f32 %v924_v16, %v1970_v57  ;;  %v2123_v12 = vmul.f32 %v924_v16, %v1977_v63  ;;  %v2126_v26 = vmul.f32 %v924_v16, %v1984_v5 }
 0x31b   : > { %v2129_v19 = vmul.f32 %v924_v16, %v1991_v9  ;;  %v2132_v33 = vmul.f32 %v924_v16, %v1998_v56  ;;  %v2135_v41 = vmul.f32 %v924_v16, %v2005_v17  ;;  %v2138_v54 = vmul.f32 %v924_v16, %v2012_v28 }
 0x31c   : > { %v2141_v51 = vmul.f32 %v924_v16, %v2019_v34  ;;  %v2144_v57 = vmul.f32 %v924_v16, %v2026_v39  ;;  %vm957_vm3 = vcmp.ge.f32.partialorder %v2057_v10, 0.0  ;;  %vm958_vm4 = vcmp.ge.f32.partialorder %v2060_v46, 0.0 }
 0x31d   : > { %vm959_vm5 = vcmp.ge.f32.partialorder %v2063_v27, 0.0  ;;  %vm960_vm6 = vcmp.ge.f32.partialorder %v2066_v0, 0.0  ;;  %vm961_vm7 = vcmp.ge.f32.partialorder %v2069_v21, 0.0  ;;  %vm962_vm8 = vcmp.ge.f32.partialorder %v2072_v37, 0.0 }
 0x31e   : > { %vm963_vm9 = vcmp.ge.f32.partialorder %v2075_v25, 0.0  ;;  %vm964_vm10 = vcmp.ge.f32.partialorder %v2078_v30, 0.0  ;;  %vm965_vm11 = vcmp.ge.f32.partialorder %v2081_v22, 0.0  ;;  %v2157_v63 = vmul.f32 %v924_v16, %v2033_v45 }
 0x31f   : > { %v989_v5 = vmul.f32 0.2, %v2057_v10  ;;  %v990_v9 = vmul.f32 0.2, %v2060_v46  ;;  %v991_v56 = vmul.f32 0.2, %v2063_v27  ;;  %v2167_v17 = vmul.f32 %v924_v16, %v2040_v53 }
 0x320   : > { %vm972_vm2 = vcmp.ge.f32.partialorder %v2102_v49, 0.0  ;;  %vm973_vm13 = vcmp.ge.f32.partialorder %v2105_v47, 0.0  ;;  %v992_v28 = vmul.f32 0.2, %v2066_v0  ;;  %v993_v34 = vmul.f32 0.2, %v2069_v21 }
 0x321   : > { %v994_v39 = vmul.f32 0.2, %v2072_v37  ;;  %vm978_vm1 = vcmp.ge.f32.partialorder %v2120_v6, 0.0  ;;  %v995_v45 = vmul.f32 0.2, %v2075_v25  ;;  %v2186_v32 = vsel %vm957_vm3, %v2057_v10, %v989_v5 }
 0x322   : > { %v996_v53 = vmul.f32 0.2, %v2078_v30  ;;  %v997_v38 = vmul.f32 0.2, %v2081_v22  ;;  %vm982_vm12 = vcmp.ge.f32.partialorder %v2132_v33, 0.0  ;;  %v2198_v43 = vsel %vm958_vm4, %v2060_v46, %v990_v9 }
 0x323   : > { %v998_v35 = vmul.f32 0.2, %v2084_v20  ;;  %v999_v55 = vmul.f32 0.2, %v2087_v23  ;;  %v1000_v42 = vmul.f32 0.2, %v2090_v24  ;;  %v2210_v61 = vsel %vm959_vm5, %v2063_v27, %v991_v56 }
 0x324   : > { %vm984_vm14 = vcmp.ge.f32.partialorder %v2138_v54, 0.0  ;;  %vm985_vm0 = vcmp.ge.f32.partialorder %v2141_v51, 0.0  ;;  %vm986_vm15 = vcmp.ge.f32.partialorder %v2144_v57, 0.0  ;;  %v1001_v44 = vmul.f32 0.2, %v2093_v29 }
 0x325   : > { %v1002_v40 = vmul.f32 0.2, %v2096_v31  ;;  %v1003_v48 = vmul.f32 0.2, %v2099_v18  ;;  %vm987_vm4 = vcmp.ge.f32.partialorder %v2157_v63, 0.0  ;;  %vm988_vm3 = vcmp.ge.f32.partialorder %v2167_v17, 0.0 }
 0x326   : > { %v1004_v36 = vmul.f32 0.2, %v2102_v49  ;;  %v1005_v50 = vmul.f32 0.2, %v2105_v47  ;;  %v1006_v59 = vmul.f32 0.2, %v2108_v52  ;;  %v2220_v60 = vsel %vm960_vm6, %v2066_v0, %v992_v28 }
 0x327   : > { %v1007_v62 = vmul.f32 0.2, %v2111_v58  ;;  %v1008_v2 = vmul.f32 0.2, %v2114_v3  ;;  %v1009_v4 = vmul.f32 0.2, %v2117_v1  ;;  %v1025_v7 = vsel %vm961_vm7, %v2069_v21, %v993_v34 }
 0x328   : > { %v1010_v11 = vmul.f32 0.2, %v2120_v6  ;;  %v1011_v8 = vmul.f32 0.2, %v2123_v12  ;;  %v1012_v13 = vmul.f32 0.2, %v2126_v26  ;;  %v1026_v14 = vsel %vm962_vm8, %v2072_v37, %v994_v39 }
 0x329   : > { %vm1181_vm5 = vcmask 257024   ;;  %v1013_v15 = vmul.f32 0.2, %v2129_v19  ;;  %v1014_v16 = vmul.f32 0.2, %v2132_v33  ;;  %v1027_v46 = vsel %vm963_vm9, %v2075_v25, %v995_v45 }
 0x32a   : > { %v1015_v10 = vmul.f32 0.2, %v2135_v41  ;;  %v1016_v27 = vmul.f32 0.2, %v2138_v54  ;;  %v1017_v0 = vmul.f32 0.2, %v2141_v51  ;;  %v1028_v37 = vsel %vm964_vm10, %v2078_v30, %v996_v53 }
 0x32b   : > { %v1018_v21 = vmul.f32 0.2, %v2144_v57  ;;  %v1019_v5 = vmul.f32 0.2, %v2157_v63  ;;  %v1020_v9 = vmul.f32 0.2, %v2167_v17  ;;  %v1029_v56 = vsel %vm965_vm11, %v2081_v22, %v997_v38 }
 0x32c   : > { %vm2463_vm6 = vcmp.ge.f32.partialorder %v2084_v20, 0.0  ;;  %vm2464_vm7 = vcmp.ge.f32.partialorder %v2087_v23, 0.0  ;;  %vm2465_vm8 = vcmp.ge.f32.partialorder %v2090_v24, 0.0  ;;  %vm2466_vm9 = vcmp.ge.f32.partialorder %v2093_v29, 0.0 }
 0x32d   : > { %v1030_v25 = vsel %vm2463_vm6, %v2084_v20, %v998_v35  ;;  %v1031_v28 = vsel %vm2464_vm7, %v2087_v23, %v999_v55  ;;  %v1032_v30 = vsel %vm2465_vm8, %v2090_v24, %v1000_v42  ;;  %v1033_v34 = vsel %vm2466_vm9, %v2093_v29, %v1001_v44 }
 0x32e   : > { %vm2467_vm10 = vcmp.ge.f32.partialorder %v2096_v31, 0.0  ;;  %vm2468_vm11 = vcmp.ge.f32.partialorder %v2099_v18, 0.0  ;;  %v1036_v23 = vsel %vm972_vm2, %v2102_v49, %v1004_v36  ;;  %v1037_v24 = vsel %vm973_vm13, %v2105_v47, %v1005_v50 }
 0x32f   : > { %v1034_v22 = vsel %vm2467_vm10, %v2096_v31, %v1002_v40  ;;  %v1035_v20 = vsel %vm2468_vm11, %v2099_v18, %v1003_v48  ;;  %vm2469_vm6 = vcmp.ge.f32.partialorder %v2108_v52, 0.0  ;;  %vm2470_vm7 = vcmp.ge.f32.partialorder %v2111_v58, 0.0 }
 0x330   : > { %v1038_v29 = vsel %vm2469_vm6, %v2108_v52, %v1006_v59  ;;  %v2281_v31 = vsel %vm2470_vm7, %v2111_v58, %v1007_v62  ;;  %vm2471_vm8 = vcmp.ge.f32.partialorder %v2114_v3, 0.0  ;;  %vm2472_vm2 = vcmp.ge.f32.partialorder %v2117_v1, 0.0 }
 0x331   : > { %v2286_v18 = vsel %vm2471_vm8, %v2114_v3, %v1008_v2  ;;  %v2291_v49 = vsel %vm2472_vm2, %v2117_v1, %v1009_v4  ;;  %v2296_v47 = vsel %vm978_vm1, %v2120_v6, %v1010_v11  ;;  %vm2473_vm13 = vcmp.ge.f32.partialorder %v2123_v12, 0.0 }
 0x332   : > { %v2301_v52 = vsel %vm2473_vm13, %v2123_v12, %v1011_v8  ;;  %vm2474_vm9 = vcmp.ge.f32.partialorder %v2126_v26, 0.0  ;;  %vm2475_vm10 = vcmp.ge.f32.partialorder %v2129_v19, 0.0  ;;  %v2316_v1 = vsel %vm982_vm12, %v2132_v33, %v1014_v16 }
 0x333   : > { %v2306_v58 = vsel %vm2474_vm9, %v2126_v26, %v1012_v13  ;;  %v2311_v3 = vsel %vm2475_vm10, %v2129_v19, %v1013_v15  ;;  %vm2476_vm1 = vcmp.ge.f32.partialorder %v2135_v41, 0.0  ;;  %v2333_v12 = vsel %vm984_vm14, %v2138_v54, %v1016_v27 }
 0x334   : > { %v2328_v6 = vsel %vm2476_vm1, %v2135_v41, %v1015_v10  ;;  %v2338_v26 = vsel %vm985_vm0, %v2141_v51, %v1017_v0  ;;  %v2343_v19 = vsel %vm986_vm15, %v2144_v57, %v1018_v21  ;;  %v2348_v33 = vsel %vm987_vm4, %v2157_v63, %v1019_v5 }
 0x335   : > { %v2353_v41 = vsel %vm988_vm3, %v2167_v17, %v1020_v9  ;;  %v1352_v54 = vpack.c.bf16 %v2186_v32, %v2186_v32  ;;  %v1353_v51 = vpack.c.bf16 %v2198_v43, %v2198_v43  ;;  %v1354_v57 = vpack.c.bf16 %v2210_v61, %v2210_v61 }
 0x336   : > { %v1355_v63 = vpack.c.bf16 %v2220_v60, %v2220_v60  ;;  %v1356_v39 = vpack.c.bf16 %v1025_v7, %v1025_v7  ;;  %v1357_v45 = vpack.c.bf16 %v1026_v14, %v1026_v14  ;;  %v1358_v17 = vpack.c.bf16 %v1027_v46, %v1027_v46 }
 0x337   : > { %v1359_v53 = vpack.c.bf16 %v1028_v37, %v1028_v37  ;;  %v1360_v38 = vpack.c.bf16 %v1029_v56, %v1029_v56  ;;  %v1361_v32 = vpack.c.bf16 %v1030_v25, %v1030_v25  ;;  %1182 = vst.msk [vmem:[%s2323_s17] sm:$0xf] %vm1181_vm5, %v1352_v54  ;;  %1183 = vst.msk [vmem:[%s2323_s17 + $0x4] sm:$0xf] %vm1181_vm5, %v1353_v51 }
 0x338   : > { %v1362_v35 = vpack.c.bf16 %v1031_v28, %v1031_v28  ;;  %v1363_v55 = vpack.c.bf16 %v1032_v30, %v1032_v30  ;;  %v1364_v42 = vpack.c.bf16 %v1033_v34, %v1033_v34  ;;  %v1365_v43 = vpack.c.bf16 %v1034_v22, %v1034_v22  ;;  %1184 = vst.msk [vmem:[%s2323_s17 + $0x8] sm:$0xf] %vm1181_vm5, %v1354_v57 }
 0x339   : > { %1185 = vst.msk [vmem:[%s2323_s17 + $0xc] sm:$0xf] %vm1181_vm5, %v1355_v63  ;;  %1186 = vst.msk [vmem:[%s2323_s17 + $0x10] sm:$0xf] %vm1181_vm5, %v1356_v39  ;;  %v1366_v44 = vpack.c.bf16 %v1035_v20, %v1035_v20  ;;  %v1367_v40 = vpack.c.bf16 %v1036_v23, %v1036_v23  ;;  %v1368_v48 = vpack.c.bf16 %v1037_v24, %v1037_v24 }
 0x33a   : > { %1187 = vst.msk [vmem:[%s2323_s17 + $0x14] sm:$0xf] %vm1181_vm5, %v1357_v45  ;;  %v1369_v61 = vpack.c.bf16 %v1038_v29, %v1038_v29  ;;  %1188 = vst.msk [vmem:[%s2323_s17 + $0x18] sm:$0xf] %vm1181_vm5, %v1358_v17  ;;  %v1370_v36 = vpack.c.bf16 %v2281_v31, %v2281_v31  ;;  %v1371_v50 = vpack.c.bf16 %v2286_v18, %v2286_v18 }
 0x33b   : > { %1189 = vst.msk [vmem:[%s2323_s17 + $0x1c] sm:$0xf] %vm1181_vm5, %v1359_v53  ;;  %1190 = vst.msk [vmem:[%s2323_s17 + $0x20] sm:$0xf] %vm1181_vm5, %v1360_v38  ;;  %v1372_v59 = vpack.c.bf16 %v2291_v49, %v2291_v49  ;;  %v1373_v60 = vpack.c.bf16 %v2296_v47, %v2296_v47  ;;  %v1374_v62 = vpack.c.bf16 %v2301_v52, %v2301_v52 }
 0x33c   : > { %1191 = vst.msk [vmem:[%s2323_s17 + $0x24] sm:$0xf] %vm1181_vm5, %v1361_v32  ;;  %1192 = vst.msk [vmem:[%s2323_s17 + $0x28] sm:$0xf] %vm1181_vm5, %v1362_v35  ;;  %v1375_v2 = vpack.c.bf16 %v2306_v58, %v2306_v58  ;;  %v1376_v4 = vpack.c.bf16 %v2311_v3, %v2311_v3  ;;  %v1377_v7 = vpack.c.bf16 %v2316_v1, %v2316_v1 }
 0x33d   : > { %1193 = vst.msk [vmem:[%s2323_s17 + $0x2c] sm:$0xf] %vm1181_vm5, %v1363_v55  ;;  %1194 = vst.msk [vmem:[%s2323_s17 + $0x30] sm:$0xf] %vm1181_vm5, %v1364_v42  ;;  %v1378_v11 = vpack.c.bf16 %v2328_v6, %v2328_v6  ;;  %v1379_v8 = vpack.c.bf16 %v2333_v12, %v2333_v12  ;;  %v1380_v13 = vpack.c.bf16 %v2338_v26, %v2338_v26 }
 0x33e   : > { %1195 = vst.msk [vmem:[%s2323_s17 + $0x34] sm:$0xf] %vm1181_vm5, %v1365_v43  ;;  %1196 = vst.msk [vmem:[%s2323_s17 + $0x38] sm:$0xf] %vm1181_vm5, %v1366_v44  ;;  %v1381_v14 = vpack.c.bf16 %v2343_v19, %v2343_v19  ;;  %v1382_v15 = vpack.c.bf16 %v2348_v33, %v2348_v33  ;;  %v1383_v16 = vpack.c.bf16 %v2353_v41, %v2353_v41 }
 0x33f   : > { %1197 = vst.msk [vmem:[%s2323_s17 + $0x3c] sm:$0xf] %vm1181_vm5, %v1367_v40  ;;  %1198 = vst.msk [vmem:[%s2323_s17 + $0x40] sm:$0xf] %vm1181_vm5, %v1368_v48 }
 0x340   : > { %1199 = vst.msk [vmem:[%s2323_s17 + $0x44] sm:$0xf] %vm1181_vm5, %v1369_v61  ;;  %1200 = vst.msk [vmem:[%s2323_s17 + $0x48] sm:$0xf] %vm1181_vm5, %v1370_v36 }
 0x341   : > { %1201 = vst.msk [vmem:[%s2323_s17 + $0x4c] sm:$0xf] %vm1181_vm5, %v1371_v50  ;;  %1202 = vst.msk [vmem:[%s2323_s17 + $0x50] sm:$0xf] %vm1181_vm5, %v1372_v59 }
 0x342   : > { %1203 = vst.msk [vmem:[%s2323_s17 + $0x54] sm:$0xf] %vm1181_vm5, %v1373_v60  ;;  %1204 = vst.msk [vmem:[%s2323_s17 + $0x58] sm:$0xf] %vm1181_vm5, %v1374_v62 }
 0x343   : > { %1205 = vst.msk [vmem:[%s2323_s17 + $0x5c] sm:$0xf] %vm1181_vm5, %v1375_v2  ;;  %1206 = vst.msk [vmem:[%s2323_s17 + $0x60] sm:$0xf] %vm1181_vm5, %v1376_v4 }
 0x344   : > { %1207 = vst.msk [vmem:[%s2323_s17 + $0x64] sm:$0xf] %vm1181_vm5, %v1377_v7  ;;  %1208 = vst.msk [vmem:[%s2323_s17 + $0x68] sm:$0xf] %vm1181_vm5, %v1378_v11 }
 0x345   : > { %1209 = vst.msk [vmem:[%s2323_s17 + $0x6c] sm:$0xf] %vm1181_vm5, %v1379_v8  ;;  %1210 = vst.msk [vmem:[%s2323_s17 + $0x70] sm:$0xf] %vm1181_vm5, %v1380_v13 }
 0x346   : > { %1211 = vst.msk [vmem:[%s2323_s17 + $0x74] sm:$0xf] %vm1181_vm5, %v1381_v14  ;;  %1212 = vst.msk [vmem:[%s2323_s17 + $0x78] sm:$0xf] %vm1181_vm5, %v1382_v15 }
 0x347   : > { %1213 = vst.msk [vmem:[%s2323_s17 + $0x7c] sm:$0xf] %vm1181_vm5, %v1383_v16 }
 0x348 PF: > { %s14_s15 = sadd.s32 1, %s1522_s15  }
 0x349   : > { %p11_p4 = scmp.ge.s32.totalorder %s14_s15, 4  }
 0x34b   :  { %13 = sbr.rel (!%p11_p4) target bundleno = 1 (0x1), region = 66 }

// kernel: label_discriminator_forward.3
= control target key start
LH: loop header
LB: loop body
LE: loop exit
PB: predicated region body
PF: predicated region fallthrough
CT: control target
= control target key end

     0   :  { %s6457_s23 = smov 0   ;;  %s8478_s0 = inlined_call_operand.vmem [shape: bf16[128,512], index: 0, kind: input, shape index: {}]   ;;  %s8479_s1 = inlined_call_operand.vmem [shape: bf16[512,64], index: 1, kind: input, shape index: {}]   ;;  %s8480_s2 = inlined_call_operand.vmem [shape: f32[1,64], index: 2, kind: input, shape index: {}]   ;;  %s8481_s3 = inlined_call_operand.vmem [shape: f32[64,64], index: 3, kind: input, shape index: {}]   ;;  %s8482_s4 = inlined_call_operand.vmem [shape: bf16[1024,128], index: 4, kind: input, shape index: {}]   ;;  %s8483_s5 = inlined_call_operand.vmem [shape: f32[1,128], index: 5, kind: input, shape index: {}]   ;;  %s8484_s6 = inlined_call_operand.vmem [shape: f32[128,128], index: 6, kind: input, shape index: {}]   ;;  %s8485_s7 = inlined_call_operand.vmem [shape: bf16[2048,256], index: 7, kind: input, shape index: {}]   ;;  %s8486_s8 = inlined_call_operand.vmem [shape: f32[1,256], index: 8, kind: input, shape index: {}]   ;;  %s8487_s9 = inlined_call_operand.vmem [shape: f32[256,256], index: 9, kind: input, shape index: {}]   ;;  %s8488_s10 = inlined_call_operand.vmem [shape: f32[4,256], index: 10, kind: input, shape index: {}]   ;;  %s8489_s11 = inlined_call_operand.<no memory space> [shape: f32[1,1], index: 11, kind: input, shape index: {}]   ;;  %s8490_s12 = inlined_call_operand.vmem [shape: f32[2,8,128], index: 12, kind: output, shape index: {}]  }
   0x1   :  { %v17_v0 = vstv %s8489_s11 }
   0x2   :  { %18 = vst [vmem:[#allocation4] sm:$0x1] %v17_v0 }
   0x3 LB: > { %s6463_s24 = sadd.s32 4294967295, %s6382_s23   ;;  %p5107_p0 = scmp.ge.s32.totalorder %s6382_s23, 1  ;;  %s6382_s23 = sphi %s6457_s23, %s24_s23  }
   0x4   : > { %p366_p1 = scmp.lt.s32.totalorder %s6382_s23, 3 }
   0x6   : > { %p367_p2 = pnand %p5107_p0, %p366_p1 }
   0x7   : > { %s5108_s21 = sshll.u32 (!%p367_p2), %s6463_s24, 3  ;;  %s6386_s27 = smov (!%p367_p2), 64  }
   0x8   : > { %370 = sbr.rel (%p367_p2) target bundleno = 2762 (0xaca), region = 68  ;;  %p409_p3 = scmp.lt.s32.totalorder (!%p367_p2), %s5108_s21, 15 }
   0x9   : > { %p415_p4 = scmp.lt.s32.totalorder (!%p367_p2), %s6463_s24, 1 }
   0xd   : > { %v5862_v1 = vld [vmem:[%s8479_s1 + $0x78] sm:$0xff]   ;;  %v5866_v5 = vld [vmem:[%s8479_s1 + $0x70] sm:$0xff]   ;;  %v5870_v9 = vld [vmem:[%s8479_s1 + $0x68] sm:$0xff]   ;;  %s8492_s21 = smov (!%p409_p3, %s5108_s21), 15  ;;  %v6384_v50 = vmov 0.0   ;;  %vm6385_vm0 = vmmov 0  }
   0xe   : > { %v5863_v2 = vld [vmem:[%s8479_s1 + $0xf8] sm:$0xff]   ;;  %5509 = vmatprep.subr.bf16.mxu0 %v5862_v1  ;;  %v5867_v6 = vld [vmem:[%s8479_s1 + $0xf0] sm:$0xff]   ;;  %v5871_v10 = vld [vmem:[%s8479_s1 + $0xe8] sm:$0xff]   ;;  %s5508_s29 = sshll.u32 %s8492_s21, 4  ;;  %1163 = vst [vmem:[#allocation2] sm:$0xff] %v6384_v50  ;;  %vm917_vm1 = vcmask 523264  }
   0xf   : > { %v5864_v3 = vld [vmem:[%s8479_s1 + $0x38] sm:$0xff]   ;;  %5549 = vmatprep.subr.bf16.mxu1 %v5863_v2  ;;  %v5868_v7 = vld [vmem:[%s8479_s1 + $0x30] sm:$0xff]   ;;  %v5872_v11 = vld [vmem:[%s8479_s1 + $0x28] sm:$0xff]   ;;  %s6561_s20 = scalar_lea.vmem %s8478_s0, %s5508_s29  ;;  %1164 = vst [vmem:[#allocation2 + $0x8] sm:$0xff] %v6384_v50  ;;  %vm1195_vm2 = vcmask 516096   ;;  %vm1248_vm3 = vcmask 1040896  }
  0x10   : > { %v5865_v4 = vld [vmem:[%s8479_s1 + $0xb8] sm:$0xff]   ;;  %5510 = vmatpush3.bf16.msra.mxu0 %v5864_v3  ;;  %v5869_v8 = vld [vmem:[%s8479_s1 + $0xb0] sm:$0xff]   ;;  %v5873_v12 = vld [vmem:[%s8479_s1 + $0xa8] sm:$0xff]   ;;  %1165 = vst [vmem:[#allocation2 + $0x10] sm:$0xff] %v6384_v50  ;;  %vm4818_vm14 = vcmask 1043456   ;;  %s8494_s24 = smov (!%p415_p4, %s6463_s24), 1 }
  0x11   : > { %5550 = vmatpush3.bf16.msra.mxu1 %v5865_v4  ;;  %5511 = vmatprep.subr.bf16.mxu0 %v5866_v5  ;;  %v5874_v13 = vld [vmem:[%s8479_s1 + $0x60] sm:$0xff]   ;;  %v5878_v17 = vld [vmem:[%s8479_s1 + $0x58] sm:$0xff]   ;;  %v5882_v21 = vld [vmem:[%s8479_s1 + $0x50] sm:$0xff]   ;;  %1166 = vst [vmem:[#allocation2 + $0x18] sm:$0xff] %v6384_v50 }
  0x12   : > { %5551 = vmatprep.subr.bf16.mxu1 %v5867_v6  ;;  %v5875_v14 = vld [vmem:[%s8479_s1 + $0xe0] sm:$0xff]   ;;  %v5879_v18 = vld [vmem:[%s8479_s1 + $0xd8] sm:$0xff]   ;;  %v5883_v22 = vld [vmem:[%s8479_s1 + $0xd0] sm:$0xff]   ;;  %1167 = vst [vmem:[#allocation2 + $0x20] sm:$0xff] %v6384_v50 }
  0x13   : > { %v5876_v15 = vld [vmem:[%s8479_s1 + $0x20] sm:$0xff]   ;;  %v5880_v19 = vld [vmem:[%s8479_s1 + $0x18] sm:$0xff]   ;;  %v5884_v23 = vld [vmem:[%s8479_s1 + $0x10] sm:$0xff]   ;;  %1168 = vst [vmem:[#allocation2 + $0x28] sm:$0xff] %v6384_v50 }
  0x14   : > { %5512 = vmatpush3.bf16.msra.mxu0 %v5868_v7  ;;  %v5877_v16 = vld [vmem:[%s8479_s1 + $0xa0] sm:$0xff]   ;;  %v5881_v20 = vld [vmem:[%s8479_s1 + $0x98] sm:$0xff]   ;;  %v5885_v24 = vld [vmem:[%s8479_s1 + $0x90] sm:$0xff]   ;;  %1169 = vst [vmem:[#allocation2 + $0x30] sm:$0xff] %v6384_v50 }
  0x15   : > { %5552 = vmatpush3.bf16.msra.mxu1 %v5869_v8  ;;  %5513 = vmatprep.subr.bf16.mxu0 %v5870_v9  ;;  %v5886_v25 = vld [vmem:[%s8479_s1 + $0x48] sm:$0xff]   ;;  %v5890_v29 = vld [vmem:[%s8479_s1 + $0x40] sm:$0xff]   ;;  %v916_v49 = vld [vmem:[%s8481_s3 + $0x38] sm:$0xff]  ;;  %1170 = vst [vmem:[#allocation2 + $0x38] sm:$0xff] %v6384_v50 }
  0x16   : > { %5553 = vmatprep.subr.bf16.mxu1 %v5871_v10  ;;  %v5887_v26 = vld [vmem:[%s8479_s1 + $0xc8] sm:$0xff]   ;;  %v5891_v30 = vld [vmem:[%s8479_s1 + $0xc0] sm:$0xff]   ;;  %1171 = vst [vmem:[#allocation2 + $0x40] sm:$0xff] %v6384_v50  ;;  %1172 = vst [vmem:[#allocation2 + $0x48] sm:$0xff] %v6384_v50 }
  0x17   : > { %v5888_v27 = vld [vmem:[%s8479_s1 + $0x8] sm:$0xff]   ;;  %v5892_v31 = vld [vmem:[%s8479_s1] sm:$0xff]   ;;  %1173 = vst [vmem:[#allocation2 + $0x50] sm:$0xff] %v6384_v50  ;;  %1174 = vst [vmem:[#allocation2 + $0x58] sm:$0xff] %v6384_v50 }
  0x18   : > { %5514 = vmatpush3.bf16.msra.mxu0 %v5872_v11  ;;  %v5889_v28 = vld [vmem:[%s8479_s1 + $0x88] sm:$0xff]   ;;  %v5893_v32 = vld [vmem:[%s8479_s1 + $0x80] sm:$0xff]   ;;  %1175 = vst [vmem:[#allocation2 + $0x60] sm:$0xff] %v6384_v50  ;;  %1176 = vst [vmem:[#allocation2 + $0x68] sm:$0xff] %v6384_v50 }
  0x19   : > { %5554 = vmatpush3.bf16.msra.mxu1 %v5873_v12  ;;  %5515 = vmatprep.subr.bf16.mxu0 %v5874_v13  ;;  %v5894_v33 = vld [vmem:[%s6561_s20] ss:$16 sps:$4 sm:$0xff]   ;;  %v5896_v34 = vld [vmem:[%s6561_s20 + $0x4] ss:$16 sps:$4 sm:$0xff]   ;;  %v5897_v35 = vld [vmem:[%s6561_s20 + $0x8] ss:$16 sps:$4 sm:$0xff]  }
  0x1a   : > { %5555 = vmatprep.subr.bf16.mxu1 %v5875_v14  ;;  %v5899_v36 = vld [vmem:[%s6561_s20 + $0xc] ss:$16 sps:$4 sm:$0xff]   ;;  %811 = vmatprep.mubr.bf16.mxu0 %v5896_v34  ;;  %v5900_v37 = vld [vmem:[%s6561_s20 + $0x24] ss:$16 sps:$4 sm:$0xff]   ;;  %v5904_v39 = vld [vmem:[%s6561_s20 + $0x20] ss:$16 sps:$4 sm:$0xff]  }
  0x1b   : > { %876 = vmatprep.mubr.bf16.mxu1 %v5899_v36  ;;  %v5902_v38 = vld [vmem:[%s6561_s20 + $0x2c] ss:$16 sps:$4 sm:$0xff]   ;;  %v5905_v40 = vld [vmem:[%s6561_s20 + $0x28] ss:$16 sps:$4 sm:$0xff]   ;;  %v5906_v41 = vld [vmem:[%s6561_s20 + $0x44] ss:$16 sps:$4 sm:$0xff]  }
  0x1c   : > { %5516 = vmatpush3.bf16.msra.mxu0 %v5876_v15  ;;  %v5908_v42 = vld [vmem:[%s6561_s20 + $0x4c] ss:$16 sps:$4 sm:$0xff]   ;;  %v5910_v43 = vld [vmem:[%s6561_s20 + $0x40] ss:$16 sps:$4 sm:$0xff]   ;;  %v5911_v44 = vld [vmem:[%s6561_s20 + $0x48] ss:$16 sps:$4 sm:$0xff]  }
  0x1d   : > { %5556 = vmatpush3.bf16.msra.mxu1 %v5877_v16  ;;  %5517 = vmatprep.subr.bf16.mxu0 %v5878_v17  ;;  %v5912_v45 = vld [vmem:[%s6561_s20 + $0x64] ss:$16 sps:$4 sm:$0xff]   ;;  %v5914_v46 = vld [vmem:[%s6561_s20 + $0x6c] ss:$16 sps:$4 sm:$0xff]   ;;  %v5916_v47 = vld [vmem:[%s6561_s20 + $0x60] ss:$16 sps:$4 sm:$0xff]  }
  0x1e   : > { %5557 = vmatprep.subr.bf16.mxu1 %v5879_v18  ;;  %v5917_v48 = vld [vmem:[%s6561_s20 + $0x68] ss:$16 sps:$4 sm:$0xff]   ;;  %1177 = vst [vmem:[#allocation2 + $0x70] sm:$0xff] %v6384_v50  ;;  %1178 = vst [vmem:[#allocation2 + $0x78] sm:$0xff] %v6384_v50  ;;  %v915_v51 = vld [vmem:[%s8481_s3 + $0x30] sm:$0xff]  ;;  %s5111_s20 = sshll.u32 %s8494_s24, 3 }
  0x1f   : > { %2627 = vst [vmem:[#allocation3] sm:$0xff] %v6384_v50  ;;  %2628 = vst [vmem:[#allocation3 + $0x8] sm:$0xff] %v6384_v50  ;;  %v914_v52 = vld [vmem:[%s8481_s3 + $0x28] sm:$0xff]  ;;  %v913_v53 = vld [vmem:[%s8481_s3 + $0x20] sm:$0xff]  ;;  %s418_s25 = scalar_lea.vmem %s8490_s12, %s5111_s20 }
  0x20   : > { %5518 = vmatpush3.bf16.msra.mxu0 %v5880_v19  ;;  %2629 = vst [vmem:[#allocation3 + $0x10] sm:$0xff] %v6384_v50  ;;  %2630 = vst [vmem:[#allocation3 + $0x18] sm:$0xff] %v6384_v50  ;;  %v912_v54 = vld [vmem:[%s8481_s3 + $0x18] sm:$0xff]  ;;  %v911_v55 = vld [vmem:[%s8481_s3 + $0x10] sm:$0xff] }
  0x21   : > { %5558 = vmatpush3.bf16.msra.mxu1 %v5881_v20  ;;  %5519 = vmatprep.subr.bf16.mxu0 %v5882_v21  ;;  %2631 = vst [vmem:[#allocation3 + $0x20] sm:$0xff] %v6384_v50  ;;  %2632 = vst [vmem:[#allocation3 + $0x28] sm:$0xff] %v6384_v50  ;;  %v910_v56 = vld [vmem:[%s8481_s3 + $0x8] sm:$0xff]  ;;  %v909_v57 = vld [vmem:[%s8481_s3] sm:$0xff] }
  0x22   : > { %5559 = vmatprep.subr.bf16.mxu1 %v5883_v22  ;;  %2633 = vst [vmem:[#allocation3 + $0x30] sm:$0xff] %v6384_v50  ;;  %2634 = vst [vmem:[#allocation3 + $0x38] sm:$0xff] %v6384_v50  ;;  %v5112_v9 = vld [vmem:[%s8480_s2] ss:$0 sm:$0xff] }
  0x23   : > { %2657 = vst [vmem:[#allocation3 + $0x2] sm:$0x1] %v6384_v50  ;;  %2749 = vst [vmem:[#allocation3 + $0x3a] sm:$0x1] %v6384_v50 }
  0x24   : > { %5520 = vmatpush3.bf16.msra.mxu0 %v5884_v23 }
  0x25   : > { %5560 = vmatpush3.bf16.msra.mxu1 %v5885_v24  ;;  %5521 = vmatprep.subr.bf16.mxu0 %v5886_v25 }
  0x26   : > { %5561 = vmatprep.subr.bf16.mxu1 %v5887_v26 }
  0x28   : > { %5522 = vmatpush3.bf16.msra.mxu0 %v5888_v27 }
  0x29   : > { %5562 = vmatpush3.bf16.msra.mxu1 %v5889_v28  ;;  %5523 = vmatprep.subr.bf16.mxu0 %v5890_v29 }
  0x2a   : > { %5563 = vmatprep.subr.bf16.mxu1 %v5891_v30 }
  0x2c   : > { %5524 = vmatpush3.bf16.msra.mxu0 %v5892_v31 }
  0x2d   : > { %5564 = vmatpush3.bf16.msra.mxu1 %v5893_v32  ;;  %5729 = vmatprep.subr.mxu0 %v6384_v50 }
  0x2e   : > { %5748 = vmatprep.subr.mxu1 %v6384_v50 }
  0x2f   : > { %812 = vmatmul.mubr.bf16.vlgmr.msra.gmra.mxu0 %v5894_v33 }
  0x30   : > { %877 = vmatmul.mubr.bf16.vlgmr.msra.gmra.mxu1 %v5897_v35  ;;  %819 = vmatprep.mubr.bf16.mxu0 %v5900_v37 }
  0x31   : > { %884 = vmatprep.mubr.bf16.mxu1 %v5902_v38  ;;  %5730 = vmatpush3.msra.mxu0 %v916_v49 }
  0x32   : > { %5749 = vmatpush3.msra.mxu1 %v916_v49  ;;  %5731 = vmatprep.subr.mxu0 %v6384_v50 }
  0x33   : > { %5750 = vmatprep.subr.mxu1 %v6384_v50  ;;  %5732 = vmatpush3.msra.mxu0 %v915_v51 }
  0x34   : > { %5751 = vmatpush3.msra.mxu1 %v915_v51  ;;  %5733 = vmatprep.subr.mxu0 %v6384_v50 }
  0x35   : > { %5752 = vmatprep.subr.mxu1 %v6384_v50  ;;  %5734 = vmatpush3.msra.mxu0 %v914_v52 }
  0x36   : > { %5753 = vmatpush3.msra.mxu1 %v914_v52  ;;  %5735 = vmatprep.subr.mxu0 %v6384_v50 }
  0x37   : > { %820 = vmatmul.mubr.bf16.gmra.mxu0 %v5904_v39  ;;  %5754 = vmatprep.subr.mxu1 %v6384_v50 }
  0x38   : > { %885 = vmatmul.mubr.bf16.gmra.mxu1 %v5905_v40  ;;  %827 = vmatprep.mubr.bf16.mxu0 %v5906_v41 }
  0x39   : > { %892 = vmatprep.mubr.bf16.mxu1 %v5908_v42  ;;  %5736 = vmatpush3.msra.mxu0 %v913_v53 }
  0x3a   : > { %5755 = vmatpush3.msra.mxu1 %v913_v53  ;;  %5737 = vmatprep.subr.mxu0 %v6384_v50 }
  0x3b   : > { %5756 = vmatprep.subr.mxu1 %v6384_v50  ;;  %5738 = vmatpush3.msra.mxu0 %v912_v54 }
  0x3c   : > { %5757 = vmatpush3.msra.mxu1 %v912_v54  ;;  %5739 = vmatprep.subr.mxu0 %v6384_v50 }
  0x3d   : > { %5758 = vmatprep.subr.mxu1 %v6384_v50  ;;  %5740 = vmatpush3.msra.mxu0 %v911_v55 }
  0x3e   : > { %5759 = vmatpush3.msra.mxu1 %v911_v55  ;;  %5741 = vmatprep.subr.mxu0 %v6384_v50 }
  0x3f   : > { %828 = vmatmul.mubr.bf16.gmra.mxu0 %v5910_v43  ;;  %5760 = vmatprep.subr.mxu1 %v6384_v50 }
  0x40   : > { %893 = vmatmul.mubr.bf16.gmra.mxu1 %v5911_v44  ;;  %835 = vmatprep.mubr.bf16.mxu0 %v5912_v45 }
  0x41   : > { %900 = vmatprep.mubr.bf16.mxu1 %v5914_v46  ;;  %5742 = vmatpush3.msra.mxu0 %v910_v56 }
  0x42   : > { %5761 = vmatpush3.msra.mxu1 %v910_v56  ;;  %5743 = vmatprep.subr.mxu0 %v6384_v50 }
  0x43   : > { %5744 = vmatpush3.msra.mxu0 %v909_v57  ;;  %5762 = vmatprep.subr.mxu1 %v6384_v50 }
  0x44   : > { %5763 = vmatpush3.msra.mxu1 %v909_v57 }
  0x47   : > { %836 = vmatmul.mubr.bf16.gmra.mxu0 %v5916_v47 }
  0x48   : > { %901 = vmatmul.mubr.bf16.gmra.mxu1 %v5917_v48  ;;  %5745 = vmatprep.mubr.msk.f32.mxu0 %vm6385_vm0, %v6384_v50 }
  0x49   : > { %5764 = vmatprep.mubr.msk.f32.mxu1 %vm6385_vm0, %v6384_v50 }
  0xef   : > { %v5525_v58 = vpop.f32.mrf.mxu0 }
  0xf0   : > { %v5565_v59 = vpop.f32.mrf.mxu1 }
  0xf1   : > { %v5526_v60 = vpop.f32.mrf.mxu0 }
  0xf2   : > { %v5566_v61 = vpop.f32.mrf.mxu1  ;;  %v5527_v7 = vadd.f32 %v5526_v60, %v5525_v58 }
  0xf3   : > { %v5528_v62 = vpop.f32.mrf.mxu0  ;;  %v5567_v21 = vadd.f32 %v5566_v61, %v5565_v59 }
  0xf4   : > { %v5568_v63 = vpop.f32.mrf.mxu1  ;;  %v814_v16 = vadd.f32 %v5527_v7, %v5112_v9 }
  0xf5   : > { %v5529_v0 = vpop.f32.mrf.mxu0 }
  0xf6   : > { %v5569_v1 = vpop.f32.mrf.mxu1  ;;  %v5530_v5 = vadd.f32 %v5529_v0, %v5528_v62  ;;  %v879_v28 = vadd.f32 %v5567_v21, %v814_v16 }
  0xf7   : > { %v5531_v2 = vpop.f32.mrf.mxu0  ;;  %v5570_v18 = vadd.f32 %v5569_v1, %v5568_v63 }
  0xf8   : > { %v5571_v3 = vpop.f32.mrf.mxu1  ;;  %v817_v13 = vadd.f32 %v5530_v5, %v5112_v9  ;;  %v918_v40 = vsel %vm917_vm1, %v879_v28, 0.0 }
  0xf9   : > { %v5532_v4 = vpop.f32.mrf.mxu0 }
  0xfa   : > { %v5572_v6 = vpop.f32.mrf.mxu1  ;;  %v5533_v10 = vadd.f32 %v5532_v4, %v5531_v2  ;;  %v6658_v23 = vadd.f32 %v5570_v18, %v817_v13  ;;  %v1012_v18 = vlaneseq }
  0xfb   : > { %v5534_v8 = vpop.f32.mrf.mxu0  ;;  %v5573_v24 = vadd.f32 %v5572_v6, %v5571_v3 }
  0xfc   : > { %v5574_v11 = vpop.f32.mrf.mxu1  ;;  %v822_v19 = vadd.f32 %v5533_v10, %v5112_v9  ;;  %v919_v35 = vsel %vm917_vm1, %v6658_v23, 0.0 }
  0xfd   : > { %v5535_v12 = vpop.f32.mrf.mxu0  ;;  %v920_v47 = vadd.f32 %v919_v35, %v918_v40 }
  0xfe   : > { %v5536_v14 = vadd.f32 %v5535_v12, %v5534_v8  ;;  %v5575_v15 = vpop.f32.mrf.mxu1  ;;  %v887_v30 = vadd.f32 %v5573_v24, %v822_v19  ;;  %v6670_v19 = vshrl.u32 %v1012_v18, 7 }
  0xff   : > { %v5537_v17 = vpop.f32.mrf.mxu0  ;;  %v5576_v31 = vadd.f32 %v5575_v15, %v5574_v11 }
 0x100   : > { %v5577_v20 = vpop.f32.mrf.mxu1  ;;  %v825_v25 = vadd.f32 %v5536_v14, %v5112_v9  ;;  %v921_v42 = vsel %vm917_vm1, %v887_v30, 0.0 }
 0x101   : > { %v5538_v22 = vpop.f32.mrf.mxu0  ;;  %v922_v54 = vadd.f32 %v921_v42, %v920_v47 }
 0x102   : > { %v5539_v26 = vadd.f32 %v5538_v22, %v5537_v17  ;;  %v5578_v27 = vpop.f32.mrf.mxu1  ;;  %v890_v36 = vadd.f32 %v5576_v31, %v825_v25 }
 0x103   : > { %v5540_v29 = vpop.f32.mrf.mxu0  ;;  %v5579_v37 = vadd.f32 %v5578_v27, %v5577_v20 }
 0x104   : > { %v830_v32 = vadd.f32 %v5539_v26, %v5112_v9  ;;  %v5580_v33 = vpop.f32.mrf.mxu1  ;;  %v923_v49 = vsel %vm917_vm1, %v890_v36, 0.0 }
 0x105   : > { %v5541_v34 = vpop.f32.mrf.mxu0  ;;  %v924_v60 = vadd.f32 %v923_v49, %v922_v54 }
 0x106   : > { %v5542_v38 = vadd.f32 %v5541_v34, %v5540_v29  ;;  %v5581_v39 = vpop.f32.mrf.mxu1  ;;  %v895_v43 = vadd.f32 %v5579_v37, %v830_v32 }
 0x107   : > { %v5543_v41 = vpop.f32.mrf.mxu0  ;;  %v5582_v45 = vadd.f32 %v5581_v39, %v5580_v33 }
 0x108   : > { %v833_v44 = vadd.f32 %v5542_v38, %v5112_v9  ;;  %v5583_v46 = vpop.f32.mrf.mxu1  ;;  %v925_v56 = vsel %vm917_vm1, %v895_v43, 0.0 }
 0x109   : > { %v5544_v48 = vpop.f32.mrf.mxu0  ;;  %v926_v2 = vadd.f32 %v925_v56, %v924_v60 }
 0x10a   : > { %v898_v51 = vadd.f32 %v5582_v45, %v833_v44  ;;  %v5545_v52 = vadd.f32 %v5544_v48, %v5543_v41  ;;  %v5584_v53 = vpop.f32.mrf.mxu1 }
 0x10b   : > { %v5546_v55 = vpop.f32.mrf.mxu0  ;;  %v5585_v58 = vadd.f32 %v5584_v53, %v5583_v46 }
 0x10c   : > { %v838_v57 = vadd.f32 %v5545_v52, %v5112_v9  ;;  %v5586_v59 = vpop.f32.mrf.mxu1  ;;  %v927_v62 = vsel %vm917_vm1, %v898_v51, 0.0 }
 0x10d   : > { %v5547_v61 = vpop.f32.mrf.mxu0  ;;  %v928_v6 = vadd.f32 %v927_v62, %v926_v2  ;;  %v5163_v62 = vrot.slane %v6384_v50, 10 }
 0x10e   : > { %v903_v63 = vadd.f32 %v5585_v58, %v838_v57  ;;  %v5548_v0 = vadd.f32 %v5547_v61, %v5546_v55  ;;  %v5587_v1 = vpop.f32.mrf.mxu1  ;;  %v1216_v61 = vcombine.high %v6384_v50, %v6384_v50 }
 0x10f   : > { %v5588_v5 = vadd.f32 %v5587_v1, %v5586_v59 }
 0x110   : > { %v929_v3 = vsel %vm917_vm1, %v903_v63, 0.0  ;;  %v841_v4 = vadd.f32 %v5548_v0, %v5112_v9  ;;  %v6673_v9 = vsub.s32 0, %v6670_v19  ;;  %v5850_v0 = vpack.i.bf16 %v5163_v62, %v6384_v50 }
 0x111   : > { %v930_v8 = vadd.f32 %v929_v3, %v928_v6  ;;  %v1329_v2 = vrot.slane %v1216_v61, 7  ;;  %v1220_v3 = vrot.slane %v1216_v61, 5  ;;  %v1183_v6 = vrot.slane %v6384_v50, 5 }
 0x112   : > { %v906_v7 = vadd.f32 %v5588_v5, %v841_v4  ;;  %5851 = vrot.lane.b32.xlu0 %v5850_v0, %s6386_s27 }
 0x113   : > { %v1330_v4 = vrot.slane %v1329_v2, 4  ;;  %v1221_v5 = vrot.slane %v1220_v3, 4 }
 0x114   : > { %v931_v10 = vsel %vm917_vm1, %v906_v7, 0.0 }
 0x115   : > { %v932_v11 = vadd.f32 %v931_v10, %v930_v8  ;;  %1341 = vst.msk [vmem:[#allocation2 + $0x7] sm:$0x1] %vm1195_vm2, %v1330_v4  ;;  %1662 = vst.msk [vmem:[#allocation2 + $0x7f] sm:$0x1] %vm1195_vm2, %v1330_v4  ;;  %v1184_v8 = vrot.slane %v1183_v6, 4 }
 0x116   : > { %1232 = vst.msk [vmem:[#allocation2 + $0x3] sm:$0x1] %vm1195_vm2, %v1221_v5  ;;  %1325 = vst.msk [vmem:[#allocation2 + $0x6] sm:$0x1] %vm1195_vm2, %v1221_v5 }
 0x117   : > { %v933_v12 = vrot.slane %v932_v11, 4  ;;  %1630 = vst.msk [vmem:[#allocation2 + $0x7b] sm:$0x1] %vm1195_vm2, %v1221_v5  ;;  %1658 = vst.msk [vmem:[#allocation2 + $0x7e] sm:$0x1] %vm1195_vm2, %v1221_v5 }
 0x118   : > { %1196 = vst.msk [vmem:[#allocation2 + $0x1] sm:$0x1] %vm1195_vm2, %v1184_v8  ;;  %1317 = vst.msk [vmem:[#allocation2 + $0x4] sm:$0x1] %vm1195_vm2, %v1184_v8 }
 0x119   : > { %v934_v13 = vadd.f32 %v933_v12, %v932_v11  ;;  %1622 = vst.msk [vmem:[#allocation2 + $0x79] sm:$0x1] %vm1195_vm2, %v1184_v8  ;;  %1650 = vst.msk [vmem:[#allocation2 + $0x7c] sm:$0x1] %vm1195_vm2, %v1184_v8 }
 0x11b   : > { %v935_v14 = vrot.slane %v934_v13, 2 }
 0x11d   : > { %v936_v15 = vadd.f32 %v935_v14, %v934_v13 }
 0x11f   : > { %v937_v16 = vrot.slane %v936_v15, 1 }
 0x121   : > { %v938_v17 = vadd.f32 %v937_v16, %v936_v15 }
 0x123   : > { %5746 = vmatmul.mubr.msk.f32.vlgmr.msra.gmra.mxu0 %vm917_vm1, %v938_v17 }
 0x184   : > { %v5852_v13 = vpop.permute.xlu0 %5851 }
 0x185   : > { %v5854_v14 = vunpack.i.h.bf16 %v5852_v13  ;;  %v5853_v15 = vunpack.i.l.bf16 %v5852_v13  ;;  %v5919_v13 = vld [vmem:[%s8482_s4 + $0x38] sm:$0xff]  }
 0x187   : > { %1249 = vst.msk [vmem:[#allocation2] sm:$0x1] %vm1248_vm3, %v5853_v15  ;;  %1273 = vst.msk [vmem:[#allocation2 + $0x1] sm:$0x1] %vm1248_vm3, %v5854_v14 }
 0x188   : > { %1345 = vst.msk [vmem:[#allocation2 + $0x4] sm:$0x1] %vm1248_vm3, %v5854_v14  ;;  %1634 = vst.msk [vmem:[#allocation2 + $0x78] sm:$0x1] %vm1248_vm3, %v5853_v15 }
 0x189   : > { %1638 = vst.msk [vmem:[#allocation2 + $0x79] sm:$0x1] %vm1248_vm3, %v5854_v14  ;;  %1666 = vst.msk [vmem:[#allocation2 + $0x7c] sm:$0x1] %vm1248_vm3, %v5854_v14 }
 0x1e3   : > { %v1008_v20 = vpop.f32.mrf.mxu0 }
 0x1e4   : > { %v1015_v21 = vrot.slane %v1008_v20, %v6673_v9 }
 0x1e5   : > { %v5747_v22 = vpop.f32.mrf.mxu0 }
 0x1e6   : > { %v6676_v24 = vsub.f32 %v879_v28, %v1015_v21  ;;  %v6679_v25 = vsub.f32 %v6658_v23, %v1015_v21  ;;  %v6681_v26 = vsub.f32 %v887_v30, %v1015_v21  ;;  %v6683_v27 = vsub.f32 %v890_v36, %v1015_v21 }
 0x1e7   : > { %v6685_v29 = vsub.f32 %v895_v43, %v1015_v21  ;;  %v6693_v28 = vsub.f32 %v898_v51, %v1015_v21  ;;  %v6699_v36 = vsub.f32 %v903_v63, %v1015_v21  ;;  %v6704_v40 = vsub.f32 %v906_v7, %v1015_v21 }
 0x1e8   : > { %v1024_v31 = vmul.f32 %v6676_v24, %v6676_v24  ;;  %v1025_v32 = vmul.f32 %v6679_v25, %v6679_v25  ;;  %v1026_v33 = vmul.f32 %v6681_v26, %v6681_v26  ;;  %v1027_v23 = vmul.f32 %v6683_v27, %v6683_v27 }
 0x1e9   : > { %v1028_v37 = vmul.f32 %v6685_v29, %v6685_v29  ;;  %v1029_v41 = vmul.f32 %v6693_v28, %v6693_v28  ;;  %v1030_v44 = vmul.f32 %v6699_v36, %v6699_v36  ;;  %v1031_v47 = vmul.f32 %v6704_v40, %v6704_v40 }
 0x1ea   : > { %v1032_v30 = vsel %vm917_vm1, %v1024_v31, 0.0  ;;  %v1033_v34 = vsel %vm917_vm1, %v1025_v32, 0.0  ;;  %v1035_v38 = vsel %vm917_vm1, %v1026_v33, 0.0  ;;  %v1037_v42 = vsel %vm917_vm1, %v1027_v23, 0.0 }
 0x1eb   : > { %v1034_v35 = vadd.f32 %v1033_v34, %v1032_v30  ;;  %v1039_v45 = vsel %vm917_vm1, %v1028_v37, 0.0  ;;  %v1041_v48 = vsel %vm917_vm1, %v1029_v41, 0.0  ;;  %v1043_v51 = vsel %vm917_vm1, %v1030_v44, 0.0 }
 0x1ec   : > { %v1045_v53 = vsel %vm917_vm1, %v1031_v47, 0.0  ;;  %v5167_v63 = vrot.slane %v1216_v61, 10  ;;  %v1200_v7 = vrot.slane %v6384_v50, 7 }
 0x1ed   : > { %v1036_v39 = vadd.f32 %v1035_v38, %v1034_v35 }
 0x1ee   : > { %v5855_v1 = vpack.i.bf16 %v5167_v63, %v1216_v61  ;;  %v1201_v10 = vrot.slane %v1200_v7, 4 }
 0x1ef   : > { %v1038_v43 = vadd.f32 %v1037_v42, %v1036_v39 }
 0x1f0   : > { %5856 = vrot.lane.b32.xlu1 %v5855_v1, %s6386_s27  ;;  %1212 = vst.msk [vmem:[#allocation2 + $0x2] sm:$0x1] %vm1195_vm2, %v1201_v10  ;;  %1321 = vst.msk [vmem:[#allocation2 + $0x5] sm:$0x1] %vm1195_vm2, %v1201_v10 }
 0x1f1   : > { %v1040_v46 = vadd.f32 %v1039_v45, %v1038_v43  ;;  %1626 = vst.msk [vmem:[#allocation2 + $0x7a] sm:$0x1] %vm1195_vm2, %v1201_v10  ;;  %1654 = vst.msk [vmem:[#allocation2 + $0x7d] sm:$0x1] %vm1195_vm2, %v1201_v10 }
 0x1f3   : > { %v1042_v49 = vadd.f32 %v1041_v48, %v1040_v46 }
 0x1f5   : > { %v1044_v52 = vadd.f32 %v1043_v51, %v1042_v49 }
 0x1f7   : > { %v1046_v54 = vadd.f32 %v1045_v53, %v1044_v52 }
 0x1f9   : > { %v1047_v55 = vrot.slane %v1046_v54, 4 }
 0x1fb   : > { %v1048_v56 = vadd.f32 %v1047_v55, %v1046_v54 }
 0x1fd   : > { %v1049_v57 = vrot.slane %v1048_v56, 2 }
 0x1ff   : > { %v1050_v58 = vadd.f32 %v1049_v57, %v1048_v56 }
 0x201   : > { %v1051_v59 = vrot.slane %v1050_v58, 1 }
 0x203   : > { %v1052_v60 = vadd.f32 %v1051_v59, %v1050_v58 }
 0x205   : > { %5765 = vmatmul.mubr.msk.f32.vlgmr.msra.gmra.mxu1 %vm917_vm1, %v1052_v60 }
 0x262   : > { %v5857_v16 = vpop.permute.xlu1 %5856 }
 0x263   : > { %v5859_v17 = vunpack.i.h.bf16 %v5857_v16  ;;  %v5858_v18 = vunpack.i.l.bf16 %v5857_v16 }
 0x265   : > { %1289 = vst.msk [vmem:[#allocation2 + $0x2] sm:$0x1] %vm1248_vm3, %v5858_v18  ;;  %1313 = vst.msk [vmem:[#allocation2 + $0x3] sm:$0x1] %vm1248_vm3, %v5859_v17 }
 0x266   : > { %1349 = vst.msk [vmem:[#allocation2 + $0x5] sm:$0x1] %vm1248_vm3, %v5858_v18  ;;  %1353 = vst.msk [vmem:[#allocation2 + $0x6] sm:$0x1] %vm1248_vm3, %v5859_v17 }
 0x267   : > { %1642 = vst.msk [vmem:[#allocation2 + $0x7a] sm:$0x1] %vm1248_vm3, %v5858_v18  ;;  %1646 = vst.msk [vmem:[#allocation2 + $0x7b] sm:$0x1] %vm1248_vm3, %v5859_v17 }
 0x268   : > { %1670 = vst.msk [vmem:[#allocation2 + $0x7d] sm:$0x1] %vm1248_vm3, %v5858_v18  ;;  %1674 = vst.msk [vmem:[#allocation2 + $0x7e] sm:$0x1] %vm1248_vm3, %v5859_v17 }
 0x2c5   : > { %v1122_v11 = vpop.f32.mrf.mxu1 }
 0x2c6   : > { %v1123_v50 = vadd.f32 1e-05, %v1122_v11 }
 0x2c7   : > { %v5766_v12 = vpop.f32.mrf.mxu1 }
 0x2c8   : > { %6367 = vrsqrt.f32 %v1123_v50  ;;  %v5918_v12 = vld [vmem:[%s8482_s4 + $0x78] sm:$0xff]  }
 0x2c9   : > { %5607 = vmatprep.subr.bf16.mxu0 %v5918_v12 }
 0x2ca   : > { %5608 = vmatpush3.bf16.msra.mxu0 %v5919_v13 }
 0x2d5   : > { %v6368_v20 = vpop.eup %6367 }
 0x2d6   : > { %v6755_v21 = vrot.slane %v6368_v20, %v6673_v9 }
 0x2d8   : > { %v1134_v22 = vmul.f32 %v6755_v21, %v6683_v27  ;;  %v1132_v31 = vmul.f32 %v6755_v21, %v6679_v25  ;;  %v1136_v32 = vmul.f32 %v6755_v21, %v6693_v28  ;;  %v1131_v33 = vmul.f32 %v6755_v21, %v6676_v24 }
 0x2d9   : > { %v1133_v23 = vmul.f32 %v6755_v21, %v6681_v26  ;;  %v1135_v30 = vmul.f32 %v6755_v21, %v6685_v29  ;;  %v1137_v34 = vmul.f32 %v6755_v21, %v6699_v36 }
 0x2da   : > { %vm1142_vm4 = vcmp.ge.f32.partialorder %v1134_v22, 0.0  ;;  %v1150_v27 = vmul.f32 0.2, %v1134_v22  ;;  %vm1140_vm5 = vcmp.ge.f32.partialorder %v1132_v31, 0.0  ;;  %v1148_v35 = vmul.f32 0.2, %v1132_v31 }
 0x2db   : > { %vm1144_vm6 = vcmp.ge.f32.partialorder %v1136_v32, 0.0  ;;  %v1152_v25 = vmul.f32 0.2, %v1136_v32  ;;  %vm1139_vm7 = vcmp.ge.f32.partialorder %v1131_v33, 0.0  ;;  %v1147_v28 = vmul.f32 0.2, %v1131_v33 }
 0x2dc   : > { %v6771_v37 = vsel %vm1142_vm4, %v1134_v22, %v1150_v27  ;;  %v6773_v24 = vsel %vm1140_vm5, %v1132_v31, %v1148_v35  ;;  %vm1141_vm8 = vcmp.ge.f32.partialorder %v1133_v23, 0.0  ;;  %v1149_v26 = vmul.f32 0.2, %v1133_v23  ;;  %v5920_v27 = vld [vmem:[%s8482_s4 + $0x70] sm:$0xff]  }
 0x2dd   : > { %1240 = vrot.lane.b32.xlu1 %v6771_v37, %s6386_s27  ;;  %v1187_v29 = vrot.slane %v6771_v37, 5  ;;  %v1204_v36 = vrot.slane %v6771_v37, 7  ;;  %1238 = vrot.lane.b32.xlu0 %v6773_v24, %s6386_s27  ;;  %v1185_v38 = vrot.slane %v6773_v24, 5  ;;  %v1202_v39 = vrot.slane %v6773_v24, 7  ;;  %v5921_v35 = vld [vmem:[%s8482_s4 + $0x30] sm:$0xff]  }
 0x2de   : > { %v6783_v41 = vsel %vm1144_vm6, %v1136_v32, %v1152_v25  ;;  %v6785_v42 = vsel %vm1139_vm7, %v1131_v33, %v1147_v28  ;;  %v6787_v43 = vsel %vm1141_vm8, %v1133_v23, %v1149_v26  ;;  %vm1143_vm9 = vcmp.ge.f32.partialorder %v1135_v30, 0.0  ;;  %5609 = vmatprep.subr.bf16.mxu0 %v5920_v27  ;;  %v5941_v27 = vld [vmem:[%s8482_s4 + $0x98] sm:$0xff]  }
 0x2df   : > { %v1188_v44 = vrot.slane %v1187_v29, 4  ;;  %v1205_v45 = vrot.slane %v1204_v36, 4  ;;  %v1186_v46 = vrot.slane %v1185_v38, 4  ;;  %v1203_v47 = vrot.slane %v1202_v39, 4  ;;  %5610 = vmatpush3.bf16.msra.mxu0 %v5921_v35 }
 0x2e0   : > { %v1189_v48 = vrot.slane %v6783_v41, 5  ;;  %v1206_v49 = vrot.slane %v6783_v41, 7  ;;  %v1363_v51 = vrot.slane %v6787_v43, 5  ;;  %v1379_v52 = vrot.slane %v6787_v43, 7 }
 0x2e1   : > { %1242 = vrot.lane.b32.xlu1 %v6783_v41, %s6386_s27  ;;  %1413 = vrot.lane.b32.xlu0 %v6785_v42, %s6386_s27  ;;  %v1151_v53 = vmul.f32 0.2, %v1135_v30  ;;  %vm1145_vm10 = vcmp.ge.f32.partialorder %v1137_v34, 0.0  ;;  %v1153_v54 = vmul.f32 0.2, %v1137_v34  ;;  %v6845_v1 = vcombine.high %v6771_v37, %v6771_v37 }
 0x2e2   : > { %1197 = vst.msk [vmem:[#allocation2 + $0x21] sm:$0x1] %vm1195_vm2, %v1186_v46  ;;  %1198 = vst.msk [vmem:[#allocation2 + $0x41] sm:$0x1] %vm1195_vm2, %v1188_v44  ;;  %v1190_v55 = vrot.slane %v1189_v48, 4  ;;  %v1207_v56 = vrot.slane %v1206_v49, 4  ;;  %v6849_v2 = vcombine.high %v6773_v24, %v6773_v24  ;;  %v6853_v3 = vcombine.high %v6783_v41, %v6783_v41 }
 0x2e3   : > { %1213 = vst.msk [vmem:[#allocation2 + $0x22] sm:$0x1] %vm1195_vm2, %v1203_v47  ;;  %1214 = vst.msk [vmem:[#allocation2 + $0x42] sm:$0x1] %vm1195_vm2, %v1205_v45  ;;  %v1364_v57 = vrot.slane %v1363_v51, 4  ;;  %v1380_v58 = vrot.slane %v1379_v52, 4  ;;  %v6814_v59 = vsel %vm1143_vm9, %v1135_v30, %v1151_v53  ;;  %v6817_v60 = vsel %vm1145_vm10, %v1137_v34, %v1153_v54 }
 0x2e4   : > { %1318 = vst.msk [vmem:[#allocation2 + $0x24] sm:$0x1] %vm1195_vm2, %v1186_v46  ;;  %1319 = vst.msk [vmem:[#allocation2 + $0x44] sm:$0x1] %vm1195_vm2, %v1188_v44  ;;  %v1365_v61 = vrot.slane %v6814_v59, 5  ;;  %v1381_v62 = vrot.slane %v6814_v59, 7  ;;  %v6886_v16 = vcombine.high %v6787_v43, %v6787_v43  ;;  %v6890_v18 = vcombine.high %v6817_v60, %v6817_v60 }
 0x2e5   : > { %1322 = vst.msk [vmem:[#allocation2 + $0x25] sm:$0x1] %vm1195_vm2, %v1203_v47  ;;  %1323 = vst.msk [vmem:[#allocation2 + $0x45] sm:$0x1] %vm1195_vm2, %v1205_v45  ;;  %v1367_v63 = vrot.slane %v6817_v60, 5  ;;  %v1383_v0 = vrot.slane %v6817_v60, 7  ;;  %1415 = vrot.lane.b32.xlu1 %v6787_v43, %s6386_s27  ;;  %1417 = vrot.lane.b32.xlu0 %v6814_v59, %s6386_s27  ;;  %v6894_v20 = vcombine.high %v6785_v42, %v6785_v42 }
 0x2e6   : > { %1537 = vst.msk [vmem:[#allocation2 + $0x11] sm:$0x1] %vm1195_vm2, %v1186_v46  ;;  %1538 = vst.msk [vmem:[#allocation2 + $0x31] sm:$0x1] %vm1195_vm2, %v1188_v44  ;;  %v1366_v4 = vrot.slane %v1365_v61, 4  ;;  %v1382_v5 = vrot.slane %v1381_v62, 4  ;;  %v1138_v22 = vmul.f32 %v6755_v21, %v6704_v40  ;;  %v6903_v23 = vcombine.high %v6814_v59, %v6814_v59 }
 0x2e7   : > { %1544 = vst.msk [vmem:[#allocation2 + $0x12] sm:$0x1] %vm1195_vm2, %v1203_v47  ;;  %1545 = vst.msk [vmem:[#allocation2 + $0x32] sm:$0x1] %vm1195_vm2, %v1205_v45  ;;  %v1368_v6 = vrot.slane %v1367_v63, 4  ;;  %v1384_v7 = vrot.slane %v1383_v0, 4 }
 0x2e8   : > { %1588 = vst.msk [vmem:[#allocation2 + $0x14] sm:$0x1] %vm1195_vm2, %v1186_v46  ;;  %1589 = vst.msk [vmem:[#allocation2 + $0x34] sm:$0x1] %vm1195_vm2, %v1188_v44  ;;  %v5164_v8 = vrot.slane %v6773_v24, 10  ;;  %v1333_v10 = vrot.slane %v6845_v1, 7 }
 0x2e9   : > { %1592 = vst.msk [vmem:[#allocation2 + $0x15] sm:$0x1] %vm1195_vm2, %v1203_v47  ;;  %1593 = vst.msk [vmem:[#allocation2 + $0x35] sm:$0x1] %vm1195_vm2, %v1205_v45  ;;  %v1331_v11 = vrot.slane %v6849_v2, 7  ;;  %v1335_v50 = vrot.slane %v6853_v3, 7  ;;  %1419 = vrot.lane.b32.xlu1 %v6817_v60, %s6386_s27 }
 0x2ea   : > { %1199 = vst.msk [vmem:[#allocation2 + $0x61] sm:$0x1] %vm1195_vm2, %v1190_v55  ;;  %1215 = vst.msk [vmem:[#allocation2 + $0x62] sm:$0x1] %vm1195_vm2, %v1207_v56  ;;  %1263 = vrot.lane.b32.xlu0 %v5164_v8, %s6386_s27  ;;  %v1334_v14 = vrot.slane %v1333_v10, 4  ;;  %v5165_v31 = vrot.slane %v6771_v37, 10 }
 0x2eb   : > { %1320 = vst.msk [vmem:[#allocation2 + $0x64] sm:$0x1] %vm1195_vm2, %v1190_v55  ;;  %1324 = vst.msk [vmem:[#allocation2 + $0x65] sm:$0x1] %vm1195_vm2, %v1207_v56  ;;  %v1332_v15 = vrot.slane %v1331_v11, 4  ;;  %v1336_v17 = vrot.slane %v1335_v50, 4 }
 0x2ec   : > { %1374 = vst.msk [vmem:[#allocation2 + $0x29] sm:$0x1] %vm1195_vm2, %v1364_v57  ;;  %1390 = vst.msk [vmem:[#allocation2 + $0x2a] sm:$0x1] %vm1195_vm2, %v1380_v58  ;;  %v5166_v32 = vrot.slane %v6783_v41, 10  ;;  %v1507_v33 = vrot.slane %v6886_v16, 7 }
 0x2ed   : > { %1494 = vst.msk [vmem:[#allocation2 + $0x2c] sm:$0x1] %vm1195_vm2, %v1364_v57  ;;  %1498 = vst.msk [vmem:[#allocation2 + $0x2d] sm:$0x1] %vm1195_vm2, %v1380_v58  ;;  %v1222_v40 = vrot.slane %v6849_v2, 5  ;;  %v1226_v21 = vrot.slane %v6853_v3, 5  ;;  %1265 = vrot.lane.b32.xlu1 %v5165_v31, %s6386_s27 }
 0x2ee   : > { %1539 = vst.msk [vmem:[#allocation2 + $0x51] sm:$0x1] %vm1195_vm2, %v1190_v55  ;;  %1546 = vst.msk [vmem:[#allocation2 + $0x52] sm:$0x1] %vm1195_vm2, %v1207_v56  ;;  %v1511_v30 = vrot.slane %v6890_v18, 7  ;;  %v5179_v34 = vrot.slane %v6894_v20, 11  ;;  %1267 = vrot.lane.b32.xlu0 %v5166_v32, %s6386_s27 }
 0x2ef   : > { %1590 = vst.msk [vmem:[#allocation2 + $0x54] sm:$0x1] %vm1195_vm2, %v1190_v55  ;;  %1594 = vst.msk [vmem:[#allocation2 + $0x55] sm:$0x1] %vm1195_vm2, %v1207_v56  ;;  %v1224_v25 = vrot.slane %v6845_v1, 5  ;;  %v1399_v28 = vrot.slane %v6886_v16, 5 }
 0x2f0   : > { %1619 = vst.msk [vmem:[#allocation2 + $0x19] sm:$0x1] %vm1195_vm2, %v1364_v57  ;;  %1623 = vst.msk [vmem:[#allocation2 + $0x1a] sm:$0x1] %vm1195_vm2, %v1380_v58  ;;  %v1508_v37 = vrot.slane %v1507_v33, 4  ;;  %v1509_v24 = vrot.slane %v6903_v23, 7 }
 0x2f1   : > { %1647 = vst.msk [vmem:[#allocation2 + $0x1c] sm:$0x1] %vm1195_vm2, %v1364_v57  ;;  %1651 = vst.msk [vmem:[#allocation2 + $0x1d] sm:$0x1] %vm1195_vm2, %v1380_v58  ;;  %v1403_v26 = vrot.slane %v6890_v18, 5  ;;  %v1512_v29 = vrot.slane %v1511_v30, 4  ;;  %1281 = vrot.lane.b32.xlu1 %v6845_v1, %s6386_s27 }
 0x2f2   : > { %1375 = vst.msk [vmem:[#allocation2 + $0x49] sm:$0x1] %vm1195_vm2, %v1366_v4  ;;  %1376 = vst.msk [vmem:[#allocation2 + $0x69] sm:$0x1] %vm1195_vm2, %v1368_v6  ;;  %v1401_v36 = vrot.slane %v6903_v23, 5  ;;  %v1510_v38 = vrot.slane %v1509_v24, 4  ;;  %1279 = vrot.lane.b32.xlu0 %v6849_v2, %s6386_s27 }
 0x2f3   : > { %1391 = vst.msk [vmem:[#allocation2 + $0x4a] sm:$0x1] %vm1195_vm2, %v1382_v5  ;;  %1392 = vst.msk [vmem:[#allocation2 + $0x6a] sm:$0x1] %vm1195_vm2, %v1384_v7  ;;  %vm1146_vm11 = vcmp.ge.f32.partialorder %v1138_v22, 0.0  ;;  %v1361_v41 = vrot.slane %v6785_v42, 5 }
 0x2f4   : > { %1495 = vst.msk [vmem:[#allocation2 + $0x4c] sm:$0x1] %vm1195_vm2, %v1366_v4  ;;  %1496 = vst.msk [vmem:[#allocation2 + $0x6c] sm:$0x1] %vm1195_vm2, %v1368_v6  ;;  %v1154_v39 = vmul.f32 0.2, %v1138_v22 }
 0x2f5   : > { %1499 = vst.msk [vmem:[#allocation2 + $0x4d] sm:$0x1] %vm1195_vm2, %v1382_v5  ;;  %1500 = vst.msk [vmem:[#allocation2 + $0x6d] sm:$0x1] %vm1195_vm2, %v1384_v7  ;;  %v5922_v44 = vld [vmem:[%s8482_s4 + $0x68] sm:$0xff]   ;;  %v5923_v45 = vld [vmem:[%s8482_s4 + $0xf8] sm:$0xff]  }
 0x2f6   : > { %1620 = vst.msk [vmem:[#allocation2 + $0x39] sm:$0x1] %vm1195_vm2, %v1366_v4  ;;  %1621 = vst.msk [vmem:[#allocation2 + $0x59] sm:$0x1] %vm1195_vm2, %v1368_v6  ;;  %v5924_v46 = vld [vmem:[%s8482_s4 + $0x28] sm:$0xff]   ;;  %v1377_v47 = vrot.slane %v6785_v42, 7  ;;  %v6949_v51 = vsel %vm1146_vm11, %v1138_v22, %v1154_v39  ;;  %5611 = vmatprep.subr.bf16.mxu0 %v5922_v44  ;;  %5629 = vmatprep.subr.bf16.mxu1 %v5923_v45 }
 0x2f7   : > { %1624 = vst.msk [vmem:[#allocation2 + $0x3a] sm:$0x1] %vm1195_vm2, %v1382_v5  ;;  %1625 = vst.msk [vmem:[#allocation2 + $0x5a] sm:$0x1] %vm1195_vm2, %v1384_v7  ;;  %v1223_v48 = vrot.slane %v1222_v40, 4  ;;  %v1227_v49 = vrot.slane %v1226_v21, 4  ;;  %v6959_v57 = vcombine.high %v6949_v51, %v6949_v51  ;;  %5612 = vmatpush3.bf16.msra.mxu0 %v5924_v46  ;;  %1283 = vrot.lane.b32.xlu0 %v6853_v3, %s6386_s27 }
 0x2f8   : > { %1648 = vst.msk [vmem:[#allocation2 + $0x3c] sm:$0x1] %vm1195_vm2, %v1366_v4  ;;  %1649 = vst.msk [vmem:[#allocation2 + $0x5c] sm:$0x1] %vm1195_vm2, %v1368_v6  ;;  %v1362_v52 = vrot.slane %v1361_v41, 4  ;;  %v5925_v53 = vld [vmem:[%s8482_s4 + $0xb8] sm:$0xff]  }
 0x2f9   : > { %1652 = vst.msk [vmem:[#allocation2 + $0x3d] sm:$0x1] %vm1195_vm2, %v1382_v5  ;;  %1653 = vst.msk [vmem:[#allocation2 + $0x5d] sm:$0x1] %vm1195_vm2, %v1384_v7  ;;  %v1225_v54 = vrot.slane %v1224_v25, 4  ;;  %v1400_v55 = vrot.slane %v1399_v28, 4  ;;  %5630 = vmatpush3.bf16.msra.mxu1 %v5925_v53 }
 0x2fa   : > { %1342 = vst.msk [vmem:[#allocation2 + $0x27] sm:$0x1] %vm1195_vm2, %v1332_v15  ;;  %1343 = vst.msk [vmem:[#allocation2 + $0x47] sm:$0x1] %vm1195_vm2, %v1334_v14  ;;  %v5172_v56 = vrot.slane %v6787_v43, 10  ;;  %v1378_v58 = vrot.slane %v1377_v47, 4 }
 0x2fb   : > { %1603 = vst.msk [vmem:[#allocation2 + $0x17] sm:$0x1] %vm1195_vm2, %v1332_v15  ;;  %1604 = vst.msk [vmem:[#allocation2 + $0x37] sm:$0x1] %vm1195_vm2, %v1334_v14  ;;  %v1397_v43 = vrot.slane %v6894_v20, 5  ;;  %v1404_v61 = vrot.slane %v1403_v26, 4 }
 0x2fc   : > { %1344 = vst.msk [vmem:[#allocation2 + $0x67] sm:$0x1] %vm1195_vm2, %v1336_v17  ;;  %1605 = vst.msk [vmem:[#allocation2 + $0x57] sm:$0x1] %vm1195_vm2, %v1336_v17  ;;  %v1402_v62 = vrot.slane %v1401_v36, 4  ;;  %v1534_v63 = vrot.slane %v6949_v51, 5  ;;  %1439 = vrot.lane.b32.xlu1 %v5172_v56, %s6386_s27 }
 0x2fd   : > { %1517 = vst.msk [vmem:[#allocation2 + $0xf] sm:$0x1] %vm1195_vm2, %v5179_v34  ;;  %1518 = vst.msk [vmem:[#allocation2 + $0x2f] sm:$0x1] %vm1195_vm2, %v1508_v37  ;;  %v1541_v0 = vrot.slane %v6949_v51, 7  ;;  %v5182_v4 = vrot.slane %v6959_v57, 11 }
 0x2fe   : > { %1659 = vst.msk [vmem:[#allocation2 + $0x1f] sm:$0x1] %vm1195_vm2, %v1508_v37  ;;  %1520 = vst.msk [vmem:[#allocation2 + $0x6f] sm:$0x1] %vm1195_vm2, %v1512_v29  ;;  %v5926_v5 = vld [vmem:[%s8482_s4 + $0x60] sm:$0xff]   ;;  %v5927_v6 = vld [vmem:[%s8482_s4 + $0xf0] sm:$0xff]  }
 0x2ff   : > { %1661 = vst.msk [vmem:[#allocation2 + $0x5f] sm:$0x1] %vm1195_vm2, %v1512_v29  ;;  %1519 = vst.msk [vmem:[#allocation2 + $0x4f] sm:$0x1] %vm1195_vm2, %v1510_v38  ;;  %v5928_v7 = vld [vmem:[%s8482_s4 + $0x20] sm:$0xff]   ;;  %v1398_v8 = vrot.slane %v1397_v43, 4  ;;  %5613 = vmatprep.subr.bf16.mxu0 %v5926_v5  ;;  %5631 = vmatprep.subr.bf16.mxu1 %v5927_v6 }
 0x300   : > { %1660 = vst.msk [vmem:[#allocation2 + $0x3f] sm:$0x1] %vm1195_vm2, %v1510_v38  ;;  %1233 = vst.msk [vmem:[#allocation2 + $0x23] sm:$0x1] %vm1195_vm2, %v1223_v48  ;;  %v5929_v10 = vld [vmem:[%s8482_s4 + $0xb0] sm:$0xff]   ;;  %v1535_v11 = vrot.slane %v1534_v63, 4  ;;  %5614 = vmatpush3.bf16.msra.mxu0 %v5928_v7 }
 0x301   : > { %1326 = vst.msk [vmem:[#allocation2 + $0x26] sm:$0x1] %vm1195_vm2, %v1223_v48  ;;  %1552 = vst.msk [vmem:[#allocation2 + $0x13] sm:$0x1] %vm1195_vm2, %v1223_v48  ;;  %v1549_v50 = vrot.slane %v6959_v57, 5  ;;  %v1542_v12 = vrot.slane %v1541_v0, 4  ;;  %5632 = vmatpush3.bf16.msra.mxu1 %v5929_v10 }
 0x302   : > { %1596 = vst.msk [vmem:[#allocation2 + $0x16] sm:$0x1] %vm1195_vm2, %v1223_v48  ;;  %1235 = vst.msk [vmem:[#allocation2 + $0x63] sm:$0x1] %vm1195_vm2, %v1227_v49  ;;  %v5174_v13 = vrot.slane %v6817_v60, 10  ;;  %v5171_v14 = vrot.slane %v6785_v42, 10 }
 0x303   : > { %1328 = vst.msk [vmem:[#allocation2 + $0x66] sm:$0x1] %vm1195_vm2, %v1227_v49  ;;  %1554 = vst.msk [vmem:[#allocation2 + $0x53] sm:$0x1] %vm1195_vm2, %v1227_v49  ;;  %v1550_v15 = vrot.slane %v1549_v50, 4  ;;  %v5930_v17 = vld [vmem:[%s8482_s4 + $0x58] sm:$0xff]  }
 0x304   : > { %1598 = vst.msk [vmem:[#allocation2 + $0x56] sm:$0x1] %vm1195_vm2, %v1227_v49  ;;  %1373 = vst.msk [vmem:[#allocation2 + $0x9] sm:$0x1] %vm1195_vm2, %v1362_v52  ;;  %v5931_v60 = vld [vmem:[%s8482_s4 + $0xe8] sm:$0xff]   ;;  %v5932_v42 = vld [vmem:[%s8482_s4 + $0x18] sm:$0xff]   ;;  %1443 = vrot.lane.b32.xlu1 %v5174_v13, %s6386_s27  ;;  %1437 = vrot.lane.b32.xlu0 %v5171_v14, %s6386_s27 }
 0x305   : > { %1493 = vst.msk [vmem:[#allocation2 + $0xc] sm:$0x1] %vm1195_vm2, %v1362_v52  ;;  %1234 = vst.msk [vmem:[#allocation2 + $0x43] sm:$0x1] %vm1195_vm2, %v1225_v54  ;;  %v5933_v22 = vld [vmem:[%s8482_s4 + $0xa8] sm:$0xff]   ;;  %5615 = vmatprep.subr.bf16.mxu0 %v5930_v17  ;;  %5633 = vmatprep.subr.bf16.mxu1 %v5931_v60  ;;  %v5173_v31 = vrot.slane %v6814_v59, 10 }
 0x306   : > { %1327 = vst.msk [vmem:[#allocation2 + $0x46] sm:$0x1] %vm1195_vm2, %v1225_v54  ;;  %1553 = vst.msk [vmem:[#allocation2 + $0x33] sm:$0x1] %vm1195_vm2, %v1225_v54  ;;  %5616 = vmatpush3.bf16.msra.mxu0 %v5932_v42  ;;  %5634 = vmatpush3.bf16.msra.mxu1 %v5933_v22  ;;  %v5934_v32 = vld [vmem:[%s8482_s4 + $0x50] sm:$0xff]   ;;  %v5935_v33 = vld [vmem:[%s8482_s4 + $0xe0] sm:$0xff]  }
 0x307   : > { %1597 = vst.msk [vmem:[#allocation2 + $0x36] sm:$0x1] %vm1195_vm2, %v1225_v54  ;;  %1410 = vst.msk [vmem:[#allocation2 + $0x2b] sm:$0x1] %vm1195_vm2, %v1400_v55  ;;  %v5936_v40 = vld [vmem:[%s8482_s4 + $0x10] sm:$0xff]   ;;  %v5937_v59 = vld [vmem:[%s8482_s4 + $0xa0] sm:$0xff]   ;;  %5617 = vmatprep.subr.bf16.mxu0 %v5934_v32  ;;  %5635 = vmatprep.subr.bf16.mxu1 %v5935_v33 }
 0x308   : > { %1502 = vst.msk [vmem:[#allocation2 + $0x2e] sm:$0x1] %vm1195_vm2, %v1400_v55  ;;  %1627 = vst.msk [vmem:[#allocation2 + $0x1b] sm:$0x1] %vm1195_vm2, %v1400_v55  ;;  %1455 = vrot.lane.b32.xlu1 %v6886_v16, %s6386_s27  ;;  %1441 = vrot.lane.b32.xlu0 %v5173_v31, %s6386_s27  ;;  %v5938_v21 = vld [vmem:[%s8482_s4 + $0x48] sm:$0xff]   ;;  %v5939_v30 = vld [vmem:[%s8482_s4 + $0xd8] sm:$0xff]  }
 0x309   : > { %1655 = vst.msk [vmem:[#allocation2 + $0x1e] sm:$0x1] %vm1195_vm2, %v1400_v55  ;;  %1389 = vst.msk [vmem:[#allocation2 + $0xa] sm:$0x1] %vm1195_vm2, %v1378_v58  ;;  %v5940_v34 = vld [vmem:[%s8482_s4 + $0x8] sm:$0xff]   ;;  %v5168_v35 = vrot.slane %v6849_v2, 10 }
 0x30a   : > { %1497 = vst.msk [vmem:[#allocation2 + $0xd] sm:$0x1] %vm1195_vm2, %v1378_v58  ;;  %1412 = vst.msk [vmem:[#allocation2 + $0x6b] sm:$0x1] %vm1195_vm2, %v1404_v61  ;;  %5618 = vmatpush3.bf16.msra.mxu0 %v5936_v40  ;;  %5636 = vmatpush3.bf16.msra.mxu1 %v5937_v59  ;;  %v5942_v25 = vld [vmem:[%s8482_s4 + $0x40] sm:$0xff]   ;;  %v5943_v28 = vld [vmem:[%s8482_s4 + $0xd0] sm:$0xff]  }
 0x30b   : > { %1504 = vst.msk [vmem:[#allocation2 + $0x6e] sm:$0x1] %vm1195_vm2, %v1404_v61  ;;  %1629 = vst.msk [vmem:[#allocation2 + $0x5b] sm:$0x1] %vm1195_vm2, %v1404_v61  ;;  %5619 = vmatprep.subr.bf16.mxu0 %v5938_v21  ;;  %5637 = vmatprep.subr.bf16.mxu1 %v5939_v30  ;;  %v5944_v37 = vld [vmem:[%s8482_s4] sm:$0xff]   ;;  %v5945_v2 = vld [vmem:[%s8482_s4 + $0x90] sm:$0xff]  }
 0x30c   : > { %1657 = vst.msk [vmem:[#allocation2 + $0x5e] sm:$0x1] %vm1195_vm2, %v1404_v61  ;;  %1411 = vst.msk [vmem:[#allocation2 + $0x4b] sm:$0x1] %vm1195_vm2, %v1402_v62  ;;  %1459 = vrot.lane.b32.xlu1 %v6890_v18, %s6386_s27  ;;  %1453 = vrot.lane.b32.xlu0 %v6894_v20, %s6386_s27  ;;  %v5170_v24 = vrot.slane %v6853_v3, 10  ;;  %v5169_v26 = vrot.slane %v6845_v1, 10 }
 0x30d   : > { %1503 = vst.msk [vmem:[#allocation2 + $0x4e] sm:$0x1] %vm1195_vm2, %v1402_v62  ;;  %1628 = vst.msk [vmem:[#allocation2 + $0x3b] sm:$0x1] %vm1195_vm2, %v1402_v62  ;;  %v5946_v29 = vld [vmem:[%s8482_s4 + $0xc8] sm:$0xff]   ;;  %v5947_v36 = vld [vmem:[%s8482_s4 + $0x178] sm:$0xff]  }
 0x30e   : > { %1656 = vst.msk [vmem:[#allocation2 + $0x3e] sm:$0x1] %vm1195_vm2, %v1402_v62  ;;  %1606 = vst.msk [vmem:[#allocation2 + $0x77] sm:$0x1] %vm1195_vm2, %v5182_v4  ;;  %5620 = vmatpush3.bf16.msra.mxu0 %v5940_v34  ;;  %5638 = vmatpush3.bf16.msra.mxu1 %v5941_v27  ;;  %v5948_v3 = vld [vmem:[%s8482_s4 + $0x88] sm:$0xff]   ;;  %v5176_v1 = vrot.slane %v6886_v16, 10 }
 0x30f   : > { %1409 = vst.msk [vmem:[#allocation2 + $0xb] sm:$0x1] %vm1195_vm2, %v1398_v8  ;;  %1501 = vst.msk [vmem:[#allocation2 + $0xe] sm:$0x1] %vm1195_vm2, %v1398_v8  ;;  %5621 = vmatprep.subr.bf16.mxu0 %v5942_v25  ;;  %5639 = vmatprep.subr.bf16.mxu1 %v5943_v28  ;;  %v5175_v38 = vrot.slane %v6894_v20, 10  ;;  %v5950_v39 = vld [vmem:[%s8482_s4 + $0xc0] sm:$0xff]  }
 0x310   : > { %1540 = vst.msk [vmem:[#allocation2 + $0x71] sm:$0x1] %vm1195_vm2, %v1535_v11  ;;  %1591 = vst.msk [vmem:[#allocation2 + $0x74] sm:$0x1] %vm1195_vm2, %v1535_v11  ;;  %1303 = vrot.lane.b32.xlu1 %v5168_v35, %s6386_s27  ;;  %1457 = vrot.lane.b32.xlu0 %v6903_v23, %s6386_s27  ;;  %v5952_v41 = vld [vmem:[%s8482_s4 + $0x80] sm:$0xff]   ;;  %v5178_v44 = vrot.slane %v6890_v18, 10 }
 0x311   : > { %1547 = vst.msk [vmem:[#allocation2 + $0x72] sm:$0x1] %vm1195_vm2, %v1542_v12  ;;  %1595 = vst.msk [vmem:[#allocation2 + $0x75] sm:$0x1] %vm1195_vm2, %v1542_v12  ;;  %v5177_v16 = vrot.slane %v6903_v23, 10  ;;  %v5955_v20 = vld [vmem:[%s8482_s4 + $0x1f8] sm:$0xff]  }
 0x312   : > { %1555 = vst.msk [vmem:[#allocation2 + $0x73] sm:$0x1] %vm1195_vm2, %v1550_v15  ;;  %1599 = vst.msk [vmem:[#allocation2 + $0x76] sm:$0x1] %vm1195_vm2, %v1550_v15  ;;  %5622 = vmatpush3.bf16.msra.mxu0 %v5944_v37  ;;  %5640 = vmatpush3.bf16.msra.mxu1 %v5945_v2  ;;  %v5180_v45 = vrot.slane %v6949_v51, 10  ;;  %v5181_v18 = vrot.slane %v6959_v57, 10 }
 0x313   : > { %5641 = vmatprep.subr.bf16.mxu1 %v5946_v29  ;;  %5651 = vmatprep.subr.bf16.mxu0 %v5947_v36  ;;  %v1675_v15 = vld [vmem:[#allocation2] sm:$0xff]  ;;  %v5949_v59 = vld [vmem:[%s8482_s4 + $0x138] sm:$0xff]   ;;  %v5951_v34 = vld [vmem:[%s8482_s4 + $0x170] sm:$0xff]  }
 0x314   : > { %1307 = vrot.lane.b32.xlu1 %v5170_v24, %s6386_s27  ;;  %1305 = vrot.lane.b32.xlu0 %v5169_v26, %s6386_s27  ;;  %v5953_v25 = vld [vmem:[%s8482_s4 + $0x130] sm:$0xff]   ;;  %v5954_v28 = vld [vmem:[%s8482_s4 + $0x168] sm:$0xff]  }
 0x316   : > { %5642 = vmatpush3.bf16.msra.mxu1 %v5948_v3 }
 0x317   : > { %5643 = vmatprep.subr.bf16.mxu1 %v5950_v39 }
 0x318   : > { %1479 = vrot.lane.b32.xlu1 %v5176_v1, %s6386_s27  ;;  %1477 = vrot.lane.b32.xlu0 %v5175_v38, %s6386_s27 }
 0x31a   : > { %5644 = vmatpush3.bf16.msra.mxu1 %v5952_v41 }
 0x31b   : > { %5673 = vmatprep.subr.bf16.mxu1 %v5955_v20 }
 0x31c   : > { %1483 = vrot.lane.b32.xlu1 %v5178_v44, %s6386_s27  ;;  %1481 = vrot.lane.b32.xlu0 %v5177_v16, %s6386_s27  ;;  %v7236_v44 = vld [vmem:[#allocation2 + $0x78] sm:$0xff] }
 0x320   : > { %1565 = vrot.lane.b32.xlu1 %v5180_v45, %s6386_s27  ;;  %1556 = vrot.lane.b32.xlu0 %v6949_v51, %s6386_s27 }
 0x324   : > { %1581 = vrot.lane.b32.xlu1 %v5181_v18, %s6386_s27  ;;  %1572 = vrot.lane.b32.xlu0 %v6959_v57, %s6386_s27 }
 0x34f   : > { %v1241_v23 = vpop.permute.xlu1 %1240  ;;  %v1239_v46 = vpop.permute.xlu0 %1238 }
 0x350   : > { %1251 = vst.msk [vmem:[#allocation2 + $0x40] sm:$0x1] %vm1248_vm3, %v1241_v23  ;;  %1560 = vst.msk [vmem:[#allocation2 + $0x30] sm:$0x1] %vm1248_vm3, %v1241_v23  ;;  %v5956_v23 = vld [vmem:[%s8482_s4 + $0x128] sm:$0xff]  }
 0x351   : > { %1250 = vst.msk [vmem:[#allocation2 + $0x20] sm:$0x1] %vm1248_vm3, %v1239_v46  ;;  %1559 = vst.msk [vmem:[#allocation2 + $0x10] sm:$0x1] %vm1248_vm3, %v1239_v46  ;;  %v5957_v46 = vld [vmem:[%s8482_s4 + $0x1b8] sm:$0xff]  }
 0x353   : > { %v1243_v47 = vpop.permute.xlu1 %1242  ;;  %v1414_v48 = vpop.permute.xlu0 %1413 }
 0x354   : > { %1252 = vst.msk [vmem:[#allocation2 + $0x60] sm:$0x1] %vm1248_vm3, %v1243_v47  ;;  %1561 = vst.msk [vmem:[#allocation2 + $0x50] sm:$0x1] %vm1248_vm3, %v1243_v47  ;;  %v5958_v47 = vld [vmem:[%s8482_s4 + $0x160] sm:$0xff]  }
 0x355   : > { %1425 = vst.msk [vmem:[#allocation2 + $0x8] sm:$0x1] %vm1248_vm3, %v1414_v48  ;;  %v5959_v48 = vld [vmem:[%s8482_s4 + $0x1f0] sm:$0xff]  }
 0x357   : > { %v1416_v49 = vpop.permute.xlu1 %1415  ;;  %v1418_v51 = vpop.permute.xlu0 %1417 }
 0x358   : > { %1426 = vst.msk [vmem:[#allocation2 + $0x28] sm:$0x1] %vm1248_vm3, %v1416_v49  ;;  %1631 = vst.msk [vmem:[#allocation2 + $0x18] sm:$0x1] %vm1248_vm3, %v1416_v49 }
 0x359   : > { %1427 = vst.msk [vmem:[#allocation2 + $0x48] sm:$0x1] %vm1248_vm3, %v1418_v51  ;;  %1632 = vst.msk [vmem:[#allocation2 + $0x38] sm:$0x1] %vm1248_vm3, %v1418_v51  ;;  %v5960_v51 = vld [vmem:[%s8482_s4 + $0x120] sm:$0xff]  }
 0x35b   : > { %v1420_v52 = vpop.permute.xlu1 %1419 }
 0x35c   : > { %v1264_v53 = vpop.permute.xlu0 %1263  ;;  %1428 = vst.msk [vmem:[#allocation2 + $0x68] sm:$0x1] %vm1248_vm3, %v1420_v52  ;;  %1633 = vst.msk [vmem:[#allocation2 + $0x58] sm:$0x1] %vm1248_vm3, %v1420_v52 }
 0x35d   : > { %1274 = vst.msk [vmem:[#allocation2 + $0x21] sm:$0x1] %vm1248_vm3, %v1264_v53  ;;  %1346 = vst.msk [vmem:[#allocation2 + $0x24] sm:$0x1] %vm1248_vm3, %v1264_v53 }
 0x35e   : > { %1568 = vst.msk [vmem:[#allocation2 + $0x11] sm:$0x1] %vm1248_vm3, %v1264_v53  ;;  %1607 = vst.msk [vmem:[#allocation2 + $0x14] sm:$0x1] %vm1248_vm3, %v1264_v53  ;;  %v5961_v53 = vld [vmem:[%s8482_s4 + $0x1b0] sm:$0xff]  }
 0x35f   : > { %v1266_v54 = vpop.permute.xlu1 %1265 }
 0x360   : > { %v1268_v55 = vpop.permute.xlu0 %1267  ;;  %1275 = vst.msk [vmem:[#allocation2 + $0x41] sm:$0x1] %vm1248_vm3, %v1266_v54  ;;  %1347 = vst.msk [vmem:[#allocation2 + $0x44] sm:$0x1] %vm1248_vm3, %v1266_v54 }
 0x361   : > { %1569 = vst.msk [vmem:[#allocation2 + $0x31] sm:$0x1] %vm1248_vm3, %v1266_v54  ;;  %1608 = vst.msk [vmem:[#allocation2 + $0x34] sm:$0x1] %vm1248_vm3, %v1266_v54  ;;  %v5962_v54 = vld [vmem:[%s8482_s4 + $0x158] sm:$0xff]  }
 0x362   : > { %1276 = vst.msk [vmem:[#allocation2 + $0x61] sm:$0x1] %vm1248_vm3, %v1268_v55  ;;  %1348 = vst.msk [vmem:[#allocation2 + $0x64] sm:$0x1] %vm1248_vm3, %v1268_v55 }
 0x363   : > { %1570 = vst.msk [vmem:[#allocation2 + $0x51] sm:$0x1] %vm1248_vm3, %v1268_v55  ;;  %1609 = vst.msk [vmem:[#allocation2 + $0x54] sm:$0x1] %vm1248_vm3, %v1268_v55  ;;  %v1282_v56 = vpop.permute.xlu1 %1281  ;;  %v5963_v55 = vld [vmem:[%s8482_s4 + $0x1e8] sm:$0xff]  }
 0x364   : > { %v1280_v57 = vpop.permute.xlu0 %1279  ;;  %1291 = vst.msk [vmem:[#allocation2 + $0x42] sm:$0x1] %vm1248_vm3, %v1282_v56  ;;  %1351 = vst.msk [vmem:[#allocation2 + $0x45] sm:$0x1] %vm1248_vm3, %v1282_v56 }
 0x365   : > { %1576 = vst.msk [vmem:[#allocation2 + $0x32] sm:$0x1] %vm1248_vm3, %v1282_v56  ;;  %1612 = vst.msk [vmem:[#allocation2 + $0x35] sm:$0x1] %vm1248_vm3, %v1282_v56 }
 0x366   : > { %1290 = vst.msk [vmem:[#allocation2 + $0x22] sm:$0x1] %vm1248_vm3, %v1280_v57  ;;  %1350 = vst.msk [vmem:[#allocation2 + $0x25] sm:$0x1] %vm1248_vm3, %v1280_v57 }
 0x367   : > { %1575 = vst.msk [vmem:[#allocation2 + $0x12] sm:$0x1] %vm1248_vm3, %v1280_v57  ;;  %1611 = vst.msk [vmem:[#allocation2 + $0x15] sm:$0x1] %vm1248_vm3, %v1280_v57 }
 0x369   : > { %v1284_v43 = vpop.permute.xlu0 %1283 }
 0x36a   : > { %1292 = vst.msk [vmem:[#allocation2 + $0x62] sm:$0x1] %vm1248_vm3, %v1284_v43  ;;  %1352 = vst.msk [vmem:[#allocation2 + $0x65] sm:$0x1] %vm1248_vm3, %v1284_v43 }
 0x36b   : > { %1577 = vst.msk [vmem:[#allocation2 + $0x52] sm:$0x1] %vm1248_vm3, %v1284_v43  ;;  %1613 = vst.msk [vmem:[#allocation2 + $0x55] sm:$0x1] %vm1248_vm3, %v1284_v43 }
 0x36e   : > { %v1440_v58 = vpop.permute.xlu1 %1439 }
 0x36f   : > { %1450 = vst.msk [vmem:[#allocation2 + $0x29] sm:$0x1] %vm1248_vm3, %v1440_v58  ;;  %1522 = vst.msk [vmem:[#allocation2 + $0x2c] sm:$0x1] %vm1248_vm3, %v1440_v58 }
 0x370   : > { %1635 = vst.msk [vmem:[#allocation2 + $0x19] sm:$0x1] %vm1248_vm3, %v1440_v58  ;;  %1663 = vst.msk [vmem:[#allocation2 + $0x1c] sm:$0x1] %vm1248_vm3, %v1440_v58 }
 0x376   : > { %v1444_v61 = vpop.permute.xlu1 %1443  ;;  %v1438_v62 = vpop.permute.xlu0 %1437 }
 0x377   : > { %1452 = vst.msk [vmem:[#allocation2 + $0x69] sm:$0x1] %vm1248_vm3, %v1444_v61  ;;  %1524 = vst.msk [vmem:[#allocation2 + $0x6c] sm:$0x1] %vm1248_vm3, %v1444_v61 }
 0x378   : > { %1637 = vst.msk [vmem:[#allocation2 + $0x59] sm:$0x1] %vm1248_vm3, %v1444_v61  ;;  %1665 = vst.msk [vmem:[#allocation2 + $0x5c] sm:$0x1] %vm1248_vm3, %v1444_v61 }
 0x379   : > { %1449 = vst.msk [vmem:[#allocation2 + $0x9] sm:$0x1] %vm1248_vm3, %v1438_v62  ;;  %1521 = vst.msk [vmem:[#allocation2 + $0xc] sm:$0x1] %vm1248_vm3, %v1438_v62 }
 0x37a   : > { %v1456_v63 = vpop.permute.xlu1 %1455  ;;  %v1442_v0 = vpop.permute.xlu0 %1441 }
 0x37b   : > { %1466 = vst.msk [vmem:[#allocation2 + $0x2a] sm:$0x1] %vm1248_vm3, %v1456_v63  ;;  %1526 = vst.msk [vmem:[#allocation2 + $0x2d] sm:$0x1] %vm1248_vm3, %v1456_v63 }
 0x37c   : > { %1639 = vst.msk [vmem:[#allocation2 + $0x1a] sm:$0x1] %vm1248_vm3, %v1456_v63  ;;  %1667 = vst.msk [vmem:[#allocation2 + $0x1d] sm:$0x1] %vm1248_vm3, %v1456_v63  ;;  %v5964_v63 = vld [vmem:[%s8482_s4 + $0x118] sm:$0xff]  }
 0x37d   : > { %1451 = vst.msk [vmem:[#allocation2 + $0x49] sm:$0x1] %vm1248_vm3, %v1442_v0  ;;  %1523 = vst.msk [vmem:[#allocation2 + $0x4c] sm:$0x1] %vm1248_vm3, %v1442_v0 }
 0x37e   : > { %1636 = vst.msk [vmem:[#allocation2 + $0x39] sm:$0x1] %vm1248_vm3, %v1442_v0  ;;  %1664 = vst.msk [vmem:[#allocation2 + $0x3c] sm:$0x1] %vm1248_vm3, %v1442_v0  ;;  %v1460_v4 = vpop.permute.xlu1 %1459  ;;  %v1454_v5 = vpop.permute.xlu0 %1453  ;;  %v5965_v0 = vld [vmem:[%s8482_s4 + $0x1a8] sm:$0xff]  }
 0x37f   : > { %1468 = vst.msk [vmem:[#allocation2 + $0x6a] sm:$0x1] %vm1248_vm3, %v1460_v4  ;;  %1528 = vst.msk [vmem:[#allocation2 + $0x6d] sm:$0x1] %vm1248_vm3, %v1460_v4 }
 0x380   : > { %1641 = vst.msk [vmem:[#allocation2 + $0x5a] sm:$0x1] %vm1248_vm3, %v1460_v4  ;;  %1669 = vst.msk [vmem:[#allocation2 + $0x5d] sm:$0x1] %vm1248_vm3, %v1460_v4  ;;  %v5966_v4 = vld [vmem:[%s8482_s4 + $0x150] sm:$0xff]  }
 0x381   : > { %1465 = vst.msk [vmem:[#allocation2 + $0xa] sm:$0x1] %vm1248_vm3, %v1454_v5  ;;  %1525 = vst.msk [vmem:[#allocation2 + $0xd] sm:$0x1] %vm1248_vm3, %v1454_v5  ;;  %v5967_v5 = vld [vmem:[%s8482_s4 + $0x1e0] sm:$0xff]  }
 0x382   : > { %v1304_v6 = vpop.permute.xlu1 %1303  ;;  %v1458_v7 = vpop.permute.xlu0 %1457 }
 0x383   : > { %1314 = vst.msk [vmem:[#allocation2 + $0x23] sm:$0x1] %vm1248_vm3, %v1304_v6  ;;  %1354 = vst.msk [vmem:[#allocation2 + $0x26] sm:$0x1] %vm1248_vm3, %v1304_v6 }
 0x384   : > { %1584 = vst.msk [vmem:[#allocation2 + $0x13] sm:$0x1] %vm1248_vm3, %v1304_v6  ;;  %1615 = vst.msk [vmem:[#allocation2 + $0x16] sm:$0x1] %vm1248_vm3, %v1304_v6  ;;  %v5968_v6 = vld [vmem:[%s8482_s4 + $0x110] sm:$0xff]  }
 0x385   : > { %1467 = vst.msk [vmem:[#allocation2 + $0x4a] sm:$0x1] %vm1248_vm3, %v1458_v7  ;;  %1527 = vst.msk [vmem:[#allocation2 + $0x4d] sm:$0x1] %vm1248_vm3, %v1458_v7 }
 0x386   : > { %1640 = vst.msk [vmem:[#allocation2 + $0x3a] sm:$0x1] %vm1248_vm3, %v1458_v7  ;;  %1668 = vst.msk [vmem:[#allocation2 + $0x3d] sm:$0x1] %vm1248_vm3, %v1458_v7  ;;  %v1308_v8 = vpop.permute.xlu1 %1307  ;;  %v1306_v10 = vpop.permute.xlu0 %1305  ;;  %v5969_v7 = vld [vmem:[%s8482_s4 + $0x1a0] sm:$0xff]  }
 0x387   : > { %1316 = vst.msk [vmem:[#allocation2 + $0x63] sm:$0x1] %vm1248_vm3, %v1308_v8  ;;  %1356 = vst.msk [vmem:[#allocation2 + $0x66] sm:$0x1] %vm1248_vm3, %v1308_v8 }
 0x388   : > { %1586 = vst.msk [vmem:[#allocation2 + $0x53] sm:$0x1] %vm1248_vm3, %v1308_v8  ;;  %1617 = vst.msk [vmem:[#allocation2 + $0x56] sm:$0x1] %vm1248_vm3, %v1308_v8  ;;  %v5970_v8 = vld [vmem:[%s8482_s4 + $0x148] sm:$0xff]  }
 0x389   : > { %1315 = vst.msk [vmem:[#allocation2 + $0x43] sm:$0x1] %vm1248_vm3, %v1306_v10  ;;  %1355 = vst.msk [vmem:[#allocation2 + $0x46] sm:$0x1] %vm1248_vm3, %v1306_v10 }
 0x38a   : > { %1585 = vst.msk [vmem:[#allocation2 + $0x33] sm:$0x1] %vm1248_vm3, %v1306_v10  ;;  %1616 = vst.msk [vmem:[#allocation2 + $0x36] sm:$0x1] %vm1248_vm3, %v1306_v10  ;;  %v1480_v11 = vpop.permute.xlu1 %1479  ;;  %v1478_v50 = vpop.permute.xlu0 %1477  ;;  %v1679_v12 = vld [vmem:[#allocation2 + $0x20] sm:$0xff]  ;;  %v5971_v10 = vld [vmem:[%s8482_s4 + $0x1d8] sm:$0xff]  }
 0x38b   : > { %1490 = vst.msk [vmem:[#allocation2 + $0x2b] sm:$0x1] %vm1248_vm3, %v1480_v11  ;;  %1530 = vst.msk [vmem:[#allocation2 + $0x2e] sm:$0x1] %vm1248_vm3, %v1480_v11  ;;  %v1707_v42 = vcombine.low %v1675_v15, %v1679_v12  ;;  %v1708_v22 = vcombine.high %v1675_v15, %v1679_v12  ;;  %v1677_v56 = vld [vmem:[#allocation2 + $0x10] sm:$0xff]  ;;  %v5974_v12 = vld [vmem:[%s8482_s4 + $0x140] sm:$0xff]  }
 0x38c   : > { %1643 = vst.msk [vmem:[#allocation2 + $0x1b] sm:$0x1] %vm1248_vm3, %v1480_v11  ;;  %1671 = vst.msk [vmem:[#allocation2 + $0x1e] sm:$0x1] %vm1248_vm3, %v1480_v11  ;;  %v5972_v11 = vld [vmem:[%s8482_s4 + $0x108] sm:$0xff]   ;;  %v5977_v15 = vld [vmem:[%s8482_s4 + $0x190] sm:$0xff]  }
 0x38d   : > { %1489 = vst.msk [vmem:[#allocation2 + $0xb] sm:$0x1] %vm1248_vm3, %v1478_v50  ;;  %1529 = vst.msk [vmem:[#allocation2 + $0xe] sm:$0x1] %vm1248_vm3, %v1478_v50  ;;  %v5973_v50 = vld [vmem:[%s8482_s4 + $0x198] sm:$0xff]  }
 0x38e   : > { %v1484_v13 = vpop.permute.xlu1 %1483  ;;  %v1482_v14 = vpop.permute.xlu0 %1481  ;;  %v1687_v60 = vld [vmem:[#allocation2 + $0x60] sm:$0xff] }
 0x38f   : > { %1492 = vst.msk [vmem:[#allocation2 + $0x6b] sm:$0x1] %vm1248_vm3, %v1484_v13  ;;  %1532 = vst.msk [vmem:[#allocation2 + $0x6e] sm:$0x1] %vm1248_vm3, %v1484_v13  ;;  %v1685_v57 = vld [vmem:[#allocation2 + $0x50] sm:$0xff] }
 0x390   : > { %v1683_v17 = vld [vmem:[#allocation2 + $0x40] sm:$0xff]  ;;  %1645 = vst.msk [vmem:[#allocation2 + $0x5b] sm:$0x1] %vm1248_vm3, %v1484_v13  ;;  %1673 = vst.msk [vmem:[#allocation2 + $0x5e] sm:$0x1] %vm1248_vm3, %v1484_v13  ;;  %v5975_v13 = vld [vmem:[%s8482_s4 + $0x1d0] sm:$0xff]  }
 0x391   : > { %1491 = vst.msk [vmem:[#allocation2 + $0x4b] sm:$0x1] %vm1248_vm3, %v1482_v14  ;;  %1531 = vst.msk [vmem:[#allocation2 + $0x4e] sm:$0x1] %vm1248_vm3, %v1482_v14  ;;  %v1715_v31 = vcombine.low %v1683_v17, %v1687_v60  ;;  %v1716_v32 = vcombine.high %v1683_v17, %v1687_v60  ;;  %v1681_v52 = vld [vmem:[#allocation2 + $0x30] sm:$0xff]  ;;  %v5978_v60 = vld [vmem:[%s8482_s4 + $0x1c8] sm:$0xff]  }
 0x392   : > { %1644 = vst.msk [vmem:[#allocation2 + $0x3b] sm:$0x1] %vm1248_vm3, %v1482_v14  ;;  %1672 = vst.msk [vmem:[#allocation2 + $0x3e] sm:$0x1] %vm1248_vm3, %v1482_v14  ;;  %v1566_v21 = vpop.permute.xlu1 %1565  ;;  %v1557_v30 = vpop.permute.xlu0 %1556  ;;  %v1680_v35 = vld [vmem:[#allocation2 + $0x28] sm:$0xff]  ;;  %v1712_v43 = vcombine.high %v1677_v56, %v1681_v52  ;;  %v5976_v14 = vld [vmem:[%s8482_s4 + $0x100] sm:$0xff]  }
 0x393   : > { %v1740_v33 = vpack.c.bf16 %v1716_v32, %v1708_v22  ;;  %v1739_v40 = vpack.c.bf16 %v1715_v31, %v1707_v42  ;;  %1571 = vst.msk [vmem:[#allocation2 + $0x71] sm:$0x1] %vm1248_vm3, %v1566_v21  ;;  %1610 = vst.msk [vmem:[#allocation2 + $0x74] sm:$0x1] %vm1248_vm3, %v1566_v21  ;;  %v7232_v39 = vld [vmem:[#allocation2 + $0x18] sm:$0xff]  ;;  %v1711_v42 = vcombine.low %v1677_v56, %v1681_v52  ;;  %v5979_v22 = vld [vmem:[%s8482_s4 + $0x188] sm:$0xff]  }
 0x394   : > { %1562 = vst.msk [vmem:[#allocation2 + $0x70] sm:$0x1] %vm1248_vm3, %v1557_v30  ;;  %v1676_v27 = vld [vmem:[#allocation2 + $0x8] sm:$0xff]  ;;  %v5980_v32 = vld [vmem:[%s8482_s4 + $0x1c0] sm:$0xff]  }
 0x395   : > { %2298 = vmatprep.mubr.bf16.mxu0 %v1740_v33  ;;  %v1709_v36 = vcombine.low %v1676_v27, %v1680_v35  ;;  %v1710_v3 = vcombine.high %v1676_v27, %v1680_v35  ;;  %v7317_v33 = vld [vmem:[#allocation3 + $0x8] sm:$0xff]  ;;  %v2444_v27 = vld [vmem:[%s8484_s6 + $0x70] sm:$0xff] }
 0x396   : > { %2299 = vmatmul.mubr.bf16.vlgmr.msra.gmra.mxu0 %v1739_v40  ;;  %v1582_v37 = vpop.permute.xlu1 %1581  ;;  %v1573_v2 = vpop.permute.xlu0 %1572  ;;  %v1688_v26 = vld [vmem:[#allocation2 + $0x68] sm:$0xff]  ;;  %v5981_v40 = vld [vmem:[%s8482_s4 + $0x180] sm:$0xff]  }
 0x397   : > { %5652 = vmatpush3.bf16.msra.mxu0 %v5949_v59  ;;  %1587 = vst.msk [vmem:[#allocation2 + $0x73] sm:$0x1] %vm1248_vm3, %v1582_v37  ;;  %1618 = vst.msk [vmem:[#allocation2 + $0x76] sm:$0x1] %vm1248_vm3, %v1582_v37  ;;  %v7234_v41 = vld [vmem:[#allocation2 + $0x58] sm:$0xff]  ;;  %v2443_v35 = vld [vmem:[%s8484_s6 + $0x68] sm:$0xff] }
 0x398   : > { %5653 = vmatprep.subr.bf16.mxu0 %v5951_v34  ;;  %v1684_v24 = vld [vmem:[#allocation2 + $0x48] sm:$0xff]  ;;  %1578 = vst.msk [vmem:[#allocation2 + $0x72] sm:$0x1] %vm1248_vm3, %v1573_v2  ;;  %1614 = vst.msk [vmem:[#allocation2 + $0x75] sm:$0x1] %vm1248_vm3, %v1573_v2  ;;  %v1722_v20 = vcombine.high %v7234_v41, %v7236_v44  ;;  %v1721_v21 = vcombine.low %v7234_v41, %v7236_v44  ;;  %v2445_v34 = vld [vmem:[%s8484_s6 + $0x78] sm:$0xff] }
 0x399   : > { %v7226_v29 = vld [vmem:[#allocation2 + $0x38] sm:$0xff]  ;;  %v1717_v1 = vcombine.low %v1684_v24, %v1688_v26  ;;  %v1718_v38 = vcombine.high %v1684_v24, %v1688_v26  ;;  %v2440_v37 = vld [vmem:[%s8484_s6 + $0x50] sm:$0xff]  ;;  %v2439_v2 = vld [vmem:[%s8484_s6 + $0x48] sm:$0xff] }
 0x39a   : > { %v1714_v16 = vcombine.high %v7232_v39, %v7226_v29  ;;  %v1713_v59 = vcombine.low %v7232_v39, %v7226_v29  ;;  %v2438_v24 = vld [vmem:[%s8484_s6 + $0x40] sm:$0xff]  ;;  %v2437_v26 = vld [vmem:[%s8484_s6 + $0x38] sm:$0xff]  ;;  %v2436_v29 = vld [vmem:[%s8484_s6 + $0x30] sm:$0xff] }
 0x39b   : > { %5654 = vmatpush3.bf16.msra.mxu0 %v5953_v25  ;;  %v1742_v45 = vpack.c.bf16 %v1718_v38, %v1710_v3  ;;  %v1741_v18 = vpack.c.bf16 %v1717_v1, %v1709_v36  ;;  %v2442_v25 = vld [vmem:[%s8484_s6 + $0x60] sm:$0xff]  ;;  %v2435_v36 = vld [vmem:[%s8484_s6 + $0x28] sm:$0xff]  ;;  %v2433_v1 = vld [vmem:[%s8484_s6 + $0x18] sm:$0xff] }
 0x39c   : > { %5655 = vmatprep.subr.bf16.mxu0 %v5954_v28  ;;  %v1746_v49 = vpack.c.bf16 %v1722_v20, %v1714_v16  ;;  %v1745_v30 = vpack.c.bf16 %v1721_v21, %v1713_v59  ;;  %v2441_v28 = vld [vmem:[%s8484_s6 + $0x58] sm:$0xff]  ;;  %v2434_v3 = vld [vmem:[%s8484_s6 + $0x20] sm:$0xff]  ;;  %v2432_v38 = vld [vmem:[%s8484_s6 + $0x10] sm:$0xff] }
 0x39d   : > { %2339 = vmatprep.mubr.bf16.mxu1 %v1742_v45  ;;  %v2431_v39 = vld [vmem:[%s8484_s6 + $0x8] sm:$0xff]  ;;  %v2430_v41 = vld [vmem:[%s8484_s6] sm:$0xff]  ;;  %v5987_v59 = vld [vmem:[%s8485_s7 + $0x174] ss:$8 sps:$4 sm:$0xff]  }
 0x39e   : > { %2340 = vmatmul.mubr.bf16.vlgmr.msra.gmra.mxu1 %v1741_v18  ;;  %v5990_v21 = vld [vmem:[%s8485_s7 + $0x64] ss:$8 sps:$4 sm:$0xff]  }
 0x39f   : > { %5656 = vmatpush3.bf16.msra.mxu0 %v5956_v23  ;;  %5674 = vmatpush3.bf16.msra.mxu1 %v5957_v46  ;;  %v1689_v58 = vld [vmem:[#allocation2 + $0x70] sm:$0xff] }
 0x3a0   : > { %2421 = vmatprep.mubr.bf16.mxu1 %v1746_v49  ;;  %5657 = vmatprep.subr.bf16.mxu0 %v5958_v47  ;;  %v1720_v61 = vcombine.high %v1685_v57, %v1689_v58  ;;  %v1719_v17 = vcombine.low %v1685_v57, %v1689_v58 }
 0x3a1   : > { %5675 = vmatprep.subr.bf16.mxu1 %v5959_v48 }
 0x3a2   : > { %v1744_v62 = vpack.c.bf16 %v1720_v61, %v1712_v43  ;;  %v1743_v31 = vpack.c.bf16 %v1719_v17, %v1711_v42 }
 0x3a3   : > { %5658 = vmatpush3.bf16.msra.mxu0 %v5960_v51  ;;  %5676 = vmatpush3.bf16.msra.mxu1 %v5961_v53 }
 0x3a4   : > { %5659 = vmatprep.subr.bf16.mxu0 %v5962_v54  ;;  %5677 = vmatprep.subr.bf16.mxu1 %v5963_v55  ;;  %v5183_v54 = vld [vmem:[%s8483_s5] ss:$0 sm:$0xff] }
 0x3a5   : > { %2380 = vmatprep.mubr.bf16.mxu0 %v1744_v62 }
 0x3a7   : > { %5660 = vmatpush3.bf16.msra.mxu0 %v5964_v63  ;;  %5678 = vmatpush3.bf16.msra.mxu1 %v5965_v0 }
 0x3a8   : > { %5661 = vmatprep.subr.bf16.mxu0 %v5966_v4  ;;  %5679 = vmatprep.subr.bf16.mxu1 %v5967_v5 }
 0x3ab   : > { %5662 = vmatpush3.bf16.msra.mxu0 %v5968_v6  ;;  %5680 = vmatpush3.bf16.msra.mxu1 %v5969_v7 }
 0x3ac   : > { %5663 = vmatprep.subr.bf16.mxu0 %v5970_v8  ;;  %5681 = vmatprep.subr.bf16.mxu1 %v5971_v10 }
 0x3af   : > { %5664 = vmatpush3.bf16.msra.mxu0 %v5972_v11  ;;  %5682 = vmatpush3.bf16.msra.mxu1 %v5973_v50 }
 0x3b0   : > { %5665 = vmatprep.subr.bf16.mxu0 %v5974_v12  ;;  %5683 = vmatprep.subr.bf16.mxu1 %v5975_v13 }
 0x3b3   : > { %5666 = vmatpush3.bf16.msra.mxu0 %v5976_v14  ;;  %5684 = vmatpush3.bf16.msra.mxu1 %v5977_v15 }
 0x3b4   : > { %5685 = vmatprep.subr.bf16.mxu1 %v5978_v60  ;;  %5767 = vmatprep.subr.mxu0 %v7317_v33 }
 0x3b6   : > { %2381 = vmatmul.mubr.bf16.vlgmr.msra.gmra.mxu0 %v1743_v31 }
 0x3b7   : > { %5686 = vmatpush3.bf16.msra.mxu1 %v5979_v22  ;;  %5799 = vmatprep.mubr.msk.f32.mxu0 %vm6385_vm0, %v7317_v33 }
 0x3b8   : > { %5687 = vmatprep.subr.bf16.mxu1 %v5980_v32  ;;  %5768 = vmatpush3.msra.mxu0 %v2445_v34  ;;  %v5982_v32 = vld [vmem:[%s8485_s7 + $0x70] ss:$8 sps:$4 sm:$0xff]  }
 0x3b9   : > { %5769 = vmatprep.subr.mxu0 %v7317_v33 }
 0x3ba   : > { %5770 = vmatpush3.msra.mxu0 %v2444_v27 }
 0x3bb   : > { %5688 = vmatpush3.bf16.msra.mxu1 %v5981_v40  ;;  %5771 = vmatprep.subr.mxu0 %v7317_v33  ;;  %v5984_v40 = vld [vmem:[%s8485_s7 + $0x74] ss:$8 sps:$4 sm:$0xff]  }
 0x3bc   : > { %5802 = vmatprep.subr.mxu1 %v7317_v33  ;;  %5772 = vmatpush3.msra.mxu0 %v2443_v35 }
 0x3bd   : > { %5773 = vmatprep.subr.mxu0 %v7317_v33 }
 0x3be   : > { %2422 = vmatmul.mubr.bf16.vlgmr.msra.gmra.mxu1 %v1745_v30  ;;  %5774 = vmatpush3.msra.mxu0 %v2442_v25  ;;  %v5988_v30 = vld [vmem:[%s8485_s7 + $0x60] ss:$8 sps:$4 sm:$0xff]  }
 0x3bf   : > { %5834 = vmatprep.mubr.msk.f32.mxu1 %vm6385_vm0, %v7317_v33  ;;  %5803 = vmatpush3.msra.mxu1 %v2445_v34  ;;  %v5996_v34 = vld [vmem:[%s8485_s7 + $0x54] ss:$8 sps:$4 sm:$0xff]  }
 0x3c0   : > { %5804 = vmatprep.subr.mxu1 %v7317_v33  ;;  %5775 = vmatprep.subr.mxu0 %v7317_v33 }
 0x3c1   : > { %5805 = vmatpush3.msra.mxu1 %v2444_v27  ;;  %5776 = vmatpush3.msra.mxu0 %v2441_v28  ;;  %v5994_v27 = vld [vmem:[%s8485_s7 + $0x50] ss:$8 sps:$4 sm:$0xff]  }
 0x3c2   : > { %5806 = vmatprep.subr.mxu1 %v7317_v33  ;;  %5777 = vmatprep.subr.mxu0 %v7317_v33 }
 0x3c3   : > { %5807 = vmatpush3.msra.mxu1 %v2443_v35  ;;  %5778 = vmatpush3.msra.mxu0 %v2440_v37  ;;  %v6002_v35 = vld [vmem:[%s8485_s7 + $0x44] ss:$8 sps:$4 sm:$0xff]  }
 0x3c4   : > { %5808 = vmatprep.subr.mxu1 %v7317_v33  ;;  %5779 = vmatprep.subr.mxu0 %v7317_v33 }
 0x3c5   : > { %5809 = vmatpush3.msra.mxu1 %v2442_v25  ;;  %5780 = vmatpush3.msra.mxu0 %v2439_v2  ;;  %v6000_v25 = vld [vmem:[%s8485_s7 + $0x40] ss:$8 sps:$4 sm:$0xff]  }
 0x3c6   : > { %5810 = vmatprep.subr.mxu1 %v7317_v33  ;;  %5781 = vmatprep.subr.mxu0 %v7317_v33 }
 0x3c7   : > { %5811 = vmatpush3.msra.mxu1 %v2441_v28  ;;  %5782 = vmatpush3.msra.mxu0 %v2438_v24 }
 0x3c8   : > { %5812 = vmatprep.subr.mxu1 %v7317_v33  ;;  %5783 = vmatprep.subr.mxu0 %v7317_v33 }
 0x3c9   : > { %5813 = vmatpush3.msra.mxu1 %v2440_v37  ;;  %5784 = vmatpush3.msra.mxu0 %v2437_v26 }
 0x3ca   : > { %5814 = vmatprep.subr.mxu1 %v7317_v33  ;;  %5785 = vmatprep.subr.mxu0 %v7317_v33 }
 0x3cb   : > { %5815 = vmatpush3.msra.mxu1 %v2439_v2  ;;  %5786 = vmatpush3.msra.mxu0 %v2436_v29 }
 0x3cc   : > { %5816 = vmatprep.subr.mxu1 %v7317_v33  ;;  %5787 = vmatprep.subr.mxu0 %v7317_v33 }
 0x3cd   : > { %5817 = vmatpush3.msra.mxu1 %v2438_v24  ;;  %5788 = vmatpush3.msra.mxu0 %v2435_v36 }
 0x3ce   : > { %5818 = vmatprep.subr.mxu1 %v7317_v33  ;;  %5789 = vmatprep.subr.mxu0 %v7317_v33 }
 0x3cf   : > { %5819 = vmatpush3.msra.mxu1 %v2437_v26  ;;  %5790 = vmatpush3.msra.mxu0 %v2434_v3 }
 0x3d0   : > { %5820 = vmatprep.subr.mxu1 %v7317_v33  ;;  %5791 = vmatprep.subr.mxu0 %v7317_v33 }
 0x3d1   : > { %5821 = vmatpush3.msra.mxu1 %v2436_v29  ;;  %5792 = vmatpush3.msra.mxu0 %v2433_v1 }
 0x3d2   : > { %5822 = vmatprep.subr.mxu1 %v7317_v33  ;;  %5793 = vmatprep.subr.mxu0 %v7317_v33 }
 0x3d3   : > { %5823 = vmatpush3.msra.mxu1 %v2435_v36  ;;  %5794 = vmatpush3.msra.mxu0 %v2432_v38 }
 0x3d4   : > { %5824 = vmatprep.subr.mxu1 %v7317_v33  ;;  %5795 = vmatprep.subr.mxu0 %v7317_v33 }
 0x3d5   : > { %5825 = vmatpush3.msra.mxu1 %v2434_v3  ;;  %5796 = vmatpush3.msra.mxu0 %v2431_v39 }
 0x3d6   : > { %5826 = vmatprep.subr.mxu1 %v7317_v33  ;;  %5797 = vmatprep.subr.mxu0 %v7317_v33 }
 0x3d7   : > { %5827 = vmatpush3.msra.mxu1 %v2433_v1  ;;  %5798 = vmatpush3.msra.mxu0 %v2430_v41 }
 0x3d8   : > { %5828 = vmatprep.subr.mxu1 %v7317_v33  ;;  %4426 = vmatprep.subr.bf16.mxu0 %v5984_v40  ;;  %v6045_v40 = vld [vmem:[%s8485_s7 + $0x1d0] ss:$8 sps:$4 sm:$0xff]  }
 0x3d9   : > { %5829 = vmatpush3.msra.mxu1 %v2432_v38 }
 0x3da   : > { %5830 = vmatprep.subr.mxu1 %v7317_v33 }
 0x3db   : > { %5831 = vmatpush3.msra.mxu1 %v2431_v39 }
 0x3dc   : > { %5832 = vmatprep.subr.mxu1 %v7317_v33 }
 0x3dd   : > { %5833 = vmatpush3.msra.mxu1 %v2430_v41 }
 0x3de   : > { %4467 = vmatprep.subr.bf16.mxu1 %v5987_v59  ;;  %v6050_v59 = vld [vmem:[%s8485_s7 + $0xc4] ss:$8 sps:$4 sm:$0xff]  }
 0x456   : > { %v5623_v44 = vpop.f32.mrf.mxu0 }
 0x458   : > { %v5624_v16 = vpop.f32.mrf.mxu0 }
 0x459   : > { %v5625_v52 = vadd.f32 %v5624_v16, %v5623_v44  ;;  %v5985_v16 = vld [vmem:[%s8485_s7 + $0x170] ss:$8 sps:$4 sm:$0xff]  }
 0x45a   : > { %v5626_v20 = vpop.f32.mrf.mxu0 }
 0x45b   : > { %v2301_v61 = vadd.f32 %v5625_v52, %v5183_v54  ;;  %v6387_v52 = vmov 1983009808  }
 0x45c   : > { %v5627_v18 = vpop.f32.mrf.mxu0 }
 0x45d   : > { %v5628_v53 = vadd.f32 %v5627_v18, %v5626_v20  ;;  %v5991_v18 = vld [vmem:[%s8485_s7 + $0x160] ss:$8 sps:$4 sm:$0xff]  }
 0x45e   : > { %v5645_v45 = vpop.f32.mrf.mxu1 }
 0x45f   : > { %v2304_v62 = vadd.f32 %v5628_v53, %v5183_v54  ;;  %v2636_v53 = vunpack.c.l.s4 %v6387_v52  ;;  %v6006_v54 = vld [vmem:[%s8485_s7 + $0x30] ss:$8 sps:$4 sm:$0xff]  }
 0x460   : > { %v5646_v23 = vpop.f32.mrf.mxu1 }
 0x461   : > { %v5647_v57 = vadd.f32 %v5646_v23, %v5645_v45  ;;  %v5993_v45 = vld [vmem:[%s8485_s7 + $0x164] ss:$8 sps:$4 sm:$0xff]   ;;  %v5999_v23 = vld [vmem:[%s8485_s7 + $0x154] ss:$8 sps:$4 sm:$0xff]  }
 0x462   : > { %v5648_v47 = vpop.f32.mrf.mxu1 }
 0x463   : > { %v2342_v5 = vadd.f32 %v5647_v57, %v2301_v61  ;;  %v6017_v57 = vld [vmem:[%s8485_s7 + $0x124] ss:$8 sps:$4 sm:$0xff]   ;;  %v6015_v61 = vld [vmem:[%s8485_s7 + $0x120] ss:$8 sps:$4 sm:$0xff]  }
 0x464   : > { %v5649_v51 = vpop.f32.mrf.mxu1 }
 0x465   : > { %v5650_v58 = vadd.f32 %v5649_v51, %v5648_v47  ;;  %v6005_v47 = vld [vmem:[%s8485_s7 + $0x144] ss:$8 sps:$4 sm:$0xff]   ;;  %v6011_v51 = vld [vmem:[%s8485_s7 + $0x134] ss:$8 sps:$4 sm:$0xff]  }
 0x467   : > { %v2345_v6 = vadd.f32 %v5650_v58, %v2304_v62  ;;  %v2637_v58 = vunpack.c.0.s8 %v2636_v53  ;;  %v6020_v62 = vld [vmem:[%s8485_s7 + $0x14] ss:$8 sps:$4 sm:$0xff]  }
 0x476   : > { %v5667_v46 = vpop.f32.mrf.mxu0 }
 0x478   : > { %v5668_v48 = vpop.f32.mrf.mxu0 }
 0x479   : > { %v5669_v63 = vadd.f32 %v5668_v48, %v5667_v46  ;;  %v5997_v46 = vld [vmem:[%s8485_s7 + $0x150] ss:$8 sps:$4 sm:$0xff]   ;;  %v6003_v48 = vld [vmem:[%s8485_s7 + $0x140] ss:$8 sps:$4 sm:$0xff]  }
 0x47a   : > { %v5670_v49 = vpop.f32.mrf.mxu0 }
 0x47b   : > { %v2383_v10 = vadd.f32 %v5669_v63, %v2342_v5  ;;  %v6023_v63 = vld [vmem:[%s8485_s7 + $0x114] ss:$8 sps:$4 sm:$0xff]   ;;  %v6021_v5 = vld [vmem:[%s8485_s7 + $0x110] ss:$8 sps:$4 sm:$0xff]  }
 0x47c   : > { %v5671_v55 = vpop.f32.mrf.mxu0 }
 0x47d   : > { %v5672_v0 = vadd.f32 %v5671_v55, %v5670_v49  ;;  %v6008_v49 = vld [vmem:[%s8485_s7 + $0x34] ss:$8 sps:$4 sm:$0xff]   ;;  %v6009_v55 = vld [vmem:[%s8485_s7 + $0x130] ss:$8 sps:$4 sm:$0xff]  }
 0x47e   : > { %v5689_v56 = vpop.f32.mrf.mxu1 }
 0x47f   : > { %v2386_v11 = vadd.f32 %v5672_v0, %v2345_v6  ;;  %v7501_v0 = vsub.s32 %v2637_v58, %v6670_v19  ;;  %v6026_v6 = vld [vmem:[%s8485_s7 + $0x4] ss:$8 sps:$4 sm:$0xff]  }
 0x480   : > { %v5690_v43 = vpop.f32.mrf.mxu1 }
 0x481   : > { %v5691_v7 = vadd.f32 %v5690_v43, %v5689_v56  ;;  %v6014_v56 = vld [vmem:[%s8485_s7 + $0x24] ss:$8 sps:$4 sm:$0xff]   ;;  %v6012_v43 = vld [vmem:[%s8485_s7 + $0x20] ss:$8 sps:$4 sm:$0xff]  }
 0x482   : > { %v5692_v4 = vpop.f32.mrf.mxu1 }
 0x483   : > { %v2424_v12 = vadd.f32 %v5691_v7, %v2383_v10  ;;  %v6029_v7 = vld [vmem:[%s8485_s7 + $0x104] ss:$8 sps:$4 sm:$0xff]   ;;  %v6027_v10 = vld [vmem:[%s8485_s7 + $0x100] ss:$8 sps:$4 sm:$0xff]  }
 0x484   : > { %v5693_v8 = vpop.f32.mrf.mxu1 }
 0x485   : > { %v5694_v50 = vadd.f32 %v5693_v8, %v5692_v4  ;;  %v6018_v4 = vld [vmem:[%s8485_s7 + $0x10] ss:$8 sps:$4 sm:$0xff]   ;;  %v6024_v8 = vld [vmem:[%s8485_s7] ss:$8 sps:$4 sm:$0xff]  }
 0x487   : > { %v2427_v13 = vadd.f32 %v5694_v50, %v2386_v11  ;;  %v2641_v11 = vrot.slane %v7317_v33, %v7501_v0  ;;  %v6032_v50 = vld [vmem:[%s8485_s7 + $0xf4] ss:$8 sps:$4 sm:$0xff]   ;;  %v6033_v33 = vld [vmem:[%s8485_s7 + $0x1f0] ss:$8 sps:$4 sm:$0xff]  }
 0x489   : > { %v2446_v14 = vadd.f32 %v2427_v13, %v2424_v12 }
 0x48b   : > { %v2447_v15 = vrot.slane %v2446_v14, 4 }
 0x48d   : > { %v2448_v17 = vadd.f32 %v2447_v15, %v2446_v14  ;;  %v2659_v14 = vcombine.high %v2641_v11, %v2641_v11  ;;  %v6038_v15 = vld [vmem:[%s8485_s7 + $0xe4] ss:$8 sps:$4 sm:$0xff]  }
 0x48f   : > { %v2449_v60 = vrot.slane %v2448_v17, 2  ;;  %2663 = vst [vmem:[#allocation3 + $0x3] sm:$0x1] %v2659_v14  ;;  %2675 = vst [vmem:[#allocation3 + $0x6] sm:$0x1] %v2659_v14 }
 0x490   : > { %2751 = vst [vmem:[#allocation3 + $0x3b] sm:$0x1] %v2659_v14  ;;  %2757 = vst [vmem:[#allocation3 + $0x3e] sm:$0x1] %v2659_v14 }
 0x491   : > { %v2450_v42 = vadd.f32 %v2449_v60, %v2448_v17  ;;  %v6041_v17 = vld [vmem:[%s8485_s7 + $0x1e4] ss:$8 sps:$4 sm:$0xff]   ;;  %v6036_v60 = vld [vmem:[%s8485_s7 + $0xe0] ss:$8 sps:$4 sm:$0xff]  }
 0x493   : > { %v2451_v22 = vrot.slane %v2450_v42, 1 }
 0x495   : > { %v2452_v31 = vadd.f32 %v2451_v22, %v2450_v42  ;;  %v6039_v42 = vld [vmem:[%s8485_s7 + $0x1e0] ss:$8 sps:$4 sm:$0xff]   ;;  %v6044_v22 = vld [vmem:[%s8485_s7 + $0xd4] ss:$8 sps:$4 sm:$0xff]  }
 0x497   : > { %5800 = vmatmul.mubr.f32.vlgmr.msra.gmra.mxu0 %v2452_v31  ;;  %v6047_v31 = vld [vmem:[%s8485_s7 + $0x1d4] ss:$8 sps:$4 sm:$0xff]  }
 0x498   : > { %4427 = vmatpush1.bf16.msra.mxu0 %v5982_v32  ;;  %v6042_v32 = vld [vmem:[%s8485_s7 + $0xd0] ss:$8 sps:$4 sm:$0xff]  }
 0x499   : > { %4428 = vmatprep.subr.bf16.mxu0 %v5990_v21  ;;  %v6053_v21 = vld [vmem:[%s8485_s7 + $0x1c4] ss:$8 sps:$4 sm:$0xff]  }
 0x49c   : > { %4429 = vmatpush1.bf16.msra.mxu0 %v5988_v30  ;;  %v2649_v30 = vrot.slane %v2641_v11, 7 }
 0x49d   : > { %4430 = vmatprep.subr.bf16.mxu0 %v5996_v34  ;;  %v2667_v34 = vrot.slane %v2659_v14, 7 }
 0x4a0   : > { %4431 = vmatpush1.bf16.msra.mxu0 %v5994_v27  ;;  %v2650_v27 = vrot.slane %v2649_v30, 2 }
 0x4a1   : > { %4432 = vmatprep.subr.bf16.mxu0 %v6002_v35  ;;  %v2668_v35 = vrot.slane %v2667_v34, 2 }
 0x4a2   : > { %2655 = vst [vmem:[#allocation3 + $0x1] sm:$0x1] %v2650_v27  ;;  %2665 = vst [vmem:[#allocation3 + $0x4] sm:$0x1] %v2650_v27 }
 0x4a3   : > { %2673 = vst [vmem:[#allocation3 + $0x5] sm:$0x1] %v2668_v35  ;;  %2747 = vst [vmem:[#allocation3 + $0x39] sm:$0x1] %v2650_v27 }
 0x4a4   : > { %4433 = vmatpush1.bf16.msra.mxu0 %v6000_v25  ;;  %v6048_v25 = vld [vmem:[%s8485_s7 + $0xc0] ss:$8 sps:$4 sm:$0xff]   ;;  %2753 = vst [vmem:[#allocation3 + $0x3c] sm:$0x1] %v2650_v27  ;;  %2755 = vst [vmem:[#allocation3 + $0x3d] sm:$0x1] %v2668_v35 }
 0x4a5   : > { %4434 = vmatprep.subr.bf16.mxu0 %v6008_v49 }
 0x4a8   : > { %4435 = vmatpush1.bf16.msra.mxu0 %v6006_v54 }
 0x4a9   : > { %4436 = vmatprep.subr.bf16.mxu0 %v6014_v56 }
 0x4ac   : > { %4437 = vmatpush1.bf16.msra.mxu0 %v6012_v43 }
 0x4ad   : > { %4438 = vmatprep.subr.bf16.mxu0 %v6020_v62 }
 0x4b0   : > { %4439 = vmatpush1.bf16.msra.mxu0 %v6018_v4 }
 0x4b1   : > { %4440 = vmatprep.subr.bf16.mxu0 %v6026_v6 }
 0x4b4   : > { %4441 = vmatpush1.bf16.msra.mxu0 %v6024_v8 }
 0x4b5   : > { %4442 = vmatprep.subr.bf16.mxu0 %v6032_v50 }
 0x557   : > { %v2519_v28 = vpop.f32.mrf.mxu0 }
 0x558   : > { %v2526_v37 = vrot.slane %v2519_v28, %v6673_v9  ;;  %v6051_v28 = vld [vmem:[%s8485_s7 + $0x1c0] ss:$8 sps:$4 sm:$0xff]  }
 0x559   : > { %v5801_v2 = vpop.f32.mrf.mxu0 }
 0x55a   : > { %v7441_v24 = vsub.f32 %v2424_v12, %v2526_v37  ;;  %v7443_v26 = vsub.f32 %v2427_v13, %v2526_v37  ;;  %v6035_v12 = vld [vmem:[%s8485_s7 + $0x1f4] ss:$8 sps:$4 sm:$0xff]   ;;  %v6030_v13 = vld [vmem:[%s8485_s7 + $0xf0] ss:$8 sps:$4 sm:$0xff]  }
 0x55b   : > { %4443 = vmatpush2.bf16.msra.mxu0 %v6030_v13  ;;  %v6056_v37 = vld [vmem:[%s8485_s7 + $0xb4] ss:$8 sps:$4 sm:$0xff]  }
 0x55c   : > { %v2529_v29 = vmul.f32 %v7441_v24, %v7441_v24  ;;  %v2530_v36 = vmul.f32 %v7443_v26, %v7443_v26  ;;  %4444 = vmatprep.subr.bf16.mxu0 %v6038_v15  ;;  %v6059_v2 = vld [vmem:[%s8485_s7 + $0x1b4] ss:$8 sps:$4 sm:$0xff]  }
 0x55e   : > { %v2531_v3 = vadd.f32 %v2530_v36, %v2529_v29  ;;  %v6054_v29 = vld [vmem:[%s8485_s7 + $0xb0] ss:$8 sps:$4 sm:$0xff]  }
 0x55f   : > { %4445 = vmatpush2.bf16.msra.mxu0 %v6036_v60  ;;  %v6057_v36 = vld [vmem:[%s8485_s7 + $0x1b0] ss:$8 sps:$4 sm:$0xff]  }
 0x560   : > { %v2532_v1 = vrot.slane %v2531_v3, 4  ;;  %4446 = vmatprep.subr.bf16.mxu0 %v6044_v22 }
 0x562   : > { %v2533_v38 = vadd.f32 %v2532_v1, %v2531_v3  ;;  %v6062_v3 = vld [vmem:[%s8485_s7 + $0xa4] ss:$8 sps:$4 sm:$0xff]  }
 0x563   : > { %4447 = vmatpush2.bf16.msra.mxu0 %v6042_v32  ;;  %v6065_v1 = vld [vmem:[%s8485_s7 + $0x1a4] ss:$8 sps:$4 sm:$0xff]  }
 0x564   : > { %v2534_v39 = vrot.slane %v2533_v38, 2  ;;  %4448 = vmatprep.subr.bf16.mxu0 %v6050_v59  ;;  %v2758_v59 = vld [vmem:[#allocation3] sm:$0xff] }
 0x566   : > { %v2535_v41 = vadd.f32 %v2534_v39, %v2533_v38  ;;  %v6060_v38 = vld [vmem:[%s8485_s7 + $0xa0] ss:$8 sps:$4 sm:$0xff]  }
 0x567   : > { %4449 = vmatpush2.bf16.msra.mxu0 %v6048_v25  ;;  %v6063_v39 = vld [vmem:[%s8485_s7 + $0x1a0] ss:$8 sps:$4 sm:$0xff]  }
 0x568   : > { %v2536_v44 = vrot.slane %v2535_v41, 1  ;;  %4450 = vmatprep.subr.bf16.mxu0 %v6056_v37 }
 0x56a   : > { %v2537_v20 = vadd.f32 %v2536_v44, %v2535_v41  ;;  %v6068_v41 = vld [vmem:[%s8485_s7 + $0x94] ss:$8 sps:$4 sm:$0xff]  }
 0x56b   : > { %4451 = vmatpush2.bf16.msra.mxu0 %v6054_v29  ;;  %v6071_v44 = vld [vmem:[%s8485_s7 + $0x194] ss:$8 sps:$4 sm:$0xff]  }
 0x56c   : > { %5835 = vmatmul.mubr.f32.vlgmr.msra.gmra.mxu1 %v2537_v20  ;;  %4452 = vmatprep.subr.bf16.mxu0 %v6062_v3  ;;  %v6069_v20 = vld [vmem:[%s8485_s7 + $0x190] ss:$8 sps:$4 sm:$0xff]  }
 0x56d   : > { %4468 = vmatpush1.bf16.msra.mxu1 %v5985_v16  ;;  %v6066_v16 = vld [vmem:[%s8485_s7 + $0x90] ss:$8 sps:$4 sm:$0xff]  }
 0x56e   : > { %4469 = vmatprep.subr.bf16.mxu1 %v5993_v45  ;;  %v6074_v45 = vld [vmem:[%s8485_s7 + $0x84] ss:$8 sps:$4 sm:$0xff]  }
 0x56f   : > { %4453 = vmatpush2.bf16.msra.mxu0 %v6060_v38 }
 0x570   : > { %4454 = vmatprep.subr.bf16.mxu0 %v6068_v41 }
 0x571   : > { %4470 = vmatpush1.bf16.msra.mxu1 %v5991_v18  ;;  %v6077_v18 = vld [vmem:[%s8485_s7 + $0x184] ss:$8 sps:$4 sm:$0xff]  }
 0x572   : > { %4471 = vmatprep.subr.bf16.mxu1 %v5999_v23  ;;  %v6072_v23 = vld [vmem:[%s8485_s7 + $0x80] ss:$8 sps:$4 sm:$0xff]  }
 0x573   : > { %4455 = vmatpush2.bf16.msra.mxu0 %v6066_v16  ;;  %v6078_v16 = vld [vmem:[%s8485_s7 + $0x270] ss:$8 sps:$4 sm:$0xff]  }
 0x574   : > { %4456 = vmatprep.subr.bf16.mxu0 %v6074_v45 }
 0x575   : > { %4472 = vmatpush1.bf16.msra.mxu1 %v5997_v46  ;;  %v6075_v46 = vld [vmem:[%s8485_s7 + $0x180] ss:$8 sps:$4 sm:$0xff]  }
 0x576   : > { %4473 = vmatprep.subr.bf16.mxu1 %v6005_v47  ;;  %v6080_v47 = vld [vmem:[%s8485_s7 + $0x274] ss:$8 sps:$4 sm:$0xff]  }
 0x577   : > { %4457 = vmatpush2.bf16.msra.mxu0 %v6072_v23  ;;  %v6086_v23 = vld [vmem:[%s8485_s7 + $0x264] ss:$8 sps:$4 sm:$0xff]  }
 0x578   : > { %4508 = vmatprep.subr.bf16.mxu0 %v6080_v47 }
 0x579   : > { %4474 = vmatpush1.bf16.msra.mxu1 %v6003_v48  ;;  %v6083_v48 = vld [vmem:[%s8485_s7 + $0x374] ss:$8 sps:$4 sm:$0xff]  }
 0x57a   : > { %4475 = vmatprep.subr.bf16.mxu1 %v6011_v51 }
 0x57d   : > { %4476 = vmatpush1.bf16.msra.mxu1 %v6009_v55 }
 0x57e   : > { %4477 = vmatprep.subr.bf16.mxu1 %v6017_v57 }
 0x581   : > { %4478 = vmatpush1.bf16.msra.mxu1 %v6015_v61 }
 0x582   : > { %4479 = vmatprep.subr.bf16.mxu1 %v6023_v63 }
 0x585   : > { %4480 = vmatpush1.bf16.msra.mxu1 %v6021_v5 }
 0x586   : > { %4481 = vmatprep.subr.bf16.mxu1 %v6029_v7 }
 0x589   : > { %4482 = vmatpush1.bf16.msra.mxu1 %v6027_v10 }
 0x58a   : > { %4483 = vmatprep.subr.bf16.mxu1 %v6035_v12 }
 0x58d   : > { %4484 = vmatpush2.bf16.msra.mxu1 %v6033_v33 }
 0x58e   : > { %4485 = vmatprep.subr.bf16.mxu1 %v6041_v17 }
 0x591   : > { %4486 = vmatpush2.bf16.msra.mxu1 %v6039_v42 }
 0x592   : > { %4487 = vmatprep.subr.bf16.mxu1 %v6047_v31 }
 0x595   : > { %4488 = vmatpush2.bf16.msra.mxu1 %v6045_v40 }
 0x596   : > { %4489 = vmatprep.subr.bf16.mxu1 %v6053_v21 }
 0x599   : > { %4490 = vmatpush2.bf16.msra.mxu1 %v6051_v28 }
 0x59a   : > { %4491 = vmatprep.subr.bf16.mxu1 %v6059_v2 }
 0x59d   : > { %4492 = vmatpush2.bf16.msra.mxu1 %v6057_v36 }
 0x59e   : > { %4493 = vmatprep.subr.bf16.mxu1 %v6065_v1 }
 0x5a1   : > { %4494 = vmatpush2.bf16.msra.mxu1 %v6063_v39 }
 0x5a2   : > { %4495 = vmatprep.subr.bf16.mxu1 %v6071_v44 }
 0x5a5   : > { %4496 = vmatpush2.bf16.msra.mxu1 %v6069_v20  ;;  %v6081_v20 = vld [vmem:[%s8485_s7 + $0x370] ss:$8 sps:$4 sm:$0xff]  }
 0x5a6   : > { %4497 = vmatprep.subr.bf16.mxu1 %v6077_v18 }
 0x5a9   : > { %4498 = vmatpush2.bf16.msra.mxu1 %v6075_v46  ;;  %v6089_v46 = vld [vmem:[%s8485_s7 + $0x364] ss:$8 sps:$4 sm:$0xff]  }
 0x5aa   : > { %4549 = vmatprep.subr.bf16.mxu1 %v6083_v48 }
 0x62c   : > { %v2604_v49 = vpop.f32.mrf.mxu1 }
 0x62d   : > { %v2605_v51 = vadd.f32 1e-05, %v2604_v49  ;;  %v6084_v49 = vld [vmem:[%s8485_s7 + $0x260] ss:$8 sps:$4 sm:$0xff]  }
 0x62e   : > { %v5836_v52 = vpop.f32.mrf.mxu1 }
 0x62f   : > { %6369 = vrsqrt.f32 %v2605_v51  ;;  %v6087_v51 = vld [vmem:[%s8485_s7 + $0x360] ss:$8 sps:$4 sm:$0xff]   ;;  %v6092_v52 = vld [vmem:[%s8485_s7 + $0x254] ss:$8 sps:$4 sm:$0xff]  }
 0x63c   : > { %v6370_v53 = vpop.eup %6369 }
 0x63d   : > { %v2612_v54 = vrot.slane %v6370_v53, %v6673_v9  ;;  %v6095_v53 = vld [vmem:[%s8485_s7 + $0x354] ss:$8 sps:$4 sm:$0xff]  }
 0x63f   : > { %v2613_v55 = vmul.f32 %v2612_v54, %v7441_v24  ;;  %v2614_v56 = vmul.f32 %v2612_v54, %v7443_v26  ;;  %v6090_v54 = vld [vmem:[%s8485_s7 + $0x250] ss:$8 sps:$4 sm:$0xff]  }
 0x641   : > { %vm2615_vm12 = vcmp.ge.f32.partialorder %v2613_v55, 0.0  ;;  %vm2616_vm13 = vcmp.ge.f32.partialorder %v2614_v56, 0.0  ;;  %v2617_v57 = vmul.f32 0.2, %v2613_v55  ;;  %v2618_v58 = vmul.f32 0.2, %v2614_v56 }
 0x643   : > { %v2619_v43 = vsel %vm2615_vm12, %v2613_v55, %v2617_v57  ;;  %v2620_v61 = vsel %vm2616_vm13, %v2614_v56, %v2618_v58  ;;  %v6093_v55 = vld [vmem:[%s8485_s7 + $0x350] ss:$8 sps:$4 sm:$0xff]   ;;  %v6098_v56 = vld [vmem:[%s8485_s7 + $0x244] ss:$8 sps:$4 sm:$0xff]   ;;  %v6096_v58 = vld [vmem:[%s8485_s7 + $0x240] ss:$8 sps:$4 sm:$0xff]  }
 0x644   : > { %v2623_v62 = vcombine.high %v2619_v43, %v2619_v43  ;;  %v2624_v63 = vcombine.high %v2620_v61, %v2620_v61  ;;  %v2683_v4 = vrot.slane %v2619_v43, %v7501_v0  ;;  %v2690_v5 = vrot.slane %v2620_v61, %v7501_v0  ;;  %2699 = vst [vmem:[#allocation3 + $0xa] sm:$0x1] %v2619_v43  ;;  %v6101_v57 = vld [vmem:[%s8485_s7 + $0x344] ss:$8 sps:$4 sm:$0xff]   ;;  %v6099_v43 = vld [vmem:[%s8485_s7 + $0x340] ss:$8 sps:$4 sm:$0xff]  }
 0x645   : > { %2700 = vst [vmem:[#allocation3 + $0x2a] sm:$0x1] %v2620_v61  ;;  %2748 = vst [vmem:[#allocation3 + $0x1a] sm:$0x1] %v2620_v61  ;;  %v6104_v61 = vld [vmem:[%s8485_s7 + $0x234] ss:$8 sps:$4 sm:$0xff]  }
 0x646   : > { %v2648_v6 = vrot.slane %v2623_v62, %v7501_v0  ;;  %2658 = vst [vmem:[#allocation3 + $0x22] sm:$0x1] %v2623_v62  ;;  %v2691_v24 = vrot.slane %v2683_v4, 7  ;;  %v2693_v26 = vrot.slane %v2690_v5, 7  ;;  %v2701_v7 = vcombine.high %v2683_v4, %v2683_v4  ;;  %2731 = vst [vmem:[#allocation3 + $0x12] sm:$0x1] %v2623_v62 }
 0x647   : > { %2732 = vst [vmem:[#allocation3 + $0x32] sm:$0x1] %v2624_v63  ;;  %v2702_v8 = vcombine.high %v2690_v5, %v2690_v5  ;;  %v2725_v10 = vrot.slane %v2624_v63, %v7501_v0  ;;  %v6107_v62 = vld [vmem:[%s8485_s7 + $0x334] ss:$8 sps:$4 sm:$0xff]   ;;  %v6102_v63 = vld [vmem:[%s8485_s7 + $0x230] ss:$8 sps:$4 sm:$0xff]  }
 0x648   : > { %v2651_v11 = vrot.slane %v2648_v6, 7  ;;  %v2660_v50 = vcombine.high %v2648_v6, %v2648_v6  ;;  %v2692_v12 = vrot.slane %v2691_v24, 2  ;;  %v2694_v13 = vrot.slane %v2693_v26, 2  ;;  %2705 = vst [vmem:[#allocation3 + $0xb] sm:$0x1] %v2701_v7 }
 0x649   : > { %2717 = vst [vmem:[#allocation3 + $0xe] sm:$0x1] %v2701_v7  ;;  %2706 = vst [vmem:[#allocation3 + $0x2b] sm:$0x1] %v2702_v8  ;;  %v5248_v33 = vrot.slane %v2701_v7, 9  ;;  %v2711_v14 = vrot.slane %v2702_v8, 7  ;;  %v2733_v17 = vcombine.high %v2725_v10, %v2725_v10 }
 0x64a   : > { %2718 = vst [vmem:[#allocation3 + $0x2e] sm:$0x1] %v2702_v8  ;;  %v2726_v15 = vrot.slane %v2725_v10, 7  ;;  %2750 = vst [vmem:[#allocation3 + $0x1b] sm:$0x1] %v2702_v8  ;;  %v2652_v60 = vrot.slane %v2651_v11, 2 }
 0x64b   : > { %2756 = vst [vmem:[#allocation3 + $0x1e] sm:$0x1] %v2702_v8  ;;  %v2669_v42 = vrot.slane %v2660_v50, 7  ;;  %2697 = vst [vmem:[#allocation3 + $0x9] sm:$0x1] %v2692_v12  ;;  %v2712_v22 = vrot.slane %v2711_v14, 2 }
 0x64c   : > { %2698 = vst [vmem:[#allocation3 + $0x29] sm:$0x1] %v2694_v13  ;;  %2707 = vst [vmem:[#allocation3 + $0xc] sm:$0x1] %v2692_v12  ;;  %v2727_v31 = vrot.slane %v2726_v15, 2  ;;  %v5249_v32 = vrot.slane %v2733_v17, 9 }
 0x64d   : > { %2708 = vst [vmem:[#allocation3 + $0x2c] sm:$0x1] %v2694_v13  ;;  %2746 = vst [vmem:[#allocation3 + $0x19] sm:$0x1] %v2694_v13  ;;  %v2670_v40 = vrot.slane %v2669_v42, 2 }
 0x64e   : > { %2752 = vst [vmem:[#allocation3 + $0x1c] sm:$0x1] %v2694_v13  ;;  %2664 = vst [vmem:[#allocation3 + $0x23] sm:$0x1] %v2660_v50  ;;  %v6105_v4 = vld [vmem:[%s8485_s7 + $0x330] ss:$8 sps:$4 sm:$0xff]  }
 0x64f   : > { %2676 = vst [vmem:[#allocation3 + $0x26] sm:$0x1] %v2660_v50  ;;  %2735 = vst [vmem:[#allocation3 + $0x13] sm:$0x1] %v2660_v50  ;;  %v6110_v5 = vld [vmem:[%s8485_s7 + $0x224] ss:$8 sps:$4 sm:$0xff]  }
 0x650   : > { %2744 = vst [vmem:[#allocation3 + $0x16] sm:$0x1] %v2660_v50  ;;  %2715 = vst [vmem:[#allocation3 + $0xd] sm:$0x1] %v5248_v33  ;;  %v6113_v6 = vld [vmem:[%s8485_s7 + $0x324] ss:$8 sps:$4 sm:$0xff]  }
 0x651   : > { %2736 = vst [vmem:[#allocation3 + $0x33] sm:$0x1] %v2733_v17  ;;  %2745 = vst [vmem:[#allocation3 + $0x36] sm:$0x1] %v2733_v17  ;;  %v6108_v24 = vld [vmem:[%s8485_s7 + $0x220] ss:$8 sps:$4 sm:$0xff]  }
 0x652   : > { %2656 = vst [vmem:[#allocation3 + $0x21] sm:$0x1] %v2652_v60  ;;  %2666 = vst [vmem:[#allocation3 + $0x24] sm:$0x1] %v2652_v60  ;;  %v6111_v26 = vld [vmem:[%s8485_s7 + $0x320] ss:$8 sps:$4 sm:$0xff]  }
 0x653   : > { %2729 = vst [vmem:[#allocation3 + $0x11] sm:$0x1] %v2652_v60  ;;  %2737 = vst [vmem:[#allocation3 + $0x14] sm:$0x1] %v2652_v60  ;;  %v6116_v7 = vld [vmem:[%s8485_s7 + $0x214] ss:$8 sps:$4 sm:$0xff]  }
 0x654   : > { %2730 = vst [vmem:[#allocation3 + $0x31] sm:$0x1] %v2727_v31  ;;  %2738 = vst [vmem:[#allocation3 + $0x34] sm:$0x1] %v2727_v31  ;;  %v6119_v8 = vld [vmem:[%s8485_s7 + $0x314] ss:$8 sps:$4 sm:$0xff]  }
 0x655   : > { %2743 = vst [vmem:[#allocation3 + $0x35] sm:$0x1] %v5249_v32  ;;  %2716 = vst [vmem:[#allocation3 + $0x2d] sm:$0x1] %v2712_v22  ;;  %v6114_v10 = vld [vmem:[%s8485_s7 + $0x210] ss:$8 sps:$4 sm:$0xff]  }
 0x656   : > { %2754 = vst [vmem:[#allocation3 + $0x1d] sm:$0x1] %v2712_v22  ;;  %2674 = vst [vmem:[#allocation3 + $0x25] sm:$0x1] %v2670_v40  ;;  %v6117_v11 = vld [vmem:[%s8485_s7 + $0x310] ss:$8 sps:$4 sm:$0xff]  }
 0x657   : > { %2742 = vst [vmem:[#allocation3 + $0x15] sm:$0x1] %v2670_v40  ;;  %v2759_v21 = vld [vmem:[#allocation3 + $0x8] sm:$0xff]  ;;  %v6128_v14 = vld [vmem:[%s8485_s7 + $0x2f4] ss:$8 sps:$4 sm:$0xff]  }
 0x658   : > { %v6122_v50 = vld [vmem:[%s8485_s7 + $0x204] ss:$8 sps:$4 sm:$0xff]   ;;  %v6120_v13 = vld [vmem:[%s8485_s7 + $0x200] ss:$8 sps:$4 sm:$0xff]   ;;  %v6131_v15 = vld [vmem:[%s8485_s7 + $0x3f4] ss:$8 sps:$4 sm:$0xff]  }
 0x659   : > { %v6125_v12 = vld [vmem:[%s8485_s7 + $0x304] ss:$8 sps:$4 sm:$0xff]   ;;  %v6123_v33 = vld [vmem:[%s8485_s7 + $0x300] ss:$8 sps:$4 sm:$0xff]   ;;  %v6126_v17 = vld [vmem:[%s8485_s7 + $0x2f0] ss:$8 sps:$4 sm:$0xff]  }
 0x65a   : > { %v6129_v60 = vld [vmem:[%s8485_s7 + $0x3f0] ss:$8 sps:$4 sm:$0xff]   ;;  %v6134_v42 = vld [vmem:[%s8485_s7 + $0x2e4] ss:$8 sps:$4 sm:$0xff]   ;;  %v6132_v31 = vld [vmem:[%s8485_s7 + $0x2e0] ss:$8 sps:$4 sm:$0xff]  }
 0x65b   : > { %v6137_v22 = vld [vmem:[%s8485_s7 + $0x3e4] ss:$8 sps:$4 sm:$0xff]   ;;  %v6135_v32 = vld [vmem:[%s8485_s7 + $0x3e0] ss:$8 sps:$4 sm:$0xff]   ;;  %v6140_v40 = vld [vmem:[%s8485_s7 + $0x2d4] ss:$8 sps:$4 sm:$0xff]  }
 0x65c   : > { %v2763_v30 = vld [vmem:[#allocation3 + $0x28] sm:$0xff] }
 0x65d   : > { %v2762_v34 = vld [vmem:[#allocation3 + $0x20] sm:$0xff]  ;;  %v2792_v27 = vcombine.low %v2759_v21, %v2763_v30  ;;  %v2793_v35 = vcombine.high %v2759_v21, %v2763_v30  ;;  %v6138_v21 = vld [vmem:[%s8485_s7 + $0x2d0] ss:$8 sps:$4 sm:$0xff]  }
 0x65e   : > { %v2774_v25 = vcombine.low %v2758_v59, %v2762_v34  ;;  %v2775_v28 = vcombine.high %v2758_v59, %v2762_v34  ;;  %v6143_v59 = vld [vmem:[%s8485_s7 + $0x3d4] ss:$8 sps:$4 sm:$0xff]   ;;  %v6141_v30 = vld [vmem:[%s8485_s7 + $0x3d0] ss:$8 sps:$4 sm:$0xff]   ;;  %v6146_v34 = vld [vmem:[%s8485_s7 + $0x2c4] ss:$8 sps:$4 sm:$0xff]  }
 0x65f   : > { %v7633_v37 = vrot.slane %v2792_v27, %v7501_v0  ;;  %v7636_v2 = vrot.slane %v2793_v35, %v7501_v0  ;;  %v6149_v27 = vld [vmem:[%s8485_s7 + $0x3c4] ss:$8 sps:$4 sm:$0xff]   ;;  %v6144_v35 = vld [vmem:[%s8485_s7 + $0x2c0] ss:$8 sps:$4 sm:$0xff]  }
 0x660   : > { %v2782_v29 = vrot.slane %v2774_v25, %v7501_v0  ;;  %v2789_v36 = vrot.slane %v2775_v28, %v7501_v0  ;;  %v6147_v25 = vld [vmem:[%s8485_s7 + $0x3c0] ss:$8 sps:$4 sm:$0xff]   ;;  %v6152_v28 = vld [vmem:[%s8485_s7 + $0x2b4] ss:$8 sps:$4 sm:$0xff]  }
 0x661   : > { %v2808_v38 = vcombine.high %v7633_v37, %v7633_v37  ;;  %v2809_v39 = vcombine.high %v7636_v2, %v7636_v2 }
 0x662   : > { %v2790_v3 = vcombine.high %v2782_v29, %v2782_v29  ;;  %v2791_v1 = vcombine.high %v2789_v36, %v2789_v36  ;;  %v2862_v45 = vpack.c.bf16 %v2782_v29, %v2782_v29  ;;  %v2864_v18 = vpack.c.bf16 %v2789_v36, %v2789_v36  ;;  %v6155_v29 = vld [vmem:[%s8485_s7 + $0x3b4] ss:$8 sps:$4 sm:$0xff]   ;;  %v6150_v36 = vld [vmem:[%s8485_s7 + $0x2b0] ss:$8 sps:$4 sm:$0xff]  }
 0x663   : > { %v2867_v47 = vpack.c.bf16 %v2808_v38, %v2808_v38  ;;  %v2869_v48 = vpack.c.bf16 %v2809_v39, %v2809_v39  ;;  %v6161_v38 = vld [vmem:[%s8485_s7 + $0x3a4] ss:$8 sps:$4 sm:$0xff]   ;;  %v2760_v39 = vld [vmem:[#allocation3 + $0x10] sm:$0xff] }
 0x664   : > { %v2863_v41 = vpack.c.bf16 %v2790_v3, %v2790_v3  ;;  %v2865_v44 = vpack.c.bf16 %v2791_v1, %v2791_v1  ;;  %v6153_v3 = vld [vmem:[%s8485_s7 + $0x3b0] ss:$8 sps:$4 sm:$0xff]   ;;  %v6158_v1 = vld [vmem:[%s8485_s7 + $0x2a4] ss:$8 sps:$4 sm:$0xff]  }
 0x666   : > { %4458 = vmatprep.mubr.bf16.mxu0 %v2863_v41  ;;  %4499 = vmatprep.mubr.bf16.mxu1 %v2865_v44  ;;  %v6156_v41 = vld [vmem:[%s8485_s7 + $0x2a0] ss:$8 sps:$4 sm:$0xff]  }
 0x667   : > { %4459 = vmatmul.mubr.bf16.vlgmr.msra.gmra.mxu0 %v2862_v45  ;;  %4500 = vmatmul.mubr.bf16.vlgmr.msra.gmra.mxu1 %v2864_v18  ;;  %v6159_v44 = vld [vmem:[%s8485_s7 + $0x3a0] ss:$8 sps:$4 sm:$0xff]   ;;  %v2764_v45 = vld [vmem:[#allocation3 + $0x30] sm:$0xff] }
 0x668   : > { %4509 = vmatpush1.bf16.msra.mxu0 %v6078_v16  ;;  %4550 = vmatpush1.bf16.msra.mxu1 %v6081_v20  ;;  %v6164_v16 = vld [vmem:[%s8485_s7 + $0x294] ss:$8 sps:$4 sm:$0xff]   ;;  %v2810_v18 = vcombine.low %v2760_v39, %v2764_v45 }
 0x669   : > { %4540 = vmatprep.mubr.bf16.mxu0 %v2867_v47  ;;  %4581 = vmatprep.mubr.bf16.mxu1 %v2869_v48  ;;  %v6167_v20 = vld [vmem:[%s8485_s7 + $0x394] ss:$8 sps:$4 sm:$0xff]   ;;  %v6165_v47 = vld [vmem:[%s8485_s7 + $0x390] ss:$8 sps:$4 sm:$0xff]   ;;  %v6170_v48 = vld [vmem:[%s8485_s7 + $0x284] ss:$8 sps:$4 sm:$0xff]  }
 0x66a   : > { %4510 = vmatprep.subr.bf16.mxu0 %v6086_v23  ;;  %4551 = vmatprep.subr.bf16.mxu1 %v6089_v46  ;;  %v2811_v23 = vcombine.high %v2760_v39, %v2764_v45  ;;  %v6162_v46 = vld [vmem:[%s8485_s7 + $0x290] ss:$8 sps:$4 sm:$0xff]   ;;  %v6231_v39 = vld [vmem:[%s8485_s7 + $0x5e0] ss:$8 sps:$4 sm:$0xff]   ;;  %v6242_v45 = vld [vmem:[%s8485_s7 + $0x4c4] ss:$8 sps:$4 sm:$0xff]  }
 0x66c   : > { %4511 = vmatpush1.bf16.msra.mxu0 %v6084_v49  ;;  %4552 = vmatpush1.bf16.msra.mxu1 %v6087_v51  ;;  %v6173_v49 = vld [vmem:[%s8485_s7 + $0x384] ss:$8 sps:$4 sm:$0xff]   ;;  %v7825_v51 = vrot.slane %v2810_v18, %v7501_v0 }
 0x66d   : > { %4512 = vmatprep.subr.bf16.mxu0 %v6092_v52  ;;  %4553 = vmatprep.subr.bf16.mxu1 %v6095_v53  ;;  %v7828_v52 = vrot.slane %v2811_v23, %v7501_v0  ;;  %v6168_v53 = vld [vmem:[%s8485_s7 + $0x280] ss:$8 sps:$4 sm:$0xff]   ;;  %v6245_v18 = vld [vmem:[%s8485_s7 + $0x5c4] ss:$8 sps:$4 sm:$0xff]  }
 0x66e   : > { %v6240_v23 = vld [vmem:[%s8485_s7 + $0x4c0] ss:$8 sps:$4 sm:$0xff]  }
 0x670   : > { %4513 = vmatpush1.bf16.msra.mxu0 %v6090_v54  ;;  %4554 = vmatpush1.bf16.msra.mxu1 %v6093_v55  ;;  %v6171_v54 = vld [vmem:[%s8485_s7 + $0x380] ss:$8 sps:$4 sm:$0xff]   ;;  %v6176_v55 = vld [vmem:[%s8485_s7 + $0x474] ss:$8 sps:$4 sm:$0xff]  }
 0x671   : > { %4514 = vmatprep.subr.bf16.mxu0 %v6098_v56  ;;  %4555 = vmatprep.subr.bf16.mxu1 %v6101_v57  ;;  %v6179_v56 = vld [vmem:[%s8485_s7 + $0x574] ss:$8 sps:$4 sm:$0xff]   ;;  %v2826_v57 = vcombine.high %v7825_v51, %v7825_v51 }
 0x674   : > { %4515 = vmatpush1.bf16.msra.mxu0 %v6096_v58  ;;  %4556 = vmatpush1.bf16.msra.mxu1 %v6099_v43  ;;  %v2827_v58 = vcombine.high %v7828_v52, %v7828_v52  ;;  %v6174_v43 = vld [vmem:[%s8485_s7 + $0x470] ss:$8 sps:$4 sm:$0xff]  }
 0x675   : > { %4516 = vmatprep.subr.bf16.mxu0 %v6104_v61  ;;  %4557 = vmatprep.subr.bf16.mxu1 %v6107_v62  ;;  %v2866_v61 = vpack.c.bf16 %v7633_v37, %v7633_v37  ;;  %v2868_v62 = vpack.c.bf16 %v7636_v2, %v7636_v2  ;;  %v6180_v2 = vld [vmem:[%s8485_s7 + $0x460] ss:$8 sps:$4 sm:$0xff]  }
 0x676   : > { %v2873_v37 = vpack.c.bf16 %v2827_v58, %v2827_v58  ;;  %v2765_v58 = vld [vmem:[#allocation3 + $0x38] sm:$0xff] }
 0x678   : > { %4517 = vmatpush1.bf16.msra.mxu0 %v6102_v63  ;;  %4558 = vmatpush1.bf16.msra.mxu1 %v6105_v4  ;;  %v6177_v63 = vld [vmem:[%s8485_s7 + $0x570] ss:$8 sps:$4 sm:$0xff]   ;;  %v2871_v4 = vpack.c.bf16 %v2826_v57, %v2826_v57 }
 0x679   : > { %4518 = vmatprep.subr.bf16.mxu0 %v6110_v5  ;;  %4559 = vmatprep.subr.bf16.mxu1 %v6113_v6  ;;  %v6182_v5 = vld [vmem:[%s8485_s7 + $0x464] ss:$8 sps:$4 sm:$0xff]   ;;  %v2761_v57 = vld [vmem:[#allocation3 + $0x18] sm:$0xff] }
 0x67a   : > { %v6185_v6 = vld [vmem:[%s8485_s7 + $0x564] ss:$8 sps:$4 sm:$0xff]  }
 0x67c   : > { %4519 = vmatpush1.bf16.msra.mxu0 %v6108_v24  ;;  %4560 = vmatpush1.bf16.msra.mxu1 %v6111_v26  ;;  %v6183_v24 = vld [vmem:[%s8485_s7 + $0x560] ss:$8 sps:$4 sm:$0xff]   ;;  %v6188_v26 = vld [vmem:[%s8485_s7 + $0x454] ss:$8 sps:$4 sm:$0xff]  }
 0x67d   : > { %4520 = vmatprep.subr.bf16.mxu0 %v6116_v7  ;;  %4561 = vmatprep.subr.bf16.mxu1 %v6119_v8  ;;  %v6191_v7 = vld [vmem:[%s8485_s7 + $0x554] ss:$8 sps:$4 sm:$0xff]   ;;  %v6186_v8 = vld [vmem:[%s8485_s7 + $0x450] ss:$8 sps:$4 sm:$0xff]  }
 0x680   : > { %4521 = vmatpush1.bf16.msra.mxu0 %v6114_v10  ;;  %4562 = vmatpush1.bf16.msra.mxu1 %v6117_v11  ;;  %v6189_v10 = vld [vmem:[%s8485_s7 + $0x550] ss:$8 sps:$4 sm:$0xff]   ;;  %v6194_v11 = vld [vmem:[%s8485_s7 + $0x444] ss:$8 sps:$4 sm:$0xff]  }
 0x681   : > { %4522 = vmatprep.subr.bf16.mxu0 %v6122_v50  ;;  %4563 = vmatprep.subr.bf16.mxu1 %v6125_v12  ;;  %v6197_v50 = vld [vmem:[%s8485_s7 + $0x544] ss:$8 sps:$4 sm:$0xff]   ;;  %v6192_v12 = vld [vmem:[%s8485_s7 + $0x440] ss:$8 sps:$4 sm:$0xff]  }
 0x684   : > { %4523 = vmatpush1.bf16.msra.mxu0 %v6120_v13  ;;  %4564 = vmatpush1.bf16.msra.mxu1 %v6123_v33  ;;  %v6195_v13 = vld [vmem:[%s8485_s7 + $0x540] ss:$8 sps:$4 sm:$0xff]   ;;  %v6200_v33 = vld [vmem:[%s8485_s7 + $0x434] ss:$8 sps:$4 sm:$0xff]  }
 0x685   : > { %4524 = vmatprep.subr.bf16.mxu0 %v6128_v14  ;;  %4565 = vmatprep.subr.bf16.mxu1 %v6131_v15  ;;  %v6203_v14 = vld [vmem:[%s8485_s7 + $0x534] ss:$8 sps:$4 sm:$0xff]   ;;  %v6198_v15 = vld [vmem:[%s8485_s7 + $0x430] ss:$8 sps:$4 sm:$0xff]  }
 0x688   : > { %4525 = vmatpush2.bf16.msra.mxu0 %v6126_v17  ;;  %4566 = vmatpush2.bf16.msra.mxu1 %v6129_v60  ;;  %v6201_v17 = vld [vmem:[%s8485_s7 + $0x530] ss:$8 sps:$4 sm:$0xff]   ;;  %v6206_v60 = vld [vmem:[%s8485_s7 + $0x424] ss:$8 sps:$4 sm:$0xff]  }
 0x689   : > { %4526 = vmatprep.subr.bf16.mxu0 %v6134_v42  ;;  %4567 = vmatprep.subr.bf16.mxu1 %v6137_v22  ;;  %v6209_v42 = vld [vmem:[%s8485_s7 + $0x524] ss:$8 sps:$4 sm:$0xff]   ;;  %v6204_v22 = vld [vmem:[%s8485_s7 + $0x420] ss:$8 sps:$4 sm:$0xff]  }
 0x68c   : > { %4527 = vmatpush2.bf16.msra.mxu0 %v6132_v31  ;;  %4568 = vmatpush2.bf16.msra.mxu1 %v6135_v32  ;;  %v6207_v31 = vld [vmem:[%s8485_s7 + $0x520] ss:$8 sps:$4 sm:$0xff]   ;;  %v6212_v32 = vld [vmem:[%s8485_s7 + $0x414] ss:$8 sps:$4 sm:$0xff]  }
 0x68d   : > { %4528 = vmatprep.subr.bf16.mxu0 %v6140_v40  ;;  %4569 = vmatprep.subr.bf16.mxu1 %v6143_v59  ;;  %v6215_v40 = vld [vmem:[%s8485_s7 + $0x514] ss:$8 sps:$4 sm:$0xff]   ;;  %v6210_v59 = vld [vmem:[%s8485_s7 + $0x410] ss:$8 sps:$4 sm:$0xff]  }
 0x690   : > { %4529 = vmatpush2.bf16.msra.mxu0 %v6138_v21  ;;  %4570 = vmatpush2.bf16.msra.mxu1 %v6141_v30  ;;  %v6213_v21 = vld [vmem:[%s8485_s7 + $0x510] ss:$8 sps:$4 sm:$0xff]   ;;  %v6218_v30 = vld [vmem:[%s8485_s7 + $0x404] ss:$8 sps:$4 sm:$0xff]  }
 0x691   : > { %4530 = vmatprep.subr.bf16.mxu0 %v6146_v34  ;;  %4571 = vmatprep.subr.bf16.mxu1 %v6149_v27  ;;  %v6221_v34 = vld [vmem:[%s8485_s7 + $0x504] ss:$8 sps:$4 sm:$0xff]   ;;  %v6216_v27 = vld [vmem:[%s8485_s7 + $0x400] ss:$8 sps:$4 sm:$0xff]  }
 0x694   : > { %4531 = vmatpush2.bf16.msra.mxu0 %v6144_v35  ;;  %4572 = vmatpush2.bf16.msra.mxu1 %v6147_v25  ;;  %v6219_v35 = vld [vmem:[%s8485_s7 + $0x500] ss:$8 sps:$4 sm:$0xff]   ;;  %v6224_v25 = vld [vmem:[%s8485_s7 + $0x4f4] ss:$8 sps:$4 sm:$0xff]  }
 0x695   : > { %4532 = vmatprep.subr.bf16.mxu0 %v6152_v28  ;;  %4573 = vmatprep.subr.bf16.mxu1 %v6155_v29  ;;  %v6227_v28 = vld [vmem:[%s8485_s7 + $0x5f4] ss:$8 sps:$4 sm:$0xff]   ;;  %v6222_v29 = vld [vmem:[%s8485_s7 + $0x4f0] ss:$8 sps:$4 sm:$0xff]  }
 0x698   : > { %4533 = vmatpush2.bf16.msra.mxu0 %v6150_v36  ;;  %4574 = vmatpush2.bf16.msra.mxu1 %v6153_v3  ;;  %v6225_v36 = vld [vmem:[%s8485_s7 + $0x5f0] ss:$8 sps:$4 sm:$0xff]   ;;  %v6230_v3 = vld [vmem:[%s8485_s7 + $0x4e4] ss:$8 sps:$4 sm:$0xff]  }
 0x699   : > { %4534 = vmatprep.subr.bf16.mxu0 %v6158_v1  ;;  %4575 = vmatprep.subr.bf16.mxu1 %v6161_v38  ;;  %v6233_v1 = vld [vmem:[%s8485_s7 + $0x5e4] ss:$8 sps:$4 sm:$0xff]   ;;  %v6228_v38 = vld [vmem:[%s8485_s7 + $0x4e0] ss:$8 sps:$4 sm:$0xff]  }
 0x69c   : > { %4535 = vmatpush2.bf16.msra.mxu0 %v6156_v41  ;;  %4576 = vmatpush2.bf16.msra.mxu1 %v6159_v44  ;;  %v6236_v41 = vld [vmem:[%s8485_s7 + $0x4d4] ss:$8 sps:$4 sm:$0xff]  }
 0x69d   : > { %4536 = vmatprep.subr.bf16.mxu0 %v6164_v16  ;;  %4577 = vmatprep.subr.bf16.mxu1 %v6167_v20  ;;  %v6239_v44 = vld [vmem:[%s8485_s7 + $0x5d4] ss:$8 sps:$4 sm:$0xff]   ;;  %v6234_v16 = vld [vmem:[%s8485_s7 + $0x4d0] ss:$8 sps:$4 sm:$0xff]  }
 0x69e   : > { %v6237_v20 = vld [vmem:[%s8485_s7 + $0x5d0] ss:$8 sps:$4 sm:$0xff]  }
 0x6a0   : > { %4537 = vmatpush2.bf16.msra.mxu0 %v6162_v46  ;;  %4578 = vmatpush2.bf16.msra.mxu1 %v6165_v47  ;;  %v6243_v46 = vld [vmem:[%s8485_s7 + $0x5c0] ss:$8 sps:$4 sm:$0xff]   ;;  %v6248_v47 = vld [vmem:[%s8485_s7 + $0x4b4] ss:$8 sps:$4 sm:$0xff]  }
 0x6a1   : > { %4538 = vmatprep.subr.bf16.mxu0 %v6170_v48  ;;  %4579 = vmatprep.subr.bf16.mxu1 %v6173_v49  ;;  %v6251_v48 = vld [vmem:[%s8485_s7 + $0x5b4] ss:$8 sps:$4 sm:$0xff]   ;;  %v6246_v49 = vld [vmem:[%s8485_s7 + $0x4b0] ss:$8 sps:$4 sm:$0xff]  }
 0x6a4   : > { %4539 = vmatpush2.bf16.msra.mxu0 %v6168_v53  ;;  %4580 = vmatpush2.bf16.msra.mxu1 %v6171_v54  ;;  %v6249_v53 = vld [vmem:[%s8485_s7 + $0x5b0] ss:$8 sps:$4 sm:$0xff]   ;;  %v6254_v54 = vld [vmem:[%s8485_s7 + $0x4a4] ss:$8 sps:$4 sm:$0xff]  }
 0x6a5   : > { %4590 = vmatprep.subr.bf16.mxu0 %v6176_v55  ;;  %4631 = vmatprep.subr.bf16.mxu1 %v6179_v56  ;;  %v6257_v55 = vld [vmem:[%s8485_s7 + $0x5a4] ss:$8 sps:$4 sm:$0xff]   ;;  %v6252_v56 = vld [vmem:[%s8485_s7 + $0x4a0] ss:$8 sps:$4 sm:$0xff]  }
 0x6a7   : > { %4541 = vmatmul.mubr.bf16.vlgmr.msra.gmra.mxu0 %v2866_v61  ;;  %4582 = vmatmul.mubr.bf16.vlgmr.msra.gmra.mxu1 %v2868_v62  ;;  %v6260_v61 = vld [vmem:[%s8485_s7 + $0x494] ss:$8 sps:$4 sm:$0xff]  }
 0x6a8   : > { %4591 = vmatpush1.bf16.msra.mxu0 %v6174_v43  ;;  %4622 = vmatprep.mubr.bf16.mxu0 %v2871_v4  ;;  %v6255_v43 = vld [vmem:[%s8485_s7 + $0x5a0] ss:$8 sps:$4 sm:$0xff]   ;;  %v6263_v62 = vld [vmem:[%s8485_s7 + $0x594] ss:$8 sps:$4 sm:$0xff]   ;;  %v6258_v4 = vld [vmem:[%s8485_s7 + $0x490] ss:$8 sps:$4 sm:$0xff]  }
 0x6a9   : > { %4632 = vmatpush1.bf16.msra.mxu1 %v6177_v63  ;;  %4663 = vmatprep.mubr.bf16.mxu1 %v2873_v37  ;;  %v2828_v63 = vcombine.low %v2761_v57, %v2765_v58  ;;  %v6266_v37 = vld [vmem:[%s8485_s7 + $0x484] ss:$8 sps:$4 sm:$0xff]  }
 0x6aa   : > { %4592 = vmatprep.subr.bf16.mxu0 %v6182_v5  ;;  %4633 = vmatprep.subr.bf16.mxu1 %v6185_v6  ;;  %v2829_v5 = vcombine.high %v2761_v57, %v2765_v58  ;;  %v6261_v6 = vld [vmem:[%s8485_s7 + $0x590] ss:$8 sps:$4 sm:$0xff]   ;;  %v6335_v57 = vld [vmem:[%s8485_s7 + $0x7d4] ss:$8 sps:$4 sm:$0xff]  }
 0x6ab   : > { %v6330_v58 = vld [vmem:[%s8485_s7 + $0x6d0] ss:$8 sps:$4 sm:$0xff]  }
 0x6ac   : > { %4593 = vmatpush1.bf16.msra.mxu0 %v6180_v2  ;;  %v6269_v2 = vld [vmem:[%s8485_s7 + $0x584] ss:$8 sps:$4 sm:$0xff]  }
 0x6ad   : > { %4634 = vmatpush1.bf16.msra.mxu1 %v6183_v24  ;;  %4594 = vmatprep.subr.bf16.mxu0 %v6188_v26  ;;  %v8031_v24 = vrot.slane %v2828_v63, %v7501_v0  ;;  %v6264_v26 = vld [vmem:[%s8485_s7 + $0x480] ss:$8 sps:$4 sm:$0xff]  }
 0x6ae   : > { %4635 = vmatprep.subr.bf16.mxu1 %v6191_v7  ;;  %v8037_v7 = vrot.slane %v2829_v5, %v7501_v0  ;;  %v6270_v0 = vld [vmem:[%s8485_s7 + $0x670] ss:$8 sps:$4 sm:$0xff]   ;;  %v6336_v63 = vld [vmem:[%s8485_s7 + $0x6c0] ss:$8 sps:$4 sm:$0xff]   ;;  %v6344_v5 = vld [vmem:[%s8485_s7 + $0x6b4] ss:$8 sps:$4 sm:$0xff]  }
 0x6b0   : > { %4595 = vmatpush1.bf16.msra.mxu0 %v6186_v8  ;;  %v6267_v8 = vld [vmem:[%s8485_s7 + $0x580] ss:$8 sps:$4 sm:$0xff]  }
 0x6b1   : > { %4636 = vmatpush1.bf16.msra.mxu1 %v6189_v10  ;;  %4596 = vmatprep.subr.bf16.mxu0 %v6194_v11  ;;  %v6272_v10 = vld [vmem:[%s8485_s7 + $0x674] ss:$8 sps:$4 sm:$0xff]  }
 0x6b2   : > { %4637 = vmatprep.subr.bf16.mxu1 %v6197_v50  ;;  %v6275_v11 = vld [vmem:[%s8485_s7 + $0x774] ss:$8 sps:$4 sm:$0xff]   ;;  %v2844_v50 = vcombine.high %v8031_v24, %v8031_v24 }
 0x6b4   : > { %4597 = vmatpush1.bf16.msra.mxu0 %v6192_v12  ;;  %v2845_v12 = vcombine.high %v8037_v7, %v8037_v7 }
 0x6b5   : > { %4638 = vmatpush1.bf16.msra.mxu1 %v6195_v13  ;;  %4598 = vmatprep.subr.bf16.mxu0 %v6200_v33  ;;  %v2870_v13 = vpack.c.bf16 %v7825_v51, %v7825_v51  ;;  %v6273_v33 = vld [vmem:[%s8485_s7 + $0x770] ss:$8 sps:$4 sm:$0xff]  }
 0x6b6   : > { %4639 = vmatprep.subr.bf16.mxu1 %v6203_v14  ;;  %v2872_v14 = vpack.c.bf16 %v7828_v52, %v7828_v52  ;;  %v2877_v51 = vpack.c.bf16 %v2845_v12, %v2845_v12  ;;  %v6279_v52 = vld [vmem:[%s8485_s7 + $0x760] ss:$8 sps:$4 sm:$0xff]   ;;  %v6354_v12 = vld [vmem:[%s8485_s7 + $0x690] ss:$8 sps:$4 sm:$0xff]  }
 0x6b8   : > { %4599 = vmatpush1.bf16.msra.mxu0 %v6198_v15  ;;  %v6278_v15 = vld [vmem:[%s8485_s7 + $0x664] ss:$8 sps:$4 sm:$0xff]  }
 0x6b9   : > { %4640 = vmatpush1.bf16.msra.mxu1 %v6201_v17  ;;  %4600 = vmatprep.subr.bf16.mxu0 %v6206_v60  ;;  %v2875_v17 = vpack.c.bf16 %v2844_v50, %v2844_v50  ;;  %v6281_v60 = vld [vmem:[%s8485_s7 + $0x764] ss:$8 sps:$4 sm:$0xff]   ;;  %v6356_v50 = vld [vmem:[%s8485_s7 + $0x694] ss:$8 sps:$4 sm:$0xff]  }
 0x6ba   : > { %4641 = vmatprep.subr.bf16.mxu1 %v6209_v42  ;;  %v6276_v42 = vld [vmem:[%s8485_s7 + $0x660] ss:$8 sps:$4 sm:$0xff]  }
 0x6bc   : > { %4601 = vmatpush1.bf16.msra.mxu0 %v6204_v22  ;;  %v6284_v22 = vld [vmem:[%s8485_s7 + $0x654] ss:$8 sps:$4 sm:$0xff]  }
 0x6bd   : > { %4642 = vmatpush1.bf16.msra.mxu1 %v6207_v31  ;;  %4602 = vmatprep.subr.bf16.mxu0 %v6212_v32  ;;  %v6287_v31 = vld [vmem:[%s8485_s7 + $0x754] ss:$8 sps:$4 sm:$0xff]   ;;  %v6282_v32 = vld [vmem:[%s8485_s7 + $0x650] ss:$8 sps:$4 sm:$0xff]  }
 0x6be   : > { %4643 = vmatprep.subr.bf16.mxu1 %v6215_v40  ;;  %v6285_v40 = vld [vmem:[%s8485_s7 + $0x750] ss:$8 sps:$4 sm:$0xff]  }
 0x6c0   : > { %4603 = vmatpush1.bf16.msra.mxu0 %v6210_v59  ;;  %v6290_v59 = vld [vmem:[%s8485_s7 + $0x644] ss:$8 sps:$4 sm:$0xff]  }
 0x6c1   : > { %4644 = vmatpush1.bf16.msra.mxu1 %v6213_v21  ;;  %4604 = vmatprep.subr.bf16.mxu0 %v6218_v30  ;;  %v6293_v21 = vld [vmem:[%s8485_s7 + $0x744] ss:$8 sps:$4 sm:$0xff]   ;;  %v6288_v30 = vld [vmem:[%s8485_s7 + $0x640] ss:$8 sps:$4 sm:$0xff]  }
 0x6c2   : > { %4645 = vmatprep.subr.bf16.mxu1 %v6221_v34  ;;  %v6291_v34 = vld [vmem:[%s8485_s7 + $0x740] ss:$8 sps:$4 sm:$0xff]  }
 0x6c4   : > { %4605 = vmatpush1.bf16.msra.mxu0 %v6216_v27  ;;  %v6296_v27 = vld [vmem:[%s8485_s7 + $0x634] ss:$8 sps:$4 sm:$0xff]  }
 0x6c5   : > { %4646 = vmatpush1.bf16.msra.mxu1 %v6219_v35  ;;  %4606 = vmatprep.subr.bf16.mxu0 %v6224_v25  ;;  %v6299_v35 = vld [vmem:[%s8485_s7 + $0x734] ss:$8 sps:$4 sm:$0xff]   ;;  %v6294_v25 = vld [vmem:[%s8485_s7 + $0x630] ss:$8 sps:$4 sm:$0xff]  }
 0x6c6   : > { %4647 = vmatprep.subr.bf16.mxu1 %v6227_v28  ;;  %v6297_v28 = vld [vmem:[%s8485_s7 + $0x730] ss:$8 sps:$4 sm:$0xff]  }
 0x6c8   : > { %4607 = vmatpush2.bf16.msra.mxu0 %v6222_v29  ;;  %v6302_v29 = vld [vmem:[%s8485_s7 + $0x624] ss:$8 sps:$4 sm:$0xff]  }
 0x6c9   : > { %4648 = vmatpush2.bf16.msra.mxu1 %v6225_v36  ;;  %4608 = vmatprep.subr.bf16.mxu0 %v6230_v3  ;;  %v6305_v36 = vld [vmem:[%s8485_s7 + $0x724] ss:$8 sps:$4 sm:$0xff]   ;;  %v6300_v3 = vld [vmem:[%s8485_s7 + $0x620] ss:$8 sps:$4 sm:$0xff]  }
 0x6ca   : > { %4649 = vmatprep.subr.bf16.mxu1 %v6233_v1  ;;  %v6303_v1 = vld [vmem:[%s8485_s7 + $0x720] ss:$8 sps:$4 sm:$0xff]  }
 0x6cc   : > { %4609 = vmatpush2.bf16.msra.mxu0 %v6228_v38  ;;  %v6308_v38 = vld [vmem:[%s8485_s7 + $0x614] ss:$8 sps:$4 sm:$0xff]  }
 0x6cd   : > { %4650 = vmatpush2.bf16.msra.mxu1 %v6231_v39  ;;  %4610 = vmatprep.subr.bf16.mxu0 %v6236_v41  ;;  %v6311_v39 = vld [vmem:[%s8485_s7 + $0x714] ss:$8 sps:$4 sm:$0xff]   ;;  %v6306_v41 = vld [vmem:[%s8485_s7 + $0x610] ss:$8 sps:$4 sm:$0xff]  }
 0x6ce   : > { %4651 = vmatprep.subr.bf16.mxu1 %v6239_v44  ;;  %v6309_v44 = vld [vmem:[%s8485_s7 + $0x710] ss:$8 sps:$4 sm:$0xff]  }
 0x6d0   : > { %4611 = vmatpush2.bf16.msra.mxu0 %v6234_v16  ;;  %v6314_v16 = vld [vmem:[%s8485_s7 + $0x604] ss:$8 sps:$4 sm:$0xff]  }
 0x6d1   : > { %4652 = vmatpush2.bf16.msra.mxu1 %v6237_v20  ;;  %4612 = vmatprep.subr.bf16.mxu0 %v6242_v45  ;;  %v6317_v20 = vld [vmem:[%s8485_s7 + $0x704] ss:$8 sps:$4 sm:$0xff]   ;;  %v6312_v45 = vld [vmem:[%s8485_s7 + $0x600] ss:$8 sps:$4 sm:$0xff]  }
 0x6d2   : > { %4653 = vmatprep.subr.bf16.mxu1 %v6245_v18  ;;  %v6315_v18 = vld [vmem:[%s8485_s7 + $0x700] ss:$8 sps:$4 sm:$0xff]  }
 0x6d4   : > { %4613 = vmatpush2.bf16.msra.mxu0 %v6240_v23  ;;  %v6320_v23 = vld [vmem:[%s8485_s7 + $0x6f4] ss:$8 sps:$4 sm:$0xff]  }
 0x6d5   : > { %4654 = vmatpush2.bf16.msra.mxu1 %v6243_v46  ;;  %4614 = vmatprep.subr.bf16.mxu0 %v6248_v47  ;;  %v6323_v46 = vld [vmem:[%s8485_s7 + $0x7f4] ss:$8 sps:$4 sm:$0xff]   ;;  %v6318_v47 = vld [vmem:[%s8485_s7 + $0x6f0] ss:$8 sps:$4 sm:$0xff]  }
 0x6d6   : > { %4655 = vmatprep.subr.bf16.mxu1 %v6251_v48  ;;  %v6321_v48 = vld [vmem:[%s8485_s7 + $0x7f0] ss:$8 sps:$4 sm:$0xff]  }
 0x6d8   : > { %4615 = vmatpush2.bf16.msra.mxu0 %v6246_v49  ;;  %v6326_v49 = vld [vmem:[%s8485_s7 + $0x6e4] ss:$8 sps:$4 sm:$0xff]  }
 0x6d9   : > { %4656 = vmatpush2.bf16.msra.mxu1 %v6249_v53  ;;  %4616 = vmatprep.subr.bf16.mxu0 %v6254_v54  ;;  %v6329_v53 = vld [vmem:[%s8485_s7 + $0x7e4] ss:$8 sps:$4 sm:$0xff]   ;;  %v6324_v54 = vld [vmem:[%s8485_s7 + $0x6e0] ss:$8 sps:$4 sm:$0xff]  }
 0x6da   : > { %4657 = vmatprep.subr.bf16.mxu1 %v6257_v55  ;;  %v6327_v55 = vld [vmem:[%s8485_s7 + $0x7e0] ss:$8 sps:$4 sm:$0xff]  }
 0x6dc   : > { %4617 = vmatpush2.bf16.msra.mxu0 %v6252_v56  ;;  %v6332_v56 = vld [vmem:[%s8485_s7 + $0x6d4] ss:$8 sps:$4 sm:$0xff]  }
 0x6dd   : > { %4658 = vmatpush2.bf16.msra.mxu1 %v6255_v43  ;;  %4618 = vmatprep.subr.bf16.mxu0 %v6260_v61  ;;  %v6333_v43 = vld [vmem:[%s8485_s7 + $0x7d0] ss:$8 sps:$4 sm:$0xff]   ;;  %v6338_v61 = vld [vmem:[%s8485_s7 + $0x6c4] ss:$8 sps:$4 sm:$0xff]  }
 0x6de   : > { %4659 = vmatprep.subr.bf16.mxu1 %v6263_v62  ;;  %v6341_v62 = vld [vmem:[%s8485_s7 + $0x7c4] ss:$8 sps:$4 sm:$0xff]  }
 0x6e0   : > { %4619 = vmatpush2.bf16.msra.mxu0 %v6258_v4  ;;  %v6339_v4 = vld [vmem:[%s8485_s7 + $0x7c0] ss:$8 sps:$4 sm:$0xff]  }
 0x6e1   : > { %4660 = vmatpush2.bf16.msra.mxu1 %v6261_v6  ;;  %4620 = vmatprep.subr.bf16.mxu0 %v6266_v37  ;;  %v6347_v6 = vld [vmem:[%s8485_s7 + $0x7b4] ss:$8 sps:$4 sm:$0xff]   ;;  %v6342_v37 = vld [vmem:[%s8485_s7 + $0x6b0] ss:$8 sps:$4 sm:$0xff]  }
 0x6e2   : > { %4661 = vmatprep.subr.bf16.mxu1 %v6269_v2  ;;  %v6345_v2 = vld [vmem:[%s8485_s7 + $0x7b0] ss:$8 sps:$4 sm:$0xff]  }
 0x6e4   : > { %4621 = vmatpush2.bf16.msra.mxu0 %v6264_v26  ;;  %v6350_v26 = vld [vmem:[%s8485_s7 + $0x6a4] ss:$8 sps:$4 sm:$0xff]  }
 0x6e5   : > { %4662 = vmatpush2.bf16.msra.mxu1 %v6267_v8  ;;  %4672 = vmatprep.subr.bf16.mxu0 %v6272_v10  ;;  %v6353_v8 = vld [vmem:[%s8485_s7 + $0x7a4] ss:$8 sps:$4 sm:$0xff]   ;;  %v6348_v10 = vld [vmem:[%s8485_s7 + $0x6a0] ss:$8 sps:$4 sm:$0xff]  }
 0x6e6   : > { %4713 = vmatprep.subr.bf16.mxu1 %v6275_v11  ;;  %v6351_v11 = vld [vmem:[%s8485_s7 + $0x7a0] ss:$8 sps:$4 sm:$0xff]  }
 0x6e7   : > { %4623 = vmatmul.mubr.bf16.vlgmr.msra.gmra.mxu0 %v2870_v13  ;;  %v6357_v13 = vld [vmem:[%s8485_s7 + $0x790] ss:$8 sps:$4 sm:$0xff]  }
 0x6e8   : > { %4664 = vmatmul.mubr.bf16.vlgmr.msra.gmra.mxu1 %v2872_v14  ;;  %4673 = vmatpush1.bf16.msra.mxu0 %v6270_v0  ;;  %v6359_v0 = vld [vmem:[%s8485_s7 + $0x794] ss:$8 sps:$4 sm:$0xff]   ;;  %v6365_v14 = vld [vmem:[%s8485_s7 + $0x784] ss:$8 sps:$4 sm:$0xff]  }
 0x6e9   : > { %4704 = vmatprep.mubr.bf16.mxu0 %v2875_v17  ;;  %4714 = vmatpush1.bf16.msra.mxu1 %v6273_v33  ;;  %v6362_v33 = vld [vmem:[%s8485_s7 + $0x684] ss:$8 sps:$4 sm:$0xff]   ;;  %v6363_v17 = vld [vmem:[%s8485_s7 + $0x780] ss:$8 sps:$4 sm:$0xff]  }
 0x6ea   : > { %4745 = vmatprep.mubr.bf16.mxu1 %v2877_v51  ;;  %4674 = vmatprep.subr.bf16.mxu0 %v6278_v15  ;;  %v6360_v15 = vld [vmem:[%s8485_s7 + $0x680] ss:$8 sps:$4 sm:$0xff]   ;;  %v3142_v51 = vsub.s32 1, %v6670_v19 }
 0x6eb   : > { %4715 = vmatprep.subr.bf16.mxu1 %v6281_v60  ;;  %v3134_v60 = vld [vmem:[%s8486_s8] sm:$0x3] }
 0x6ec   : > { %4675 = vmatpush1.bf16.msra.mxu0 %v6276_v42  ;;  %v3139_v42 = vrot.slane %v3134_v60, %v6673_v9 }
 0x6ed   : > { %4716 = vmatpush1.bf16.msra.mxu1 %v6279_v52  ;;  %4676 = vmatprep.subr.bf16.mxu0 %v6284_v22  ;;  %v2874_v52 = vpack.c.bf16 %v8031_v24, %v8031_v24  ;;  %v2876_v22 = vpack.c.bf16 %v8037_v7, %v8037_v7  ;;  %v4785_v7 = vld [vmem:[%s8487_s9 + $0xf8] sm:$0xff] }
 0x6ee   : > { %4717 = vmatprep.subr.bf16.mxu1 %v6287_v31  ;;  %v3143_v31 = vrot.slane %v3134_v60, %v3142_v51 }
 0x6f0   : > { %4677 = vmatpush1.bf16.msra.mxu0 %v6282_v32 }
 0x6f1   : > { %4718 = vmatpush1.bf16.msra.mxu1 %v6285_v40  ;;  %4678 = vmatprep.subr.bf16.mxu0 %v6290_v59 }
 0x6f2   : > { %4719 = vmatprep.subr.bf16.mxu1 %v6293_v21 }
 0x6f4   : > { %4679 = vmatpush1.bf16.msra.mxu0 %v6288_v30 }
 0x6f5   : > { %4720 = vmatpush1.bf16.msra.mxu1 %v6291_v34  ;;  %4680 = vmatprep.subr.bf16.mxu0 %v6296_v27 }
 0x6f6   : > { %4721 = vmatprep.subr.bf16.mxu1 %v6299_v35 }
 0x6f8   : > { %4681 = vmatpush1.bf16.msra.mxu0 %v6294_v25 }
 0x6f9   : > { %4722 = vmatpush1.bf16.msra.mxu1 %v6297_v28  ;;  %4682 = vmatprep.subr.bf16.mxu0 %v6302_v29  ;;  %v4784_v29 = vld [vmem:[%s8487_s9 + $0xf0] sm:$0xff] }
 0x6fa   : > { %4723 = vmatprep.subr.bf16.mxu1 %v6305_v36  ;;  %v4783_v36 = vld [vmem:[%s8487_s9 + $0xe8] sm:$0xff] }
 0x6fc   : > { %4683 = vmatpush1.bf16.msra.mxu0 %v6300_v3  ;;  %v4782_v3 = vld [vmem:[%s8487_s9 + $0xe0] sm:$0xff] }
 0x6fd   : > { %4724 = vmatpush1.bf16.msra.mxu1 %v6303_v1  ;;  %4684 = vmatprep.subr.bf16.mxu0 %v6308_v38  ;;  %v4781_v1 = vld [vmem:[%s8487_s9 + $0xd8] sm:$0xff]  ;;  %v4780_v38 = vld [vmem:[%s8487_s9 + $0xd0] sm:$0xff] }
 0x6fe   : > { %4725 = vmatprep.subr.bf16.mxu1 %v6311_v39  ;;  %v4779_v39 = vld [vmem:[%s8487_s9 + $0xc8] sm:$0xff] }
 0x700   : > { %4685 = vmatpush1.bf16.msra.mxu0 %v6306_v41  ;;  %v4778_v41 = vld [vmem:[%s8487_s9 + $0xc0] sm:$0xff] }
 0x701   : > { %4726 = vmatpush1.bf16.msra.mxu1 %v6309_v44  ;;  %4686 = vmatprep.subr.bf16.mxu0 %v6314_v16  ;;  %v4777_v44 = vld [vmem:[%s8487_s9 + $0xb8] sm:$0xff]  ;;  %v4776_v16 = vld [vmem:[%s8487_s9 + $0xb0] sm:$0xff] }
 0x702   : > { %4727 = vmatprep.subr.bf16.mxu1 %v6317_v20  ;;  %v4775_v20 = vld [vmem:[%s8487_s9 + $0xa8] sm:$0xff] }
 0x704   : > { %4687 = vmatpush1.bf16.msra.mxu0 %v6312_v45  ;;  %v4774_v45 = vld [vmem:[%s8487_s9 + $0xa0] sm:$0xff] }
 0x705   : > { %4728 = vmatpush1.bf16.msra.mxu1 %v6315_v18  ;;  %4688 = vmatprep.subr.bf16.mxu0 %v6320_v23  ;;  %v4773_v18 = vld [vmem:[%s8487_s9 + $0x98] sm:$0xff]  ;;  %v4772_v23 = vld [vmem:[%s8487_s9 + $0x90] sm:$0xff] }
 0x706   : > { %4729 = vmatprep.subr.bf16.mxu1 %v6323_v46  ;;  %v4771_v46 = vld [vmem:[%s8487_s9 + $0x88] sm:$0xff] }
 0x708   : > { %4689 = vmatpush2.bf16.msra.mxu0 %v6318_v47  ;;  %v4770_v47 = vld [vmem:[%s8487_s9 + $0x80] sm:$0xff] }
 0x709   : > { %4730 = vmatpush2.bf16.msra.mxu1 %v6321_v48  ;;  %4690 = vmatprep.subr.bf16.mxu0 %v6326_v49  ;;  %v4769_v48 = vld [vmem:[%s8487_s9 + $0x78] sm:$0xff]  ;;  %v4768_v49 = vld [vmem:[%s8487_s9 + $0x70] sm:$0xff] }
 0x70a   : > { %4731 = vmatprep.subr.bf16.mxu1 %v6329_v53  ;;  %v4767_v53 = vld [vmem:[%s8487_s9 + $0x68] sm:$0xff] }
 0x70c   : > { %4691 = vmatpush2.bf16.msra.mxu0 %v6324_v54  ;;  %v4766_v54 = vld [vmem:[%s8487_s9 + $0x60] sm:$0xff] }
 0x70d   : > { %4732 = vmatpush2.bf16.msra.mxu1 %v6327_v55  ;;  %4692 = vmatprep.subr.bf16.mxu0 %v6332_v56  ;;  %v4765_v55 = vld [vmem:[%s8487_s9 + $0x58] sm:$0xff]  ;;  %v4764_v56 = vld [vmem:[%s8487_s9 + $0x50] sm:$0xff] }
 0x70e   : > { %4733 = vmatprep.subr.bf16.mxu1 %v6335_v57  ;;  %v4763_v57 = vld [vmem:[%s8487_s9 + $0x48] sm:$0xff] }
 0x710   : > { %4693 = vmatpush2.bf16.msra.mxu0 %v6330_v58  ;;  %v4762_v58 = vld [vmem:[%s8487_s9 + $0x40] sm:$0xff] }
 0x711   : > { %4734 = vmatpush2.bf16.msra.mxu1 %v6333_v43  ;;  %4694 = vmatprep.subr.bf16.mxu0 %v6338_v61  ;;  %v4761_v43 = vld [vmem:[%s8487_s9 + $0x38] sm:$0xff]  ;;  %v4760_v61 = vld [vmem:[%s8487_s9 + $0x30] sm:$0xff] }
 0x712   : > { %4735 = vmatprep.subr.bf16.mxu1 %v6341_v62  ;;  %v4759_v62 = vld [vmem:[%s8487_s9 + $0x28] sm:$0xff] }
 0x714   : > { %4695 = vmatpush2.bf16.msra.mxu0 %v6336_v63  ;;  %v4758_v63 = vld [vmem:[%s8487_s9 + $0x20] sm:$0xff] }
 0x715   : > { %4736 = vmatpush2.bf16.msra.mxu1 %v6339_v4  ;;  %4696 = vmatprep.subr.bf16.mxu0 %v6344_v5  ;;  %v4757_v4 = vld [vmem:[%s8487_s9 + $0x18] sm:$0xff]  ;;  %v4756_v5 = vld [vmem:[%s8487_s9 + $0x10] sm:$0xff] }
 0x716   : > { %4737 = vmatprep.subr.bf16.mxu1 %v6347_v6  ;;  %v4755_v6 = vld [vmem:[%s8487_s9 + $0x8] sm:$0xff] }
 0x718   : > { %4697 = vmatpush2.bf16.msra.mxu0 %v6342_v37  ;;  %v4754_v37 = vld [vmem:[%s8487_s9] sm:$0xff] }
 0x719   : > { %4738 = vmatpush2.bf16.msra.mxu1 %v6345_v2  ;;  %4698 = vmatprep.subr.bf16.mxu0 %v6350_v26  ;;  %v4817_v2 = vld [vmem:[%s8487_s9 + $0x1f8] sm:$0xff]  ;;  %v4816_v26 = vld [vmem:[%s8487_s9 + $0x1f0] sm:$0xff] }
 0x71a   : > { %4739 = vmatprep.subr.bf16.mxu1 %v6353_v8  ;;  %v4815_v8 = vld [vmem:[%s8487_s9 + $0x1e8] sm:$0xff] }
 0x71c   : > { %4699 = vmatpush2.bf16.msra.mxu0 %v6348_v10  ;;  %v4814_v10 = vld [vmem:[%s8487_s9 + $0x1e0] sm:$0xff] }
 0x71d   : > { %4740 = vmatpush2.bf16.msra.mxu1 %v6351_v11  ;;  %4700 = vmatprep.subr.bf16.mxu0 %v6356_v50  ;;  %v4813_v11 = vld [vmem:[%s8487_s9 + $0x1d8] sm:$0xff]  ;;  %v4812_v50 = vld [vmem:[%s8487_s9 + $0x1d0] sm:$0xff] }
 0x71e   : > { %4741 = vmatprep.subr.bf16.mxu1 %v6359_v0  ;;  %v4811_v0 = vld [vmem:[%s8487_s9 + $0x1c8] sm:$0xff] }
 0x720   : > { %4701 = vmatpush2.bf16.msra.mxu0 %v6354_v12  ;;  %v4810_v12 = vld [vmem:[%s8487_s9 + $0x1c0] sm:$0xff] }
 0x721   : > { %4742 = vmatpush2.bf16.msra.mxu1 %v6357_v13  ;;  %4702 = vmatprep.subr.bf16.mxu0 %v6362_v33  ;;  %v4809_v13 = vld [vmem:[%s8487_s9 + $0x1b8] sm:$0xff]  ;;  %v4808_v33 = vld [vmem:[%s8487_s9 + $0x1b0] sm:$0xff] }
 0x722   : > { %4743 = vmatprep.subr.bf16.mxu1 %v6365_v14  ;;  %v4807_v14 = vld [vmem:[%s8487_s9 + $0x1a8] sm:$0xff] }
 0x724   : > { %4703 = vmatpush2.bf16.msra.mxu0 %v6360_v15 }
 0x725   : > { %4744 = vmatpush2.bf16.msra.mxu1 %v6363_v17  ;;  %4833 = vmatprep.subr.mxu0 %v4785_v7 }
 0x726   : > { %4930 = vmatprep.subr.mxu1 %v4785_v7  ;;  %v4798_v7 = vld [vmem:[%s8487_s9 + $0x160] sm:$0xff] }
 0x727   : > { %4705 = vmatmul.mubr.bf16.vlgmr.msra.gmra.mxu0 %v2874_v52  ;;  %v4460_v32 = vpop.f32.mrf.mxu0  ;;  %v4501_v40 = vpop.f32.mrf.mxu1 }
 0x728   : > { %4746 = vmatmul.mubr.bf16.vlgmr.msra.gmra.mxu1 %v2876_v22  ;;  %v4461_v59 = vadd.f32 %v4460_v32, %v3139_v42  ;;  %4834 = vmatpush1.msra.mxu0 %v4784_v29 }
 0x729   : > { %v4462_v21 = vpop.f32.mrf.mxu0  ;;  %v4503_v30 = vpop.f32.mrf.mxu1  ;;  %4931 = vmatpush1.msra.mxu1 %v4784_v29  ;;  %4835 = vmatprep.subr.mxu0 %v4783_v36  ;;  %v4797_v29 = vld [vmem:[%s8487_s9 + $0x158] sm:$0xff] }
 0x72a   : > { %v8251_v34 = vadd.f32 %v4501_v40, %v4461_v59  ;;  %v4463_v19 = vadd.f32 %v4462_v21, %v3143_v31  ;;  %4932 = vmatprep.subr.mxu1 %v4783_v36  ;;  %4836 = vmatpush1.msra.mxu0 %v4782_v3  ;;  %v4796_v36 = vld [vmem:[%s8487_s9 + $0x150] sm:$0xff] }
 0x72b   : > { %v4464_v27 = vpop.f32.mrf.mxu0  ;;  %v4505_v35 = vpop.f32.mrf.mxu1  ;;  %4933 = vmatpush1.msra.mxu1 %v4782_v3  ;;  %4837 = vmatprep.subr.mxu0 %v4781_v1  ;;  %v4795_v3 = vld [vmem:[%s8487_s9 + $0x148] sm:$0xff] }
 0x72c   : > { %v8253_v25 = vadd.f32 %v4503_v30, %v4463_v19  ;;  %4934 = vmatprep.subr.mxu1 %v4781_v1  ;;  %4838 = vmatpush1.msra.mxu0 %v4780_v38  ;;  %v4806_v30 = vld [vmem:[%s8487_s9 + $0x1a0] sm:$0xff]  ;;  %v4804_v19 = vld [vmem:[%s8487_s9 + $0x190] sm:$0xff]  ;;  %v4803_v27 = vld [vmem:[%s8487_s9 + $0x188] sm:$0xff] }
 0x72d   : > { %v4465_v28 = vpop.f32.mrf.mxu0  ;;  %v4506_v24 = vpop.f32.mrf.mxu1  ;;  %4935 = vmatpush1.msra.mxu1 %v4780_v38  ;;  %4839 = vmatprep.subr.mxu0 %v4779_v39  ;;  %v4802_v35 = vld [vmem:[%s8487_s9 + $0x180] sm:$0xff]  ;;  %v4793_v38 = vld [vmem:[%s8487_s9 + $0x138] sm:$0xff] }
 0x72e   : > { %4936 = vmatprep.subr.mxu1 %v4779_v39  ;;  %4840 = vmatpush1.msra.mxu0 %v4778_v41  ;;  %v4800_v28 = vld [vmem:[%s8487_s9 + $0x170] sm:$0xff]  ;;  %v4799_v24 = vld [vmem:[%s8487_s9 + $0x168] sm:$0xff]  ;;  %v4794_v1 = vld [vmem:[%s8487_s9 + $0x140] sm:$0xff] }
 0x72f   : > { %4937 = vmatpush1.msra.mxu1 %v4778_v41  ;;  %4841 = vmatprep.subr.mxu0 %v4777_v44  ;;  %v4792_v39 = vld [vmem:[%s8487_s9 + $0x130] sm:$0xff]  ;;  %v4791_v41 = vld [vmem:[%s8487_s9 + $0x128] sm:$0xff] }
 0x730   : > { %4938 = vmatprep.subr.mxu1 %v4777_v44  ;;  %4842 = vmatpush1.msra.mxu0 %v4776_v16  ;;  %v4790_v44 = vld [vmem:[%s8487_s9 + $0x120] sm:$0xff] }
 0x731   : > { %4939 = vmatpush1.msra.mxu1 %v4776_v16  ;;  %4843 = vmatprep.subr.mxu0 %v4775_v20  ;;  %v4789_v16 = vld [vmem:[%s8487_s9 + $0x118] sm:$0xff] }
 0x732   : > { %4940 = vmatprep.subr.mxu1 %v4775_v20  ;;  %4844 = vmatpush1.msra.mxu0 %v4774_v45  ;;  %v4788_v20 = vld [vmem:[%s8487_s9 + $0x110] sm:$0xff] }
 0x733   : > { %4941 = vmatpush1.msra.mxu1 %v4774_v45  ;;  %4845 = vmatprep.subr.mxu0 %v4773_v18  ;;  %v4787_v45 = vld [vmem:[%s8487_s9 + $0x108] sm:$0xff] }
 0x734   : > { %4942 = vmatprep.subr.mxu1 %v4773_v18  ;;  %4846 = vmatpush1.msra.mxu0 %v4772_v23  ;;  %v4786_v18 = vld [vmem:[%s8487_s9 + $0x100] sm:$0xff] }
 0x735   : > { %4943 = vmatpush1.msra.mxu1 %v4772_v23  ;;  %4847 = vmatprep.subr.mxu0 %v4771_v46 }
 0x736   : > { %4944 = vmatprep.subr.mxu1 %v4771_v46  ;;  %4848 = vmatpush1.msra.mxu0 %v4770_v47 }
 0x737   : > { %4945 = vmatpush1.msra.mxu1 %v4770_v47  ;;  %4849 = vmatprep.subr.mxu0 %v4769_v48 }
 0x738   : > { %4946 = vmatprep.subr.mxu1 %v4769_v48  ;;  %4850 = vmatpush1.msra.mxu0 %v4768_v49 }
 0x739   : > { %4947 = vmatpush1.msra.mxu1 %v4768_v49  ;;  %4851 = vmatprep.subr.mxu0 %v4767_v53 }
 0x73a   : > { %4948 = vmatprep.subr.mxu1 %v4767_v53  ;;  %4852 = vmatpush1.msra.mxu0 %v4766_v54 }
 0x73b   : > { %4949 = vmatpush1.msra.mxu1 %v4766_v54  ;;  %4853 = vmatprep.subr.mxu0 %v4765_v55 }
 0x73c   : > { %4950 = vmatprep.subr.mxu1 %v4765_v55  ;;  %4854 = vmatpush1.msra.mxu0 %v4764_v56 }
 0x73d   : > { %4951 = vmatpush1.msra.mxu1 %v4764_v56  ;;  %4855 = vmatprep.subr.mxu0 %v4763_v57 }
 0x73e   : > { %4952 = vmatprep.subr.mxu1 %v4763_v57  ;;  %4856 = vmatpush1.msra.mxu0 %v4762_v58 }
 0x73f   : > { %4953 = vmatpush1.msra.mxu1 %v4762_v58  ;;  %4857 = vmatprep.subr.mxu0 %v4761_v43 }
 0x740   : > { %4954 = vmatprep.subr.mxu1 %v4761_v43  ;;  %4858 = vmatpush1.msra.mxu0 %v4760_v61 }
 0x741   : > { %4955 = vmatpush1.msra.mxu1 %v4760_v61  ;;  %4859 = vmatprep.subr.mxu0 %v4759_v62 }
 0x742   : > { %4956 = vmatprep.subr.mxu1 %v4759_v62  ;;  %4860 = vmatpush1.msra.mxu0 %v4758_v63 }
 0x743   : > { %4957 = vmatpush1.msra.mxu1 %v4758_v63  ;;  %4861 = vmatprep.subr.mxu0 %v4757_v4 }
 0x744   : > { %4958 = vmatprep.subr.mxu1 %v4757_v4  ;;  %4862 = vmatpush1.msra.mxu0 %v4756_v5 }
 0x745   : > { %4959 = vmatpush1.msra.mxu1 %v4756_v5  ;;  %4863 = vmatprep.subr.mxu0 %v4755_v6 }
 0x746   : > { %4960 = vmatprep.subr.mxu1 %v4755_v6  ;;  %4864 = vmatpush1.msra.mxu0 %v4754_v37 }
 0x747   : > { %4961 = vmatpush1.msra.mxu1 %v4754_v37  ;;  %4865 = vmatprep.subr.mxu0 %v4817_v2 }
 0x748   : > { %4962 = vmatprep.subr.mxu1 %v4817_v2  ;;  %4866 = vmatpush2.msra.mxu0 %v4816_v26 }
 0x749   : > { %4963 = vmatpush2.msra.mxu1 %v4816_v26  ;;  %4867 = vmatprep.subr.mxu0 %v4815_v8 }
 0x74a   : > { %4964 = vmatprep.subr.mxu1 %v4815_v8  ;;  %4868 = vmatpush2.msra.mxu0 %v4814_v10 }
 0x74b   : > { %4965 = vmatpush2.msra.mxu1 %v4814_v10  ;;  %4869 = vmatprep.subr.mxu0 %v4813_v11 }
 0x74c   : > { %4966 = vmatprep.subr.mxu1 %v4813_v11  ;;  %4870 = vmatpush2.msra.mxu0 %v4812_v50 }
 0x74d   : > { %4967 = vmatpush2.msra.mxu1 %v4812_v50  ;;  %4871 = vmatprep.subr.mxu0 %v4811_v0 }
 0x74e   : > { %4968 = vmatprep.subr.mxu1 %v4811_v0  ;;  %4872 = vmatpush2.msra.mxu0 %v4810_v12 }
 0x74f   : > { %4969 = vmatpush2.msra.mxu1 %v4810_v12  ;;  %4873 = vmatprep.subr.mxu0 %v4809_v13 }
 0x750   : > { %4970 = vmatprep.subr.mxu1 %v4809_v13  ;;  %4874 = vmatpush2.msra.mxu0 %v4808_v33 }
 0x751   : > { %4971 = vmatpush2.msra.mxu1 %v4808_v33  ;;  %4875 = vmatprep.subr.mxu0 %v4807_v14 }
 0x752   : > { %4972 = vmatprep.subr.mxu1 %v4807_v14  ;;  %4876 = vmatpush2.msra.mxu0 %v4806_v30 }
 0x753   : > { %4973 = vmatpush2.msra.mxu1 %v4806_v30 }
 0x767   : > { %v4542_v15 = vpop.f32.mrf.mxu0  ;;  %v4583_v17 = vpop.f32.mrf.mxu1 }
 0x768   : > { %v4543_v60 = vadd.f32 %v4542_v15, %v8251_v34  ;;  %v4805_v34 = vld [vmem:[%s8487_s9 + $0x198] sm:$0xff] }
 0x769   : > { %v4544_v51 = vpop.f32.mrf.mxu0  ;;  %v4585_v42 = vpop.f32.mrf.mxu1  ;;  %4877 = vmatprep.subr.mxu0 %v4805_v34  ;;  %4974 = vmatprep.subr.mxu1 %v4805_v34 }
 0x76a   : > { %v8385_v52 = vadd.f32 %v4583_v17, %v4543_v60  ;;  %v4545_v22 = vadd.f32 %v4544_v51, %v8253_v25  ;;  %4878 = vmatpush2.msra.mxu0 %v4804_v19  ;;  %v4801_v25 = vld [vmem:[%s8487_s9 + $0x178] sm:$0xff]  ;;  %4975 = vmatpush2.msra.mxu1 %v4804_v19 }
 0x76b   : > { %v4546_v31 = vpop.f32.mrf.mxu0  ;;  %v4587_v32 = vpop.f32.mrf.mxu1  ;;  %4879 = vmatprep.subr.mxu0 %v4803_v27  ;;  %4976 = vmatprep.subr.mxu1 %v4803_v27 }
 0x76c   : > { %v8388_v40 = vadd.f32 %v4585_v42, %v4545_v22  ;;  %4880 = vmatpush2.msra.mxu0 %v4802_v35  ;;  %4977 = vmatpush2.msra.mxu1 %v4802_v35 }
 0x76d   : > { %v4547_v59 = vpop.f32.mrf.mxu0  ;;  %v4588_v21 = vpop.f32.mrf.mxu1  ;;  %4881 = vmatprep.subr.mxu0 %v4801_v25  ;;  %4978 = vmatprep.subr.mxu1 %v4801_v25 }
 0x76e   : > { %4882 = vmatpush2.msra.mxu0 %v4800_v28  ;;  %4979 = vmatpush2.msra.mxu1 %v4800_v28 }
 0x76f   : > { %4883 = vmatprep.subr.mxu0 %v4799_v24  ;;  %4980 = vmatprep.subr.mxu1 %v4799_v24 }
 0x770   : > { %4884 = vmatpush2.msra.mxu0 %v4798_v7  ;;  %4981 = vmatpush2.msra.mxu1 %v4798_v7 }
 0x771   : > { %4885 = vmatprep.subr.mxu0 %v4797_v29  ;;  %4982 = vmatprep.subr.mxu1 %v4797_v29 }
 0x772   : > { %4886 = vmatpush2.msra.mxu0 %v4796_v36  ;;  %4983 = vmatpush2.msra.mxu1 %v4796_v36 }
 0x773   : > { %4887 = vmatprep.subr.mxu0 %v4795_v3  ;;  %4984 = vmatprep.subr.mxu1 %v4795_v3 }
 0x774   : > { %4888 = vmatpush2.msra.mxu0 %v4794_v1  ;;  %4985 = vmatpush2.msra.mxu1 %v4794_v1 }
 0x775   : > { %4889 = vmatprep.subr.mxu0 %v4793_v38  ;;  %4986 = vmatprep.subr.mxu1 %v4793_v38 }
 0x776   : > { %4890 = vmatpush2.msra.mxu0 %v4792_v39  ;;  %4987 = vmatpush2.msra.mxu1 %v4792_v39 }
 0x777   : > { %4891 = vmatprep.subr.mxu0 %v4791_v41  ;;  %4988 = vmatprep.subr.mxu1 %v4791_v41 }
 0x778   : > { %4892 = vmatpush2.msra.mxu0 %v4790_v44  ;;  %4989 = vmatpush2.msra.mxu1 %v4790_v44 }
 0x779   : > { %4893 = vmatprep.subr.mxu0 %v4789_v16  ;;  %4990 = vmatprep.subr.mxu1 %v4789_v16 }
 0x77a   : > { %4894 = vmatpush2.msra.mxu0 %v4788_v20  ;;  %4991 = vmatpush2.msra.mxu1 %v4788_v20 }
 0x77b   : > { %4895 = vmatprep.subr.mxu0 %v4787_v45  ;;  %4992 = vmatprep.subr.mxu1 %v4787_v45 }
 0x77c   : > { %4896 = vmatpush2.msra.mxu0 %v4786_v18  ;;  %4993 = vmatpush2.msra.mxu1 %v4786_v18 }
 0x7a7   : > { %v4624_v23 = vpop.f32.mrf.mxu0 }
 0x7a8   : > { %v4625_v46 = vadd.f32 %v4624_v23, %v8385_v52  ;;  %v4665_v47 = vpop.f32.mrf.mxu1 }
 0x7a9   : > { %v4626_v48 = vpop.f32.mrf.mxu0 }
 0x7aa   : > { %v4666_v49 = vadd.f32 %v4665_v47, %v4625_v46  ;;  %v4667_v53 = vpop.f32.mrf.mxu1  ;;  %v4627_v58 = vadd.f32 %v4626_v48, %v8388_v40 }
 0x7ab   : > { %v4628_v54 = vpop.f32.mrf.mxu0 }
 0x7ac   : > { %v4669_v55 = vpop.f32.mrf.mxu1  ;;  %v4668_v61 = vadd.f32 %v4667_v53, %v4627_v58  ;;  %v5019_v54 = vld [vmem:[%s8488_s10] sm:$0xff] }
 0x7ad   : > { %v4629_v56 = vpop.f32.mrf.mxu0 }
 0x7ae   : > { %v4670_v57 = vpop.f32.mrf.mxu1 }
 0x7af   : > { %v5021_v57 = vcombine.high %v5019_v54, %v5019_v54 }
 0x7e7   : > { %v4706_v43 = vpop.f32.mrf.mxu0 }
 0x7e8   : > { %v4707_v62 = vadd.f32 %v4706_v43, %v4666_v49  ;;  %v4747_v63 = vpop.f32.mrf.mxu1 }
 0x7e9   : > { %v4708_v4 = vpop.f32.mrf.mxu0 }
 0x7ea   : > { %v4748_v5 = vadd.f32 %v4747_v63, %v4707_v62  ;;  %v4709_v6 = vadd.f32 %v4708_v4, %v4668_v61  ;;  %v4749_v37 = vpop.f32.mrf.mxu1 }
 0x7eb   : > { %v4710_v2 = vpop.f32.mrf.mxu0 }
 0x7ec   : > { %v4819_v26 = vsel %vm4818_vm14, %v4748_v5, 0.0  ;;  %v4750_v8 = vadd.f32 %v4749_v37, %v4709_v6  ;;  %v4751_v10 = vpop.f32.mrf.mxu1  ;;  %v6388_v37 = vmov 0  }
 0x7ed   : > { %v4820_v11 = vrot.slane %v4819_v26, 4  ;;  %v4711_v50 = vpop.f32.mrf.mxu0  ;;  %5860 = vset.pattern.permute.xlu1 %v6388_v37  ;;  %5861 = vset.pattern.permute.xlu0 %v6388_v37 }
 0x7ee   : > { %v4826_v0 = vsel %vm4818_vm14, %v4750_v8, 0.0  ;;  %v4752_v12 = vpop.f32.mrf.mxu1 }
 0x7ef   : > { %v4821_v13 = vadd.f32 %v4820_v11, %v4819_v26  ;;  %v4827_v33 = vrot.slane %v4826_v0, 4  ;;  %v5037_v12 = vld [vmem:[#allocation4] sm:$0x1] }
 0x7f1   : > { %v4822_v14 = vrot.slane %v4821_v13, 2  ;;  %v4828_v15 = vadd.f32 %v4827_v33, %v4826_v0 }
 0x7f3   : > { %v4823_v17 = vadd.f32 %v4822_v14, %v4821_v13  ;;  %v4829_v60 = vrot.slane %v4828_v15, 2 }
 0x7f5   : > { %v4830_v51 = vadd.f32 %v4829_v60, %v4828_v15  ;;  %v4824_v42 = vrot.slane %v4823_v17, 1 }
 0x7f7   : > { %v4831_v52 = vrot.slane %v4830_v51, 1  ;;  %v4825_v31 = vadd.f32 %v4824_v42, %v4823_v17 }
 0x7f9   : > { %v4832_v22 = vadd.f32 %v4831_v52, %v4830_v51 }
 0x7fb   : > { %4897 = vmatprep.mubr.f32.mxu0 %v4832_v22 }
 0x7fc   : > { %4898 = vmatmul.mubr.f32.vlgmr.msra.gmra.mxu0 %v4825_v31 }
 0x8bc   : > { %v4899_v32 = vpop.f32.mrf.mxu0 }
 0x8bd   : > { %v4907_v40 = vrot.slane %v4899_v32, %v6673_v9 }
 0x8be   : > { %v4901_v59 = vpop.f32.mrf.mxu0 }
 0x8bf   : > { %v4912_v21 = vsub.f32 %v4748_v5, %v4907_v40  ;;  %v4911_v30 = vrot.slane %v4901_v59, %v6673_v9 }
 0x8c1   : > { %v4914_v34 = vmul.f32 %v4912_v21, %v4912_v21  ;;  %v4913_v19 = vsub.f32 %v4750_v8, %v4911_v30 }
 0x8c3   : > { %v4916_v27 = vsel %vm4818_vm14, %v4914_v34, 0.0  ;;  %v4915_v35 = vmul.f32 %v4913_v19, %v4913_v19 }
 0x8c4   : > { %v4917_v25 = vrot.slane %v4916_v27, 4 }
 0x8c5   : > { %v4923_v28 = vsel %vm4818_vm14, %v4915_v35, 0.0 }
 0x8c6   : > { %v4918_v24 = vadd.f32 %v4917_v25, %v4916_v27  ;;  %v4924_v7 = vrot.slane %v4923_v28, 4 }
 0x8c8   : > { %v4919_v29 = vrot.slane %v4918_v24, 2  ;;  %v4925_v36 = vadd.f32 %v4924_v7, %v4923_v28 }
 0x8ca   : > { %v4926_v3 = vrot.slane %v4925_v36, 2  ;;  %v4920_v1 = vadd.f32 %v4919_v29, %v4918_v24 }
 0x8cc   : > { %v4927_v38 = vadd.f32 %v4926_v3, %v4925_v36  ;;  %v4921_v39 = vrot.slane %v4920_v1, 1 }
 0x8ce   : > { %v4928_v41 = vrot.slane %v4927_v38, 1  ;;  %v4922_v16 = vadd.f32 %v4921_v39, %v4920_v1 }
 0x8d0   : > { %v4929_v44 = vadd.f32 %v4928_v41, %v4927_v38 }
 0x8d2   : > { %4994 = vmatprep.mubr.f32.mxu1 %v4929_v44 }
 0x8d3   : > { %4995 = vmatmul.mubr.f32.vlgmr.msra.gmra.mxu1 %v4922_v16 }
 0x993   : > { %v4996_v20 = vpop.f32.mrf.mxu1 }
 0x994   : > { %v4997_v45 = vadd.f32 1e-05, %v4996_v20 }
 0x995   : > { %v4998_v18 = vpop.f32.mrf.mxu1 }
 0x996   : > { %6371 = vrsqrt.f32 %v4997_v45  ;;  %v4999_v23 = vadd.f32 1e-05, %v4998_v18 }
 0x998   : > { %6373 = vrsqrt.f32 %v4999_v23 }
 0x9a3   : > { %v6372_v46 = vpop.eup %6371 }
 0x9a4   : > { %v5006_v47 = vrot.slane %v6372_v46, %v6673_v9 }
 0x9a5   : > { %v6374_v48 = vpop.eup %6373 }
 0x9a6   : > { %v5010_v49 = vrot.slane %v6374_v48, %v6673_v9  ;;  %v5011_v53 = vmul.f32 %v5006_v47, %v4912_v21 }
 0x9a8   : > { %v5012_v55 = vmul.f32 %v5010_v49, %v4913_v19  ;;  %vm5013_vm15 = vcmp.ge.f32.partialorder %v5011_v53, 0.0  ;;  %v5015_v56 = vmul.f32 0.2, %v5011_v53 }
 0x9aa   : > { %vm5014_vm0 = vcmp.ge.f32.partialorder %v5012_v55, 0.0  ;;  %v5016_v58 = vmul.f32 0.2, %v5012_v55  ;;  %v5017_v43 = vsel %vm5013_vm15, %v5011_v53, %v5015_v56 }
 0x9ab   : > { %v5023_v61 = vmul.f32 %v5019_v54, %v5017_v43 }
 0x9ac   : > { %v5018_v62 = vsel %vm5014_vm0, %v5012_v55, %v5016_v58 }
 0x9ad   : > { %v5024_v63 = vmul.f32 %v5021_v57, %v5018_v62  ;;  %v5025_v4 = vsel %vm4818_vm14, %v5023_v61, 0.0 }
 0x9af   : > { %v5026_v5 = vsel %vm4818_vm14, %v5024_v63, 0.0 }
 0x9b0   : > { %v5027_v6 = vadd.f32 %v5026_v5, %v5025_v4 }
 0x9b2   : > { %5028 = vadd.xlane.f32.xlu0 %v5027_v6 }
 0xa3b   : > { %v5029_v2 = vpop.xlane.xlu0 %5028 }
 0xa3c   : > { %v5030_v26 = vsel %vm4818_vm14, %v5029_v2, 0.0 }
 0xa3d   : > { %v5031_v8 = vrot.slane %v5030_v26, 4 }
 0xa3f   : > { %v5032_v10 = vadd.f32 %v5031_v8, %v5030_v26 }
 0xa41   : > { %v5033_v11 = vrot.slane %v5032_v10, 2 }
 0xa43   : > { %v5034_v50 = vadd.f32 %v5033_v11, %v5032_v10 }
 0xa45   : > { %v5035_v0 = vrot.slane %v5034_v50, 1 }
 0xa47   : > { %v5036_v13 = vadd.f32 %v5035_v0, %v5034_v50 }
 0xa49   : > { %v5038_v33 = vadd.f32 %v5037_v12, %v5036_v13 }
 0xa4b   : > { %v5043_v14 = vrot.slane %v5038_v33, %v6673_v9 }
 0xa4d   : > { %5045 = vperm.xlu1 %5860, %v5043_v14  }
 0xac8   : > { %v5046_v15 = vpop.permute.xlu1 %5045 }
 0xac9   : > { %5049 = vst [vmem:[%s418_s25] sm:$0xff] %v5046_v15 }
 0xaca PF: > { %s24_s23 = sadd.s32 1, %s6382_s23  }
 0xacb   : > { %p21_p5 = scmp.ge.s32.totalorder %s24_s23, 4  }
 0xacd   :  { %23 = sbr.rel (!%p21_p5) target bundleno = 3 (0x3), region = 98 }

</bundles_post_ra>
